<compile_context>
chip_gen: v7x
topology: tpu7x:2x2x1
jax: 0.10.0
libtpu: 0.0.40
codegen_flags: <defaults>
</compile_context>

<pallas_src>
import functools
import math

import jax
import jax.numpy as jnp
from jax.experimental import pallas as pl
from jax.experimental.pallas import tpu as pltpu

FFN_DIM = 2048   # nn.TransformerEncoder/DecoderLayer(dim_feedforward=2048)
LN_EPS = 1e-5    # PyTorch LayerNorm default eps


# --------------------------- in-kernel helpers -----------------------------

def _layer_norm(x, g_ref, b_ref):
    """LayerNorm over the last axis of a VMEM-resident value. g/b: (1, E) refs."""
    mu = jnp.mean(x, axis=-1, keepdims=True)
    xc = x - mu
    var = jnp.mean(xc * xc, axis=-1, keepdims=True)
    return xc * jax.lax.rsqrt(var + LN_EPS) * g_ref[...] + b_ref[...]


def _ffn(x, w1_ref, b1_ref, w2_ref, b2_ref):
    """relu(x @ W1 + b1) @ W2 + b2, all operands VMEM-resident."""
    h = jnp.maximum(
        jnp.dot(x, w1_ref[...], preferred_element_type=jnp.float32) + b1_ref[...],
        0.0)
    return jnp.dot(h, w2_ref[...], preferred_element_type=jnp.float32) + b2_ref[...]


def _multihead_attention(get_q, get_kv, wq_ref, bq_ref, wkv_ref, bkv_ref,
                         wo_ref, bo_ref, out_scr, *, nbatch, q_len, nheads):
    """Multi-head attention, fully in-kernel.

    get_q(b)  -> (q_len, E)  query rows of batch b (value)
    get_kv(b) -> (kv_len, E) key/value rows of batch b (value)
    wq:(H,E,Dh) bq:(H,1,Dh) wkv:(2H,E,Dh) [K heads then V heads] bkv:(2H,1,Dh)
    wo:(H,Dh,E) bo:(1,E).  The per-head out-projection is accumulated directly
    (sum_h o_h @ Wo[h]) so only full-lane-width, tile-aligned stores hit out_scr.
    """
    dh = wq_ref.shape[-1]
    scale = 1.0 / math.sqrt(dh)
    for b in range(nbatch):
        xq = get_q(b)                       # (q_len, E)
        xkv = get_kv(b)                     # (kv_len, E)
        acc = None
        for h in range(nheads):
            q = jnp.dot(xq, wq_ref[h], preferred_element_type=jnp.float32) + bq_ref[h]
            k = jnp.dot(xkv, wkv_ref[h], preferred_element_type=jnp.float32) + bkv_ref[h]
            v = (jnp.dot(xkv, wkv_ref[nheads + h], preferred_element_type=jnp.float32)
                 + bkv_ref[nheads + h])
            # q·kᵀ without an explicit transpose (contract last axes).
            s = jax.lax.dot_general(q, k, (((1,), (1,)), ((), ())),
                                    preferred_element_type=jnp.float32) * scale
            s = s - jnp.max(s, axis=-1, keepdims=True)
            p = jnp.exp(s)
            p = p * pl.reciprocal(jnp.sum(p, axis=-1, keepdims=True), approx=True)
            o = jnp.dot(p, v, preferred_element_type=jnp.float32)       # (q_len, Dh)
            contrib = jnp.dot(o, wo_ref[h], preferred_element_type=jnp.float32)
            acc = contrib if acc is None else acc + contrib
        out_scr[b * q_len:(b + 1) * q_len, :] = acc + bo_ref[...]


# ------------------------------ fused kernels -------------------------------

def _encoder_layer_kernel(x_ref,
                          wq_ref, bq_ref, wkv_ref, bkv_ref, wo_ref, bo_ref,
                          w1_ref, b1_ref, w2_ref, b2_ref,
                          n1g_ref, n1b_ref, n2g_ref, n2b_ref,
                          o_ref, attn_scr, *, nbatch, seq, nheads):
    # post-norm TransformerEncoderLayer (relu, dropout = identity / eval mode)
    x = x_ref[...]                                           # (nbatch*seq, E)
    get = lambda b: x[b * seq:(b + 1) * seq, :]
    _multihead_attention(get, get, wq_ref, bq_ref, wkv_ref, bkv_ref, wo_ref, bo_ref,
                         attn_scr, nbatch=nbatch, q_len=seq, nheads=nheads)
    h1 = _layer_norm(x + attn_scr[...], n1g_ref, n1b_ref)
    y = _layer_norm(h1 + _ffn(h1, w1_ref, b1_ref, w2_ref, b2_ref), n2g_ref, n2b_ref)
    o_ref[...] = y.astype(o_ref.dtype)


def _decoder_layer_kernel(x_ref, mem_ref,
                          sq_w, sq_b, skv_w, skv_b, so_w, so_b,
                          cq_w, cq_b, ckv_w, ckv_b, co_w, co_b,
                          w1_ref, b1_ref, w2_ref, b2_ref,
                          n1g_ref, n1b_ref, n2g_ref, n2b_ref, n3g_ref, n3b_ref,
                          o_ref, attn_scr, *, nbatch, seq, nheads):
    # post-norm TransformerDecoderLayer; reference passes no tgt_mask (no causal mask)
    x = x_ref[...]                                           # (B*S, E)
    get_x = lambda b: x[b * seq:(b + 1) * seq, :]
    _multihead_attention(get_x, get_x, sq_w, sq_b, skv_w, skv_b, so_w, so_b,
                         attn_scr, nbatch=nbatch, q_len=seq, nheads=nheads)
    h1 = _layer_norm(x + attn_scr[...], n1g_ref, n1b_ref)

    # cross-attention: memory is a length-1 sequence per batch element (B, 1, E)
    get_q = lambda b: h1[b * seq:(b + 1) * seq, :]
    get_m = lambda b: mem_ref[b]                             # (1, E)
    _multihead_attention(get_q, get_m, cq_w, cq_b, ckv_w, ckv_b, co_w, co_b,
                         attn_scr, nbatch=nbatch, q_len=seq, nheads=nheads)
    h2 = _layer_norm(h1 + attn_scr[...], n2g_ref, n2b_ref)

    y = _layer_norm(h2 + _ffn(h2, w1_ref, b1_ref, w2_ref, b2_ref), n3g_ref, n3b_ref)
    o_ref[...] = y.astype(o_ref.dtype)


def _head_loss_kernel(y_ref, w_ref, b_ref, tgt_ref, logits_ref, loss_ref,
                      *, nbatch, seq, smoothing):
    """fc_out + LabelSmoothingLoss fused.  Reference permutes logits to (B, V, S),
    so the loss's class axis is the sequence axis: log_softmax runs over the S axis
    of each (S, V) logits block, targets are (B, 1, V) ints in [0, S)."""
    logits = jnp.dot(y_ref[...], w_ref[...],
                     preferred_element_type=jnp.float32) + b_ref[...]    # (B*S, V)
    logits_ref[...] = logits.astype(logits_ref.dtype)
    vocab = logits.shape[-1]
    total = None
    for b in range(nbatch):
        lb = logits[b * seq:(b + 1) * seq, :]                            # (S, V)
        m = jnp.max(lb, axis=0, keepdims=True)
        lse = jnp.log(jnp.sum(jnp.exp(lb - m), axis=0, keepdims=True)) + m
        logp = lb - lse                                                  # log_softmax over S
        one_hot = (jax.lax.broadcasted_iota(jnp.int32, lb.shape, 0)
                   == tgt_ref[b]).astype(jnp.float32)                    # (S, V)
        smoothed = one_hot * (1.0 - smoothing) + smoothing / seq
        term = jnp.sum(jnp.sum(-smoothed * logp, axis=1, keepdims=True),
                       axis=0, keepdims=True)
        total = term if total is None else total + term
    # torch.mean over all B*V*S elements of the permuted tensor
    loss_ref[...] = total / float(nbatch * vocab * seq)


# ----------------------------- pallas wrappers ------------------------------

def encoder_layer_call(x2d, p, num_heads):
    rows, e = x2d.shape          # encoder "sequence" = B, batch = 1
    a = p["attn"]
    return pl.pallas_call(
        functools.partial(_encoder_layer_kernel, nbatch=1, seq=rows, nheads=num_heads),
        out_shape=jax.ShapeDtypeStruct((rows, e), x2d.dtype),
        scratch_shapes=[pltpu.VMEM((rows, e), jnp.float32)],
    )(x2d, a["w_q"], a["b_q"], a["w_kv"], a["b_kv"], a["w_o"], a["b_o"],
      p["w1"], p["b1"], p["w2"], p["b2"],
      p["n1_g"], p["n1_b"], p["n2_g"], p["n2_b"])


def decoder_layer_call(x2d, mem, p, num_heads, *, nbatch, seq):
    rows, e = x2d.shape
    a, c = p["attn"], p["cross"]
    return pl.pallas_call(
        functools.partial(_decoder_layer_kernel,
                          nbatch=nbatch, seq=seq, nheads=num_heads),
        out_shape=jax.ShapeDtypeStruct((rows, e), x2d.dtype),
        scratch_shapes=[pltpu.VMEM((rows, e), jnp.float32)],
    )(x2d, mem,
      a["w_q"], a["b_q"], a["w_kv"], a["b_kv"], a["w_o"], a["b_o"],
      c["w_q"], c["b_q"], c["w_kv"], c["b_kv"], c["w_o"], c["b_o"],
      p["w1"], p["b1"], p["w2"], p["b2"],
      p["n1_g"], p["n1_b"], p["n2_g"], p["n2_b"], p["n3_g"], p["n3_b"])


def head_loss_call(y2d, fc_w, fc_b, targets3d, *, nbatch, seq, smoothing=0.1):
    rows, _ = y2d.shape
    vocab = fc_w.shape[1]
    logits2d, loss = pl.pallas_call(
        functools.partial(_head_loss_kernel,
                          nbatch=nbatch, seq=seq, smoothing=smoothing),
        out_shape=(jax.ShapeDtypeStruct((rows, vocab), jnp.float32),
                   jax.ShapeDtypeStruct((1, 1), jnp.float32)),
    )(y2d, fc_w, fc_b, targets3d)
    return logits2d, loss[0, 0]


# ------------------------------- model glue ---------------------------------

def make_positional_encoding(max_len, embed_dim):
    pos = jnp.arange(max_len, dtype=jnp.float32)[:, None]
    div = jnp.exp(jnp.arange(0, embed_dim, 2, dtype=jnp.float32)
                  * -(math.log(10000.0) / embed_dim))
    pe = jnp.zeros((max_len, embed_dim), jnp.float32)
    pe = pe.at[:, 0::2].set(jnp.sin(pos * div))
    pe = pe.at[:, 1::2].set(jnp.cos(pos * div))
    return pe[None]  # (1, max_len, E)


def init_params(key, embed_size, vocab_size, n_enc, n_dec, num_heads, max_len=64):
    e, h = embed_size, num_heads
    dh = e // h
    counter = [0]

    def nxt():
        counter[0] += 1
        return jax.random.fold_in(key, counter[0])

    def dense(shape):
        return jax.random.normal(nxt(), shape, jnp.float32) * 0.02

    def mha():
        # per-head packing on a leading axis keeps every in-kernel slice tile-aligned
        return dict(w_q=dense((h, e, dh)), b_q=jnp.zeros((h, 1, dh), jnp.float32),
                    w_kv=dense((2 * h, e, dh)), b_kv=jnp.zeros((2 * h, 1, dh), jnp.float32),
                    w_o=dense((h, dh, e)), b_o=jnp.zeros((1, e), jnp.float32))

    def enc_layer():
        return dict(attn=mha(),
                    w1=dense((e, FFN_DIM)), b1=jnp.zeros((1, FFN_DIM), jnp.float32),
                    w2=dense((FFN_DIM, e)), b2=jnp.zeros((1, e), jnp.float32),
                    n1_g=jnp.ones((1, e), jnp.float32), n1_b=jnp.zeros((1, e), jnp.float32),
                    n2_g=jnp.ones((1, e), jnp.float32), n2_b=jnp.zeros((1, e), jnp.float32))

    def dec_layer():
        d = enc_layer()
        d["cross"] = mha()
        d["n3_g"] = jnp.ones((1, e), jnp.float32)
        d["n3_b"] = jnp.zeros((1, e), jnp.float32)
        return d

    return dict(
        enc_layers=[enc_layer() for _ in range(n_enc)],
        dec_layers=[dec_layer() for _ in range(n_dec)],
        embedding=dense((vocab_size, e)),
        fc_w=dense((e, vocab_size)),
        fc_b=jnp.zeros((1, vocab_size), jnp.float32),
        pos_enc=make_positional_encoding(max_len, e),
    )


def caption_generator_forward(params, features, captions, targets, *, num_heads):
    b, e = features.shape
    s = captions.shape[1]

    # Encoder: reference does features.unsqueeze(1) -> (B,1,E) and feeds it seq-first,
    # i.e. "sequence" = B, "batch" = 1; PositionalEncoding sees seq_len=1 -> pe row 0.
    x = features + params["pos_enc"][0, :1, :]                  # (B, E)
    for lp in params["enc_layers"]:
        x = encoder_layer_call(x, lp, num_heads)
    mem = x.reshape(b, 1, e)        # decoder memory: length-1 sequence per batch elem

    # Decoder: embedding gather + positional encoding (XLA glue), batch-major flatten
    # -> no seq-first transposes anywhere between kernels.
    emb = params["embedding"][captions] + params["pos_enc"][0, :s, :]   # (B, S, E)
    y = emb.reshape(b * s, e)
    for lp in params["dec_layers"]:
        y = decoder_layer_call(y, mem, lp, num_heads, nbatch=b, seq=s)

    logits2d, loss = head_loss_call(
        y, params["fc_w"], params["fc_b"], targets.reshape(b, 1, -1),
        nbatch=b, seq=s)
    return logits2d.reshape(b, s, -1), loss


# ----------------------------------- main -----------------------------------

if __name__ == "__main__":
    B, E, S = 2, 32, 8
    VOCAB = 32
    NUM_HEADS = 4
    N_ENC, N_DEC = 2, 2

    key = jax.random.PRNGKey(0)
    kp, kf, kc, kt = jax.random.split(key, 4)

    params = init_params(kp, E, VOCAB, N_ENC, N_DEC, NUM_HEADS)
    features = jax.random.normal(kf, (B, E), jnp.float32)
    captions = jax.random.randint(kc, (B, S), 0, VOCAB)
    # NOTE: the reference permutes logits to (B, VOCAB, S) before LabelSmoothingLoss,
    # so its class axis is S; targets must be (B, VOCAB) with values in [0, S).
    targets = jax.random.randint(kt, (B, VOCAB), 0, S)

    fwd = jax.jit(functools.partial(caption_generator_forward, num_heads=NUM_HEADS))
    outputs, loss = fwd(params, features, captions, targets)
    jax.block_until_ready((outputs, loss))
    assert outputs.shape == (B, S, VOCAB)
    assert loss.shape == ()
    print("KERNEL_OK")
</pallas_src>

<mosaic_0001>
module attributes {stable_mosaic.version = 11 : i64} {
  func.func @_encoder_layer_kernel(%arg0: memref<2x32xf32, #tpu.memory_space<vmem>>, %arg1: memref<4x32x8xf32, #tpu.memory_space<vmem>>, %arg2: memref<4x1x8xf32, #tpu.memory_space<vmem>>, %arg3: memref<8x32x8xf32, #tpu.memory_space<vmem>>, %arg4: memref<8x1x8xf32, #tpu.memory_space<vmem>>, %arg5: memref<4x8x32xf32, #tpu.memory_space<vmem>>, %arg6: memref<1x32xf32, #tpu.memory_space<vmem>>, %arg7: memref<32x2048xf32, #tpu.memory_space<vmem>>, %arg8: memref<1x2048xf32, #tpu.memory_space<vmem>>, %arg9: memref<2048x32xf32, #tpu.memory_space<vmem>>, %arg10: memref<1x32xf32, #tpu.memory_space<vmem>>, %arg11: memref<1x32xf32, #tpu.memory_space<vmem>>, %arg12: memref<1x32xf32, #tpu.memory_space<vmem>>, %arg13: memref<1x32xf32, #tpu.memory_space<vmem>>, %arg14: memref<1x32xf32, #tpu.memory_space<vmem>>, %arg15: memref<2x32xf32, #tpu.memory_space<vmem>>, %arg16: memref<2x32xf32, #tpu.memory_space<vmem>>) attributes {dimension_semantics = [], scalar_prefetch = 0 : i64, scratch_operands = 1 : i64, tpu.core_type = #tpu.core_type<tc>} {
    %c0 = arith.constant 0 : index
    %c0_0 = arith.constant 0 : index
    %0 = vector.load %arg0[%c0, %c0_0] : memref<2x32xf32, #tpu.memory_space<vmem>>, vector<2x32xf32>
    %c0_1 = arith.constant 0 : index
    %c0_2 = arith.constant 0 : index
    %c0_3 = arith.constant 0 : index
    %1 = vector.load %arg1[%c0_1, %c0_2, %c0_3] : memref<4x32x8xf32, #tpu.memory_space<vmem>>, vector<1x32x8xf32>
    %2 = vector.shape_cast %1 : vector<1x32x8xf32> to vector<32x8xf32>
    %cst = arith.constant dense<0.000000e+00> : vector<2x8xf32>
    %3 = tpu.matmul %0, %2, %cst {dimension_numbers = #tpu.dot_dimension_numbers<[1], [0], [0], [1], [0, 0, 1, 1], [], []>} : vector<2x32xf32>, vector<32x8xf32>, vector<2x8xf32> -> vector<2x8xf32>
    %c0_4 = arith.constant 0 : index
    %c0_5 = arith.constant 0 : index
    %c0_6 = arith.constant 0 : index
    %4 = vector.load %arg2[%c0_4, %c0_5, %c0_6] : memref<4x1x8xf32, #tpu.memory_space<vmem>>, vector<1x1x8xf32>
    %5 = vector.shape_cast %4 : vector<1x1x8xf32> to vector<1x8xf32>
    %6 = vector.broadcast %5 : vector<1x8xf32> to vector<2x8xf32>
    %7 = arith.addf %3, %6 : vector<2x8xf32>
    %c0_7 = arith.constant 0 : index
    %c0_8 = arith.constant 0 : index
    %c0_9 = arith.constant 0 : index
    %8 = vector.load %arg3[%c0_7, %c0_8, %c0_9] : memref<8x32x8xf32, #tpu.memory_space<vmem>>, vector<1x32x8xf32>
    %9 = vector.shape_cast %8 : vector<1x32x8xf32> to vector<32x8xf32>
    %cst_10 = arith.constant dense<0.000000e+00> : vector<2x8xf32>
    %10 = tpu.matmul %0, %9, %cst_10 {dimension_numbers = #tpu.dot_dimension_numbers<[1], [0], [0], [1], [0, 0, 1, 1], [], []>} : vector<2x32xf32>, vector<32x8xf32>, vector<2x8xf32> -> vector<2x8xf32>
    %c0_11 = arith.constant 0 : index
    %c0_12 = arith.constant 0 : index
    %c0_13 = arith.constant 0 : index
    %11 = vector.load %arg4[%c0_11, %c0_12, %c0_13] : memref<8x1x8xf32, #tpu.memory_space<vmem>>, vector<1x1x8xf32>
    %12 = vector.shape_cast %11 : vector<1x1x8xf32> to vector<1x8xf32>
    %13 = vector.broadcast %12 : vector<1x8xf32> to vector<2x8xf32>
    %14 = arith.addf %10, %13 : vector<2x8xf32>
    %c4 = arith.constant 4 : index
    %c0_14 = arith.constant 0 : index
    %c0_15 = arith.constant 0 : index
    %15 = vector.load %arg3[%c4, %c0_14, %c0_15] : memref<8x32x8xf32, #tpu.memory_space<vmem>>, vector<1x32x8xf32>
    %16 = vector.shape_cast %15 : vector<1x32x8xf32> to vector<32x8xf32>
    %cst_16 = arith.constant dense<0.000000e+00> : vector<2x8xf32>
    %17 = tpu.matmul %0, %16, %cst_16 {dimension_numbers = #tpu.dot_dimension_numbers<[1], [0], [0], [1], [0, 0, 1, 1], [], []>} : vector<2x32xf32>, vector<32x8xf32>, vector<2x8xf32> -> vector<2x8xf32>
    %c4_17 = arith.constant 4 : index
    %c0_18 = arith.constant 0 : index
    %c0_19 = arith.constant 0 : index
    %18 = vector.load %arg4[%c4_17, %c0_18, %c0_19] : memref<8x1x8xf32, #tpu.memory_space<vmem>>, vector<1x1x8xf32>
    %19 = vector.shape_cast %18 : vector<1x1x8xf32> to vector<1x8xf32>
    %20 = vector.broadcast %19 : vector<1x8xf32> to vector<2x8xf32>
    %21 = arith.addf %17, %20 : vector<2x8xf32>
    %cst_20 = arith.constant dense<0.000000e+00> : vector<2x2xf32>
    %22 = tpu.matmul %7, %14, %cst_20 {dimension_numbers = #tpu.dot_dimension_numbers<[1], [1], [0], [0], [0, 0, 1, 0], [], []>} : vector<2x8xf32>, vector<2x8xf32>, vector<2x2xf32> -> vector<2x2xf32>
    %cst_21 = arith.constant 0.353553385 : f32
    %23 = vector.broadcast %cst_21 : f32 to vector<2x2xf32>
    %24 = arith.mulf %22, %23 : vector<2x2xf32>
    %cst_22 = arith.constant dense<0xFF800000> : vector<2xf32>
    %25 = vector.multi_reduction <maximumf>, %24, %cst_22 [1] : vector<2x2xf32> to vector<2xf32>
    %26 = vector.shape_cast %25 : vector<2xf32> to vector<2x1xf32>
    %27 = vector.broadcast %26 : vector<2x1xf32> to vector<2x2xf32>
    %28 = arith.subf %24, %27 : vector<2x2xf32>
    %29 = math.exp %28 : vector<2x2xf32>
    %cst_23 = arith.constant dense<0.000000e+00> : vector<2xf32>
    %30 = vector.multi_reduction <add>, %29, %cst_23 [1] : vector<2x2xf32> to vector<2xf32>
    %31 = vector.shape_cast %30 : vector<2xf32> to vector<2x1xf32>
    %32 = tpu.reciprocal %31 {approx = true} : vector<2x1xf32> -> vector<2x1xf32>
    %33 = vector.broadcast %32 : vector<2x1xf32> to vector<2x2xf32>
    %34 = arith.mulf %29, %33 : vector<2x2xf32>
    %cst_24 = arith.constant dense<0.000000e+00> : vector<2x8xf32>
    %35 = tpu.matmul %34, %21, %cst_24 {dimension_numbers = #tpu.dot_dimension_numbers<[1], [0], [0], [1], [0, 0, 1, 1], [], []>} : vector<2x2xf32>, vector<2x8xf32>, vector<2x8xf32> -> vector<2x8xf32>
    %c0_25 = arith.constant 0 : index
    %c0_26 = arith.constant 0 : index
    %c0_27 = arith.constant 0 : index
    %36 = vector.load %arg5[%c0_25, %c0_26, %c0_27] : memref<4x8x32xf32, #tpu.memory_space<vmem>>, vector<1x8x32xf32>
    %37 = vector.shape_cast %36 : vector<1x8x32xf32> to vector<8x32xf32>
    %cst_28 = arith.constant dense<0.000000e+00> : vector<2x32xf32>
    %38 = tpu.matmul %35, %37, %cst_28 {dimension_numbers = #tpu.dot_dimension_numbers<[1], [0], [0], [1], [0, 0, 1, 1], [], []>} : vector<2x8xf32>, vector<8x32xf32>, vector<2x32xf32> -> vector<2x32xf32>
    %c1 = arith.constant 1 : index
    %c0_29 = arith.constant 0 : index
    %c0_30 = arith.constant 0 : index
    %39 = vector.load %arg1[%c1, %c0_29, %c0_30] : memref<4x32x8xf32, #tpu.memory_space<vmem>>, vector<1x32x8xf32>
    %40 = vector.shape_cast %39 : vector<1x32x8xf32> to vector<32x8xf32>
    %cst_31 = arith.constant dense<0.000000e+00> : vector<2x8xf32>
    %41 = tpu.matmul %0, %40, %cst_31 {dimension_numbers = #tpu.dot_dimension_numbers<[1], [0], [0], [1], [0, 0, 1, 1], [], []>} : vector<2x32xf32>, vector<32x8xf32>, vector<2x8xf32> -> vector<2x8xf32>
    %c1_32 = arith.constant 1 : index
    %c0_33 = arith.constant 0 : index
    %c0_34 = arith.constant 0 : index
    %42 = vector.load %arg2[%c1_32, %c0_33, %c0_34] : memref<4x1x8xf32, #tpu.memory_space<vmem>>, vector<1x1x8xf32>
    %43 = vector.shape_cast %42 : vector<1x1x8xf32> to vector<1x8xf32>
    %44 = vector.broadcast %43 : vector<1x8xf32> to vector<2x8xf32>
    %45 = arith.addf %41, %44 : vector<2x8xf32>
    %c1_35 = arith.constant 1 : index
    %c0_36 = arith.constant 0 : index
    %c0_37 = arith.constant 0 : index
    %46 = vector.load %arg3[%c1_35, %c0_36, %c0_37] : memref<8x32x8xf32, #tpu.memory_space<vmem>>, vector<1x32x8xf32>
    %47 = vector.shape_cast %46 : vector<1x32x8xf32> to vector<32x8xf32>
    %cst_38 = arith.constant dense<0.000000e+00> : vector<2x8xf32>
    %48 = tpu.matmul %0, %47, %cst_38 {dimension_numbers = #tpu.dot_dimension_numbers<[1], [0], [0], [1], [0, 0, 1, 1], [], []>} : vector<2x32xf32>, vector<32x8xf32>, vector<2x8xf32> -> vector<2x8xf32>
    %c1_39 = arith.constant 1 : index
    %c0_40 = arith.constant 0 : index
    %c0_41 = arith.constant 0 : index
    %49 = vector.load %arg4[%c1_39, %c0_40, %c0_41] : memref<8x1x8xf32, #tpu.memory_space<vmem>>, vector<1x1x8xf32>
    %50 = vector.shape_cast %49 : vector<1x1x8xf32> to vector<1x8xf32>
    %51 = vector.broadcast %50 : vector<1x8xf32> to vector<2x8xf32>
    %52 = arith.addf %48, %51 : vector<2x8xf32>
    %c5 = arith.constant 5 : index
    %c0_42 = arith.constant 0 : index
    %c0_43 = arith.constant 0 : index
    %53 = vector.load %arg3[%c5, %c0_42, %c0_43] : memref<8x32x8xf32, #tpu.memory_space<vmem>>, vector<1x32x8xf32>
    %54 = vector.shape_cast %53 : vector<1x32x8xf32> to vector<32x8xf32>
    %cst_44 = arith.constant dense<0.000000e+00> : vector<2x8xf32>
    %55 = tpu.matmul %0, %54, %cst_44 {dimension_numbers = #tpu.dot_dimension_numbers<[1], [0], [0], [1], [0, 0, 1, 1], [], []>} : vector<2x32xf32>, vector<32x8xf32>, vector<2x8xf32> -> vector<2x8xf32>
    %c5_45 = arith.constant 5 : index
    %c0_46 = arith.constant 0 : index
    %c0_47 = arith.constant 0 : index
    %56 = vector.load %arg4[%c5_45, %c0_46, %c0_47] : memref<8x1x8xf32, #tpu.memory_space<vmem>>, vector<1x1x8xf32>
    %57 = vector.shape_cast %56 : vector<1x1x8xf32> to vector<1x8xf32>
    %58 = vector.broadcast %57 : vector<1x8xf32> to vector<2x8xf32>
    %59 = arith.addf %55, %58 : vector<2x8xf32>
    %cst_48 = arith.constant dense<0.000000e+00> : vector<2x2xf32>
    %60 = tpu.matmul %45, %52, %cst_48 {dimension_numbers = #tpu.dot_dimension_numbers<[1], [1], [0], [0], [0, 0, 1, 0], [], []>} : vector<2x8xf32>, vector<2x8xf32>, vector<2x2xf32> -> vector<2x2xf32>
    %cst_49 = arith.constant 0.353553385 : f32
    %61 = vector.broadcast %cst_49 : f32 to vector<2x2xf32>
    %62 = arith.mulf %60, %61 : vector<2x2xf32>
    %cst_50 = arith.constant dense<0xFF800000> : vector<2xf32>
    %63 = vector.multi_reduction <maximumf>, %62, %cst_50 [1] : vector<2x2xf32> to vector<2xf32>
    %64 = vector.shape_cast %63 : vector<2xf32> to vector<2x1xf32>
    %65 = vector.broadcast %64 : vector<2x1xf32> to vector<2x2xf32>
    %66 = arith.subf %62, %65 : vector<2x2xf32>
    %67 = math.exp %66 : vector<2x2xf32>
    %cst_51 = arith.constant dense<0.000000e+00> : vector<2xf32>
    %68 = vector.multi_reduction <add>, %67, %cst_51 [1] : vector<2x2xf32> to vector<2xf32>
    %69 = vector.shape_cast %68 : vector<2xf32> to vector<2x1xf32>
    %70 = tpu.reciprocal %69 {approx = true} : vector<2x1xf32> -> vector<2x1xf32>
    %71 = vector.broadcast %70 : vector<2x1xf32> to vector<2x2xf32>
    %72 = arith.mulf %67, %71 : vector<2x2xf32>
    %cst_52 = arith.constant dense<0.000000e+00> : vector<2x8xf32>
    %73 = tpu.matmul %72, %59, %cst_52 {dimension_numbers = #tpu.dot_dimension_numbers<[1], [0], [0], [1], [0, 0, 1, 1], [], []>} : vector<2x2xf32>, vector<2x8xf32>, vector<2x8xf32> -> vector<2x8xf32>
    %c1_53 = arith.constant 1 : index
    %c0_54 = arith.constant 0 : index
    %c0_55 = arith.constant 0 : index
    %74 = vector.load %arg5[%c1_53, %c0_54, %c0_55] : memref<4x8x32xf32, #tpu.memory_space<vmem>>, vector<1x8x32xf32>
    %75 = vector.shape_cast %74 : vector<1x8x32xf32> to vector<8x32xf32>
    %cst_56 = arith.constant dense<0.000000e+00> : vector<2x32xf32>
    %76 = tpu.matmul %73, %75, %cst_56 {dimension_numbers = #tpu.dot_dimension_numbers<[1], [0], [0], [1], [0, 0, 1, 1], [], []>} : vector<2x8xf32>, vector<8x32xf32>, vector<2x32xf32> -> vector<2x32xf32>
    %77 = arith.addf %38, %76 : vector<2x32xf32>
    %c2 = arith.constant 2 : index
    %c0_57 = arith.constant 0 : index
    %c0_58 = arith.constant 0 : index
    %78 = vector.load %arg1[%c2, %c0_57, %c0_58] : memref<4x32x8xf32, #tpu.memory_space<vmem>>, vector<1x32x8xf32>
    %79 = vector.shape_cast %78 : vector<1x32x8xf32> to vector<32x8xf32>
    %cst_59 = arith.constant dense<0.000000e+00> : vector<2x8xf32>
    %80 = tpu.matmul %0, %79, %cst_59 {dimension_numbers = #tpu.dot_dimension_numbers<[1], [0], [0], [1], [0, 0, 1, 1], [], []>} : vector<2x32xf32>, vector<32x8xf32>, vector<2x8xf32> -> vector<2x8xf32>
    %c2_60 = arith.constant 2 : index
    %c0_61 = arith.constant 0 : index
    %c0_62 = arith.constant 0 : index
    %81 = vector.load %arg2[%c2_60, %c0_61, %c0_62] : memref<4x1x8xf32, #tpu.memory_space<vmem>>, vector<1x1x8xf32>
    %82 = vector.shape_cast %81 : vector<1x1x8xf32> to vector<1x8xf32>
    %83 = vector.broadcast %82 : vector<1x8xf32> to vector<2x8xf32>
    %84 = arith.addf %80, %83 : vector<2x8xf32>
    %c2_63 = arith.constant 2 : index
    %c0_64 = arith.constant 0 : index
    %c0_65 = arith.constant 0 : index
    %85 = vector.load %arg3[%c2_63, %c0_64, %c0_65] : memref<8x32x8xf32, #tpu.memory_space<vmem>>, vector<1x32x8xf32>
    %86 = vector.shape_cast %85 : vector<1x32x8xf32> to vector<32x8xf32>
    %cst_66 = arith.constant dense<0.000000e+00> : vector<2x8xf32>
    %87 = tpu.matmul %0, %86, %cst_66 {dimension_numbers = #tpu.dot_dimension_numbers<[1], [0], [0], [1], [0, 0, 1, 1], [], []>} : vector<2x32xf32>, vector<32x8xf32>, vector<2x8xf32> -> vector<2x8xf32>
    %c2_67 = arith.constant 2 : index
    %c0_68 = arith.constant 0 : index
    %c0_69 = arith.constant 0 : index
    %88 = vector.load %arg4[%c2_67, %c0_68, %c0_69] : memref<8x1x8xf32, #tpu.memory_space<vmem>>, vector<1x1x8xf32>
    %89 = vector.shape_cast %88 : vector<1x1x8xf32> to vector<1x8xf32>
    %90 = vector.broadcast %89 : vector<1x8xf32> to vector<2x8xf32>
    %91 = arith.addf %87, %90 : vector<2x8xf32>
    %c6 = arith.constant 6 : index
    %c0_70 = arith.constant 0 : index
    %c0_71 = arith.constant 0 : index
    %92 = vector.load %arg3[%c6, %c0_70, %c0_71] : memref<8x32x8xf32, #tpu.memory_space<vmem>>, vector<1x32x8xf32>
    %93 = vector.shape_cast %92 : vector<1x32x8xf32> to vector<32x8xf32>
    %cst_72 = arith.constant dense<0.000000e+00> : vector<2x8xf32>
    %94 = tpu.matmul %0, %93, %cst_72 {dimension_numbers = #tpu.dot_dimension_numbers<[1], [0], [0], [1], [0, 0, 1, 1], [], []>} : vector<2x32xf32>, vector<32x8xf32>, vector<2x8xf32> -> vector<2x8xf32>
    %c6_73 = arith.constant 6 : index
    %c0_74 = arith.constant 0 : index
    %c0_75 = arith.constant 0 : index
    %95 = vector.load %arg4[%c6_73, %c0_74, %c0_75] : memref<8x1x8xf32, #tpu.memory_space<vmem>>, vector<1x1x8xf32>
    %96 = vector.shape_cast %95 : vector<1x1x8xf32> to vector<1x8xf32>
    %97 = vector.broadcast %96 : vector<1x8xf32> to vector<2x8xf32>
    %98 = arith.addf %94, %97 : vector<2x8xf32>
    %cst_76 = arith.constant dense<0.000000e+00> : vector<2x2xf32>
    %99 = tpu.matmul %84, %91, %cst_76 {dimension_numbers = #tpu.dot_dimension_numbers<[1], [1], [0], [0], [0, 0, 1, 0], [], []>} : vector<2x8xf32>, vector<2x8xf32>, vector<2x2xf32> -> vector<2x2xf32>
    %cst_77 = arith.constant 0.353553385 : f32
    %100 = vector.broadcast %cst_77 : f32 to vector<2x2xf32>
    %101 = arith.mulf %99, %100 : vector<2x2xf32>
    %cst_78 = arith.constant dense<0xFF800000> : vector<2xf32>
    %102 = vector.multi_reduction <maximumf>, %101, %cst_78 [1] : vector<2x2xf32> to vector<2xf32>
    %103 = vector.shape_cast %102 : vector<2xf32> to vector<2x1xf32>
    %104 = vector.broadcast %103 : vector<2x1xf32> to vector<2x2xf32>
    %105 = arith.subf %101, %104 : vector<2x2xf32>
    %106 = math.exp %105 : vector<2x2xf32>
    %cst_79 = arith.constant dense<0.000000e+00> : vector<2xf32>
    %107 = vector.multi_reduction <add>, %106, %cst_79 [1] : vector<2x2xf32> to vector<2xf32>
    %108 = vector.shape_cast %107 : vector<2xf32> to vector<2x1xf32>
    %109 = tpu.reciprocal %108 {approx = true} : vector<2x1xf32> -> vector<2x1xf32>
    %110 = vector.broadcast %109 : vector<2x1xf32> to vector<2x2xf32>
    %111 = arith.mulf %106, %110 : vector<2x2xf32>
    %cst_80 = arith.constant dense<0.000000e+00> : vector<2x8xf32>
    %112 = tpu.matmul %111, %98, %cst_80 {dimension_numbers = #tpu.dot_dimension_numbers<[1], [0], [0], [1], [0, 0, 1, 1], [], []>} : vector<2x2xf32>, vector<2x8xf32>, vector<2x8xf32> -> vector<2x8xf32>
    %c2_81 = arith.constant 2 : index
    %c0_82 = arith.constant 0 : index
    %c0_83 = arith.constant 0 : index
    %113 = vector.load %arg5[%c2_81, %c0_82, %c0_83] : memref<4x8x32xf32, #tpu.memory_space<vmem>>, vector<1x8x32xf32>
    %114 = vector.shape_cast %113 : vector<1x8x32xf32> to vector<8x32xf32>
    %cst_84 = arith.constant dense<0.000000e+00> : vector<2x32xf32>
    %115 = tpu.matmul %112, %114, %cst_84 {dimension_numbers = #tpu.dot_dimension_numbers<[1], [0], [0], [1], [0, 0, 1, 1], [], []>} : vector<2x8xf32>, vector<8x32xf32>, vector<2x32xf32> -> vector<2x32xf32>
    %116 = arith.addf %77, %115 : vector<2x32xf32>
    %c3 = arith.constant 3 : index
    %c0_85 = arith.constant 0 : index
    %c0_86 = arith.constant 0 : index
    %117 = vector.load %arg1[%c3, %c0_85, %c0_86] : memref<4x32x8xf32, #tpu.memory_space<vmem>>, vector<1x32x8xf32>
    %118 = vector.shape_cast %117 : vector<1x32x8xf32> to vector<32x8xf32>
    %cst_87 = arith.constant dense<0.000000e+00> : vector<2x8xf32>
    %119 = tpu.matmul %0, %118, %cst_87 {dimension_numbers = #tpu.dot_dimension_numbers<[1], [0], [0], [1], [0, 0, 1, 1], [], []>} : vector<2x32xf32>, vector<32x8xf32>, vector<2x8xf32> -> vector<2x8xf32>
    %c3_88 = arith.constant 3 : index
    %c0_89 = arith.constant 0 : index
    %c0_90 = arith.constant 0 : index
    %120 = vector.load %arg2[%c3_88, %c0_89, %c0_90] : memref<4x1x8xf32, #tpu.memory_space<vmem>>, vector<1x1x8xf32>
    %121 = vector.shape_cast %120 : vector<1x1x8xf32> to vector<1x8xf32>
    %122 = vector.broadcast %121 : vector<1x8xf32> to vector<2x8xf32>
    %123 = arith.addf %119, %122 : vector<2x8xf32>
    %c3_91 = arith.constant 3 : index
    %c0_92 = arith.constant 0 : index
    %c0_93 = arith.constant 0 : index
    %124 = vector.load %arg3[%c3_91, %c0_92, %c0_93] : memref<8x32x8xf32, #tpu.memory_space<vmem>>, vector<1x32x8xf32>
    %125 = vector.shape_cast %124 : vector<1x32x8xf32> to vector<32x8xf32>
    %cst_94 = arith.constant dense<0.000000e+00> : vector<2x8xf32>
    %126 = tpu.matmul %0, %125, %cst_94 {dimension_numbers = #tpu.dot_dimension_numbers<[1], [0], [0], [1], [0, 0, 1, 1], [], []>} : vector<2x32xf32>, vector<32x8xf32>, vector<2x8xf32> -> vector<2x8xf32>
    %c3_95 = arith.constant 3 : index
    %c0_96 = arith.constant 0 : index
    %c0_97 = arith.constant 0 : index
    %127 = vector.load %arg4[%c3_95, %c0_96, %c0_97] : memref<8x1x8xf32, #tpu.memory_space<vmem>>, vector<1x1x8xf32>
    %128 = vector.shape_cast %127 : vector<1x1x8xf32> to vector<1x8xf32>
    %129 = vector.broadcast %128 : vector<1x8xf32> to vector<2x8xf32>
    %130 = arith.addf %126, %129 : vector<2x8xf32>
    %c7 = arith.constant 7 : index
    %c0_98 = arith.constant 0 : index
    %c0_99 = arith.constant 0 : index
    %131 = vector.load %arg3[%c7, %c0_98, %c0_99] : memref<8x32x8xf32, #tpu.memory_space<vmem>>, vector<1x32x8xf32>
    %132 = vector.shape_cast %131 : vector<1x32x8xf32> to vector<32x8xf32>
    %cst_100 = arith.constant dense<0.000000e+00> : vector<2x8xf32>
    %133 = tpu.matmul %0, %132, %cst_100 {dimension_numbers = #tpu.dot_dimension_numbers<[1], [0], [0], [1], [0, 0, 1, 1], [], []>} : vector<2x32xf32>, vector<32x8xf32>, vector<2x8xf32> -> vector<2x8xf32>
    %c7_101 = arith.constant 7 : index
    %c0_102 = arith.constant 0 : index
    %c0_103 = arith.constant 0 : index
    %134 = vector.load %arg4[%c7_101, %c0_102, %c0_103] : memref<8x1x8xf32, #tpu.memory_space<vmem>>, vector<1x1x8xf32>
    %135 = vector.shape_cast %134 : vector<1x1x8xf32> to vector<1x8xf32>
    %136 = vector.broadcast %135 : vector<1x8xf32> to vector<2x8xf32>
    %137 = arith.addf %133, %136 : vector<2x8xf32>
    %cst_104 = arith.constant dense<0.000000e+00> : vector<2x2xf32>
    %138 = tpu.matmul %123, %130, %cst_104 {dimension_numbers = #tpu.dot_dimension_numbers<[1], [1], [0], [0], [0, 0, 1, 0], [], []>} : vector<2x8xf32>, vector<2x8xf32>, vector<2x2xf32> -> vector<2x2xf32>
    %cst_105 = arith.constant 0.353553385 : f32
    %139 = vector.broadcast %cst_105 : f32 to vector<2x2xf32>
    %140 = arith.mulf %138, %139 : vector<2x2xf32>
    %cst_106 = arith.constant dense<0xFF800000> : vector<2xf32>
    %141 = vector.multi_reduction <maximumf>, %140, %cst_106 [1] : vector<2x2xf32> to vector<2xf32>
    %142 = vector.shape_cast %141 : vector<2xf32> to vector<2x1xf32>
    %143 = vector.broadcast %142 : vector<2x1xf32> to vector<2x2xf32>
    %144 = arith.subf %140, %143 : vector<2x2xf32>
    %145 = math.exp %144 : vector<2x2xf32>
    %cst_107 = arith.constant dense<0.000000e+00> : vector<2xf32>
    %146 = vector.multi_reduction <add>, %145, %cst_107 [1] : vector<2x2xf32> to vector<2xf32>
    %147 = vector.shape_cast %146 : vector<2xf32> to vector<2x1xf32>
    %148 = tpu.reciprocal %147 {approx = true} : vector<2x1xf32> -> vector<2x1xf32>
    %149 = vector.broadcast %148 : vector<2x1xf32> to vector<2x2xf32>
    %150 = arith.mulf %145, %149 : vector<2x2xf32>
    %cst_108 = arith.constant dense<0.000000e+00> : vector<2x8xf32>
    %151 = tpu.matmul %150, %137, %cst_108 {dimension_numbers = #tpu.dot_dimension_numbers<[1], [0], [0], [1], [0, 0, 1, 1], [], []>} : vector<2x2xf32>, vector<2x8xf32>, vector<2x8xf32> -> vector<2x8xf32>
    %c3_109 = arith.constant 3 : index
    %c0_110 = arith.constant 0 : index
    %c0_111 = arith.constant 0 : index
    %152 = vector.load %arg5[%c3_109, %c0_110, %c0_111] : memref<4x8x32xf32, #tpu.memory_space<vmem>>, vector<1x8x32xf32>
    %153 = vector.shape_cast %152 : vector<1x8x32xf32> to vector<8x32xf32>
    %cst_112 = arith.constant dense<0.000000e+00> : vector<2x32xf32>
    %154 = tpu.matmul %151, %153, %cst_112 {dimension_numbers = #tpu.dot_dimension_numbers<[1], [0], [0], [1], [0, 0, 1, 1], [], []>} : vector<2x8xf32>, vector<8x32xf32>, vector<2x32xf32> -> vector<2x32xf32>
    %155 = arith.addf %116, %154 : vector<2x32xf32>
    %c0_113 = arith.constant 0 : index
    %c0_114 = arith.constant 0 : index
    %156 = vector.load %arg6[%c0_113, %c0_114] : memref<1x32xf32, #tpu.memory_space<vmem>>, vector<1x32xf32>
    %157 = vector.broadcast %156 : vector<1x32xf32> to vector<2x32xf32>
    %158 = arith.addf %155, %157 : vector<2x32xf32>
    %c0_115 = arith.constant 0 : index
    %c0_116 = arith.constant 0 : index
    %159 = vector.load %arg16[%c0_115, %c0_116] : memref<2x32xf32, #tpu.memory_space<vmem>>, vector<2x32xf32>
    tpu.vector_store %arg16[%c0_115, %c0_116], %158 {strides = array<i32>} : memref<2x32xf32, #tpu.memory_space<vmem>>, vector<2x32xf32>,
    %c0_117 = arith.constant 0 : index
    %c0_118 = arith.constant 0 : index
    %160 = vector.load %arg16[%c0_117, %c0_118] : memref<2x32xf32, #tpu.memory_space<vmem>>, vector<2x32xf32>
    %161 = arith.addf %0, %160 : vector<2x32xf32>
    %cst_119 = arith.constant dense<0.000000e+00> : vector<2xf32>
    %162 = vector.multi_reduction <add>, %161, %cst_119 [1] : vector<2x32xf32> to vector<2xf32>
    %163 = vector.shape_cast %162 : vector<2xf32> to vector<2x1xf32>
    %cst_120 = arith.constant 3.200000e+01 : f32
    %164 = vector.broadcast %cst_120 : f32 to vector<2x1xf32>
    %165 = arith.divf %163, %164 : vector<2x1xf32>
    %166 = vector.broadcast %165 : vector<2x1xf32> to vector<2x32xf32>
    %167 = arith.subf %161, %166 : vector<2x32xf32>
    %168 = arith.mulf %167, %167 : vector<2x32xf32>
    %cst_121 = arith.constant dense<0.000000e+00> : vector<2xf32>
    %169 = vector.multi_reduction <add>, %168, %cst_121 [1] : vector<2x32xf32> to vector<2xf32>
    %170 = vector.shape_cast %169 : vector<2xf32> to vector<2x1xf32>
    %cst_122 = arith.constant 3.200000e+01 : f32
    %171 = vector.broadcast %cst_122 : f32 to vector<2x1xf32>
    %172 = arith.divf %170, %171 : vector<2x1xf32>
    %cst_123 = arith.constant 9.99999974E-6 : f32
    %173 = vector.broadcast %cst_123 : f32 to vector<2x1xf32>
    %174 = arith.addf %172, %173 : vector<2x1xf32>
    %175 = math.rsqrt %174 : vector<2x1xf32>
    %176 = vector.broadcast %175 : vector<2x1xf32> to vector<2x32xf32>
    %177 = arith.mulf %167, %176 : vector<2x32xf32>
    %c0_124 = arith.constant 0 : index
    %c0_125 = arith.constant 0 : index
    %178 = vector.load %arg11[%c0_124, %c0_125] : memref<1x32xf32, #tpu.memory_space<vmem>>, vector<1x32xf32>
    %179 = vector.broadcast %178 : vector<1x32xf32> to vector<2x32xf32>
    %180 = arith.mulf %177, %179 : vector<2x32xf32>
    %c0_126 = arith.constant 0 : index
    %c0_127 = arith.constant 0 : index
    %181 = vector.load %arg12[%c0_126, %c0_127] : memref<1x32xf32, #tpu.memory_space<vmem>>, vector<1x32xf32>
    %182 = vector.broadcast %181 : vector<1x32xf32> to vector<2x32xf32>
    %183 = arith.addf %180, %182 : vector<2x32xf32>
    %c0_128 = arith.constant 0 : index
    %c0_129 = arith.constant 0 : index
    %184 = vector.load %arg7[%c0_128, %c0_129] : memref<32x2048xf32, #tpu.memory_space<vmem>>, vector<32x2048xf32>
    %cst_130 = arith.constant dense<0.000000e+00> : vector<2x2048xf32>
    %185 = tpu.matmul %183, %184, %cst_130 {dimension_numbers = #tpu.dot_dimension_numbers<[1], [0], [0], [1], [0, 0, 1, 1], [], []>} : vector<2x32xf32>, vector<32x2048xf32>, vector<2x2048xf32> -> vector<2x2048xf32>
    %c0_131 = arith.constant 0 : index
    %c0_132 = arith.constant 0 : index
    %186 = vector.load %arg8[%c0_131, %c0_132] : memref<1x2048xf32, #tpu.memory_space<vmem>>, vector<1x2048xf32>
    %187 = vector.broadcast %186 : vector<1x2048xf32> to vector<2x2048xf32>
    %188 = arith.addf %185, %187 : vector<2x2048xf32>
    %cst_133 = arith.constant 0.000000e+00 : f32
    %189 = vector.broadcast %cst_133 : f32 to vector<2x2048xf32>
    %190 = arith.maximumf %188, %189 : vector<2x2048xf32>
    %c0_134 = arith.constant 0 : index
    %c0_135 = arith.constant 0 : index
    %191 = vector.load %arg9[%c0_134, %c0_135] : memref<2048x32xf32, #tpu.memory_space<vmem>>, vector<2048x32xf32>
    %cst_136 = arith.constant dense<0.000000e+00> : vector<2x32xf32>
    %192 = tpu.matmul %190, %191, %cst_136 {dimension_numbers = #tpu.dot_dimension_numbers<[1], [0], [0], [1], [0, 0, 1, 1], [], []>} : vector<2x2048xf32>, vector<2048x32xf32>, vector<2x32xf32> -> vector<2x32xf32>
    %c0_137 = arith.constant 0 : index
    %c0_138 = arith.constant 0 : index
    %193 = vector.load %arg10[%c0_137, %c0_138] : memref<1x32xf32, #tpu.memory_space<vmem>>, vector<1x32xf32>
    %194 = vector.broadcast %193 : vector<1x32xf32> to vector<2x32xf32>
    %195 = arith.addf %192, %194 : vector<2x32xf32>
    %196 = arith.addf %183, %195 : vector<2x32xf32>
    %cst_139 = arith.constant dense<0.000000e+00> : vector<2xf32>
    %197 = vector.multi_reduction <add>, %196, %cst_139 [1] : vector<2x32xf32> to vector<2xf32>
    %198 = vector.shape_cast %197 : vector<2xf32> to vector<2x1xf32>
    %cst_140 = arith.constant 3.200000e+01 : f32
    %199 = vector.broadcast %cst_140 : f32 to vector<2x1xf32>
    %200 = arith.divf %198, %199 : vector<2x1xf32>
    %201 = vector.broadcast %200 : vector<2x1xf32> to vector<2x32xf32>
    %202 = arith.subf %196, %201 : vector<2x32xf32>
    %203 = arith.mulf %202, %202 : vector<2x32xf32>
    %cst_141 = arith.constant dense<0.000000e+00> : vector<2xf32>
    %204 = vector.multi_reduction <add>, %203, %cst_141 [1] : vector<2x32xf32> to vector<2xf32>
    %205 = vector.shape_cast %204 : vector<2xf32> to vector<2x1xf32>
    %cst_142 = arith.constant 3.200000e+01 : f32
    %206 = vector.broadcast %cst_142 : f32 to vector<2x1xf32>
    %207 = arith.divf %205, %206 : vector<2x1xf32>
    %cst_143 = arith.constant 9.99999974E-6 : f32
    %208 = vector.broadcast %cst_143 : f32 to vector<2x1xf32>
    %209 = arith.addf %207, %208 : vector<2x1xf32>
    %210 = math.rsqrt %209 : vector<2x1xf32>
    %211 = vector.broadcast %210 : vector<2x1xf32> to vector<2x32xf32>
    %212 = arith.mulf %202, %211 : vector<2x32xf32>
    %c0_144 = arith.constant 0 : index
    %c0_145 = arith.constant 0 : index
    %213 = vector.load %arg13[%c0_144, %c0_145] : memref<1x32xf32, #tpu.memory_space<vmem>>, vector<1x32xf32>
    %214 = vector.broadcast %213 : vector<1x32xf32> to vector<2x32xf32>
    %215 = arith.mulf %212, %214 : vector<2x32xf32>
    %c0_146 = arith.constant 0 : index
    %c0_147 = arith.constant 0 : index
    %216 = vector.load %arg14[%c0_146, %c0_147] : memref<1x32xf32, #tpu.memory_space<vmem>>, vector<1x32xf32>
    %217 = vector.broadcast %216 : vector<1x32xf32> to vector<2x32xf32>
    %218 = arith.addf %215, %217 : vector<2x32xf32>
    %c0_148 = arith.constant 0 : index
    %c0_149 = arith.constant 0 : index
    %219 = vector.load %arg15[%c0_148, %c0_149] : memref<2x32xf32, #tpu.memory_space<vmem>>, vector<2x32xf32>
    tpu.vector_store %arg15[%c0_148, %c0_149], %218 {strides = array<i32>} : memref<2x32xf32, #tpu.memory_space<vmem>>, vector<2x32xf32>,
    return
  }
}

module attributes {stable_mosaic.version = 11 : i64} {
  func.func @_head_loss_kernel(%arg0: memref<16x32xf32, #tpu.memory_space<vmem>>, %arg1: memref<32x32xf32, #tpu.memory_space<vmem>>, %arg2: memref<1x32xf32, #tpu.memory_space<vmem>>, %arg3: memref<2x1x32xi32, #tpu.memory_space<vmem>>, %arg4: memref<16x32xf32, #tpu.memory_space<vmem>>, %arg5: memref<1x1xf32, #tpu.memory_space<vmem>>) attributes {dimension_semantics = [], scalar_prefetch = 0 : i64, scratch_operands = 0 : i64, tpu.core_type = #tpu.core_type<tc>} {
    %c0 = arith.constant 0 : index
    %c0_0 = arith.constant 0 : index
    %0 = vector.load %arg0[%c0, %c0_0] : memref<16x32xf32, #tpu.memory_space<vmem>>, vector<16x32xf32>
    %c0_1 = arith.constant 0 : index
    %c0_2 = arith.constant 0 : index
    %1 = vector.load %arg1[%c0_1, %c0_2] : memref<32x32xf32, #tpu.memory_space<vmem>>, vector<32x32xf32>
    %cst = arith.constant dense<0.000000e+00> : vector<16x32xf32>
    %2 = tpu.matmul %0, %1, %cst {dimension_numbers = #tpu.dot_dimension_numbers<[1], [0], [0], [1], [0, 0, 1, 1], [], []>} : vector<16x32xf32>, vector<32x32xf32>, vector<16x32xf32> -> vector<16x32xf32>
    %c0_3 = arith.constant 0 : index
    %c0_4 = arith.constant 0 : index
    %3 = vector.load %arg2[%c0_3, %c0_4] : memref<1x32xf32, #tpu.memory_space<vmem>>, vector<1x32xf32>
    %4 = vector.broadcast %3 : vector<1x32xf32> to vector<16x32xf32>
    %5 = arith.addf %2, %4 : vector<16x32xf32>
    %c0_5 = arith.constant 0 : index
    %c0_6 = arith.constant 0 : index
    %6 = vector.load %arg4[%c0_5, %c0_6] : memref<16x32xf32, #tpu.memory_space<vmem>>, vector<16x32xf32>
    tpu.vector_store %arg4[%c0_5, %c0_6], %5 {strides = array<i32>} : memref<16x32xf32, #tpu.memory_space<vmem>>, vector<16x32xf32>,
    %7 = vector.extract_strided_slice %5 {offsets = [0, 0], sizes = [8, 32], strides = [1, 1]} : vector<16x32xf32> to vector<8x32xf32>
    %cst_7 = arith.constant dense<0xFF800000> : vector<32xf32>
    %8 = vector.multi_reduction <maximumf>, %7, %cst_7 [0] : vector<8x32xf32> to vector<32xf32>
    %9 = vector.shape_cast %8 : vector<32xf32> to vector<1x32xf32>
    %10 = vector.broadcast %9 : vector<1x32xf32> to vector<8x32xf32>
    %11 = arith.subf %7, %10 : vector<8x32xf32>
    %12 = math.exp %11 : vector<8x32xf32>
    %cst_8 = arith.constant dense<0.000000e+00> : vector<32xf32>
    %13 = vector.multi_reduction <add>, %12, %cst_8 [0] : vector<8x32xf32> to vector<32xf32>
    %14 = vector.shape_cast %13 : vector<32xf32> to vector<1x32xf32>
    %15 = math.log %14 : vector<1x32xf32>
    %16 = arith.addf %15, %9 : vector<1x32xf32>
    %17 = vector.broadcast %16 : vector<1x32xf32> to vector<8x32xf32>
    %18 = arith.subf %7, %17 : vector<8x32xf32>
    %19 = tpu.iota {dimensions = array<i32: 0>} : vector<8x32xi32>
    %c0_9 = arith.constant 0 : index
    %c0_10 = arith.constant 0 : index
    %c0_11 = arith.constant 0 : index
    %20 = vector.load %arg3[%c0_9, %c0_10, %c0_11] : memref<2x1x32xi32, #tpu.memory_space<vmem>>, vector<1x1x32xi32>
    %21 = vector.shape_cast %20 : vector<1x1x32xi32> to vector<1x32xi32>
    %22 = vector.broadcast %21 : vector<1x32xi32> to vector<8x32xi32>
    %23 = arith.cmpi eq, %19, %22 : vector<8x32xi32>
    %24 = arith.extui %23 : vector<8x32xi1> to vector<8x32xi32>
    %25 = arith.sitofp %24 : vector<8x32xi32> to vector<8x32xf32>
    %cst_12 = arith.constant 0.899999976 : f32
    %26 = vector.broadcast %cst_12 : f32 to vector<8x32xf32>
    %27 = arith.mulf %25, %26 : vector<8x32xf32>
    %cst_13 = arith.constant 1.250000e-02 : f32
    %28 = vector.broadcast %cst_13 : f32 to vector<8x32xf32>
    %29 = arith.addf %27, %28 : vector<8x32xf32>
    %cst_14 = arith.constant 0.000000e+00 : f32
    %30 = vector.broadcast %cst_14 : f32 to vector<8x32xf32>
    %31 = arith.subf %30, %29 : vector<8x32xf32>
    %32 = arith.mulf %31, %18 : vector<8x32xf32>
    %cst_15 = arith.constant dense<0.000000e+00> : vector<8xf32>
    %33 = vector.multi_reduction <add>, %32, %cst_15 [1] : vector<8x32xf32> to vector<8xf32>
    %34 = vector.shape_cast %33 : vector<8xf32> to vector<8x1xf32>
    %cst_16 = arith.constant dense<0.000000e+00> : vector<1xf32>
    %35 = vector.multi_reduction <add>, %34, %cst_16 [0] : vector<8x1xf32> to vector<1xf32>
    %36 = vector.shape_cast %35 : vector<1xf32> to vector<1x1xf32>
    %37 = vector.extract_strided_slice %5 {offsets = [8, 0], sizes = [8, 32], strides = [1, 1]} : vector<16x32xf32> to vector<8x32xf32>
    %cst_17 = arith.constant dense<0xFF800000> : vector<32xf32>
    %38 = vector.multi_reduction <maximumf>, %37, %cst_17 [0] : vector<8x32xf32> to vector<32xf32>
    %39 = vector.shape_cast %38 : vector<32xf32> to vector<1x32xf32>
    %40 = vector.broadcast %39 : vector<1x32xf32> to vector<8x32xf32>
    %41 = arith.subf %37, %40 : vector<8x32xf32>
    %42 = math.exp %41 : vector<8x32xf32>
    %cst_18 = arith.constant dense<0.000000e+00> : vector<32xf32>
    %43 = vector.multi_reduction <add>, %42, %cst_18 [0] : vector<8x32xf32> to vector<32xf32>
    %44 = vector.shape_cast %43 : vector<32xf32> to vector<1x32xf32>
    %45 = math.log %44 : vector<1x32xf32>
    %46 = arith.addf %45, %39 : vector<1x32xf32>
    %47 = vector.broadcast %46 : vector<1x32xf32> to vector<8x32xf32>
    %48 = arith.subf %37, %47 : vector<8x32xf32>
    %49 = tpu.iota {dimensions = array<i32: 0>} : vector<8x32xi32>
    %c1 = arith.constant 1 : index
    %c0_19 = arith.constant 0 : index
    %c0_20 = arith.constant 0 : index
    %50 = vector.load %arg3[%c1, %c0_19, %c0_20] : memref<2x1x32xi32, #tpu.memory_space<vmem>>, vector<1x1x32xi32>
    %51 = vector.shape_cast %50 : vector<1x1x32xi32> to vector<1x32xi32>
    %52 = vector.broadcast %51 : vector<1x32xi32> to vector<8x32xi32>
    %53 = arith.cmpi eq, %49, %52 : vector<8x32xi32>
    %54 = arith.extui %53 : vector<8x32xi1> to vector<8x32xi32>
    %55 = arith.sitofp %54 : vector<8x32xi32> to vector<8x32xf32>
    %cst_21 = arith.constant 0.899999976 : f32
    %56 = vector.broadcast %cst_21 : f32 to vector<8x32xf32>
    %57 = arith.mulf %55, %56 : vector<8x32xf32>
    %cst_22 = arith.constant 1.250000e-02 : f32
    %58 = vector.broadcast %cst_22 : f32 to vector<8x32xf32>
    %59 = arith.addf %57, %58 : vector<8x32xf32>
    %cst_23 = arith.constant 0.000000e+00 : f32
    %60 = vector.broadcast %cst_23 : f32 to vector<8x32xf32>
    %61 = arith.subf %60, %59 : vector<8x32xf32>
    %62 = arith.mulf %61, %48 : vector<8x32xf32>
    %cst_24 = arith.constant dense<0.000000e+00> : vector<8xf32>
    %63 = vector.multi_reduction <add>, %62, %cst_24 [1] : vector<8x32xf32> to vector<8xf32>
    %64 = vector.shape_cast %63 : vector<8xf32> to vector<8x1xf32>
    %cst_25 = arith.constant dense<0.000000e+00> : vector<1xf32>
    %65 = vector.multi_reduction <add>, %64, %cst_25 [0] : vector<8x1xf32> to vector<1xf32>
    %66 = vector.shape_cast %65 : vector<1xf32> to vector<1x1xf32>
    %67 = arith.addf %36, %66 : vector<1x1xf32>
    %cst_26 = arith.constant 5.120000e+02 : f32
    %68 = vector.broadcast %cst_26 : f32 to vector<1x1xf32>
    %69 = arith.divf %67, %68 : vector<1x1xf32>
    %c0_27 = arith.constant 0 : index
    %c0_28 = arith.constant 0 : index
    %70 = vector.load %arg5[%c0_27, %c0_28] : memref<1x1xf32, #tpu.memory_space<vmem>>, vector<1x1xf32>
    tpu.vector_store %arg5[%c0_27, %c0_28], %69 {strides = array<i32>} : memref<1x1xf32, #tpu.memory_space<vmem>>, vector<1x1xf32>,
    return
  }
}

module attributes {stable_mosaic.version = 11 : i64} {
  func.func @_decoder_layer_kernel(%arg0: memref<16x32xf32, #tpu.memory_space<vmem>>, %arg1: memref<2x1x32xf32, #tpu.memory_space<vmem>>, %arg2: memref<4x32x8xf32, #tpu.memory_space<vmem>>, %arg3: memref<4x1x8xf32, #tpu.memory_space<vmem>>, %arg4: memref<8x32x8xf32, #tpu.memory_space<vmem>>, %arg5: memref<8x1x8xf32, #tpu.memory_space<vmem>>, %arg6: memref<4x8x32xf32, #tpu.memory_space<vmem>>, %arg7: memref<1x32xf32, #tpu.memory_space<vmem>>, %arg8: memref<4x32x8xf32, #tpu.memory_space<vmem>>, %arg9: memref<4x1x8xf32, #tpu.memory_space<vmem>>, %arg10: memref<8x32x8xf32, #tpu.memory_space<vmem>>, %arg11: memref<8x1x8xf32, #tpu.memory_space<vmem>>, %arg12: memref<4x8x32xf32, #tpu.memory_space<vmem>>, %arg13: memref<1x32xf32, #tpu.memory_space<vmem>>, %arg14: memref<32x2048xf32, #tpu.memory_space<vmem>>, %arg15: memref<1x2048xf32, #tpu.memory_space<vmem>>, %arg16: memref<2048x32xf32, #tpu.memory_space<vmem>>, %arg17: memref<1x32xf32, #tpu.memory_space<vmem>>, %arg18: memref<1x32xf32, #tpu.memory_space<vmem>>, %arg19: memref<1x32xf32, #tpu.memory_space<vmem>>, %arg20: memref<1x32xf32, #tpu.memory_space<vmem>>, %arg21: memref<1x32xf32, #tpu.memory_space<vmem>>, %arg22: memref<1x32xf32, #tpu.memory_space<vmem>>, %arg23: memref<1x32xf32, #tpu.memory_space<vmem>>, %arg24: memref<16x32xf32, #tpu.memory_space<vmem>>, %arg25: memref<16x32xf32, #tpu.memory_space<vmem>>) attributes {dimension_semantics = [], scalar_prefetch = 0 : i64, scratch_operands = 1 : i64, tpu.core_type = #tpu.core_type<tc>} {
    %c0 = arith.constant 0 : index
    %c0_0 = arith.constant 0 : index
    %0 = vector.load %arg0[%c0, %c0_0] : memref<16x32xf32, #tpu.memory_space<vmem>>, vector<16x32xf32>
    %1 = vector.extract_strided_slice %0 {offsets = [0, 0], sizes = [8, 32], strides = [1, 1]} : vector<16x32xf32> to vector<8x32xf32>
    %2 = vector.extract_strided_slice %0 {offsets = [0, 0], sizes = [8, 32], strides = [1, 1]} : vector<16x32xf32> to vector<8x32xf32>
    %c0_1 = arith.constant 0 : index
    %c0_2 = arith.constant 0 : index
    %c0_3 = arith.constant 0 : index
    %3 = vector.load %arg2[%c0_1, %c0_2, %c0_3] : memref<4x32x8xf32, #tpu.memory_space<vmem>>, vector<1x32x8xf32>
    %4 = vector.shape_cast %3 : vector<1x32x8xf32> to vector<32x8xf32>
    %cst = arith.constant dense<0.000000e+00> : vector<8x8xf32>
    %5 = tpu.matmul %1, %4, %cst {dimension_numbers = #tpu.dot_dimension_numbers<[1], [0], [0], [1], [0, 0, 1, 1], [], []>} : vector<8x32xf32>, vector<32x8xf32>, vector<8x8xf32> -> vector<8x8xf32>
    %c0_4 = arith.constant 0 : index
    %c0_5 = arith.constant 0 : index
    %c0_6 = arith.constant 0 : index
    %6 = vector.load %arg3[%c0_4, %c0_5, %c0_6] : memref<4x1x8xf32, #tpu.memory_space<vmem>>, vector<1x1x8xf32>
    %7 = vector.shape_cast %6 : vector<1x1x8xf32> to vector<1x8xf32>
    %8 = vector.broadcast %7 : vector<1x8xf32> to vector<8x8xf32>
    %9 = arith.addf %5, %8 : vector<8x8xf32>
    %c0_7 = arith.constant 0 : index
    %c0_8 = arith.constant 0 : index
    %c0_9 = arith.constant 0 : index
    %10 = vector.load %arg4[%c0_7, %c0_8, %c0_9] : memref<8x32x8xf32, #tpu.memory_space<vmem>>, vector<1x32x8xf32>
    %11 = vector.shape_cast %10 : vector<1x32x8xf32> to vector<32x8xf32>
    %cst_10 = arith.constant dense<0.000000e+00> : vector<8x8xf32>
    %12 = tpu.matmul %2, %11, %cst_10 {dimension_numbers = #tpu.dot_dimension_numbers<[1], [0], [0], [1], [0, 0, 1, 1], [], []>} : vector<8x32xf32>, vector<32x8xf32>, vector<8x8xf32> -> vector<8x8xf32>
    %c0_11 = arith.constant 0 : index
    %c0_12 = arith.constant 0 : index
    %c0_13 = arith.constant 0 : index
    %13 = vector.load %arg5[%c0_11, %c0_12, %c0_13] : memref<8x1x8xf32, #tpu.memory_space<vmem>>, vector<1x1x8xf32>
    %14 = vector.shape_cast %13 : vector<1x1x8xf32> to vector<1x8xf32>
    %15 = vector.broadcast %14 : vector<1x8xf32> to vector<8x8xf32>
    %16 = arith.addf %12, %15 : vector<8x8xf32>
    %c4 = arith.constant 4 : index
    %c0_14 = arith.constant 0 : index
    %c0_15 = arith.constant 0 : index
    %17 = vector.load %arg4[%c4, %c0_14, %c0_15] : memref<8x32x8xf32, #tpu.memory_space<vmem>>, vector<1x32x8xf32>
    %18 = vector.shape_cast %17 : vector<1x32x8xf32> to vector<32x8xf32>
    %cst_16 = arith.constant dense<0.000000e+00> : vector<8x8xf32>
    %19 = tpu.matmul %2, %18, %cst_16 {dimension_numbers = #tpu.dot_dimension_numbers<[1], [0], [0], [1], [0, 0, 1, 1], [], []>} : vector<8x32xf32>, vector<32x8xf32>, vector<8x8xf32> -> vector<8x8xf32>
    %c4_17 = arith.constant 4 : index
    %c0_18 = arith.constant 0 : index
    %c0_19 = arith.constant 0 : index
    %20 = vector.load %arg5[%c4_17, %c0_18, %c0_19] : memref<8x1x8xf32, #tpu.memory_space<vmem>>, vector<1x1x8xf32>
    %21 = vector.shape_cast %20 : vector<1x1x8xf32> to vector<1x8xf32>
    %22 = vector.broadcast %21 : vector<1x8xf32> to vector<8x8xf32>
    %23 = arith.addf %19, %22 : vector<8x8xf32>
    %cst_20 = arith.constant dense<0.000000e+00> : vector<8x8xf32>
    %24 = tpu.matmul %9, %16, %cst_20 {dimension_numbers = #tpu.dot_dimension_numbers<[1], [1], [0], [0], [0, 0, 1, 0], [], []>} : vector<8x8xf32>, vector<8x8xf32>, vector<8x8xf32> -> vector<8x8xf32>
    %cst_21 = arith.constant 0.353553385 : f32
    %25 = vector.broadcast %cst_21 : f32 to vector<8x8xf32>
    %26 = arith.mulf %24, %25 : vector<8x8xf32>
    %cst_22 = arith.constant dense<0xFF800000> : vector<8xf32>
    %27 = vector.multi_reduction <maximumf>, %26, %cst_22 [1] : vector<8x8xf32> to vector<8xf32>
    %28 = vector.shape_cast %27 : vector<8xf32> to vector<8x1xf32>
    %29 = vector.broadcast %28 : vector<8x1xf32> to vector<8x8xf32>
    %30 = arith.subf %26, %29 : vector<8x8xf32>
    %31 = math.exp %30 : vector<8x8xf32>
    %cst_23 = arith.constant dense<0.000000e+00> : vector<8xf32>
    %32 = vector.multi_reduction <add>, %31, %cst_23 [1] : vector<8x8xf32> to vector<8xf32>
    %33 = vector.shape_cast %32 : vector<8xf32> to vector<8x1xf32>
    %34 = tpu.reciprocal %33 {approx = true} : vector<8x1xf32> -> vector<8x1xf32>
    %35 = vector.broadcast %34 : vector<8x1xf32> to vector<8x8xf32>
    %36 = arith.mulf %31, %35 : vector<8x8xf32>
    %cst_24 = arith.constant dense<0.000000e+00> : vector<8x8xf32>
    %37 = tpu.matmul %36, %23, %cst_24 {dimension_numbers = #tpu.dot_dimension_numbers<[1], [0], [0], [1], [0, 0, 1, 1], [], []>} : vector<8x8xf32>, vector<8x8xf32>, vector<8x8xf32> -> vector<8x8xf32>
    %c0_25 = arith.constant 0 : index
    %c0_26 = arith.constant 0 : index
    %c0_27 = arith.constant 0 : index
    %38 = vector.load %arg6[%c0_25, %c0_26, %c0_27] : memref<4x8x32xf32, #tpu.memory_space<vmem>>, vector<1x8x32xf32>
    %39 = vector.shape_cast %38 : vector<1x8x32xf32> to vector<8x32xf32>
    %cst_28 = arith.constant dense<0.000000e+00> : vector<8x32xf32>
    %40 = tpu.matmul %37, %39, %cst_28 {dimension_numbers = #tpu.dot_dimension_numbers<[1], [0], [0], [1], [0, 0, 1, 1], [], []>} : vector<8x8xf32>, vector<8x32xf32>, vector<8x32xf32> -> vector<8x32xf32>
    %c1 = arith.constant 1 : index
    %c0_29 = arith.constant 0 : index
    %c0_30 = arith.constant 0 : index
    %41 = vector.load %arg2[%c1, %c0_29, %c0_30] : memref<4x32x8xf32, #tpu.memory_space<vmem>>, vector<1x32x8xf32>
    %42 = vector.shape_cast %41 : vector<1x32x8xf32> to vector<32x8xf32>
    %cst_31 = arith.constant dense<0.000000e+00> : vector<8x8xf32>
    %43 = tpu.matmul %1, %42, %cst_31 {dimension_numbers = #tpu.dot_dimension_numbers<[1], [0], [0], [1], [0, 0, 1, 1], [], []>} : vector<8x32xf32>, vector<32x8xf32>, vector<8x8xf32> -> vector<8x8xf32>
    %c1_32 = arith.constant 1 : index
    %c0_33 = arith.constant 0 : index
    %c0_34 = arith.constant 0 : index
    %44 = vector.load %arg3[%c1_32, %c0_33, %c0_34] : memref<4x1x8xf32, #tpu.memory_space<vmem>>, vector<1x1x8xf32>
    %45 = vector.shape_cast %44 : vector<1x1x8xf32> to vector<1x8xf32>
    %46 = vector.broadcast %45 : vector<1x8xf32> to vector<8x8xf32>
    %47 = arith.addf %43, %46 : vector<8x8xf32>
    %c1_35 = arith.constant 1 : index
    %c0_36 = arith.constant 0 : index
    %c0_37 = arith.constant 0 : index
    %48 = vector.load %arg4[%c1_35, %c0_36, %c0_37] : memref<8x32x8xf32, #tpu.memory_space<vmem>>, vector<1x32x8xf32>
    %49 = vector.shape_cast %48 : vector<1x32x8xf32> to vector<32x8xf32>
    %cst_38 = arith.constant dense<0.000000e+00> : vector<8x8xf32>
    %50 = tpu.matmul %2, %49, %cst_38 {dimension_numbers = #tpu.dot_dimension_numbers<[1], [0], [0], [1], [0, 0, 1, 1], [], []>} : vector<8x32xf32>, vector<32x8xf32>, vector<8x8xf32> -> vector<8x8xf32>
    %c1_39 = arith.constant 1 : index
    %c0_40 = arith.constant 0 : index
    %c0_41 = arith.constant 0 : index
    %51 = vector.load %arg5[%c1_39, %c0_40, %c0_41] : memref<8x1x8xf32, #tpu.memory_space<vmem>>, vector<1x1x8xf32>
    %52 = vector.shape_cast %51 : vector<1x1x8xf32> to vector<1x8xf32>
    %53 = vector.broadcast %52 : vector<1x8xf32> to vector<8x8xf32>
    %54 = arith.addf %50, %53 : vector<8x8xf32>
    %c5 = arith.constant 5 : index
    %c0_42 = arith.constant 0 : index
    %c0_43 = arith.constant 0 : index
    %55 = vector.load %arg4[%c5, %c0_42, %c0_43] : memref<8x32x8xf32, #tpu.memory_space<vmem>>, vector<1x32x8xf32>
    %56 = vector.shape_cast %55 : vector<1x32x8xf32> to vector<32x8xf32>
    %cst_44 = arith.constant dense<0.000000e+00> : vector<8x8xf32>
    %57 = tpu.matmul %2, %56, %cst_44 {dimension_numbers = #tpu.dot_dimension_numbers<[1], [0], [0], [1], [0, 0, 1, 1], [], []>} : vector<8x32xf32>, vector<32x8xf32>, vector<8x8xf32> -> vector<8x8xf32>
    %c5_45 = arith.constant 5 : index
    %c0_46 = arith.constant 0 : index
    %c0_47 = arith.constant 0 : index
    %58 = vector.load %arg5[%c5_45, %c0_46, %c0_47] : memref<8x1x8xf32, #tpu.memory_space<vmem>>, vector<1x1x8xf32>
    %59 = vector.shape_cast %58 : vector<1x1x8xf32> to vector<1x8xf32>
    %60 = vector.broadcast %59 : vector<1x8xf32> to vector<8x8xf32>
    %61 = arith.addf %57, %60 : vector<8x8xf32>
    %cst_48 = arith.constant dense<0.000000e+00> : vector<8x8xf32>
    %62 = tpu.matmul %47, %54, %cst_48 {dimension_numbers = #tpu.dot_dimension_numbers<[1], [1], [0], [0], [0, 0, 1, 0], [], []>} : vector<8x8xf32>, vector<8x8xf32>, vector<8x8xf32> -> vector<8x8xf32>
    %cst_49 = arith.constant 0.353553385 : f32
    %63 = vector.broadcast %cst_49 : f32 to vector<8x8xf32>
    %64 = arith.mulf %62, %63 : vector<8x8xf32>
    %cst_50 = arith.constant dense<0xFF800000> : vector<8xf32>
    %65 = vector.multi_reduction <maximumf>, %64, %cst_50 [1] : vector<8x8xf32> to vector<8xf32>
    %66 = vector.shape_cast %65 : vector<8xf32> to vector<8x1xf32>
    %67 = vector.broadcast %66 : vector<8x1xf32> to vector<8x8xf32>
    %68 = arith.subf %64, %67 : vector<8x8xf32>
    %69 = math.exp %68 : vector<8x8xf32>
    %cst_51 = arith.constant dense<0.000000e+00> : vector<8xf32>
    %70 = vector.multi_reduction <add>, %69, %cst_51 [1] : vector<8x8xf32> to vector<8xf32>
    %71 = vector.shape_cast %70 : vector<8xf32> to vector<8x1xf32>
    %72 = tpu.reciprocal %71 {approx = true} : vector<8x1xf32> -> vector<8x1xf32>
    %73 = vector.broadcast %72 : vector<8x1xf32> to vector<8x8xf32>
    %74 = arith.mulf %69, %73 : vector<8x8xf32>
    %cst_52 = arith.constant dense<0.000000e+00> : vector<8x8xf32>
    %75 = tpu.matmul %74, %61, %cst_52 {dimension_numbers = #tpu.dot_dimension_numbers<[1], [0], [0], [1], [0, 0, 1, 1], [], []>} : vector<8x8xf32>, vector<8x8xf32>, vector<8x8xf32> -> vector<8x8xf32>
    %c1_53 = arith.constant 1 : index
    %c0_54 = arith.constant 0 : index
    %c0_55 = arith.constant 0 : index
    %76 = vector.load %arg6[%c1_53, %c0_54, %c0_55] : memref<4x8x32xf32, #tpu.memory_space<vmem>>, vector<1x8x32xf32>
    %77 = vector.shape_cast %76 : vector<1x8x32xf32> to vector<8x32xf32>
    %cst_56 = arith.constant dense<0.000000e+00> : vector<8x32xf32>
    %78 = tpu.matmul %75, %77, %cst_56 {dimension_numbers = #tpu.dot_dimension_numbers<[1], [0], [0], [1], [0, 0, 1, 1], [], []>} : vector<8x8xf32>, vector<8x32xf32>, vector<8x32xf32> -> vector<8x32xf32>
    %79 = arith.addf %40, %78 : vector<8x32xf32>
    %c2 = arith.constant 2 : index
    %c0_57 = arith.constant 0 : index
    %c0_58 = arith.constant 0 : index
    %80 = vector.load %arg2[%c2, %c0_57, %c0_58] : memref<4x32x8xf32, #tpu.memory_space<vmem>>, vector<1x32x8xf32>
    %81 = vector.shape_cast %80 : vector<1x32x8xf32> to vector<32x8xf32>
    %cst_59 = arith.constant dense<0.000000e+00> : vector<8x8xf32>
    %82 = tpu.matmul %1, %81, %cst_59 {dimension_numbers = #tpu.dot_dimension_numbers<[1], [0], [0], [1], [0, 0, 1, 1], [], []>} : vector<8x32xf32>, vector<32x8xf32>, vector<8x8xf32> -> vector<8x8xf32>
    %c2_60 = arith.constant 2 : index
    %c0_61 = arith.constant 0 : index
    %c0_62 = arith.constant 0 : index
    %83 = vector.load %arg3[%c2_60, %c0_61, %c0_62] : memref<4x1x8xf32, #tpu.memory_space<vmem>>, vector<1x1x8xf32>
    %84 = vector.shape_cast %83 : vector<1x1x8xf32> to vector<1x8xf32>
    %85 = vector.broadcast %84 : vector<1x8xf32> to vector<8x8xf32>
    %86 = arith.addf %82, %85 : vector<8x8xf32>
    %c2_63 = arith.constant 2 : index
    %c0_64 = arith.constant 0 : index
    %c0_65 = arith.constant 0 : index
    %87 = vector.load %arg4[%c2_63, %c0_64, %c0_65] : memref<8x32x8xf32, #tpu.memory_space<vmem>>, vector<1x32x8xf32>
    %88 = vector.shape_cast %87 : vector<1x32x8xf32> to vector<32x8xf32>
    %cst_66 = arith.constant dense<0.000000e+00> : vector<8x8xf32>
    %89 = tpu.matmul %2, %88, %cst_66 {dimension_numbers = #tpu.dot_dimension_numbers<[1], [0], [0], [1], [0, 0, 1, 1], [], []>} : vector<8x32xf32>, vector<32x8xf32>, vector<8x8xf32> -> vector<8x8xf32>
    %c2_67 = arith.constant 2 : index
    %c0_68 = arith.constant 0 : index
    %c0_69 = arith.constant 0 : index
    %90 = vector.load %arg5[%c2_67, %c0_68, %c0_69] : memref<8x1x8xf32, #tpu.memory_space<vmem>>, vector<1x1x8xf32>
    %91 = vector.shape_cast %90 : vector<1x1x8xf32> to vector<1x8xf32>
    %92 = vector.broadcast %91 : vector<1x8xf32> to vector<8x8xf32>
    %93 = arith.addf %89, %92 : vector<8x8xf32>
    %c6 = arith.constant 6 : index
    %c0_70 = arith.constant 0 : index
    %c0_71 = arith.constant 0 : index
    %94 = vector.load %arg4[%c6, %c0_70, %c0_71] : memref<8x32x8xf32, #tpu.memory_space<vmem>>, vector<1x32x8xf32>
    %95 = vector.shape_cast %94 : vector<1x32x8xf32> to vector<32x8xf32>
    %cst_72 = arith.constant dense<0.000000e+00> : vector<8x8xf32>
    %96 = tpu.matmul %2, %95, %cst_72 {dimension_numbers = #tpu.dot_dimension_numbers<[1], [0], [0], [1], [0, 0, 1, 1], [], []>} : vector<8x32xf32>, vector<32x8xf32>, vector<8x8xf32> -> vector<8x8xf32>
    %c6_73 = arith.constant 6 : index
    %c0_74 = arith.constant 0 : index
    %c0_75 = arith.constant 0 : index
    %97 = vector.load %arg5[%c6_73, %c0_74, %c0_75] : memref<8x1x8xf32, #tpu.memory_space<vmem>>, vector<1x1x8xf32>
    %98 = vector.shape_cast %97 : vector<1x1x8xf32> to vector<1x8xf32>
    %99 = vector.broadcast %98 : vector<1x8xf32> to vector<8x8xf32>
    %100 = arith.addf %96, %99 : vector<8x8xf32>
    %cst_76 = arith.constant dense<0.000000e+00> : vector<8x8xf32>
    %101 = tpu.matmul %86, %93, %cst_76 {dimension_numbers = #tpu.dot_dimension_numbers<[1], [1], [0], [0], [0, 0, 1, 0], [], []>} : vector<8x8xf32>, vector<8x8xf32>, vector<8x8xf32> -> vector<8x8xf32>
    %cst_77 = arith.constant 0.353553385 : f32
    %102 = vector.broadcast %cst_77 : f32 to vector<8x8xf32>
    %103 = arith.mulf %101, %102 : vector<8x8xf32>
    %cst_78 = arith.constant dense<0xFF800000> : vector<8xf32>
    %104 = vector.multi_reduction <maximumf>, %103, %cst_78 [1] : vector<8x8xf32> to vector<8xf32>
    %105 = vector.shape_cast %104 : vector<8xf32> to vector<8x1xf32>
    %106 = vector.broadcast %105 : vector<8x1xf32> to vector<8x8xf32>
    %107 = arith.subf %103, %106 : vector<8x8xf32>
    %108 = math.exp %107 : vector<8x8xf32>
    %cst_79 = arith.constant dense<0.000000e+00> : vector<8xf32>
    %109 = vector.multi_reduction <add>, %108, %cst_79 [1] : vector<8x8xf32> to vector<8xf32>
    %110 = vector.shape_cast %109 : vector<8xf32> to vector<8x1xf32>
    %111 = tpu.reciprocal %110 {approx = true} : vector<8x1xf32> -> vector<8x1xf32>
    %112 = vector.broadcast %111 : vector<8x1xf32> to vector<8x8xf32>
    %113 = arith.mulf %108, %112 : vector<8x8xf32>
    %cst_80 = arith.constant dense<0.000000e+00> : vector<8x8xf32>
    %114 = tpu.matmul %113, %100, %cst_80 {dimension_numbers = #tpu.dot_dimension_numbers<[1], [0], [0], [1], [0, 0, 1, 1], [], []>} : vector<8x8xf32>, vector<8x8xf32>, vector<8x8xf32> -> vector<8x8xf32>
    %c2_81 = arith.constant 2 : index
    %c0_82 = arith.constant 0 : index
    %c0_83 = arith.constant 0 : index
    %115 = vector.load %arg6[%c2_81, %c0_82, %c0_83] : memref<4x8x32xf32, #tpu.memory_space<vmem>>, vector<1x8x32xf32>
    %116 = vector.shape_cast %115 : vector<1x8x32xf32> to vector<8x32xf32>
    %cst_84 = arith.constant dense<0.000000e+00> : vector<8x32xf32>
    %117 = tpu.matmul %114, %116, %cst_84 {dimension_numbers = #tpu.dot_dimension_numbers<[1], [0], [0], [1], [0, 0, 1, 1], [], []>} : vector<8x8xf32>, vector<8x32xf32>, vector<8x32xf32> -> vector<8x32xf32>
    %118 = arith.addf %79, %117 : vector<8x32xf32>
    %c3 = arith.constant 3 : index
    %c0_85 = arith.constant 0 : index
    %c0_86 = arith.constant 0 : index
    %119 = vector.load %arg2[%c3, %c0_85, %c0_86] : memref<4x32x8xf32, #tpu.memory_space<vmem>>, vector<1x32x8xf32>
    %120 = vector.shape_cast %119 : vector<1x32x8xf32> to vector<32x8xf32>
    %cst_87 = arith.constant dense<0.000000e+00> : vector<8x8xf32>
    %121 = tpu.matmul %1, %120, %cst_87 {dimension_numbers = #tpu.dot_dimension_numbers<[1], [0], [0], [1], [0, 0, 1, 1], [], []>} : vector<8x32xf32>, vector<32x8xf32>, vector<8x8xf32> -> vector<8x8xf32>
    %c3_88 = arith.constant 3 : index
    %c0_89 = arith.constant 0 : index
    %c0_90 = arith.constant 0 : index
    %122 = vector.load %arg3[%c3_88, %c0_89, %c0_90] : memref<4x1x8xf32, #tpu.memory_space<vmem>>, vector<1x1x8xf32>
    %123 = vector.shape_cast %122 : vector<1x1x8xf32> to vector<1x8xf32>
    %124 = vector.broadcast %123 : vector<1x8xf32> to vector<8x8xf32>
    %125 = arith.addf %121, %124 : vector<8x8xf32>
    %c3_91 = arith.constant 3 : index
    %c0_92 = arith.constant 0 : index
    %c0_93 = arith.constant 0 : index
    %126 = vector.load %arg4[%c3_91, %c0_92, %c0_93] : memref<8x32x8xf32, #tpu.memory_space<vmem>>, vector<1x32x8xf32>
    %127 = vector.shape_cast %126 : vector<1x32x8xf32> to vector<32x8xf32>
    %cst_94 = arith.constant dense<0.000000e+00> : vector<8x8xf32>
    %128 = tpu.matmul %2, %127, %cst_94 {dimension_numbers = #tpu.dot_dimension_numbers<[1], [0], [0], [1], [0, 0, 1, 1], [], []>} : vector<8x32xf32>, vector<32x8xf32>, vector<8x8xf32> -> vector<8x8xf32>
    %c3_95 = arith.constant 3 : index
    %c0_96 = arith.constant 0 : index
    %c0_97 = arith.constant 0 : index
    %129 = vector.load %arg5[%c3_95, %c0_96, %c0_97] : memref<8x1x8xf32, #tpu.memory_space<vmem>>, vector<1x1x8xf32>
    %130 = vector.shape_cast %129 : vector<1x1x8xf32> to vector<1x8xf32>
    %131 = vector.broadcast %130 : vector<1x8xf32> to vector<8x8xf32>
    %132 = arith.addf %128, %131 : vector<8x8xf32>
    %c7 = arith.constant 7 : index
    %c0_98 = arith.constant 0 : index
    %c0_99 = arith.constant 0 : index
    %133 = vector.load %arg4[%c7, %c0_98, %c0_99] : memref<8x32x8xf32, #tpu.memory_space<vmem>>, vector<1x32x8xf32>
    %134 = vector.shape_cast %133 : vector<1x32x8xf32> to vector<32x8xf32>
    %cst_100 = arith.constant dense<0.000000e+00> : vector<8x8xf32>
    %135 = tpu.matmul %2, %134, %cst_100 {dimension_numbers = #tpu.dot_dimension_numbers<[1], [0], [0], [1], [0, 0, 1, 1], [], []>} : vector<8x32xf32>, vector<32x8xf32>, vector<8x8xf32> -> vector<8x8xf32>
    %c7_101 = arith.constant 7 : index
    %c0_102 = arith.constant 0 : index
    %c0_103 = arith.constant 0 : index
    %136 = vector.load %arg5[%c7_101, %c0_102, %c0_103] : memref<8x1x8xf32, #tpu.memory_space<vmem>>, vector<1x1x8xf32>
    %137 = vector.shape_cast %136 : vector<1x1x8xf32> to vector<1x8xf32>
    %138 = vector.broadcast %137 : vector<1x8xf32> to vector<8x8xf32>
    %139 = arith.addf %135, %138 : vector<8x8xf32>
    %cst_104 = arith.constant dense<0.000000e+00> : vector<8x8xf32>
    %140 = tpu.matmul %125, %132, %cst_104 {dimension_numbers = #tpu.dot_dimension_numbers<[1], [1], [0], [0], [0, 0, 1, 0], [], []>} : vector<8x8xf32>, vector<8x8xf32>, vector<8x8xf32> -> vector<8x8xf32>
    %cst_105 = arith.constant 0.353553385 : f32
    %141 = vector.broadcast %cst_105 : f32 to vector<8x8xf32>
    %142 = arith.mulf %140, %141 : vector<8x8xf32>
    %cst_106 = arith.constant dense<0xFF800000> : vector<8xf32>
    %143 = vector.multi_reduction <maximumf>, %142, %cst_106 [1] : vector<8x8xf32> to vector<8xf32>
    %144 = vector.shape_cast %143 : vector<8xf32> to vector<8x1xf32>
    %145 = vector.broadcast %144 : vector<8x1xf32> to vector<8x8xf32>
    %146 = arith.subf %142, %145 : vector<8x8xf32>
    %147 = math.exp %146 : vector<8x8xf32>
    %cst_107 = arith.constant dense<0.000000e+00> : vector<8xf32>
    %148 = vector.multi_reduction <add>, %147, %cst_107 [1] : vector<8x8xf32> to vector<8xf32>
    %149 = vector.shape_cast %148 : vector<8xf32> to vector<8x1xf32>
    %150 = tpu.reciprocal %149 {approx = true} : vector<8x1xf32> -> vector<8x1xf32>
    %151 = vector.broadcast %150 : vector<8x1xf32> to vector<8x8xf32>
    %152 = arith.mulf %147, %151 : vector<8x8xf32>
    %cst_108 = arith.constant dense<0.000000e+00> : vector<8x8xf32>
    %153 = tpu.matmul %152, %139, %cst_108 {dimension_numbers = #tpu.dot_dimension_numbers<[1], [0], [0], [1], [0, 0, 1, 1], [], []>} : vector<8x8xf32>, vector<8x8xf32>, vector<8x8xf32> -> vector<8x8xf32>
    %c3_109 = arith.constant 3 : index
    %c0_110 = arith.constant 0 : index
    %c0_111 = arith.constant 0 : index
    %154 = vector.load %arg6[%c3_109, %c0_110, %c0_111] : memref<4x8x32xf32, #tpu.memory_space<vmem>>, vector<1x8x32xf32>
    %155 = vector.shape_cast %154 : vector<1x8x32xf32> to vector<8x32xf32>
    %cst_112 = arith.constant dense<0.000000e+00> : vector<8x32xf32>
    %156 = tpu.matmul %153, %155, %cst_112 {dimension_numbers = #tpu.dot_dimension_numbers<[1], [0], [0], [1], [0, 0, 1, 1], [], []>} : vector<8x8xf32>, vector<8x32xf32>, vector<8x32xf32> -> vector<8x32xf32>
    %157 = arith.addf %118, %156 : vector<8x32xf32>
    %c0_113 = arith.constant 0 : index
    %c0_114 = arith.constant 0 : index
    %158 = vector.load %arg7[%c0_113, %c0_114] : memref<1x32xf32, #tpu.memory_space<vmem>>, vector<1x32xf32>
    %159 = vector.broadcast %158 : vector<1x32xf32> to vector<8x32xf32>
    %160 = arith.addf %157, %159 : vector<8x32xf32>
    %c0_115 = arith.constant 0 : index
    %c0_116 = arith.constant 0 : index
    %161 = vector.load %arg25[%c0_115, %c0_116] : memref<16x32xf32, #tpu.memory_space<vmem>>, vector<8x32xf32>
    tpu.vector_store %arg25[%c0_115, %c0_116], %160 {strides = array<i32>} : memref<16x32xf32, #tpu.memory_space<vmem>>, vector<8x32xf32>,
    %162 = vector.extract_strided_slice %0 {offsets = [8, 0], sizes = [8, 32], strides = [1, 1]} : vector<16x32xf32> to vector<8x32xf32>
    %163 = vector.extract_strided_slice %0 {offsets = [8, 0], sizes = [8, 32], strides = [1, 1]} : vector<16x32xf32> to vector<8x32xf32>
    %c0_117 = arith.constant 0 : index
    %c0_118 = arith.constant 0 : index
    %c0_119 = arith.constant 0 : index
    %164 = vector.load %arg2[%c0_117, %c0_118, %c0_119] : memref<4x32x8xf32, #tpu.memory_space<vmem>>, vector<1x32x8xf32>
    %165 = vector.shape_cast %164 : vector<1x32x8xf32> to vector<32x8xf32>
    %cst_120 = arith.constant dense<0.000000e+00> : vector<8x8xf32>
    %166 = tpu.matmul %162, %165, %cst_120 {dimension_numbers = #tpu.dot_dimension_numbers<[1], [0], [0], [1], [0, 0, 1, 1], [], []>} : vector<8x32xf32>, vector<32x8xf32>, vector<8x8xf32> -> vector<8x8xf32>
    %c0_121 = arith.constant 0 : index
    %c0_122 = arith.constant 0 : index
    %c0_123 = arith.constant 0 : index
    %167 = vector.load %arg3[%c0_121, %c0_122, %c0_123] : memref<4x1x8xf32, #tpu.memory_space<vmem>>, vector<1x1x8xf32>
    %168 = vector.shape_cast %167 : vector<1x1x8xf32> to vector<1x8xf32>
    %169 = vector.broadcast %168 : vector<1x8xf32> to vector<8x8xf32>
    %170 = arith.addf %166, %169 : vector<8x8xf32>
    %c0_124 = arith.constant 0 : index
    %c0_125 = arith.constant 0 : index
    %c0_126 = arith.constant 0 : index
    %171 = vector.load %arg4[%c0_124, %c0_125, %c0_126] : memref<8x32x8xf32, #tpu.memory_space<vmem>>, vector<1x32x8xf32>
    %172 = vector.shape_cast %171 : vector<1x32x8xf32> to vector<32x8xf32>
    %cst_127 = arith.constant dense<0.000000e+00> : vector<8x8xf32>
    %173 = tpu.matmul %163, %172, %cst_127 {dimension_numbers = #tpu.dot_dimension_numbers<[1], [0], [0], [1], [0, 0, 1, 1], [], []>} : vector<8x32xf32>, vector<32x8xf32>, vector<8x8xf32> -> vector<8x8xf32>
    %c0_128 = arith.constant 0 : index
    %c0_129 = arith.constant 0 : index
    %c0_130 = arith.constant 0 : index
    %174 = vector.load %arg5[%c0_128, %c0_129, %c0_130] : memref<8x1x8xf32, #tpu.memory_space<vmem>>, vector<1x1x8xf32>
    %175 = vector.shape_cast %174 : vector<1x1x8xf32> to vector<1x8xf32>
    %176 = vector.broadcast %175 : vector<1x8xf32> to vector<8x8xf32>
    %177 = arith.addf %173, %176 : vector<8x8xf32>
    %c4_131 = arith.constant 4 : index
    %c0_132 = arith.constant 0 : index
    %c0_133 = arith.constant 0 : index
    %178 = vector.load %arg4[%c4_131, %c0_132, %c0_133] : memref<8x32x8xf32, #tpu.memory_space<vmem>>, vector<1x32x8xf32>
    %179 = vector.shape_cast %178 : vector<1x32x8xf32> to vector<32x8xf32>
    %cst_134 = arith.constant dense<0.000000e+00> : vector<8x8xf32>
    %180 = tpu.matmul %163, %179, %cst_134 {dimension_numbers = #tpu.dot_dimension_numbers<[1], [0], [0], [1], [0, 0, 1, 1], [], []>} : vector<8x32xf32>, vector<32x8xf32>, vector<8x8xf32> -> vector<8x8xf32>
    %c4_135 = arith.constant 4 : index
    %c0_136 = arith.constant 0 : index
    %c0_137 = arith.constant 0 : index
    %181 = vector.load %arg5[%c4_135, %c0_136, %c0_137] : memref<8x1x8xf32, #tpu.memory_space<vmem>>, vector<1x1x8xf32>
    %182 = vector.shape_cast %181 : vector<1x1x8xf32> to vector<1x8xf32>
    %183 = vector.broadcast %182 : vector<1x8xf32> to vector<8x8xf32>
    %184 = arith.addf %180, %183 : vector<8x8xf32>
    %cst_138 = arith.constant dense<0.000000e+00> : vector<8x8xf32>
    %185 = tpu.matmul %170, %177, %cst_138 {dimension_numbers = #tpu.dot_dimension_numbers<[1], [1], [0], [0], [0, 0, 1, 0], [], []>} : vector<8x8xf32>, vector<8x8xf32>, vector<8x8xf32> -> vector<8x8xf32>
    %cst_139 = arith.constant 0.353553385 : f32
    %186 = vector.broadcast %cst_139 : f32 to vector<8x8xf32>
    %187 = arith.mulf %185, %186 : vector<8x8xf32>
    %cst_140 = arith.constant dense<0xFF800000> : vector<8xf32>
    %188 = vector.multi_reduction <maximumf>, %187, %cst_140 [1] : vector<8x8xf32> to vector<8xf32>
    %189 = vector.shape_cast %188 : vector<8xf32> to vector<8x1xf32>
    %190 = vector.broadcast %189 : vector<8x1xf32> to vector<8x8xf32>
    %191 = arith.subf %187, %190 : vector<8x8xf32>
    %192 = math.exp %191 : vector<8x8xf32>
    %cst_141 = arith.constant dense<0.000000e+00> : vector<8xf32>
    %193 = vector.multi_reduction <add>, %192, %cst_141 [1] : vector<8x8xf32> to vector<8xf32>
    %194 = vector.shape_cast %193 : vector<8xf32> to vector<8x1xf32>
    %195 = tpu.reciprocal %194 {approx = true} : vector<8x1xf32> -> vector<8x1xf32>
    %196 = vector.broadcast %195 : vector<8x1xf32> to vector<8x8xf32>
    %197 = arith.mulf %192, %196 : vector<8x8xf32>
    %cst_142 = arith.constant dense<0.000000e+00> : vector<8x8xf32>
    %198 = tpu.matmul %197, %184, %cst_142 {dimension_numbers = #tpu.dot_dimension_numbers<[1], [0], [0], [1], [0, 0, 1, 1], [], []>} : vector<8x8xf32>, vector<8x8xf32>, vector<8x8xf32> -> vector<8x8xf32>
    %c0_143 = arith.constant 0 : index
    %c0_144 = arith.constant 0 : index
    %c0_145 = arith.constant 0 : index
    %199 = vector.load %arg6[%c0_143, %c0_144, %c0_145] : memref<4x8x32xf32, #tpu.memory_space<vmem>>, vector<1x8x32xf32>
    %200 = vector.shape_cast %199 : vector<1x8x32xf32> to vector<8x32xf32>
    %cst_146 = arith.constant dense<0.000000e+00> : vector<8x32xf32>
    %201 = tpu.matmul %198, %200, %cst_146 {dimension_numbers = #tpu.dot_dimension_numbers<[1], [0], [0], [1], [0, 0, 1, 1], [], []>} : vector<8x8xf32>, vector<8x32xf32>, vector<8x32xf32> -> vector<8x32xf32>
    %c1_147 = arith.constant 1 : index
    %c0_148 = arith.constant 0 : index
    %c0_149 = arith.constant 0 : index
    %202 = vector.load %arg2[%c1_147, %c0_148, %c0_149] : memref<4x32x8xf32, #tpu.memory_space<vmem>>, vector<1x32x8xf32>
    %203 = vector.shape_cast %202 : vector<1x32x8xf32> to vector<32x8xf32>
    %cst_150 = arith.constant dense<0.000000e+00> : vector<8x8xf32>
    %204 = tpu.matmul %162, %203, %cst_150 {dimension_numbers = #tpu.dot_dimension_numbers<[1], [0], [0], [1], [0, 0, 1, 1], [], []>} : vector<8x32xf32>, vector<32x8xf32>, vector<8x8xf32> -> vector<8x8xf32>
    %c1_151 = arith.constant 1 : index
    %c0_152 = arith.constant 0 : index
    %c0_153 = arith.constant 0 : index
    %205 = vector.load %arg3[%c1_151, %c0_152, %c0_153] : memref<4x1x8xf32, #tpu.memory_space<vmem>>, vector<1x1x8xf32>
    %206 = vector.shape_cast %205 : vector<1x1x8xf32> to vector<1x8xf32>
    %207 = vector.broadcast %206 : vector<1x8xf32> to vector<8x8xf32>
    %208 = arith.addf %204, %207 : vector<8x8xf32>
    %c1_154 = arith.constant 1 : index
    %c0_155 = arith.constant 0 : index
    %c0_156 = arith.constant 0 : index
    %209 = vector.load %arg4[%c1_154, %c0_155, %c0_156] : memref<8x32x8xf32, #tpu.memory_space<vmem>>, vector<1x32x8xf32>
    %210 = vector.shape_cast %209 : vector<1x32x8xf32> to vector<32x8xf32>
    %cst_157 = arith.constant dense<0.000000e+00> : vector<8x8xf32>
    %211 = tpu.matmul %163, %210, %cst_157 {dimension_numbers = #tpu.dot_dimension_numbers<[1], [0], [0], [1], [0, 0, 1, 1], [], []>} : vector<8x32xf32>, vector<32x8xf32>, vector<8x8xf32> -> vector<8x8xf32>
    %c1_158 = arith.constant 1 : index
    %c0_159 = arith.constant 0 : index
    %c0_160 = arith.constant 0 : index
    %212 = vector.load %arg5[%c1_158, %c0_159, %c0_160] : memref<8x1x8xf32, #tpu.memory_space<vmem>>, vector<1x1x8xf32>
    %213 = vector.shape_cast %212 : vector<1x1x8xf32> to vector<1x8xf32>
    %214 = vector.broadcast %213 : vector<1x8xf32> to vector<8x8xf32>
    %215 = arith.addf %211, %214 : vector<8x8xf32>
    %c5_161 = arith.constant 5 : index
    %c0_162 = arith.constant 0 : index
    %c0_163 = arith.constant 0 : index
    %216 = vector.load %arg4[%c5_161, %c0_162, %c0_163] : memref<8x32x8xf32, #tpu.memory_space<vmem>>, vector<1x32x8xf32>
    %217 = vector.shape_cast %216 : vector<1x32x8xf32> to vector<32x8xf32>
    %cst_164 = arith.constant dense<0.000000e+00> : vector<8x8xf32>
    %218 = tpu.matmul %163, %217, %cst_164 {dimension_numbers = #tpu.dot_dimension_numbers<[1], [0], [0], [1], [0, 0, 1, 1], [], []>} : vector<8x32xf32>, vector<32x8xf32>, vector<8x8xf32> -> vector<8x8xf32>
    %c5_165 = arith.constant 5 : index
    %c0_166 = arith.constant 0 : index
    %c0_167 = arith.constant 0 : index
    %219 = vector.load %arg5[%c5_165, %c0_166, %c0_167] : memref<8x1x8xf32, #tpu.memory_space<vmem>>, vector<1x1x8xf32>
    %220 = vector.shape_cast %219 : vector<1x1x8xf32> to vector<1x8xf32>
    %221 = vector.broadcast %220 : vector<1x8xf32> to vector<8x8xf32>
    %222 = arith.addf %218, %221 : vector<8x8xf32>
    %cst_168 = arith.constant dense<0.000000e+00> : vector<8x8xf32>
    %223 = tpu.matmul %208, %215, %cst_168 {dimension_numbers = #tpu.dot_dimension_numbers<[1], [1], [0], [0], [0, 0, 1, 0], [], []>} : vector<8x8xf32>, vector<8x8xf32>, vector<8x8xf32> -> vector<8x8xf32>
    %cst_169 = arith.constant 0.353553385 : f32
    %224 = vector.broadcast %cst_169 : f32 to vector<8x8xf32>
    %225 = arith.mulf %223, %224 : vector<8x8xf32>
    %cst_170 = arith.constant dense<0xFF800000> : vector<8xf32>
    %226 = vector.multi_reduction <maximumf>, %225, %cst_170 [1] : vector<8x8xf32> to vector<8xf32>
    %227 = vector.shape_cast %226 : vector<8xf32> to vector<8x1xf32>
    %228 = vector.broadcast %227 : vector<8x1xf32> to vector<8x8xf32>
    %229 = arith.subf %225, %228 : vector<8x8xf32>
    %230 = math.exp %229 : vector<8x8xf32>
    %cst_171 = arith.constant dense<0.000000e+00> : vector<8xf32>
    %231 = vector.multi_reduction <add>, %230, %cst_171 [1] : vector<8x8xf32> to vector<8xf32>
    %232 = vector.shape_cast %231 : vector<8xf32> to vector<8x1xf32>
    %233 = tpu.reciprocal %232 {approx = true} : vector<8x1xf32> -> vector<8x1xf32>
    %234 = vector.broadcast %233 : vector<8x1xf32> to vector<8x8xf32>
    %235 = arith.mulf %230, %234 : vector<8x8xf32>
    %cst_172 = arith.constant dense<0.000000e+00> : vector<8x8xf32>
    %236 = tpu.matmul %235, %222, %cst_172 {dimension_numbers = #tpu.dot_dimension_numbers<[1], [0], [0], [1], [0, 0, 1, 1], [], []>} : vector<8x8xf32>, vector<8x8xf32>, vector<8x8xf32> -> vector<8x8xf32>
    %c1_173 = arith.constant 1 : index
    %c0_174 = arith.constant 0 : index
    %c0_175 = arith.constant 0 : index
    %237 = vector.load %arg6[%c1_173, %c0_174, %c0_175] : memref<4x8x32xf32, #tpu.memory_space<vmem>>, vector<1x8x32xf32>
    %238 = vector.shape_cast %237 : vector<1x8x32xf32> to vector<8x32xf32>
    %cst_176 = arith.constant dense<0.000000e+00> : vector<8x32xf32>
    %239 = tpu.matmul %236, %238, %cst_176 {dimension_numbers = #tpu.dot_dimension_numbers<[1], [0], [0], [1], [0, 0, 1, 1], [], []>} : vector<8x8xf32>, vector<8x32xf32>, vector<8x32xf32> -> vector<8x32xf32>
    %240 = arith.addf %201, %239 : vector<8x32xf32>
    %c2_177 = arith.constant 2 : index
    %c0_178 = arith.constant 0 : index
    %c0_179 = arith.constant 0 : index
    %241 = vector.load %arg2[%c2_177, %c0_178, %c0_179] : memref<4x32x8xf32, #tpu.memory_space<vmem>>, vector<1x32x8xf32>
    %242 = vector.shape_cast %241 : vector<1x32x8xf32> to vector<32x8xf32>
    %cst_180 = arith.constant dense<0.000000e+00> : vector<8x8xf32>
    %243 = tpu.matmul %162, %242, %cst_180 {dimension_numbers = #tpu.dot_dimension_numbers<[1], [0], [0], [1], [0, 0, 1, 1], [], []>} : vector<8x32xf32>, vector<32x8xf32>, vector<8x8xf32> -> vector<8x8xf32>
    %c2_181 = arith.constant 2 : index
    %c0_182 = arith.constant 0 : index
    %c0_183 = arith.constant 0 : index
    %244 = vector.load %arg3[%c2_181, %c0_182, %c0_183] : memref<4x1x8xf32, #tpu.memory_space<vmem>>, vector<1x1x8xf32>
    %245 = vector.shape_cast %244 : vector<1x1x8xf32> to vector<1x8xf32>
    %246 = vector.broadcast %245 : vector<1x8xf32> to vector<8x8xf32>
    %247 = arith.addf %243, %246 : vector<8x8xf32>
    %c2_184 = arith.constant 2 : index
    %c0_185 = arith.constant 0 : index
    %c0_186 = arith.constant 0 : index
    %248 = vector.load %arg4[%c2_184, %c0_185, %c0_186] : memref<8x32x8xf32, #tpu.memory_space<vmem>>, vector<1x32x8xf32>
    %249 = vector.shape_cast %248 : vector<1x32x8xf32> to vector<32x8xf32>
    %cst_187 = arith.constant dense<0.000000e+00> : vector<8x8xf32>
    %250 = tpu.matmul %163, %249, %cst_187 {dimension_numbers = #tpu.dot_dimension_numbers<[1], [0], [0], [1], [0, 0, 1, 1], [], []>} : vector<8x32xf32>, vector<32x8xf32>, vector<8x8xf32> -> vector<8x8xf32>
    %c2_188 = arith.constant 2 : index
    %c0_189 = arith.constant 0 : index
    %c0_190 = arith.constant 0 : index
    %251 = vector.load %arg5[%c2_188, %c0_189, %c0_190] : memref<8x1x8xf32, #tpu.memory_space<vmem>>, vector<1x1x8xf32>
    %252 = vector.shape_cast %251 : vector<1x1x8xf32> to vector<1x8xf32>
    %253 = vector.broadcast %252 : vector<1x8xf32> to vector<8x8xf32>
    %254 = arith.addf %250, %253 : vector<8x8xf32>
    %c6_191 = arith.constant 6 : index
    %c0_192 = arith.constant 0 : index
    %c0_193 = arith.constant 0 : index
    %255 = vector.load %arg4[%c6_191, %c0_192, %c0_193] : memref<8x32x8xf32, #tpu.memory_space<vmem>>, vector<1x32x8xf32>
    %256 = vector.shape_cast %255 : vector<1x32x8xf32> to vector<32x8xf32>
    %cst_194 = arith.constant dense<0.000000e+00> : vector<8x8xf32>
    %257 = tpu.matmul %163, %256, %cst_194 {dimension_numbers = #tpu.dot_dimension_numbers<[1], [0], [0], [1], [0, 0, 1, 1], [], []>} : vector<8x32xf32>, vector<32x8xf32>, vector<8x8xf32> -> vector<8x8xf32>
    %c6_195 = arith.constant 6 : index
    %c0_196 = arith.constant 0 : index
    %c0_197 = arith.constant 0 : index
    %258 = vector.load %arg5[%c6_195, %c0_196, %c0_197] : memref<8x1x8xf32, #tpu.memory_space<vmem>>, vector<1x1x8xf32>
    %259 = vector.shape_cast %258 : vector<1x1x8xf32> to vector<1x8xf32>
    %260 = vector.broadcast %259 : vector<1x8xf32> to vector<8x8xf32>
    %261 = arith.addf %257, %260 : vector<8x8xf32>
    %cst_198 = arith.constant dense<0.000000e+00> : vector<8x8xf32>
    %262 = tpu.matmul %247, %254, %cst_198 {dimension_numbers = #tpu.dot_dimension_numbers<[1], [1], [0], [0], [0, 0, 1, 0], [], []>} : vector<8x8xf32>, vector<8x8xf32>, vector<8x8xf32> -> vector<8x8xf32>
    %cst_199 = arith.constant 0.353553385 : f32
    %263 = vector.broadcast %cst_199 : f32 to vector<8x8xf32>
    %264 = arith.mulf %262, %263 : vector<8x8xf32>
    %cst_200 = arith.constant dense<0xFF800000> : vector<8xf32>
    %265 = vector.multi_reduction <maximumf>, %264, %cst_200 [1] : vector<8x8xf32> to vector<8xf32>
    %266 = vector.shape_cast %265 : vector<8xf32> to vector<8x1xf32>
    %267 = vector.broadcast %266 : vector<8x1xf32> to vector<8x8xf32>
    %268 = arith.subf %264, %267 : vector<8x8xf32>
    %269 = math.exp %268 : vector<8x8xf32>
    %cst_201 = arith.constant dense<0.000000e+00> : vector<8xf32>
    %270 = vector.multi_reduction <add>, %269, %cst_201 [1] : vector<8x8xf32> to vector<8xf32>
    %271 = vector.shape_cast %270 : vector<8xf32> to vector<8x1xf32>
    %272 = tpu.reciprocal %271 {approx = true} : vector<8x1xf32> -> vector<8x1xf32>
    %273 = vector.broadcast %272 : vector<8x1xf32> to vector<8x8xf32>
    %274 = arith.mulf %269, %273 : vector<8x8xf32>
    %cst_202 = arith.constant dense<0.000000e+00> : vector<8x8xf32>
    %275 = tpu.matmul %274, %261, %cst_202 {dimension_numbers = #tpu.dot_dimension_numbers<[1], [0], [0], [1], [0, 0, 1, 1], [], []>} : vector<8x8xf32>, vector<8x8xf32>, vector<8x8xf32> -> vector<8x8xf32>
    %c2_203 = arith.constant 2 : index
    %c0_204 = arith.constant 0 : index
    %c0_205 = arith.constant 0 : index
    %276 = vector.load %arg6[%c2_203, %c0_204, %c0_205] : memref<4x8x32xf32, #tpu.memory_space<vmem>>, vector<1x8x32xf32>
    %277 = vector.shape_cast %276 : vector<1x8x32xf32> to vector<8x32xf32>
    %cst_206 = arith.constant dense<0.000000e+00> : vector<8x32xf32>
    %278 = tpu.matmul %275, %277, %cst_206 {dimension_numbers = #tpu.dot_dimension_numbers<[1], [0], [0], [1], [0, 0, 1, 1], [], []>} : vector<8x8xf32>, vector<8x32xf32>, vector<8x32xf32> -> vector<8x32xf32>
    %279 = arith.addf %240, %278 : vector<8x32xf32>
    %c3_207 = arith.constant 3 : index
    %c0_208 = arith.constant 0 : index
    %c0_209 = arith.constant 0 : index
    %280 = vector.load %arg2[%c3_207, %c0_208, %c0_209] : memref<4x32x8xf32, #tpu.memory_space<vmem>>, vector<1x32x8xf32>
    %281 = vector.shape_cast %280 : vector<1x32x8xf32> to vector<32x8xf32>
    %cst_210 = arith.constant dense<0.000000e+00> : vector<8x8xf32>
    %282 = tpu.matmul %162, %281, %cst_210 {dimension_numbers = #tpu.dot_dimension_numbers<[1], [0], [0], [1], [0, 0, 1, 1], [], []>} : vector<8x32xf32>, vector<32x8xf32>, vector<8x8xf32> -> vector<8x8xf32>
    %c3_211 = arith.constant 3 : index
    %c0_212 = arith.constant 0 : index
    %c0_213 = arith.constant 0 : index
    %283 = vector.load %arg3[%c3_211, %c0_212, %c0_213] : memref<4x1x8xf32, #tpu.memory_space<vmem>>, vector<1x1x8xf32>
    %284 = vector.shape_cast %283 : vector<1x1x8xf32> to vector<1x8xf32>
    %285 = vector.broadcast %284 : vector<1x8xf32> to vector<8x8xf32>
    %286 = arith.addf %282, %285 : vector<8x8xf32>
    %c3_214 = arith.constant 3 : index
    %c0_215 = arith.constant 0 : index
    %c0_216 = arith.constant 0 : index
    %287 = vector.load %arg4[%c3_214, %c0_215, %c0_216] : memref<8x32x8xf32, #tpu.memory_space<vmem>>, vector<1x32x8xf32>
    %288 = vector.shape_cast %287 : vector<1x32x8xf32> to vector<32x8xf32>
    %cst_217 = arith.constant dense<0.000000e+00> : vector<8x8xf32>
    %289 = tpu.matmul %163, %288, %cst_217 {dimension_numbers = #tpu.dot_dimension_numbers<[1], [0], [0], [1], [0, 0, 1, 1], [], []>} : vector<8x32xf32>, vector<32x8xf32>, vector<8x8xf32> -> vector<8x8xf32>
    %c3_218 = arith.constant 3 : index
    %c0_219 = arith.constant 0 : index
    %c0_220 = arith.constant 0 : index
    %290 = vector.load %arg5[%c3_218, %c0_219, %c0_220] : memref<8x1x8xf32, #tpu.memory_space<vmem>>, vector<1x1x8xf32>
    %291 = vector.shape_cast %290 : vector<1x1x8xf32> to vector<1x8xf32>
    %292 = vector.broadcast %291 : vector<1x8xf32> to vector<8x8xf32>
    %293 = arith.addf %289, %292 : vector<8x8xf32>
    %c7_221 = arith.constant 7 : index
    %c0_222 = arith.constant 0 : index
    %c0_223 = arith.constant 0 : index
    %294 = vector.load %arg4[%c7_221, %c0_222, %c0_223] : memref<8x32x8xf32, #tpu.memory_space<vmem>>, vector<1x32x8xf32>
    %295 = vector.shape_cast %294 : vector<1x32x8xf32> to vector<32x8xf32>
    %cst_224 = arith.constant dense<0.000000e+00> : vector<8x8xf32>
    %296 = tpu.matmul %163, %295, %cst_224 {dimension_numbers = #tpu.dot_dimension_numbers<[1], [0], [0], [1], [0, 0, 1, 1], [], []>} : vector<8x32xf32>, vector<32x8xf32>, vector<8x8xf32> -> vector<8x8xf32>
    %c7_225 = arith.constant 7 : index
    %c0_226 = arith.constant 0 : index
    %c0_227 = arith.constant 0 : index
    %297 = vector.load %arg5[%c7_225, %c0_226, %c0_227] : memref<8x1x8xf32, #tpu.memory_space<vmem>>, vector<1x1x8xf32>
    %298 = vector.shape_cast %297 : vector<1x1x8xf32> to vector<1x8xf32>
    %299 = vector.broadcast %298 : vector<1x8xf32> to vector<8x8xf32>
    %300 = arith.addf %296, %299 : vector<8x8xf32>
    %cst_228 = arith.constant dense<0.000000e+00> : vector<8x8xf32>
    %301 = tpu.matmul %286, %293, %cst_228 {dimension_numbers = #tpu.dot_dimension_numbers<[1], [1], [0], [0], [0, 0, 1, 0], [], []>} : vector<8x8xf32>, vector<8x8xf32>, vector<8x8xf32> -> vector<8x8xf32>
    %cst_229 = arith.constant 0.353553385 : f32
    %302 = vector.broadcast %cst_229 : f32 to vector<8x8xf32>
    %303 = arith.mulf %301, %302 : vector<8x8xf32>
    %cst_230 = arith.constant dense<0xFF800000> : vector<8xf32>
    %304 = vector.multi_reduction <maximumf>, %303, %cst_230 [1] : vector<8x8xf32> to vector<8xf32>
    %305 = vector.shape_cast %304 : vector<8xf32> to vector<8x1xf32>
    %306 = vector.broadcast %305 : vector<8x1xf32> to vector<8x8xf32>
    %307 = arith.subf %303, %306 : vector<8x8xf32>
    %308 = math.exp %307 : vector<8x8xf32>
    %cst_231 = arith.constant dense<0.000000e+00> : vector<8xf32>
    %309 = vector.multi_reduction <add>, %308, %cst_231 [1] : vector<8x8xf32> to vector<8xf32>
    %310 = vector.shape_cast %309 : vector<8xf32> to vector<8x1xf32>
    %311 = tpu.reciprocal %310 {approx = true} : vector<8x1xf32> -> vector<8x1xf32>
    %312 = vector.broadcast %311 : vector<8x1xf32> to vector<8x8xf32>
    %313 = arith.mulf %308, %312 : vector<8x8xf32>
    %cst_232 = arith.constant dense<0.000000e+00> : vector<8x8xf32>
    %314 = tpu.matmul %313, %300, %cst_232 {dimension_numbers = #tpu.dot_dimension_numbers<[1], [0], [0], [1], [0, 0, 1, 1], [], []>} : vector<8x8xf32>, vector<8x8xf32>, vector<8x8xf32> -> vector<8x8xf32>
    %c3_233 = arith.constant 3 : index
    %c0_234 = arith.constant 0 : index
    %c0_235 = arith.constant 0 : index
    %315 = vector.load %arg6[%c3_233, %c0_234, %c0_235] : memref<4x8x32xf32, #tpu.memory_space<vmem>>, vector<1x8x32xf32>
    %316 = vector.shape_cast %315 : vector<1x8x32xf32> to vector<8x32xf32>
    %cst_236 = arith.constant dense<0.000000e+00> : vector<8x32xf32>
    %317 = tpu.matmul %314, %316, %cst_236 {dimension_numbers = #tpu.dot_dimension_numbers<[1], [0], [0], [1], [0, 0, 1, 1], [], []>} : vector<8x8xf32>, vector<8x32xf32>, vector<8x32xf32> -> vector<8x32xf32>
    %318 = arith.addf %279, %317 : vector<8x32xf32>
    %c0_237 = arith.constant 0 : index
    %c0_238 = arith.constant 0 : index
    %319 = vector.load %arg7[%c0_237, %c0_238] : memref<1x32xf32, #tpu.memory_space<vmem>>, vector<1x32xf32>
    %320 = vector.broadcast %319 : vector<1x32xf32> to vector<8x32xf32>
    %321 = arith.addf %318, %320 : vector<8x32xf32>
    %c8 = arith.constant 8 : index
    %c0_239 = arith.constant 0 : index
    %322 = vector.load %arg25[%c8, %c0_239] : memref<16x32xf32, #tpu.memory_space<vmem>>, vector<8x32xf32>
    tpu.vector_store %arg25[%c8, %c0_239], %321 {strides = array<i32>} : memref<16x32xf32, #tpu.memory_space<vmem>>, vector<8x32xf32>,
    %c0_240 = arith.constant 0 : index
    %c0_241 = arith.constant 0 : index
    %323 = vector.load %arg25[%c0_240, %c0_241] : memref<16x32xf32, #tpu.memory_space<vmem>>, vector<16x32xf32>
    %324 = arith.addf %0, %323 : vector<16x32xf32>
    %cst_242 = arith.constant dense<0.000000e+00> : vector<16xf32>
    %325 = vector.multi_reduction <add>, %324, %cst_242 [1] : vector<16x32xf32> to vector<16xf32>
    %326 = vector.shape_cast %325 : vector<16xf32> to vector<16x1xf32>
    %cst_243 = arith.constant 3.200000e+01 : f32
    %327 = vector.broadcast %cst_243 : f32 to vector<16x1xf32>
    %328 = arith.divf %326, %327 : vector<16x1xf32>
    %329 = vector.broadcast %328 : vector<16x1xf32> to vector<16x32xf32>
    %330 = arith.subf %324, %329 : vector<16x32xf32>
    %331 = arith.mulf %330, %330 : vector<16x32xf32>
    %cst_244 = arith.constant dense<0.000000e+00> : vector<16xf32>
    %332 = vector.multi_reduction <add>, %331, %cst_244 [1] : vector<16x32xf32> to vector<16xf32>
    %333 = vector.shape_cast %332 : vector<16xf32> to vector<16x1xf32>
    %cst_245 = arith.constant 3.200000e+01 : f32
    %334 = vector.broadcast %cst_245 : f32 to vector<16x1xf32>
    %335 = arith.divf %333, %334 : vector<16x1xf32>
    %cst_246 = arith.constant 9.99999974E-6 : f32
    %336 = vector.broadcast %cst_246 : f32 to vector<16x1xf32>
    %337 = arith.addf %335, %336 : vector<16x1xf32>
    %338 = math.rsqrt %337 : vector<16x1xf32>
    %339 = vector.broadcast %338 : vector<16x1xf32> to vector<16x32xf32>
    %340 = arith.mulf %330, %339 : vector<16x32xf32>
    %c0_247 = arith.constant 0 : index
    %c0_248 = arith.constant 0 : index
    %341 = vector.load %arg18[%c0_247, %c0_248] : memref<1x32xf32, #tpu.memory_space<vmem>>, vector<1x32xf32>
    %342 = vector.broadcast %341 : vector<1x32xf32> to vector<16x32xf32>
    %343 = arith.mulf %340, %342 : vector<16x32xf32>
    %c0_249 = arith.constant 0 : index
    %c0_250 = arith.constant 0 : index
    %344 = vector.load %arg19[%c0_249, %c0_250] : memref<1x32xf32, #tpu.memory_space<vmem>>, vector<1x32xf32>
    %345 = vector.broadcast %344 : vector<1x32xf32> to vector<16x32xf32>
    %346 = arith.addf %343, %345 : vector<16x32xf32>
    %347 = vector.extract_strided_slice %346 {offsets = [0, 0], sizes = [8, 32], strides = [1, 1]} : vector<16x32xf32> to vector<8x32xf32>
    %c0_251 = arith.constant 0 : index
    %c0_252 = arith.constant 0 : index
    %c0_253 = arith.constant 0 : index
    %348 = vector.load %arg1[%c0_251, %c0_252, %c0_253] : memref<2x1x32xf32, #tpu.memory_space<vmem>>, vector<1x1x32xf32>
    %349 = vector.shape_cast %348 : vector<1x1x32xf32> to vector<1x32xf32>
    %c0_254 = arith.constant 0 : index
    %c0_255 = arith.constant 0 : index
    %c0_256 = arith.constant 0 : index
    %350 = vector.load %arg8[%c0_254, %c0_255, %c0_256] : memref<4x32x8xf32, #tpu.memory_space<vmem>>, vector<1x32x8xf32>
    %351 = vector.shape_cast %350 : vector<1x32x8xf32> to vector<32x8xf32>
    %cst_257 = arith.constant dense<0.000000e+00> : vector<8x8xf32>
    %352 = tpu.matmul %347, %351, %cst_257 {dimension_numbers = #tpu.dot_dimension_numbers<[1], [0], [0], [1], [0, 0, 1, 1], [], []>} : vector<8x32xf32>, vector<32x8xf32>, vector<8x8xf32> -> vector<8x8xf32>
    %c0_258 = arith.constant 0 : index
    %c0_259 = arith.constant 0 : index
    %c0_260 = arith.constant 0 : index
    %353 = vector.load %arg9[%c0_258, %c0_259, %c0_260] : memref<4x1x8xf32, #tpu.memory_space<vmem>>, vector<1x1x8xf32>
    %354 = vector.shape_cast %353 : vector<1x1x8xf32> to vector<1x8xf32>
    %355 = vector.broadcast %354 : vector<1x8xf32> to vector<8x8xf32>
    %356 = arith.addf %352, %355 : vector<8x8xf32>
    %c0_261 = arith.constant 0 : index
    %c0_262 = arith.constant 0 : index
    %c0_263 = arith.constant 0 : index
    %357 = vector.load %arg10[%c0_261, %c0_262, %c0_263] : memref<8x32x8xf32, #tpu.memory_space<vmem>>, vector<1x32x8xf32>
    %358 = vector.shape_cast %357 : vector<1x32x8xf32> to vector<32x8xf32>
    %cst_264 = arith.constant dense<0.000000e+00> : vector<1x8xf32>
    %359 = tpu.matmul %349, %358, %cst_264 {dimension_numbers = #tpu.dot_dimension_numbers<[1], [0], [0], [1], [0, 0, 1, 1], [], []>} : vector<1x32xf32>, vector<32x8xf32>, vector<1x8xf32> -> vector<1x8xf32>
    %c0_265 = arith.constant 0 : index
    %c0_266 = arith.constant 0 : index
    %c0_267 = arith.constant 0 : index
    %360 = vector.load %arg11[%c0_265, %c0_266, %c0_267] : memref<8x1x8xf32, #tpu.memory_space<vmem>>, vector<1x1x8xf32>
    %361 = vector.shape_cast %360 : vector<1x1x8xf32> to vector<1x8xf32>
    %362 = arith.addf %359, %361 : vector<1x8xf32>
    %c4_268 = arith.constant 4 : index
    %c0_269 = arith.constant 0 : index
    %c0_270 = arith.constant 0 : index
    %363 = vector.load %arg10[%c4_268, %c0_269, %c0_270] : memref<8x32x8xf32, #tpu.memory_space<vmem>>, vector<1x32x8xf32>
    %364 = vector.shape_cast %363 : vector<1x32x8xf32> to vector<32x8xf32>
    %cst_271 = arith.constant dense<0.000000e+00> : vector<1x8xf32>
    %365 = tpu.matmul %349, %364, %cst_271 {dimension_numbers = #tpu.dot_dimension_numbers<[1], [0], [0], [1], [0, 0, 1, 1], [], []>} : vector<1x32xf32>, vector<32x8xf32>, vector<1x8xf32> -> vector<1x8xf32>
    %c4_272 = arith.constant 4 : index
    %c0_273 = arith.constant 0 : index
    %c0_274 = arith.constant 0 : index
    %366 = vector.load %arg11[%c4_272, %c0_273, %c0_274] : memref<8x1x8xf32, #tpu.memory_space<vmem>>, vector<1x1x8xf32>
    %367 = vector.shape_cast %366 : vector<1x1x8xf32> to vector<1x8xf32>
    %368 = arith.addf %365, %367 : vector<1x8xf32>
    %cst_275 = arith.constant dense<0.000000e+00> : vector<8x1xf32>
    %369 = tpu.matmul %356, %362, %cst_275 {dimension_numbers = #tpu.dot_dimension_numbers<[1], [1], [0], [0], [0, 0, 1, 0], [], []>} : vector<8x8xf32>, vector<1x8xf32>, vector<8x1xf32> -> vector<8x1xf32>
    %cst_276 = arith.constant 0.353553385 : f32
    %370 = vector.broadcast %cst_276 : f32 to vector<8x1xf32>
    %371 = arith.mulf %369, %370 : vector<8x1xf32>
    %cst_277 = arith.constant dense<0xFF800000> : vector<8xf32>
    %372 = vector.multi_reduction <maximumf>, %371, %cst_277 [1] : vector<8x1xf32> to vector<8xf32>
    %373 = vector.shape_cast %372 : vector<8xf32> to vector<8x1xf32>
    %374 = arith.subf %371, %373 : vector<8x1xf32>
    %375 = math.exp %374 : vector<8x1xf32>
    %cst_278 = arith.constant dense<0.000000e+00> : vector<8xf32>
    %376 = vector.multi_reduction <add>, %375, %cst_278 [1] : vector<8x1xf32> to vector<8xf32>
    %377 = vector.shape_cast %376 : vector<8xf32> to vector<8x1xf32>
    %378 = tpu.reciprocal %377 {approx = true} : vector<8x1xf32> -> vector<8x1xf32>
    %379 = arith.mulf %375, %378 : vector<8x1xf32>
    %cst_279 = arith.constant dense<0.000000e+00> : vector<8x8xf32>
    %380 = tpu.matmul %379, %368, %cst_279 {dimension_numbers = #tpu.dot_dimension_numbers<[1], [0], [0], [1], [0, 0, 1, 1], [], []>} : vector<8x1xf32>, vector<1x8xf32>, vector<8x8xf32> -> vector<8x8xf32>
    %c0_280 = arith.constant 0 : index
    %c0_281 = arith.constant 0 : index
    %c0_282 = arith.constant 0 : index
    %381 = vector.load %arg12[%c0_280, %c0_281, %c0_282] : memref<4x8x32xf32, #tpu.memory_space<vmem>>, vector<1x8x32xf32>
    %382 = vector.shape_cast %381 : vector<1x8x32xf32> to vector<8x32xf32>
    %cst_283 = arith.constant dense<0.000000e+00> : vector<8x32xf32>
    %383 = tpu.matmul %380, %382, %cst_283 {dimension_numbers = #tpu.dot_dimension_numbers<[1], [0], [0], [1], [0, 0, 1, 1], [], []>} : vector<8x8xf32>, vector<8x32xf32>, vector<8x32xf32> -> vector<8x32xf32>
    %c1_284 = arith.constant 1 : index
    %c0_285 = arith.constant 0 : index
    %c0_286 = arith.constant 0 : index
    %384 = vector.load %arg8[%c1_284, %c0_285, %c0_286] : memref<4x32x8xf32, #tpu.memory_space<vmem>>, vector<1x32x8xf32>
    %385 = vector.shape_cast %384 : vector<1x32x8xf32> to vector<32x8xf32>
    %cst_287 = arith.constant dense<0.000000e+00> : vector<8x8xf32>
    %386 = tpu.matmul %347, %385, %cst_287 {dimension_numbers = #tpu.dot_dimension_numbers<[1], [0], [0], [1], [0, 0, 1, 1], [], []>} : vector<8x32xf32>, vector<32x8xf32>, vector<8x8xf32> -> vector<8x8xf32>
    %c1_288 = arith.constant 1 : index
    %c0_289 = arith.constant 0 : index
    %c0_290 = arith.constant 0 : index
    %387 = vector.load %arg9[%c1_288, %c0_289, %c0_290] : memref<4x1x8xf32, #tpu.memory_space<vmem>>, vector<1x1x8xf32>
    %388 = vector.shape_cast %387 : vector<1x1x8xf32> to vector<1x8xf32>
    %389 = vector.broadcast %388 : vector<1x8xf32> to vector<8x8xf32>
    %390 = arith.addf %386, %389 : vector<8x8xf32>
    %c1_291 = arith.constant 1 : index
    %c0_292 = arith.constant 0 : index
    %c0_293 = arith.constant 0 : index
    %391 = vector.load %arg10[%c1_291, %c0_292, %c0_293] : memref<8x32x8xf32, #tpu.memory_space<vmem>>, vector<1x32x8xf32>
    %392 = vector.shape_cast %391 : vector<1x32x8xf32> to vector<32x8xf32>
    %cst_294 = arith.constant dense<0.000000e+00> : vector<1x8xf32>
    %393 = tpu.matmul %349, %392, %cst_294 {dimension_numbers = #tpu.dot_dimension_numbers<[1], [0], [0], [1], [0, 0, 1, 1], [], []>} : vector<1x32xf32>, vector<32x8xf32>, vector<1x8xf32> -> vector<1x8xf32>
    %c1_295 = arith.constant 1 : index
    %c0_296 = arith.constant 0 : index
    %c0_297 = arith.constant 0 : index
    %394 = vector.load %arg11[%c1_295, %c0_296, %c0_297] : memref<8x1x8xf32, #tpu.memory_space<vmem>>, vector<1x1x8xf32>
    %395 = vector.shape_cast %394 : vector<1x1x8xf32> to vector<1x8xf32>
    %396 = arith.addf %393, %395 : vector<1x8xf32>
    %c5_298 = arith.constant 5 : index
    %c0_299 = arith.constant 0 : index
    %c0_300 = arith.constant 0 : index
    %397 = vector.load %arg10[%c5_298, %c0_299, %c0_300] : memref<8x32x8xf32, #tpu.memory_space<vmem>>, vector<1x32x8xf32>
    %398 = vector.shape_cast %397 : vector<1x32x8xf32> to vector<32x8xf32>
    %cst_301 = arith.constant dense<0.000000e+00> : vector<1x8xf32>
    %399 = tpu.matmul %349, %398, %cst_301 {dimension_numbers = #tpu.dot_dimension_numbers<[1], [0], [0], [1], [0, 0, 1, 1], [], []>} : vector<1x32xf32>, vector<32x8xf32>, vector<1x8xf32> -> vector<1x8xf32>
    %c5_302 = arith.constant 5 : index
    %c0_303 = arith.constant 0 : index
    %c0_304 = arith.constant 0 : index
    %400 = vector.load %arg11[%c5_302, %c0_303, %c0_304] : memref<8x1x8xf32, #tpu.memory_space<vmem>>, vector<1x1x8xf32>
    %401 = vector.shape_cast %400 : vector<1x1x8xf32> to vector<1x8xf32>
    %402 = arith.addf %399, %401 : vector<1x8xf32>
    %cst_305 = arith.constant dense<0.000000e+00> : vector<8x1xf32>
    %403 = tpu.matmul %390, %396, %cst_305 {dimension_numbers = #tpu.dot_dimension_numbers<[1], [1], [0], [0], [0, 0, 1, 0], [], []>} : vector<8x8xf32>, vector<1x8xf32>, vector<8x1xf32> -> vector<8x1xf32>
    %cst_306 = arith.constant 0.353553385 : f32
    %404 = vector.broadcast %cst_306 : f32 to vector<8x1xf32>
    %405 = arith.mulf %403, %404 : vector<8x1xf32>
    %cst_307 = arith.constant dense<0xFF800000> : vector<8xf32>
    %406 = vector.multi_reduction <maximumf>, %405, %cst_307 [1] : vector<8x1xf32> to vector<8xf32>
    %407 = vector.shape_cast %406 : vector<8xf32> to vector<8x1xf32>
    %408 = arith.subf %405, %407 : vector<8x1xf32>
    %409 = math.exp %408 : vector<8x1xf32>
    %cst_308 = arith.constant dense<0.000000e+00> : vector<8xf32>
    %410 = vector.multi_reduction <add>, %409, %cst_308 [1] : vector<8x1xf32> to vector<8xf32>
    %411 = vector.shape_cast %410 : vector<8xf32> to vector<8x1xf32>
    %412 = tpu.reciprocal %411 {approx = true} : vector<8x1xf32> -> vector<8x1xf32>
    %413 = arith.mulf %409, %412 : vector<8x1xf32>
    %cst_309 = arith.constant dense<0.000000e+00> : vector<8x8xf32>
    %414 = tpu.matmul %413, %402, %cst_309 {dimension_numbers = #tpu.dot_dimension_numbers<[1], [0], [0], [1], [0, 0, 1, 1], [], []>} : vector<8x1xf32>, vector<1x8xf32>, vector<8x8xf32> -> vector<8x8xf32>
    %c1_310 = arith.constant 1 : index
    %c0_311 = arith.constant 0 : index
    %c0_312 = arith.constant 0 : index
    %415 = vector.load %arg12[%c1_310, %c0_311, %c0_312] : memref<4x8x32xf32, #tpu.memory_space<vmem>>, vector<1x8x32xf32>
    %416 = vector.shape_cast %415 : vector<1x8x32xf32> to vector<8x32xf32>
    %cst_313 = arith.constant dense<0.000000e+00> : vector<8x32xf32>
    %417 = tpu.matmul %414, %416, %cst_313 {dimension_numbers = #tpu.dot_dimension_numbers<[1], [0], [0], [1], [0, 0, 1, 1], [], []>} : vector<8x8xf32>, vector<8x32xf32>, vector<8x32xf32> -> vector<8x32xf32>
    %418 = arith.addf %383, %417 : vector<8x32xf32>
    %c2_314 = arith.constant 2 : index
    %c0_315 = arith.constant 0 : index
    %c0_316 = arith.constant 0 : index
    %419 = vector.load %arg8[%c2_314, %c0_315, %c0_316] : memref<4x32x8xf32, #tpu.memory_space<vmem>>, vector<1x32x8xf32>
    %420 = vector.shape_cast %419 : vector<1x32x8xf32> to vector<32x8xf32>
    %cst_317 = arith.constant dense<0.000000e+00> : vector<8x8xf32>
    %421 = tpu.matmul %347, %420, %cst_317 {dimension_numbers = #tpu.dot_dimension_numbers<[1], [0], [0], [1], [0, 0, 1, 1], [], []>} : vector<8x32xf32>, vector<32x8xf32>, vector<8x8xf32> -> vector<8x8xf32>
    %c2_318 = arith.constant 2 : index
    %c0_319 = arith.constant 0 : index
    %c0_320 = arith.constant 0 : index
    %422 = vector.load %arg9[%c2_318, %c0_319, %c0_320] : memref<4x1x8xf32, #tpu.memory_space<vmem>>, vector<1x1x8xf32>
    %423 = vector.shape_cast %422 : vector<1x1x8xf32> to vector<1x8xf32>
    %424 = vector.broadcast %423 : vector<1x8xf32> to vector<8x8xf32>
    %425 = arith.addf %421, %424 : vector<8x8xf32>
    %c2_321 = arith.constant 2 : index
    %c0_322 = arith.constant 0 : index
    %c0_323 = arith.constant 0 : index
    %426 = vector.load %arg10[%c2_321, %c0_322, %c0_323] : memref<8x32x8xf32, #tpu.memory_space<vmem>>, vector<1x32x8xf32>
    %427 = vector.shape_cast %426 : vector<1x32x8xf32> to vector<32x8xf32>
    %cst_324 = arith.constant dense<0.000000e+00> : vector<1x8xf32>
    %428 = tpu.matmul %349, %427, %cst_324 {dimension_numbers = #tpu.dot_dimension_numbers<[1], [0], [0], [1], [0, 0, 1, 1], [], []>} : vector<1x32xf32>, vector<32x8xf32>, vector<1x8xf32> -> vector<1x8xf32>
    %c2_325 = arith.constant 2 : index
    %c0_326 = arith.constant 0 : index
    %c0_327 = arith.constant 0 : index
    %429 = vector.load %arg11[%c2_325, %c0_326, %c0_327] : memref<8x1x8xf32, #tpu.memory_space<vmem>>, vector<1x1x8xf32>
    %430 = vector.shape_cast %429 : vector<1x1x8xf32> to vector<1x8xf32>
    %431 = arith.addf %428, %430 : vector<1x8xf32>
    %c6_328 = arith.constant 6 : index
    %c0_329 = arith.constant 0 : index
    %c0_330 = arith.constant 0 : index
    %432 = vector.load %arg10[%c6_328, %c0_329, %c0_330] : memref<8x32x8xf32, #tpu.memory_space<vmem>>, vector<1x32x8xf32>
    %433 = vector.shape_cast %432 : vector<1x32x8xf32> to vector<32x8xf32>
    %cst_331 = arith.constant dense<0.000000e+00> : vector<1x8xf32>
    %434 = tpu.matmul %349, %433, %cst_331 {dimension_numbers = #tpu.dot_dimension_numbers<[1], [0], [0], [1], [0, 0, 1, 1], [], []>} : vector<1x32xf32>, vector<32x8xf32>, vector<1x8xf32> -> vector<1x8xf32>
    %c6_332 = arith.constant 6 : index
    %c0_333 = arith.constant 0 : index
    %c0_334 = arith.constant 0 : index
    %435 = vector.load %arg11[%c6_332, %c0_333, %c0_334] : memref<8x1x8xf32, #tpu.memory_space<vmem>>, vector<1x1x8xf32>
    %436 = vector.shape_cast %435 : vector<1x1x8xf32> to vector<1x8xf32>
    %437 = arith.addf %434, %436 : vector<1x8xf32>
    %cst_335 = arith.constant dense<0.000000e+00> : vector<8x1xf32>
    %438 = tpu.matmul %425, %431, %cst_335 {dimension_numbers = #tpu.dot_dimension_numbers<[1], [1], [0], [0], [0, 0, 1, 0], [], []>} : vector<8x8xf32>, vector<1x8xf32>, vector<8x1xf32> -> vector<8x1xf32>
    %cst_336 = arith.constant 0.353553385 : f32
    %439 = vector.broadcast %cst_336 : f32 to vector<8x1xf32>
    %440 = arith.mulf %438, %439 : vector<8x1xf32>
    %cst_337 = arith.constant dense<0xFF800000> : vector<8xf32>
    %441 = vector.multi_reduction <maximumf>, %440, %cst_337 [1] : vector<8x1xf32> to vector<8xf32>
    %442 = vector.shape_cast %441 : vector<8xf32> to vector<8x1xf32>
    %443 = arith.subf %440, %442 : vector<8x1xf32>
    %444 = math.exp %443 : vector<8x1xf32>
    %cst_338 = arith.constant dense<0.000000e+00> : vector<8xf32>
    %445 = vector.multi_reduction <add>, %444, %cst_338 [1] : vector<8x1xf32> to vector<8xf32>
    %446 = vector.shape_cast %445 : vector<8xf32> to vector<8x1xf32>
    %447 = tpu.reciprocal %446 {approx = true} : vector<8x1xf32> -> vector<8x1xf32>
    %448 = arith.mulf %444, %447 : vector<8x1xf32>
    %cst_339 = arith.constant dense<0.000000e+00> : vector<8x8xf32>
    %449 = tpu.matmul %448, %437, %cst_339 {dimension_numbers = #tpu.dot_dimension_numbers<[1], [0], [0], [1], [0, 0, 1, 1], [], []>} : vector<8x1xf32>, vector<1x8xf32>, vector<8x8xf32> -> vector<8x8xf32>
    %c2_340 = arith.constant 2 : index
    %c0_341 = arith.constant 0 : index
    %c0_342 = arith.constant 0 : index
    %450 = vector.load %arg12[%c2_340, %c0_341, %c0_342] : memref<4x8x32xf32, #tpu.memory_space<vmem>>, vector<1x8x32xf32>
    %451 = vector.shape_cast %450 : vector<1x8x32xf32> to vector<8x32xf32>
    %cst_343 = arith.constant dense<0.000000e+00> : vector<8x32xf32>
    %452 = tpu.matmul %449, %451, %cst_343 {dimension_numbers = #tpu.dot_dimension_numbers<[1], [0], [0], [1], [0, 0, 1, 1], [], []>} : vector<8x8xf32>, vector<8x32xf32>, vector<8x32xf32> -> vector<8x32xf32>
    %453 = arith.addf %418, %452 : vector<8x32xf32>
    %c3_344 = arith.constant 3 : index
    %c0_345 = arith.constant 0 : index
    %c0_346 = arith.constant 0 : index
    %454 = vector.load %arg8[%c3_344, %c0_345, %c0_346] : memref<4x32x8xf32, #tpu.memory_space<vmem>>, vector<1x32x8xf32>
    %455 = vector.shape_cast %454 : vector<1x32x8xf32> to vector<32x8xf32>
    %cst_347 = arith.constant dense<0.000000e+00> : vector<8x8xf32>
    %456 = tpu.matmul %347, %455, %cst_347 {dimension_numbers = #tpu.dot_dimension_numbers<[1], [0], [0], [1], [0, 0, 1, 1], [], []>} : vector<8x32xf32>, vector<32x8xf32>, vector<8x8xf32> -> vector<8x8xf32>
    %c3_348 = arith.constant 3 : index
    %c0_349 = arith.constant 0 : index
    %c0_350 = arith.constant 0 : index
    %457 = vector.load %arg9[%c3_348, %c0_349, %c0_350] : memref<4x1x8xf32, #tpu.memory_space<vmem>>, vector<1x1x8xf32>
    %458 = vector.shape_cast %457 : vector<1x1x8xf32> to vector<1x8xf32>
    %459 = vector.broadcast %458 : vector<1x8xf32> to vector<8x8xf32>
    %460 = arith.addf %456, %459 : vector<8x8xf32>
    %c3_351 = arith.constant 3 : index
    %c0_352 = arith.constant 0 : index
    %c0_353 = arith.constant 0 : index
    %461 = vector.load %arg10[%c3_351, %c0_352, %c0_353] : memref<8x32x8xf32, #tpu.memory_space<vmem>>, vector<1x32x8xf32>
    %462 = vector.shape_cast %461 : vector<1x32x8xf32> to vector<32x8xf32>
    %cst_354 = arith.constant dense<0.000000e+00> : vector<1x8xf32>
    %463 = tpu.matmul %349, %462, %cst_354 {dimension_numbers = #tpu.dot_dimension_numbers<[1], [0], [0], [1], [0, 0, 1, 1], [], []>} : vector<1x32xf32>, vector<32x8xf32>, vector<1x8xf32> -> vector<1x8xf32>
    %c3_355 = arith.constant 3 : index
    %c0_356 = arith.constant 0 : index
    %c0_357 = arith.constant 0 : index
    %464 = vector.load %arg11[%c3_355, %c0_356, %c0_357] : memref<8x1x8xf32, #tpu.memory_space<vmem>>, vector<1x1x8xf32>
    %465 = vector.shape_cast %464 : vector<1x1x8xf32> to vector<1x8xf32>
    %466 = arith.addf %463, %465 : vector<1x8xf32>
    %c7_358 = arith.constant 7 : index
    %c0_359 = arith.constant 0 : index
    %c0_360 = arith.constant 0 : index
    %467 = vector.load %arg10[%c7_358, %c0_359, %c0_360] : memref<8x32x8xf32, #tpu.memory_space<vmem>>, vector<1x32x8xf32>
    %468 = vector.shape_cast %467 : vector<1x32x8xf32> to vector<32x8xf32>
    %cst_361 = arith.constant dense<0.000000e+00> : vector<1x8xf32>
    %469 = tpu.matmul %349, %468, %cst_361 {dimension_numbers = #tpu.dot_dimension_numbers<[1], [0], [0], [1], [0, 0, 1, 1], [], []>} : vector<1x32xf32>, vector<32x8xf32>, vector<1x8xf32> -> vector<1x8xf32>
    %c7_362 = arith.constant 7 : index
    %c0_363 = arith.constant 0 : index
    %c0_364 = arith.constant 0 : index
    %470 = vector.load %arg11[%c7_362, %c0_363, %c0_364] : memref<8x1x8xf32, #tpu.memory_space<vmem>>, vector<1x1x8xf32>
    %471 = vector.shape_cast %470 : vector<1x1x8xf32> to vector<1x8xf32>
    %472 = arith.addf %469, %471 : vector<1x8xf32>
    %cst_365 = arith.constant dense<0.000000e+00> : vector<8x1xf32>
    %473 = tpu.matmul %460, %466, %cst_365 {dimension_numbers = #tpu.dot_dimension_numbers<[1], [1], [0], [0], [0, 0, 1, 0], [], []>} : vector<8x8xf32>, vector<1x8xf32>, vector<8x1xf32> -> vector<8x1xf32>
    %cst_366 = arith.constant 0.353553385 : f32
    %474 = vector.broadcast %cst_366 : f32 to vector<8x1xf32>
    %475 = arith.mulf %473, %474 : vector<8x1xf32>
    %cst_367 = arith.constant dense<0xFF800000> : vector<8xf32>
    %476 = vector.multi_reduction <maximumf>, %475, %cst_367 [1] : vector<8x1xf32> to vector<8xf32>
    %477 = vector.shape_cast %476 : vector<8xf32> to vector<8x1xf32>
    %478 = arith.subf %475, %477 : vector<8x1xf32>
    %479 = math.exp %478 : vector<8x1xf32>
    %cst_368 = arith.constant dense<0.000000e+00> : vector<8xf32>
    %480 = vector.multi_reduction <add>, %479, %cst_368 [1] : vector<8x1xf32> to vector<8xf32>
    %481 = vector.shape_cast %480 : vector<8xf32> to vector<8x1xf32>
    %482 = tpu.reciprocal %481 {approx = true} : vector<8x1xf32> -> vector<8x1xf32>
    %483 = arith.mulf %479, %482 : vector<8x1xf32>
    %cst_369 = arith.constant dense<0.000000e+00> : vector<8x8xf32>
    %484 = tpu.matmul %483, %472, %cst_369 {dimension_numbers = #tpu.dot_dimension_numbers<[1], [0], [0], [1], [0, 0, 1, 1], [], []>} : vector<8x1xf32>, vector<1x8xf32>, vector<8x8xf32> -> vector<8x8xf32>
    %c3_370 = arith.constant 3 : index
    %c0_371 = arith.constant 0 : index
    %c0_372 = arith.constant 0 : index
    %485 = vector.load %arg12[%c3_370, %c0_371, %c0_372] : memref<4x8x32xf32, #tpu.memory_space<vmem>>, vector<1x8x32xf32>
    %486 = vector.shape_cast %485 : vector<1x8x32xf32> to vector<8x32xf32>
    %cst_373 = arith.constant dense<0.000000e+00> : vector<8x32xf32>
    %487 = tpu.matmul %484, %486, %cst_373 {dimension_numbers = #tpu.dot_dimension_numbers<[1], [0], [0], [1], [0, 0, 1, 1], [], []>} : vector<8x8xf32>, vector<8x32xf32>, vector<8x32xf32> -> vector<8x32xf32>
    %488 = arith.addf %453, %487 : vector<8x32xf32>
    %c0_374 = arith.constant 0 : index
    %c0_375 = arith.constant 0 : index
    %489 = vector.load %arg13[%c0_374, %c0_375] : memref<1x32xf32, #tpu.memory_space<vmem>>, vector<1x32xf32>
    %490 = vector.broadcast %489 : vector<1x32xf32> to vector<8x32xf32>
    %491 = arith.addf %488, %490 : vector<8x32xf32>
    %c0_376 = arith.constant 0 : index
    %c0_377 = arith.constant 0 : index
    %492 = vector.load %arg25[%c0_376, %c0_377] : memref<16x32xf32, #tpu.memory_space<vmem>>, vector<8x32xf32>
    tpu.vector_store %arg25[%c0_376, %c0_377], %491 {strides = array<i32>} : memref<16x32xf32, #tpu.memory_space<vmem>>, vector<8x32xf32>,
    %493 = vector.extract_strided_slice %346 {offsets = [8, 0], sizes = [8, 32], strides = [1, 1]} : vector<16x32xf32> to vector<8x32xf32>
    %c1_378 = arith.constant 1 : index
    %c0_379 = arith.constant 0 : index
    %c0_380 = arith.constant 0 : index
    %494 = vector.load %arg1[%c1_378, %c0_379, %c0_380] : memref<2x1x32xf32, #tpu.memory_space<vmem>>, vector<1x1x32xf32>
    %495 = vector.shape_cast %494 : vector<1x1x32xf32> to vector<1x32xf32>
    %c0_381 = arith.constant 0 : index
    %c0_382 = arith.constant 0 : index
    %c0_383 = arith.constant 0 : index
    %496 = vector.load %arg8[%c0_381, %c0_382, %c0_383] : memref<4x32x8xf32, #tpu.memory_space<vmem>>, vector<1x32x8xf32>
    %497 = vector.shape_cast %496 : vector<1x32x8xf32> to vector<32x8xf32>
    %cst_384 = arith.constant dense<0.000000e+00> : vector<8x8xf32>
    %498 = tpu.matmul %493, %497, %cst_384 {dimension_numbers = #tpu.dot_dimension_numbers<[1], [0], [0], [1], [0, 0, 1, 1], [], []>} : vector<8x32xf32>, vector<32x8xf32>, vector<8x8xf32> -> vector<8x8xf32>
    %c0_385 = arith.constant 0 : index
    %c0_386 = arith.constant 0 : index
    %c0_387 = arith.constant 0 : index
    %499 = vector.load %arg9[%c0_385, %c0_386, %c0_387] : memref<4x1x8xf32, #tpu.memory_space<vmem>>, vector<1x1x8xf32>
    %500 = vector.shape_cast %499 : vector<1x1x8xf32> to vector<1x8xf32>
    %501 = vector.broadcast %500 : vector<1x8xf32> to vector<8x8xf32>
    %502 = arith.addf %498, %501 : vector<8x8xf32>
    %c0_388 = arith.constant 0 : index
    %c0_389 = arith.constant 0 : index
    %c0_390 = arith.constant 0 : index
    %503 = vector.load %arg10[%c0_388, %c0_389, %c0_390] : memref<8x32x8xf32, #tpu.memory_space<vmem>>, vector<1x32x8xf32>
    %504 = vector.shape_cast %503 : vector<1x32x8xf32> to vector<32x8xf32>
    %cst_391 = arith.constant dense<0.000000e+00> : vector<1x8xf32>
    %505 = tpu.matmul %495, %504, %cst_391 {dimension_numbers = #tpu.dot_dimension_numbers<[1], [0], [0], [1], [0, 0, 1, 1], [], []>} : vector<1x32xf32>, vector<32x8xf32>, vector<1x8xf32> -> vector<1x8xf32>
    %c0_392 = arith.constant 0 : index
    %c0_393 = arith.constant 0 : index
    %c0_394 = arith.constant 0 : index
    %506 = vector.load %arg11[%c0_392, %c0_393, %c0_394] : memref<8x1x8xf32, #tpu.memory_space<vmem>>, vector<1x1x8xf32>
    %507 = vector.shape_cast %506 : vector<1x1x8xf32> to vector<1x8xf32>
    %508 = arith.addf %505, %507 : vector<1x8xf32>
    %c4_395 = arith.constant 4 : index
    %c0_396 = arith.constant 0 : index
    %c0_397 = arith.constant 0 : index
    %509 = vector.load %arg10[%c4_395, %c0_396, %c0_397] : memref<8x32x8xf32, #tpu.memory_space<vmem>>, vector<1x32x8xf32>
    %510 = vector.shape_cast %509 : vector<1x32x8xf32> to vector<32x8xf32>
    %cst_398 = arith.constant dense<0.000000e+00> : vector<1x8xf32>
    %511 = tpu.matmul %495, %510, %cst_398 {dimension_numbers = #tpu.dot_dimension_numbers<[1], [0], [0], [1], [0, 0, 1, 1], [], []>} : vector<1x32xf32>, vector<32x8xf32>, vector<1x8xf32> -> vector<1x8xf32>
    %c4_399 = arith.constant 4 : index
    %c0_400 = arith.constant 0 : index
    %c0_401 = arith.constant 0 : index
    %512 = vector.load %arg11[%c4_399, %c0_400, %c0_401] : memref<8x1x8xf32, #tpu.memory_space<vmem>>, vector<1x1x8xf32>
    %513 = vector.shape_cast %512 : vector<1x1x8xf32> to vector<1x8xf32>
    %514 = arith.addf %511, %513 : vector<1x8xf32>
    %cst_402 = arith.constant dense<0.000000e+00> : vector<8x1xf32>
    %515 = tpu.matmul %502, %508, %cst_402 {dimension_numbers = #tpu.dot_dimension_numbers<[1], [1], [0], [0], [0, 0, 1, 0], [], []>} : vector<8x8xf32>, vector<1x8xf32>, vector<8x1xf32> -> vector<8x1xf32>
    %cst_403 = arith.constant 0.353553385 : f32
    %516 = vector.broadcast %cst_403 : f32 to vector<8x1xf32>
    %517 = arith.mulf %515, %516 : vector<8x1xf32>
    %cst_404 = arith.constant dense<0xFF800000> : vector<8xf32>
    %518 = vector.multi_reduction <maximumf>, %517, %cst_404 [1] : vector<8x1xf32> to vector<8xf32>
    %519 = vector.shape_cast %518 : vector<8xf32> to vector<8x1xf32>
    %520 = arith.subf %517, %519 : vector<8x1xf32>
    %521 = math.exp %520 : vector<8x1xf32>
    %cst_405 = arith.constant dense<0.000000e+00> : vector<8xf32>
    %522 = vector.multi_reduction <add>, %521, %cst_405 [1] : vector<8x1xf32> to vector<8xf32>
    %523 = vector.shape_cast %522 : vector<8xf32> to vector<8x1xf32>
    %524 = tpu.reciprocal %523 {approx = true} : vector<8x1xf32> -> vector<8x1xf32>
    %525 = arith.mulf %521, %524 : vector<8x1xf32>
    %cst_406 = arith.constant dense<0.000000e+00> : vector<8x8xf32>
    %526 = tpu.matmul %525, %514, %cst_406 {dimension_numbers = #tpu.dot_dimension_numbers<[1], [0], [0], [1], [0, 0, 1, 1], [], []>} : vector<8x1xf32>, vector<1x8xf32>, vector<8x8xf32> -> vector<8x8xf32>
    %c0_407 = arith.constant 0 : index
    %c0_408 = arith.constant 0 : index
    %c0_409 = arith.constant 0 : index
    %527 = vector.load %arg12[%c0_407, %c0_408, %c0_409] : memref<4x8x32xf32, #tpu.memory_space<vmem>>, vector<1x8x32xf32>
    %528 = vector.shape_cast %527 : vector<1x8x32xf32> to vector<8x32xf32>
    %cst_410 = arith.constant dense<0.000000e+00> : vector<8x32xf32>
    %529 = tpu.matmul %526, %528, %cst_410 {dimension_numbers = #tpu.dot_dimension_numbers<[1], [0], [0], [1], [0, 0, 1, 1], [], []>} : vector<8x8xf32>, vector<8x32xf32>, vector<8x32xf32> -> vector<8x32xf32>
    %c1_411 = arith.constant 1 : index
    %c0_412 = arith.constant 0 : index
    %c0_413 = arith.constant 0 : index
    %530 = vector.load %arg8[%c1_411, %c0_412, %c0_413] : memref<4x32x8xf32, #tpu.memory_space<vmem>>, vector<1x32x8xf32>
    %531 = vector.shape_cast %530 : vector<1x32x8xf32> to vector<32x8xf32>
    %cst_414 = arith.constant dense<0.000000e+00> : vector<8x8xf32>
    %532 = tpu.matmul %493, %531, %cst_414 {dimension_numbers = #tpu.dot_dimension_numbers<[1], [0], [0], [1], [0, 0, 1, 1], [], []>} : vector<8x32xf32>, vector<32x8xf32>, vector<8x8xf32> -> vector<8x8xf32>
    %c1_415 = arith.constant 1 : index
    %c0_416 = arith.constant 0 : index
    %c0_417 = arith.constant 0 : index
    %533 = vector.load %arg9[%c1_415, %c0_416, %c0_417] : memref<4x1x8xf32, #tpu.memory_space<vmem>>, vector<1x1x8xf32>
    %534 = vector.shape_cast %533 : vector<1x1x8xf32> to vector<1x8xf32>
    %535 = vector.broadcast %534 : vector<1x8xf32> to vector<8x8xf32>
    %536 = arith.addf %532, %535 : vector<8x8xf32>
    %c1_418 = arith.constant 1 : index
    %c0_419 = arith.constant 0 : index
    %c0_420 = arith.constant 0 : index
    %537 = vector.load %arg10[%c1_418, %c0_419, %c0_420] : memref<8x32x8xf32, #tpu.memory_space<vmem>>, vector<1x32x8xf32>
    %538 = vector.shape_cast %537 : vector<1x32x8xf32> to vector<32x8xf32>
    %cst_421 = arith.constant dense<0.000000e+00> : vector<1x8xf32>
    %539 = tpu.matmul %495, %538, %cst_421 {dimension_numbers = #tpu.dot_dimension_numbers<[1], [0], [0], [1], [0, 0, 1, 1], [], []>} : vector<1x32xf32>, vector<32x8xf32>, vector<1x8xf32> -> vector<1x8xf32>
    %c1_422 = arith.constant 1 : index
    %c0_423 = arith.constant 0 : index
    %c0_424 = arith.constant 0 : index
    %540 = vector.load %arg11[%c1_422, %c0_423, %c0_424] : memref<8x1x8xf32, #tpu.memory_space<vmem>>, vector<1x1x8xf32>
    %541 = vector.shape_cast %540 : vector<1x1x8xf32> to vector<1x8xf32>
    %542 = arith.addf %539, %541 : vector<1x8xf32>
    %c5_425 = arith.constant 5 : index
    %c0_426 = arith.constant 0 : index
    %c0_427 = arith.constant 0 : index
    %543 = vector.load %arg10[%c5_425, %c0_426, %c0_427] : memref<8x32x8xf32, #tpu.memory_space<vmem>>, vector<1x32x8xf32>
    %544 = vector.shape_cast %543 : vector<1x32x8xf32> to vector<32x8xf32>
    %cst_428 = arith.constant dense<0.000000e+00> : vector<1x8xf32>
    %545 = tpu.matmul %495, %544, %cst_428 {dimension_numbers = #tpu.dot_dimension_numbers<[1], [0], [0], [1], [0, 0, 1, 1], [], []>} : vector<1x32xf32>, vector<32x8xf32>, vector<1x8xf32> -> vector<1x8xf32>
    %c5_429 = arith.constant 5 : index
    %c0_430 = arith.constant 0 : index
    %c0_431 = arith.constant 0 : index
    %546 = vector.load %arg11[%c5_429, %c0_430, %c0_431] : memref<8x1x8xf32, #tpu.memory_space<vmem>>, vector<1x1x8xf32>
    %547 = vector.shape_cast %546 : vector<1x1x8xf32> to vector<1x8xf32>
    %548 = arith.addf %545, %547 : vector<1x8xf32>
    %cst_432 = arith.constant dense<0.000000e+00> : vector<8x1xf32>
    %549 = tpu.matmul %536, %542, %cst_432 {dimension_numbers = #tpu.dot_dimension_numbers<[1], [1], [0], [0], [0, 0, 1, 0], [], []>} : vector<8x8xf32>, vector<1x8xf32>, vector<8x1xf32> -> vector<8x1xf32>
    %cst_433 = arith.constant 0.353553385 : f32
    %550 = vector.broadcast %cst_433 : f32 to vector<8x1xf32>
    %551 = arith.mulf %549, %550 : vector<8x1xf32>
    %cst_434 = arith.constant dense<0xFF800000> : vector<8xf32>
    %552 = vector.multi_reduction <maximumf>, %551, %cst_434 [1] : vector<8x1xf32> to vector<8xf32>
    %553 = vector.shape_cast %552 : vector<8xf32> to vector<8x1xf32>
    %554 = arith.subf %551, %553 : vector<8x1xf32>
    %555 = math.exp %554 : vector<8x1xf32>
    %cst_435 = arith.constant dense<0.000000e+00> : vector<8xf32>
    %556 = vector.multi_reduction <add>, %555, %cst_435 [1] : vector<8x1xf32> to vector<8xf32>
    %557 = vector.shape_cast %556 : vector<8xf32> to vector<8x1xf32>
    %558 = tpu.reciprocal %557 {approx = true} : vector<8x1xf32> -> vector<8x1xf32>
    %559 = arith.mulf %555, %558 : vector<8x1xf32>
    %cst_436 = arith.constant dense<0.000000e+00> : vector<8x8xf32>
    %560 = tpu.matmul %559, %548, %cst_436 {dimension_numbers = #tpu.dot_dimension_numbers<[1], [0], [0], [1], [0, 0, 1, 1], [], []>} : vector<8x1xf32>, vector<1x8xf32>, vector<8x8xf32> -> vector<8x8xf32>
    %c1_437 = arith.constant 1 : index
    %c0_438 = arith.constant 0 : index
    %c0_439 = arith.constant 0 : index
    %561 = vector.load %arg12[%c1_437, %c0_438, %c0_439] : memref<4x8x32xf32, #tpu.memory_space<vmem>>, vector<1x8x32xf32>
    %562 = vector.shape_cast %561 : vector<1x8x32xf32> to vector<8x32xf32>
    %cst_440 = arith.constant dense<0.000000e+00> : vector<8x32xf32>
    %563 = tpu.matmul %560, %562, %cst_440 {dimension_numbers = #tpu.dot_dimension_numbers<[1], [0], [0], [1], [0, 0, 1, 1], [], []>} : vector<8x8xf32>, vector<8x32xf32>, vector<8x32xf32> -> vector<8x32xf32>
    %564 = arith.addf %529, %563 : vector<8x32xf32>
    %c2_441 = arith.constant 2 : index
    %c0_442 = arith.constant 0 : index
    %c0_443 = arith.constant 0 : index
    %565 = vector.load %arg8[%c2_441, %c0_442, %c0_443] : memref<4x32x8xf32, #tpu.memory_space<vmem>>, vector<1x32x8xf32>
    %566 = vector.shape_cast %565 : vector<1x32x8xf32> to vector<32x8xf32>
    %cst_444 = arith.constant dense<0.000000e+00> : vector<8x8xf32>
    %567 = tpu.matmul %493, %566, %cst_444 {dimension_numbers = #tpu.dot_dimension_numbers<[1], [0], [0], [1], [0, 0, 1, 1], [], []>} : vector<8x32xf32>, vector<32x8xf32>, vector<8x8xf32> -> vector<8x8xf32>
    %c2_445 = arith.constant 2 : index
    %c0_446 = arith.constant 0 : index
    %c0_447 = arith.constant 0 : index
    %568 = vector.load %arg9[%c2_445, %c0_446, %c0_447] : memref<4x1x8xf32, #tpu.memory_space<vmem>>, vector<1x1x8xf32>
    %569 = vector.shape_cast %568 : vector<1x1x8xf32> to vector<1x8xf32>
    %570 = vector.broadcast %569 : vector<1x8xf32> to vector<8x8xf32>
    %571 = arith.addf %567, %570 : vector<8x8xf32>
    %c2_448 = arith.constant 2 : index
    %c0_449 = arith.constant 0 : index
    %c0_450 = arith.constant 0 : index
    %572 = vector.load %arg10[%c2_448, %c0_449, %c0_450] : memref<8x32x8xf32, #tpu.memory_space<vmem>>, vector<1x32x8xf32>
    %573 = vector.shape_cast %572 : vector<1x32x8xf32> to vector<32x8xf32>
    %cst_451 = arith.constant dense<0.000000e+00> : vector<1x8xf32>
    %574 = tpu.matmul %495, %573, %cst_451 {dimension_numbers = #tpu.dot_dimension_numbers<[1], [0], [0], [1], [0, 0, 1, 1], [], []>} : vector<1x32xf32>, vector<32x8xf32>, vector<1x8xf32> -> vector<1x8xf32>
    %c2_452 = arith.constant 2 : index
    %c0_453 = arith.constant 0 : index
    %c0_454 = arith.constant 0 : index
    %575 = vector.load %arg11[%c2_452, %c0_453, %c0_454] : memref<8x1x8xf32, #tpu.memory_space<vmem>>, vector<1x1x8xf32>
    %576 = vector.shape_cast %575 : vector<1x1x8xf32> to vector<1x8xf32>
    %577 = arith.addf %574, %576 : vector<1x8xf32>
    %c6_455 = arith.constant 6 : index
    %c0_456 = arith.constant 0 : index
    %c0_457 = arith.constant 0 : index
    %578 = vector.load %arg10[%c6_455, %c0_456, %c0_457] : memref<8x32x8xf32, #tpu.memory_space<vmem>>, vector<1x32x8xf32>
    %579 = vector.shape_cast %578 : vector<1x32x8xf32> to vector<32x8xf32>
    %cst_458 = arith.constant dense<0.000000e+00> : vector<1x8xf32>
    %580 = tpu.matmul %495, %579, %cst_458 {dimension_numbers = #tpu.dot_dimension_numbers<[1], [0], [0], [1], [0, 0, 1, 1], [], []>} : vector<1x32xf32>, vector<32x8xf32>, vector<1x8xf32> -> vector<1x8xf32>
    %c6_459 = arith.constant 6 : index
    %c0_460 = arith.constant 0 : index
    %c0_461 = arith.constant 0 : index
    %581 = vector.load %arg11[%c6_459, %c0_460, %c0_461] : memref<8x1x8xf32, #tpu.memory_space<vmem>>, vector<1x1x8xf32>
    %582 = vector.shape_cast %581 : vector<1x1x8xf32> to vector<1x8xf32>
    %583 = arith.addf %580, %582 : vector<1x8xf32>
    %cst_462 = arith.constant dense<0.000000e+00> : vector<8x1xf32>
    %584 = tpu.matmul %571, %577, %cst_462 {dimension_numbers = #tpu.dot_dimension_numbers<[1], [1], [0], [0], [0, 0, 1, 0], [], []>} : vector<8x8xf32>, vector<1x8xf32>, vector<8x1xf32> -> vector<8x1xf32>
    %cst_463 = arith.constant 0.353553385 : f32
    %585 = vector.broadcast %cst_463 : f32 to vector<8x1xf32>
    %586 = arith.mulf %584, %585 : vector<8x1xf32>
    %cst_464 = arith.constant dense<0xFF800000> : vector<8xf32>
    %587 = vector.multi_reduction <maximumf>, %586, %cst_464 [1] : vector<8x1xf32> to vector<8xf32>
    %588 = vector.shape_cast %587 : vector<8xf32> to vector<8x1xf32>
    %589 = arith.subf %586, %588 : vector<8x1xf32>
    %590 = math.exp %589 : vector<8x1xf32>
    %cst_465 = arith.constant dense<0.000000e+00> : vector<8xf32>
    %591 = vector.multi_reduction <add>, %590, %cst_465 [1] : vector<8x1xf32> to vector<8xf32>
    %592 = vector.shape_cast %591 : vector<8xf32> to vector<8x1xf32>
    %593 = tpu.reciprocal %592 {approx = true} : vector<8x1xf32> -> vector<8x1xf32>
    %594 = arith.mulf %590, %593 : vector<8x1xf32>
    %cst_466 = arith.constant dense<0.000000e+00> : vector<8x8xf32>
    %595 = tpu.matmul %594, %583, %cst_466 {dimension_numbers = #tpu.dot_dimension_numbers<[1], [0], [0], [1], [0, 0, 1, 1], [], []>} : vector<8x1xf32>, vector<1x8xf32>, vector<8x8xf32> -> vector<8x8xf32>
    %c2_467 = arith.constant 2 : index
    %c0_468 = arith.constant 0 : index
    %c0_469 = arith.constant 0 : index
    %596 = vector.load %arg12[%c2_467, %c0_468, %c0_469] : memref<4x8x32xf32, #tpu.memory_space<vmem>>, vector<1x8x32xf32>
    %597 = vector.shape_cast %596 : vector<1x8x32xf32> to vector<8x32xf32>
    %cst_470 = arith.constant dense<0.000000e+00> : vector<8x32xf32>
    %598 = tpu.matmul %595, %597, %cst_470 {dimension_numbers = #tpu.dot_dimension_numbers<[1], [0], [0], [1], [0, 0, 1, 1], [], []>} : vector<8x8xf32>, vector<8x32xf32>, vector<8x32xf32> -> vector<8x32xf32>
    %599 = arith.addf %564, %598 : vector<8x32xf32>
    %c3_471 = arith.constant 3 : index
    %c0_472 = arith.constant 0 : index
    %c0_473 = arith.constant 0 : index
    %600 = vector.load %arg8[%c3_471, %c0_472, %c0_473] : memref<4x32x8xf32, #tpu.memory_space<vmem>>, vector<1x32x8xf32>
    %601 = vector.shape_cast %600 : vector<1x32x8xf32> to vector<32x8xf32>
    %cst_474 = arith.constant dense<0.000000e+00> : vector<8x8xf32>
    %602 = tpu.matmul %493, %601, %cst_474 {dimension_numbers = #tpu.dot_dimension_numbers<[1], [0], [0], [1], [0, 0, 1, 1], [], []>} : vector<8x32xf32>, vector<32x8xf32>, vector<8x8xf32> -> vector<8x8xf32>
    %c3_475 = arith.constant 3 : index
    %c0_476 = arith.constant 0 : index
    %c0_477 = arith.constant 0 : index
    %603 = vector.load %arg9[%c3_475, %c0_476, %c0_477] : memref<4x1x8xf32, #tpu.memory_space<vmem>>, vector<1x1x8xf32>
    %604 = vector.shape_cast %603 : vector<1x1x8xf32> to vector<1x8xf32>
    %605 = vector.broadcast %604 : vector<1x8xf32> to vector<8x8xf32>
    %606 = arith.addf %602, %605 : vector<8x8xf32>
    %c3_478 = arith.constant 3 : index
    %c0_479 = arith.constant 0 : index
    %c0_480 = arith.constant 0 : index
    %607 = vector.load %arg10[%c3_478, %c0_479, %c0_480] : memref<8x32x8xf32, #tpu.memory_space<vmem>>, vector<1x32x8xf32>
    %608 = vector.shape_cast %607 : vector<1x32x8xf32> to vector<32x8xf32>
    %cst_481 = arith.constant dense<0.000000e+00> : vector<1x8xf32>
    %609 = tpu.matmul %495, %608, %cst_481 {dimension_numbers = #tpu.dot_dimension_numbers<[1], [0], [0], [1], [0, 0, 1, 1], [], []>} : vector<1x32xf32>, vector<32x8xf32>, vector<1x8xf32> -> vector<1x8xf32>
    %c3_482 = arith.constant 3 : index
    %c0_483 = arith.constant 0 : index
    %c0_484 = arith.constant 0 : index
    %610 = vector.load %arg11[%c3_482, %c0_483, %c0_484] : memref<8x1x8xf32, #tpu.memory_space<vmem>>, vector<1x1x8xf32>
    %611 = vector.shape_cast %610 : vector<1x1x8xf32> to vector<1x8xf32>
    %612 = arith.addf %609, %611 : vector<1x8xf32>
    %c7_485 = arith.constant 7 : index
    %c0_486 = arith.constant 0 : index
    %c0_487 = arith.constant 0 : index
    %613 = vector.load %arg10[%c7_485, %c0_486, %c0_487] : memref<8x32x8xf32, #tpu.memory_space<vmem>>, vector<1x32x8xf32>
    %614 = vector.shape_cast %613 : vector<1x32x8xf32> to vector<32x8xf32>
    %cst_488 = arith.constant dense<0.000000e+00> : vector<1x8xf32>
    %615 = tpu.matmul %495, %614, %cst_488 {dimension_numbers = #tpu.dot_dimension_numbers<[1], [0], [0], [1], [0, 0, 1, 1], [], []>} : vector<1x32xf32>, vector<32x8xf32>, vector<1x8xf32> -> vector<1x8xf32>
    %c7_489 = arith.constant 7 : index
    %c0_490 = arith.constant 0 : index
    %c0_491 = arith.constant 0 : index
    %616 = vector.load %arg11[%c7_489, %c0_490, %c0_491] : memref<8x1x8xf32, #tpu.memory_space<vmem>>, vector<1x1x8xf32>
    %617 = vector.shape_cast %616 : vector<1x1x8xf32> to vector<1x8xf32>
    %618 = arith.addf %615, %617 : vector<1x8xf32>
    %cst_492 = arith.constant dense<0.000000e+00> : vector<8x1xf32>
    %619 = tpu.matmul %606, %612, %cst_492 {dimension_numbers = #tpu.dot_dimension_numbers<[1], [1], [0], [0], [0, 0, 1, 0], [], []>} : vector<8x8xf32>, vector<1x8xf32>, vector<8x1xf32> -> vector<8x1xf32>
    %cst_493 = arith.constant 0.353553385 : f32
    %620 = vector.broadcast %cst_493 : f32 to vector<8x1xf32>
    %621 = arith.mulf %619, %620 : vector<8x1xf32>
    %cst_494 = arith.constant dense<0xFF800000> : vector<8xf32>
    %622 = vector.multi_reduction <maximumf>, %621, %cst_494 [1] : vector<8x1xf32> to vector<8xf32>
    %623 = vector.shape_cast %622 : vector<8xf32> to vector<8x1xf32>
    %624 = arith.subf %621, %623 : vector<8x1xf32>
    %625 = math.exp %624 : vector<8x1xf32>
    %cst_495 = arith.constant dense<0.000000e+00> : vector<8xf32>
    %626 = vector.multi_reduction <add>, %625, %cst_495 [1] : vector<8x1xf32> to vector<8xf32>
    %627 = vector.shape_cast %626 : vector<8xf32> to vector<8x1xf32>
    %628 = tpu.reciprocal %627 {approx = true} : vector<8x1xf32> -> vector<8x1xf32>
    %629 = arith.mulf %625, %628 : vector<8x1xf32>
    %cst_496 = arith.constant dense<0.000000e+00> : vector<8x8xf32>
    %630 = tpu.matmul %629, %618, %cst_496 {dimension_numbers = #tpu.dot_dimension_numbers<[1], [0], [0], [1], [0, 0, 1, 1], [], []>} : vector<8x1xf32>, vector<1x8xf32>, vector<8x8xf32> -> vector<8x8xf32>
    %c3_497 = arith.constant 3 : index
    %c0_498 = arith.constant 0 : index
    %c0_499 = arith.constant 0 : index
    %631 = vector.load %arg12[%c3_497, %c0_498, %c0_499] : memref<4x8x32xf32, #tpu.memory_space<vmem>>, vector<1x8x32xf32>
    %632 = vector.shape_cast %631 : vector<1x8x32xf32> to vector<8x32xf32>
    %cst_500 = arith.constant dense<0.000000e+00> : vector<8x32xf32>
    %633 = tpu.matmul %630, %632, %cst_500 {dimension_numbers = #tpu.dot_dimension_numbers<[1], [0], [0], [1], [0, 0, 1, 1], [], []>} : vector<8x8xf32>, vector<8x32xf32>, vector<8x32xf32> -> vector<8x32xf32>
    %634 = arith.addf %599, %633 : vector<8x32xf32>
    %c0_501 = arith.constant 0 : index
    %c0_502 = arith.constant 0 : index
    %635 = vector.load %arg13[%c0_501, %c0_502] : memref<1x32xf32, #tpu.memory_space<vmem>>, vector<1x32xf32>
    %636 = vector.broadcast %635 : vector<1x32xf32> to vector<8x32xf32>
    %637 = arith.addf %634, %636 : vector<8x32xf32>
    %c8_503 = arith.constant 8 : index
    %c0_504 = arith.constant 0 : index
    %638 = vector.load %arg25[%c8_503, %c0_504] : memref<16x32xf32, #tpu.memory_space<vmem>>, vector<8x32xf32>
    tpu.vector_store %arg25[%c8_503, %c0_504], %637 {strides = array<i32>} : memref<16x32xf32, #tpu.memory_space<vmem>>, vector<8x32xf32>,
    %c0_505 = arith.constant 0 : index
    %c0_506 = arith.constant 0 : index
    %639 = vector.load %arg25[%c0_505, %c0_506] : memref<16x32xf32, #tpu.memory_space<vmem>>, vector<16x32xf32>
    %640 = arith.addf %346, %639 : vector<16x32xf32>
    %cst_507 = arith.constant dense<0.000000e+00> : vector<16xf32>
    %641 = vector.multi_reduction <add>, %640, %cst_507 [1] : vector<16x32xf32> to vector<16xf32>
    %642 = vector.shape_cast %641 : vector<16xf32> to vector<16x1xf32>
    %cst_508 = arith.constant 3.200000e+01 : f32
    %643 = vector.broadcast %cst_508 : f32 to vector<16x1xf32>
    %644 = arith.divf %642, %643 : vector<16x1xf32>
    %645 = vector.broadcast %644 : vector<16x1xf32> to vector<16x32xf32>
    %646 = arith.subf %640, %645 : vector<16x32xf32>
    %647 = arith.mulf %646, %646 : vector<16x32xf32>
    %cst_509 = arith.constant dense<0.000000e+00> : vector<16xf32>
    %648 = vector.multi_reduction <add>, %647, %cst_509 [1] : vector<16x32xf32> to vector<16xf32>
    %649 = vector.shape_cast %648 : vector<16xf32> to vector<16x1xf32>
    %cst_510 = arith.constant 3.200000e+01 : f32
    %650 = vector.broadcast %cst_510 : f32 to vector<16x1xf32>
    %651 = arith.divf %649, %650 : vector<16x1xf32>
    %cst_511 = arith.constant 9.99999974E-6 : f32
    %652 = vector.broadcast %cst_511 : f32 to vector<16x1xf32>
    %653 = arith.addf %651, %652 : vector<16x1xf32>
    %654 = math.rsqrt %653 : vector<16x1xf32>
    %655 = vector.broadcast %654 : vector<16x1xf32> to vector<16x32xf32>
    %656 = arith.mulf %646, %655 : vector<16x32xf32>
    %c0_512 = arith.constant 0 : index
    %c0_513 = arith.constant 0 : index
    %657 = vector.load %arg20[%c0_512, %c0_513] : memref<1x32xf32, #tpu.memory_space<vmem>>, vector<1x32xf32>
    %658 = vector.broadcast %657 : vector<1x32xf32> to vector<16x32xf32>
    %659 = arith.mulf %656, %658 : vector<16x32xf32>
    %c0_514 = arith.constant 0 : index
    %c0_515 = arith.constant 0 : index
    %660 = vector.load %arg21[%c0_514, %c0_515] : memref<1x32xf32, #tpu.memory_space<vmem>>, vector<1x32xf32>
    %661 = vector.broadcast %660 : vector<1x32xf32> to vector<16x32xf32>
    %662 = arith.addf %659, %661 : vector<16x32xf32>
    %c0_516 = arith.constant 0 : index
    %c0_517 = arith.constant 0 : index
    %663 = vector.load %arg14[%c0_516, %c0_517] : memref<32x2048xf32, #tpu.memory_space<vmem>>, vector<32x2048xf32>
    %cst_518 = arith.constant dense<0.000000e+00> : vector<16x2048xf32>
    %664 = tpu.matmul %662, %663, %cst_518 {dimension_numbers = #tpu.dot_dimension_numbers<[1], [0], [0], [1], [0, 0, 1, 1], [], []>} : vector<16x32xf32>, vector<32x2048xf32>, vector<16x2048xf32> -> vector<16x2048xf32>
    %c0_519 = arith.constant 0 : index
    %c0_520 = arith.constant 0 : index
    %665 = vector.load %arg15[%c0_519, %c0_520] : memref<1x2048xf32, #tpu.memory_space<vmem>>, vector<1x2048xf32>
    %666 = vector.broadcast %665 : vector<1x2048xf32> to vector<16x2048xf32>
    %667 = arith.addf %664, %666 : vector<16x2048xf32>
    %cst_521 = arith.constant 0.000000e+00 : f32
    %668 = vector.broadcast %cst_521 : f32 to vector<16x2048xf32>
    %669 = arith.maximumf %667, %668 : vector<16x2048xf32>
    %c0_522 = arith.constant 0 : index
    %c0_523 = arith.constant 0 : index
    %670 = vector.load %arg16[%c0_522, %c0_523] : memref<2048x32xf32, #tpu.memory_space<vmem>>, vector<2048x32xf32>
    %cst_524 = arith.constant dense<0.000000e+00> : vector<16x32xf32>
    %671 = tpu.matmul %669, %670, %cst_524 {dimension_numbers = #tpu.dot_dimension_numbers<[1], [0], [0], [1], [0, 0, 1, 1], [], []>} : vector<16x2048xf32>, vector<2048x32xf32>, vector<16x32xf32> -> vector<16x32xf32>
    %c0_525 = arith.constant 0 : index
    %c0_526 = arith.constant 0 : index
    %672 = vector.load %arg17[%c0_525, %c0_526] : memref<1x32xf32, #tpu.memory_space<vmem>>, vector<1x32xf32>
    %673 = vector.broadcast %672 : vector<1x32xf32> to vector<16x32xf32>
    %674 = arith.addf %671, %673 : vector<16x32xf32>
    %675 = arith.addf %662, %674 : vector<16x32xf32>
    %cst_527 = arith.constant dense<0.000000e+00> : vector<16xf32>
    %676 = vector.multi_reduction <add>, %675, %cst_527 [1] : vector<16x32xf32> to vector<16xf32>
    %677 = vector.shape_cast %676 : vector<16xf32> to vector<16x1xf32>
    %cst_528 = arith.constant 3.200000e+01 : f32
    %678 = vector.broadcast %cst_528 : f32 to vector<16x1xf32>
    %679 = arith.divf %677, %678 : vector<16x1xf32>
    %680 = vector.broadcast %679 : vector<16x1xf32> to vector<16x32xf32>
    %681 = arith.subf %675, %680 : vector<16x32xf32>
    %682 = arith.mulf %681, %681 : vector<16x32xf32>
    %cst_529 = arith.constant dense<0.000000e+00> : vector<16xf32>
    %683 = vector.multi_reduction <add>, %682, %cst_529 [1] : vector<16x32xf32> to vector<16xf32>
    %684 = vector.shape_cast %683 : vector<16xf32> to vector<16x1xf32>
    %cst_530 = arith.constant 3.200000e+01 : f32
    %685 = vector.broadcast %cst_530 : f32 to vector<16x1xf32>
    %686 = arith.divf %684, %685 : vector<16x1xf32>
    %cst_531 = arith.constant 9.99999974E-6 : f32
    %687 = vector.broadcast %cst_531 : f32 to vector<16x1xf32>
    %688 = arith.addf %686, %687 : vector<16x1xf32>
    %689 = math.rsqrt %688 : vector<16x1xf32>
    %690 = vector.broadcast %689 : vector<16x1xf32> to vector<16x32xf32>
    %691 = arith.mulf %681, %690 : vector<16x32xf32>
    %c0_532 = arith.constant 0 : index
    %c0_533 = arith.constant 0 : index
    %692 = vector.load %arg22[%c0_532, %c0_533] : memref<1x32xf32, #tpu.memory_space<vmem>>, vector<1x32xf32>
    %693 = vector.broadcast %692 : vector<1x32xf32> to vector<16x32xf32>
    %694 = arith.mulf %691, %693 : vector<16x32xf32>
    %c0_534 = arith.constant 0 : index
    %c0_535 = arith.constant 0 : index
    %695 = vector.load %arg23[%c0_534, %c0_535] : memref<1x32xf32, #tpu.memory_space<vmem>>, vector<1x32xf32>
    %696 = vector.broadcast %695 : vector<1x32xf32> to vector<16x32xf32>
    %697 = arith.addf %694, %696 : vector<16x32xf32>
    %c0_536 = arith.constant 0 : index
    %c0_537 = arith.constant 0 : index
    %698 = vector.load %arg24[%c0_536, %c0_537] : memref<16x32xf32, #tpu.memory_space<vmem>>, vector<16x32xf32>
    tpu.vector_store %arg24[%c0_536, %c0_537], %697 {strides = array<i32>} : memref<16x32xf32, #tpu.memory_space<vmem>>, vector<16x32xf32>,
    return
  }
}

</mosaic_0001>

<bundles_post_ra>
// kernel: caption_generator_forward.9
= control target key start
LH: loop header
LB: loop body
LE: loop exit
PB: predicated region body
PF: predicated region fallthrough
CT: control target
= control target key end

     0   :  { %11 = vsyncpa [#allocation3], 0  ;;  %vm34_vm0 = vcmask 261120   ;;  %s442_s0 = inlined_call_operand.vmem [shape: f32[16,32], index: 0, kind: input, shape index: {}]   ;;  %s443_s1 = inlined_call_operand.vmem [shape: f32[32,32], index: 1, kind: input, shape index: {}]   ;;  %s444_s2 = inlined_call_operand.vmem [shape: f32[1,32], index: 2, kind: input, shape index: {}]   ;;  %s445_s3 = inlined_call_operand.vmem [shape: s32[2,1,32], index: 3, kind: input, shape index: {}]   ;;  %s446_s4 = inlined_call_operand.hbm [shape: f32[16,32], index: 4, kind: output, shape index: {0}]   ;;  %s447_s5 = inlined_call_operand.hbm [shape: f32[1,1], index: 5, kind: output, shape index: {1}]  }
   0x1   :  { %v23_v0 = vld [vmem:[%s443_s1] sm:$0xff]  ;;  %v24_v1 = vld [vmem:[%s443_s1 + $0x8] sm:$0xff]  ;;  %v25_v2 = vld [vmem:[%s443_s1 + $0x10] sm:$0xff] }
   0x2   :  { %v265_v3 = vpack.c.bf16 %v24_v1, %v23_v0  ;;  %v26_v4 = vld [vmem:[%s443_s1 + $0x18] sm:$0xff]  ;;  %v21_v5 = vld [vmem:[%s442_s0] sm:$0xff] }
   0x3   :  { %v269_v6 = vpack.c.bf16 %v26_v4, %v25_v2  ;;  %262 = vmatprep.mubr.msk.f32.mxu0 %vm34_vm0, %v21_v5 }
   0x4   :  { %12 = vsyncpa [#allocation5], 0  ;;  %266 = vmatprep.subr.bf16.mxu0 %v265_v3  ;;  %v22_v7 = vld [vmem:[%s442_s0 + $0x8] sm:$0xff]  ;;  %v240_v8 = vld [vmem:[%s444_s2] ss:$0 sm:$0xff]  ;;  %v139_v39 = vlaneseq  ;;  %v334_v51 = vmov 0.0  }
   0x5   :  { %268 = vmatpush3.bf16.msra.mxu0 %v265_v3  ;;  %v243_v47 = vld [vmem:[%s445_s3] ss:$0 sm:$0xff]  ;;  %v246_v50 = vld [vmem:[%s445_s3 + $0x1] ss:$0 sm:$0xff]  ;;  %s335_s3 = smov [#allocation2]  }
   0x6   :  { %270 = vmatprep.subr.bf16.mxu0 %v269_v6  ;;  %v140_v44 = vshrl.u32 %v139_v39, 7  ;;  %s215_s8 = sshll.u32 %s335_s3, 4  ;;  %s216_s8 = int_to_ptr.vmem [resolvable:$true] %s215_s8 }
   0x7   :  { %s286_s9 = scalar_lea.vmem %s216_s8, 256  ;;  %p291_p1 = scmp.lt.s32.totalorder %s216_s8, %s216_s8 }
   0x8   :  { %vm146_vm1 = vcmp.eq.s32.totalorder %v140_v44, %v243_v47  ;;  %vm189_vm2 = vcmp.eq.s32.totalorder %v140_v44, %v246_v50  ;;  %p287_p0 = scmp.ne.s32.totalorder %s216_s8, %s286_s9  ;;  %p292_p2 = scmp.lt.s32.totalorder %s286_s9, %s286_s9 }
   0x9   :  { %272 = vmatpush3.bf16.msra.mxu0 %v269_v6  ;;  %v244_v52 = vsel %vm146_vm1, 1.0, %v334_v51  ;;  %v247_v53 = vsel %vm189_vm2, 1.0, %v334_v51 }
   0xa   :  { %v149_v54 = vmul.f32 0.9, %v244_v52  ;;  %v192_v55 = vmul.f32 0.9, %v247_v53  ;;  %p293_p3 = por %p292_p2, %p291_p1 }
   0xc   :  { %263 = vmatmul.mubr.msk.f32.vlgmr.msra.gmra.mrb[0].mxu0 %vm34_vm0, %v22_v7  ;;  %v150_v57 = vadd.f32 0.0125, %v149_v54  ;;  %v193_v61 = vadd.f32 0.0125, %v192_v55  ;;  %p294_p4 = pnand %p293_p3, %p287_p0 }
   0xe   :  { %v151_v0 = vsub.f32 0.0, %v150_v57  ;;  %v194_v3 = vsub.f32 0.0, %v193_v61 }
  0xdf   :  { %v264_v9 = vpop.f32.mrb[0].mxu0 }
  0xe0   :  { %v392_v10 = vadd.f32 %v264_v9, %v240_v8  ;;  %v107_v11 = vpop.f32.mrb[1].mxu0 }
  0xe1   :  { %v394_v12 = vadd.f32 %v240_v8, %v107_v11 }
  0xe2   :  { %v162_v13 = vsel %vm34_vm0, %v392_v10, -inf  ;;  %117 = vst.msk [vmem:[#allocation2 + $0x8] sm:$0xff] %vm34_vm0, %v392_v10 }
  0xe3   :  { %v163_v14 = vrot.slane %v162_v13, 4  ;;  %v118_v15 = vsel %vm34_vm0, %v394_v12, -inf  ;;  %116 = vst.msk [vmem:[#allocation2] sm:$0xff] %vm34_vm0, %v394_v12 }
  0xe4   :  { %v119_v16 = vrot.slane %v118_v15, 4 }
  0xe5   :  { %v164_v17 = vmax.f32 %v162_v13, %v163_v14 }
  0xe6   :  { %v120_v18 = vmax.f32 %v118_v15, %v119_v16 }
  0xe7   :  { %v165_v19 = vrot.slane %v164_v17, 2 }
  0xe8   :  { %v121_v20 = vrot.slane %v120_v18, 2 }
  0xe9   :  { %v166_v21 = vmax.f32 %v164_v17, %v165_v19 }
  0xea   :  { %v122_v22 = vmax.f32 %v120_v18, %v121_v20 }
  0xeb   :  { %v167_v23 = vrot.slane %v166_v21, 1 }
  0xec   :  { %v123_v24 = vrot.slane %v122_v22, 1 }
  0xed   :  { %v168_v25 = vmax.f32 %v166_v21, %v167_v23 }
  0xee   :  { %v124_v26 = vmax.f32 %v122_v22, %v123_v24 }
  0xef   :  { %v169_v27 = vsub.f32 %v392_v10, %v168_v25 }
  0xf0   :  { %v125_v28 = vsub.f32 %v394_v12, %v124_v26 }
  0xf1   :  { %v170_v29 = vmul.f32 1.442695, %v169_v27 }
  0xf2   :  { %v126_v30 = vmul.f32 1.442695, %v125_v28 }
  0xf3   :  { %278 = vpow2.f32 %v170_v29 }
  0xf4   :  { %280 = vpow2.f32 %v126_v30 }
  0xfd   :  { %v279_v31 = vpop.eup %278 }
  0xfe   :  { %v281_v32 = vpop.eup %280  ;;  %v172_v33 = vsel %vm34_vm0, %v279_v31, 0.0 }
  0xff   :  { %v128_v34 = vsel %vm34_vm0, %v281_v32, 0.0  ;;  %v173_v35 = vrot.slane %v172_v33, 4 }
 0x100   :  { %v129_v36 = vrot.slane %v128_v34, 4 }
 0x101   :  { %v174_v37 = vadd.f32 %v173_v35, %v172_v33 }
 0x102   :  { %v130_v38 = vadd.f32 %v129_v36, %v128_v34 }
 0x103   :  { %v175_v40 = vrot.slane %v174_v37, 2 }
 0x104   :  { %v131_v41 = vrot.slane %v130_v38, 2 }
 0x105   :  { %v176_v42 = vadd.f32 %v175_v40, %v174_v37 }
 0x106   :  { %v132_v43 = vadd.f32 %v131_v41, %v130_v38 }
 0x107   :  { %v177_v45 = vrot.slane %v176_v42, 1 }
 0x108   :  { %v133_v46 = vrot.slane %v132_v43, 1 }
 0x109   :  { %v178_v48 = vadd.f32 %v177_v45, %v176_v42 }
 0x10a   :  { %v134_v49 = vadd.f32 %v133_v46, %v132_v43 }
 0x10b   :  { %282 = vlog2.f32 %v178_v48 }
 0x10c   :  { %284 = vlog2.f32 %v134_v49 }
 0x115   :  { %v283_v56 = vpop.eup %282 }
 0x116   :  { %v285_v58 = vpop.eup %284  ;;  %v180_v59 = vmul.f32 0.6931472, %v283_v56 }
 0x117   :  { %v136_v60 = vmul.f32 0.6931472, %v285_v58 }
 0x118   :  { %v181_v62 = vadd.f32 %v180_v59, %v168_v25 }
 0x119   :  { %v137_v63 = vadd.f32 %v136_v60, %v124_v26 }
 0x11a   :  { %v182_v2 = vsub.f32 %v392_v10, %v181_v62 }
 0x11b   :  { %v138_v1 = vsub.f32 %v394_v12, %v137_v63 }
 0x11c   :  { %v195_v6 = vmul.f32 %v194_v3, %v182_v2 }
 0x11d   :  { %v152_v4 = vmul.f32 %v151_v0, %v138_v1 }
 0x11e   :  { %v196_v7 = vsel %vm34_vm0, %v195_v6, 0.0 }
 0x11f   :  { %v153_v5 = vsel %vm34_vm0, %v152_v4, 0.0 }
 0x120   :  { %154 = vadd.xlane.f32.xlu0 %v153_v5 }
 0x124   :  { %197 = vadd.xlane.f32.xlu0 %v196_v7 }
 0x125   :  { %297 = shalt.err (!%p294_p4)
}
 0x126   :  { %s298_s12 = scalar_lea.hbm %s446_s4, 256 }
 0x127   :  { %p299_p5 = scmp.ne.s32.totalorder %s446_s4, %s298_s12  ;;  %p302_p6 = scmp.lt.u32.totalorder %s298_s12, %s446_s4 }
 0x129   :  { %p304_p7 = pnand %p302_p6, %p299_p5 }
 0x12b   :  { %307 = shalt.err (!%p304_p7)
}
 0x12c   :  { %s336_s17 = smov 128   ;;  %s337_s18 = smov 8   ;;  %vm208_vm3 = vcmask 0  }
 0x12d   :  { %221 = dma.vmem_to_hbm [thread:$0]  %s216_s8, 256, %s446_s4, [#allocation3], %s336_s17, %s336_s17, %s337_s18  }
 0x12e   :  { %s338_s21 = smov [#allocation4]  }
 0x12f   :  { %s228_s22 = sshll.u32 %s338_s21, 4  ;;  %s229_s22 = int_to_ptr.vmem [resolvable:$true] %s228_s22 }
 0x130   :  { %s308_s4 = scalar_lea.vmem %s229_s22, 16  ;;  %s312_s23 = scalar_lea.vmem %s229_s22, 32 }
 0x131   :  { %p309_p8 = scmp.ne.s32.totalorder %s229_s22, %s308_s4  ;;  %p313_p9 = scmp.lt.s32.totalorder %s229_s22, %s229_s22 }
 0x132   :  { %p314_p10 = scmp.lt.s32.totalorder %s312_s23, %s308_s4 }
 0x134   :  { %p315_p11 = por %p314_p10, %p313_p9 }
 0x136   :  { %p316_p12 = pnand %p315_p11, %p309_p8 }
 0x1ad   :  { %v155_v8 = vpop.xlane.xlu0 %154 }
 0x1ae   :  { %v156_v9 = vrot.slane %v155_v8, 4 }
 0x1b0   :  { %v157_v10 = vadd.f32 %v156_v9, %v155_v8 }
 0x1b1   :  { %v198_v11 = vpop.xlane.xlu0 %197 }
 0x1b2   :  { %v158_v12 = vrot.slane %v157_v10, 2  ;;  %v199_v13 = vrot.slane %v198_v11, 4 }
 0x1b4   :  { %v159_v14 = vadd.f32 %v158_v12, %v157_v10  ;;  %v200_v15 = vadd.f32 %v199_v13, %v198_v11 }
 0x1b6   :  { %v201_v16 = vrot.slane %v200_v15, 2  ;;  %v160_v17 = vrot.slane %v159_v14, 1 }
 0x1b8   :  { %v202_v18 = vadd.f32 %v201_v16, %v200_v15  ;;  %v161_v20 = vadd.f32 %v160_v17, %v159_v14 }
 0x1ba   :  { %v203_v19 = vrot.slane %v202_v18, 1 }
 0x1bc   :  { %v204_v21 = vadd.f32 %v203_v19, %v202_v18 }
 0x1be   :  { %v205_v22 = vadd.f32 %v204_v21, %v161_v20 }
 0x1c0   :  { %v207_v23 = vmul.f32 0.001953125, %v205_v22 }
 0x1c2   :  { %209 = vst.msk [vmem:[#allocation4] sm:$0x1] %vm208_vm3, %v207_v23 }
 0x1c3   :  { %319 = shalt.err (!%p316_p12)
}
 0x1c4   :  { %s320_s26 = scalar_lea.hbm %s447_s5, 16 }
 0x1c5   :  { %p321_p13 = scmp.ne.s32.totalorder %s447_s5, %s320_s26  ;;  %p324_p0 = scmp.lt.u32.totalorder %s320_s26, %s447_s5 }
 0x1c7   :  { %p326_p1 = pnand %p324_p0, %p321_p13 }
 0x1c9   :  { %329 = shalt.err (!%p326_p1)
}
 0x1ca   :  { %231 = dma.vmem_to_hbm [thread:$0]  %s229_s22, 16, %s447_s5, [#allocation5]  }
 0x1cb   :  { %330 = dma.done.wait [#allocation3], 256  }
 0x1cc   :  { %331 = vsyncadd [#allocation3], 4294967040 }
 0x1cd   :  { %332 = dma.done.wait [#allocation5], 16  }
 0x1ce   :  { %333 = vsyncadd [#allocation5], 4294967280 }
 0x1cf   :  { %238 = vsyncpa [#allocation3], 1 }
 0x1d0   :  { %239 = vsyncpa [#allocation5], 1 }

// kernel: caption_generator_forward.5
= control target key start
LH: loop header
LB: loop body
LE: loop exit
PB: predicated region body
PF: predicated region fallthrough
CT: control target
= control target key end

     0   :  { %v4725_v0 = vmov 0.0|0.0   ;;  %vm4726_vm0 = vmmov 0   ;;  %v4727_v8 = vmov 0.0   ;;  %vm62_vm1 = vcmask 261120   ;;  %s6256_s3 = inlined_call_operand.vmem [shape: f32[8,32,8], index: 3, kind: input, shape index: {}]   ;;  %s6257_s1 = inlined_call_operand.vmem [shape: f32[4,32,8], index: 1, kind: input, shape index: {}]   ;;  %s6258_s0 = inlined_call_operand.vmem [shape: f32[2,32], index: 0, kind: input, shape index: {}]   ;;  %s6259_s4 = inlined_call_operand.vmem [shape: f32[8,1,8], index: 4, kind: input, shape index: {}]   ;;  %s6260_s2 = inlined_call_operand.vmem [shape: f32[4,1,8], index: 2, kind: input, shape index: {}]   ;;  %s6261_s5 = inlined_call_operand.vmem [shape: f32[4,8,32], index: 5, kind: input, shape index: {}]   ;;  %s6262_s6 = inlined_call_operand.vmem [shape: f32[1,32], index: 6, kind: input, shape index: {}]   ;;  %s6263_s7 = inlined_call_operand.vmem [shape: f32[32,2048], index: 7, kind: input, shape index: {}]   ;;  %s6264_s11 = inlined_call_operand.vmem [shape: f32[1,32], index: 11, kind: input, shape index: {}]   ;;  %s6265_s12 = inlined_call_operand.vmem [shape: f32[1,32], index: 12, kind: input, shape index: {}]   ;;  %s6266_s9 = inlined_call_operand.vmem [shape: f32[2048,32], index: 9, kind: input, shape index: {}]   ;;  %s6267_s8 = inlined_call_operand.vmem [shape: f32[1,2048], index: 8, kind: input, shape index: {}]   ;;  %s6268_s10 = inlined_call_operand.vmem [shape: f32[1,32], index: 10, kind: input, shape index: {}]   ;;  %s6269_s13 = inlined_call_operand.vmem [shape: f32[1,32], index: 13, kind: input, shape index: {}]   ;;  %s6270_s14 = inlined_call_operand.vmem [shape: f32[1,32], index: 14, kind: input, shape index: {}]   ;;  %s6271_s15 = inlined_call_operand.vmem [shape: f32[2,32], index: 15, kind: output, shape index: {}]  }
   0x1   :  { %4316 = vmatprep.subr.bf16.mxu1 %v4725_v0  ;;  %v136_v1 = vld [vmem:[%s6256_s3] sm:$0xff]  ;;  %v137_v2 = vld [vmem:[%s6256_s3 + $0x8] sm:$0xff]  ;;  %4310 = vmatprep.subr.bf16.mxu0 %v4725_v0  ;;  %v138_v6 = vld [vmem:[%s6256_s3 + $0x10] sm:$0xff]  ;;  %vm300_vm2 = vcmask 64512   ;;  %vm378_vm3 = vcmask 9216   ;;  %vm394_vm4 = vcmask 1041408  }
   0x2   :  { %v51_v3 = vld [vmem:[%s6257_s1] sm:$0xff]  ;;  %v4317_v4 = vpack.c.bf16 %v137_v2, %v136_v1  ;;  %v52_v5 = vld [vmem:[%s6257_s1 + $0x8] sm:$0xff]  ;;  %v139_v7 = vld [vmem:[%s6256_s3 + $0x18] sm:$0xff]  ;;  %4137 = vmatprep.mubr.msk.f32.mxu1 %vm4726_vm0, %v4727_v8  ;;  %4126 = vmatprep.mubr.msk.f32.mxu0 %vm4726_vm0, %v4727_v8  ;;  %vm390_vm5 = vcmask 15360   ;;  %vm2016_vm6 = vcmask 254976  }
   0x3   :  { %v4311_v9 = vpack.c.bf16 %v52_v5, %v51_v3  ;;  %v53_v10 = vld [vmem:[%s6257_s1 + $0x10] sm:$0xff]  ;;  %v54_v11 = vld [vmem:[%s6257_s1 + $0x18] sm:$0xff]  ;;  %v4320_v12 = vpack.c.bf16 %v139_v7, %v138_v6  ;;  %v4843_v14 = vld [vmem:[%s6258_s0] sm:$0x3] }
   0x4   :  { %4318 = vmatpush3.bf16.msra.mxu1 %v4317_v4  ;;  %v4314_v13 = vpack.c.bf16 %v54_v11, %v53_v10  ;;  %v3645_v15 = vld [vmem:[%s6259_s4] ss:$0 sm:$0xff]  ;;  %v3648_v24 = vld [vmem:[%s6256_s3 + $0x88] sm:$0xff]  ;;  %v3649_v25 = vld [vmem:[%s6256_s3 + $0x90] sm:$0xff] }
   0x5   :  { %4312 = vmatpush3.bf16.msra.mxu0 %v4311_v9  ;;  %4319 = vmatprep.subr.bf16.mxu1 %v4725_v0  ;;  %v3643_v16 = vld [vmem:[%s6260_s2] ss:$0 sm:$0xff]  ;;  %v3650_v27 = vld [vmem:[%s6256_s3 + $0x98] sm:$0xff]  ;;  %v3652_v39 = vld [vmem:[%s6259_s4 + $0x4] ss:$0 sm:$0xff] }
   0x6   :  { %4313 = vmatprep.subr.bf16.mxu0 %v4725_v0  ;;  %v3647_v23 = vld [vmem:[%s6256_s3 + $0x80] sm:$0xff]  ;;  %v4326_v28 = vpack.c.bf16 %v3650_v27, %v3649_v25  ;;  %v3659_v43 = vld [vmem:[%s6257_s1 + $0x28] sm:$0xff]  ;;  %v3660_v45 = vld [vmem:[%s6257_s1 + $0x30] sm:$0xff] }
   0x7   :  { %v4323_v26 = vpack.c.bf16 %v3648_v24, %v3647_v23  ;;  %v3658_v42 = vld [vmem:[%s6257_s1 + $0x20] sm:$0xff]  ;;  %v3661_v46 = vld [vmem:[%s6257_s1 + $0x38] sm:$0xff]  ;;  %v3666_v50 = vld [vmem:[%s6256_s3 + $0x28] sm:$0xff] }
   0x8   :  { %4321 = vmatpush3.bf16.msra.mxu1 %v4320_v12  ;;  %v4329_v44 = vpack.c.bf16 %v3659_v43, %v3658_v42  ;;  %v4332_v47 = vpack.c.bf16 %v3661_v46, %v3660_v45  ;;  %v3665_v49 = vld [vmem:[%s6256_s3 + $0x20] sm:$0xff]  ;;  %v3667_v54 = vld [vmem:[%s6256_s3 + $0x30] sm:$0xff]  ;;  %v3668_v55 = vld [vmem:[%s6256_s3 + $0x38] sm:$0xff] }
   0x9   :  { %4315 = vmatpush3.bf16.msra.mxu0 %v4314_v13  ;;  %4151 = vmatprep.subr.mxu1 %v4727_v8  ;;  %v4335_v52 = vpack.c.bf16 %v3666_v50, %v3665_v49  ;;  %v4338_v56 = vpack.c.bf16 %v3668_v55, %v3667_v54  ;;  %v3670_v61 = vld [vmem:[%s6259_s4 + $0x1] ss:$0 sm:$0xff]  ;;  %v3673_v5 = vld [vmem:[%s6256_s3 + $0xa8] sm:$0xff]  ;;  %v3674_v6 = vld [vmem:[%s6256_s3 + $0xb0] sm:$0xff] }
   0xa   :  { %4322 = vmatprep.subr.bf16.mxu0 %v4725_v0  ;;  %v3663_v62 = vld [vmem:[%s6260_s2 + $0x1] ss:$0 sm:$0xff]  ;;  %v3675_v9 = vld [vmem:[%s6256_s3 + $0xb8] sm:$0xff]  ;;  %v3683_v25 = vld [vmem:[%s6261_s5 + $0x8] sm:$0xff] }
   0xb   :  { %4138 = vmatmul.mubr.msk.f32.vlgmr.msra.gmra.mrb[0].mxu1 %vm62_vm1, %v4843_v14  ;;  %v3672_v4 = vld [vmem:[%s6256_s3 + $0xa0] sm:$0xff]  ;;  %v4344_v10 = vpack.c.bf16 %v3675_v9, %v3674_v6 }
   0xc   :  { %4127 = vmatmul.mubr.msk.f32.vlgmr.msra.gmra.mrb[0].mxu0 %vm62_vm1, %v4843_v14  ;;  %4153 = vmatprep.mubr.msk.f32.mxu1 %vm4726_vm0, %v4727_v8  ;;  %v4341_v7 = vpack.c.bf16 %v3673_v5, %v3672_v4  ;;  %v3698_v46 = vld [vmem:[%s6259_s4 + $0x2] ss:$0 sm:$0xff] }
   0xd   :  { %4148 = vmatprep.mubr.msk.f32.mxu0 %vm4726_vm0, %v4727_v8  ;;  %4324 = vmatpush3.bf16.msra.mxu0 %v4323_v26 }
   0xe   :  { %4325 = vmatprep.subr.bf16.mxu0 %v4725_v0 }
  0x11   :  { %4327 = vmatpush3.bf16.msra.mxu0 %v4326_v28 }
  0x12   :  { %4328 = vmatprep.subr.bf16.mxu0 %v4725_v0 }
  0x14   :  { %4149 = vmatmul.mubr.msk.f32.vlgmr.msra.gmra.mrb[2].mxu0 %vm62_vm1, %v4843_v14 }
  0x15   :  { %4169 = vmatprep.mubr.msk.f32.mxu0 %vm4726_vm0, %v4727_v8  ;;  %4330 = vmatpush3.bf16.msra.mxu0 %v4329_v44 }
  0x16   :  { %4331 = vmatprep.subr.bf16.mxu0 %v4725_v0 }
  0x19   :  { %4333 = vmatpush3.bf16.msra.mxu0 %v4332_v47 }
  0x1a   :  { %4340 = vmatprep.subr.bf16.mxu0 %v4725_v0 }
  0x1c   :  { %4170 = vmatmul.mubr.msk.f32.vlgmr.msra.gmra.mrb[4].mxu0 %vm62_vm1, %v4843_v14 }
  0x1d   :  { %4191 = vmatprep.mubr.msk.f32.mxu0 %vm4726_vm0, %v4727_v8  ;;  %4342 = vmatpush3.bf16.msra.mxu0 %v4341_v7 }
  0x1e   :  { %4343 = vmatprep.subr.bf16.mxu0 %v4725_v0 }
  0x21   :  { %4345 = vmatpush3.bf16.msra.mxu0 %v4344_v10 }
  0x22   :  { %4204 = vmatprep.subr.mxu0 %v4727_v8 }
  0x24   :  { %4192 = vmatmul.mubr.msk.f32.vlgmr.msra.gmra.mrb[6].mxu0 %vm62_vm1, %v4843_v14 }
  0x25   :  { %4206 = vmatprep.mubr.msk.f32.mxu0 %vm4726_vm0, %v4727_v8  ;;  %4205 = vmatpush3.msra.mxu0 %v3683_v25  ;;  %v3720_v25 = vld [vmem:[%s6256_s3 + $0x60] sm:$0xff] }
  0x26   :  { %4346 = vmatprep.subr.bf16.mxu0 %v4725_v0 }
  0xde   :  { %v213_v17 = vpop.f32.mrb[0].mxu1 }
  0xdf   :  { %v214_v18 = vadd.f32 %v3645_v15, %v213_v17  ;;  %v4139_v19 = vpop.f32.mrb[1].mxu1  ;;  %v132_v20 = vpop.f32.mrb[0].mxu0 }
  0xe0   :  { %v133_v21 = vadd.f32 %v3643_v16, %v132_v20  ;;  %v4128_v22 = vpop.f32.mrb[1].mxu0 }
  0xe1   :  { %4152 = vmatpush3.xpose.msk.msra.mxu1 %vm300_vm2, %v214_v18  ;;  %v3677_v22 = vld [vmem:[%s6259_s4 + $0x5] ss:$0 sm:$0xff] }
  0xe2   :  { %4156 = vmatprep.subr.mxu1 %v4727_v8 }
  0xe4   :  { %4154 = vmatmul.mubr.msk.f32.vlgmr.msra.gmra.mrb[2].mxu1 %vm300_vm2, %v133_v21 }
  0xe5   :  { %4158 = vmatprep.mubr.msk.f32.mxu1 %vm4726_vm0, %v4727_v8 }
  0xe7   :  { %v296_v38 = vpop.f32.mrb[2].mxu0 }
  0xe8   :  { %v4150_v40 = vpop.f32.mrb[3].mxu0  ;;  %v297_v41 = vadd.f32 %v3652_v39, %v296_v38  ;;  %v3688_v39 = vld [vmem:[%s6257_s1 + $0x50] sm:$0xff] }
  0xe9   :  { %v3689_v40 = vld [vmem:[%s6257_s1 + $0x58] sm:$0xff] }
  0xea   :  { %4157 = vmatpush3.msk.msra.mxu1 %vm394_vm4, %v297_v41  ;;  %v4350_v43 = vpack.c.bf16 %v3689_v40, %v3688_v39  ;;  %v3718_v39 = vld [vmem:[%s6260_s2 + $0x3] ss:$0 sm:$0xff] }
  0xeb   :  { %4334 = vmatprep.subr.bf16.mxu1 %v4725_v0 }
  0xef   :  { %v548_v57 = vpop.f32.mrb[4].mxu0 }
  0xf0   :  { %v4171_v58 = vpop.f32.mrb[5].mxu0  ;;  %v549_v3 = vadd.f32 %v3663_v62, %v548_v57  ;;  %v3700_v57 = vld [vmem:[%s6256_s3 + $0xc0] sm:$0xff] }
  0xf1   :  { %v3701_v58 = vld [vmem:[%s6256_s3 + $0xc8] sm:$0xff] }
  0xf7   :  { %v714_v21 = vpop.f32.mrb[6].mxu0 }
  0xf8   :  { %v4193_v23 = vpop.f32.mrb[7].mxu0  ;;  %v715_v24 = vadd.f32 %v3677_v22, %v714_v21  ;;  %v3715_v22 = vld [vmem:[%s6257_s1 + $0x70] sm:$0xff] }
  0xf9   :  { %v3716_v23 = vld [vmem:[%s6257_s1 + $0x78] sm:$0xff] }
 0x1b7   :  { %v373_v29 = vpop.f32.mrb[2].mxu1 }
 0x1b8   :  { %v377_v30 = vmul.f32 0.35355338, %v373_v29  ;;  %v4155_v31 = vpop.f32.mrb[3].mxu1  ;;  %v468_v29 = vld [vmem:[%s6261_s5] sm:$0xff] }
 0x1b9   :  { %v3694_v31 = vld [vmem:[%s6256_s3 + $0x48] sm:$0xff] }
 0x1ba   :  { %v379_v32 = vsel %vm378_vm3, %v377_v30, -inf }
 0x1bb   :  { %380 = vmax.xlane.f32.xlu0 %v379_v32 }
 0x248   :  { %v381_v33 = vpop.xlane.xlu0 %380 }
 0x249   :  { %v382_v34 = vsub.f32 %v377_v30, %v381_v33  ;;  %v3693_v30 = vld [vmem:[%s6256_s3 + $0x40] sm:$0xff]  ;;  %v3695_v33 = vld [vmem:[%s6256_s3 + $0x50] sm:$0xff] }
 0x24a   :  { %v4353_v32 = vpack.c.bf16 %v3694_v31, %v3693_v30 }
 0x24b   :  { %v383_v35 = vmul.f32 1.442695, %v382_v34  ;;  %v3696_v34 = vld [vmem:[%s6256_s3 + $0x58] sm:$0xff] }
 0x24d   :  { %4705 = vpow2.f32 %v383_v35  ;;  %v4356_v35 = vpack.c.bf16 %v3696_v34, %v3695_v33 }
 0x257   :  { %v4706_v36 = vpop.eup %4705 }
 0x258   :  { %v385_v37 = vsel %vm378_vm3, %v4706_v36, 0.0 }
 0x259   :  { %386 = vadd.xlane.f32.xlu0 %v385_v37  ;;  %v3687_v37 = vld [vmem:[%s6257_s1 + $0x48] sm:$0xff] }
 0x2e6   :  { %v387_v48 = vpop.xlane.xlu0 %386 }
 0x2e7   :  { %4707 = vrcp.f32 %v387_v48 }
 0x2f1   :  { %v4708_v51 = vpop.eup %4707 }
 0x2f2   :  { %v389_v53 = vmul.f32 %v4708_v51, %v4706_v36  ;;  %v3686_v36 = vld [vmem:[%s6257_s1 + $0x40] sm:$0xff] }
 0x2f3   :  { %v4347_v38 = vpack.c.bf16 %v3687_v37, %v3686_v36 }
 0x2f4   :  { %4159 = vmatmul.mubr.msk.f32.vlgmr.msra.gmra.mrb[4].mxu1 %vm390_vm5, %v389_v53  ;;  %v3691_v53 = vld [vmem:[%s6260_s2 + $0x2] ss:$0 sm:$0xff] }
 0x2f5   :  { %4336 = vmatpush3.bf16.msra.mxu1 %v4335_v52  ;;  %4180 = vmatprep.mubr.msk.f32.mxu1 %vm4726_vm0, %v4727_v8 }
 0x2f6   :  { %4337 = vmatprep.subr.bf16.mxu1 %v4725_v0 }
 0x2f9   :  { %4339 = vmatpush3.bf16.msra.mxu1 %v4338_v56 }
 0x2fa   :  { %4194 = vmatprep.subr.mxu1 %v4727_v8 }
 0x2fc   :  { %4181 = vmatmul.mubr.msk.f32.vlgmr.msra.gmra.mrb[6].mxu1 %vm62_vm1, %v4843_v14 }
 0x2fd   :  { %4196 = vmatprep.mubr.msk.f32.mxu1 %vm4726_vm0, %v4727_v8 }
 0x3c7   :  { %v464_v59 = vpop.f32.mrb[4].mxu1 }
 0x3c8   :  { %v4160_v60 = vpop.f32.mrb[5].mxu1 }
 0x3c9   :  { %v4359_v60 = vpack.c.bf16 %v3701_v58, %v3700_v57 }
 0x3cf   :  { %v631_v63 = vpop.f32.mrb[6].mxu1 }
 0x3d0   :  { %v632_v1 = vadd.f32 %v3670_v61, %v631_v63  ;;  %v4182_v2 = vpop.f32.mrb[7].mxu1  ;;  %v3703_v61 = vld [vmem:[%s6256_s3 + $0xd8] sm:$0xff] }
 0x3d2   :  { %4195 = vmatpush3.xpose.msk.msra.mxu1 %vm300_vm2, %v632_v1 }
 0x3d3   :  { %4199 = vmatprep.subr.mxu1 %v4727_v8 }
 0x3d5   :  { %4197 = vmatmul.mubr.msk.f32.vlgmr.msra.gmra.mrb[8].mxu1 %vm300_vm2, %v549_v3 }
 0x3d6   :  { %4201 = vmatprep.mubr.msk.f32.mxu1 %vm4726_vm0, %v4727_v8  ;;  %4200 = vmatpush3.msk.msra.mxu1 %vm394_vm4, %v715_v24  ;;  %v4368_v24 = vpack.c.bf16 %v3716_v23, %v3715_v22  ;;  %v2069_v23 = vld [vmem:[%s6263_s7 + $0x98] sm:$0xff] }
 0x3d7   :  { %4209 = vmatprep.subr.mxu1 %v4727_v8 }
 0x4a8   :  { %v790_v11 = vpop.f32.mrb[8].mxu1 }
 0x4a9   :  { %v794_v12 = vmul.f32 0.35355338, %v790_v11  ;;  %v4198_v13 = vpop.f32.mrb[9].mxu1  ;;  %v3705_v11 = vld [vmem:[%s6259_s4 + $0x6] ss:$0 sm:$0xff] }
 0x4ab   :  { %v795_v15 = vsel %vm378_vm3, %v794_v12, -inf }
 0x4ac   :  { %796 = vmax.xlane.f32.xlu1 %v795_v15  ;;  %v3711_v15 = vld [vmem:[%s6261_s5 + $0x10] sm:$0xff] }
 0x539   :  { %v797_v16 = vpop.xlane.xlu1 %796 }
 0x53a   :  { %v798_v17 = vsub.f32 %v794_v12, %v797_v16 }
 0x53c   :  { %v799_v18 = vmul.f32 1.442695, %v798_v17 }
 0x53e   :  { %4709 = vpow2.f32 %v799_v18 }
 0x548   :  { %v4710_v19 = vpop.eup %4709 }
 0x549   :  { %v801_v20 = vsel %vm378_vm3, %v4710_v19, 0.0 }
 0x54a   :  { %802 = vadd.xlane.f32.xlu1 %v801_v20  ;;  %v3714_v20 = vld [vmem:[%s6257_s1 + $0x68] sm:$0xff] }
 0x5d7   :  { %v803_v26 = vpop.xlane.xlu1 %802 }
 0x5d8   :  { %4711 = vrcp.f32 %v803_v26  ;;  %v3721_v26 = vld [vmem:[%s6256_s3 + $0x68] sm:$0xff] }
 0x5e2   :  { %v4712_v27 = vpop.eup %4711 }
 0x5e3   :  { %v805_v28 = vmul.f32 %v4712_v27, %v4710_v19  ;;  %v3713_v19 = vld [vmem:[%s6257_s1 + $0x60] sm:$0xff]  ;;  %v4371_v27 = vpack.c.bf16 %v3721_v26, %v3720_v25 }
 0x5e4   :  { %v4365_v21 = vpack.c.bf16 %v3714_v20, %v3713_v19  ;;  %v2051_v20 = vld [vmem:[%s6263_s7 + $0x8] sm:$0xff]  ;;  %v2066_v25 = vld [vmem:[%s6263_s7 + $0x80] sm:$0xff] }
 0x5e5   :  { %4202 = vmatmul.mubr.msk.f32.vlgmr.msra.gmra.mrb[10].mxu1 %vm390_vm5, %v805_v28  ;;  %v3722_v28 = vld [vmem:[%s6256_s3 + $0x70] sm:$0xff] }
 0x5e6   :  { %4210 = vmatpush3.msra.mxu1 %v468_v29  ;;  %4211 = vmatprep.mubr.msk.f32.mxu1 %vm4726_vm0, %v4727_v8  ;;  %v3723_v29 = vld [vmem:[%s6256_s3 + $0x78] sm:$0xff] }
 0x5e7   :  { %4352 = vmatprep.subr.bf16.mxu1 %v4725_v0 }
 0x5e9   :  { %4212 = vmatmul.mubr.msk.f32.vlgmr.msra.gmra.mrb[12].mxu1 %vm300_vm2, %v464_v59  ;;  %v3702_v59 = vld [vmem:[%s6256_s3 + $0xd0] sm:$0xff] }
 0x5ea   :  { %4354 = vmatpush3.bf16.msra.mxu1 %v4353_v32  ;;  %4233 = vmatprep.mubr.msk.f32.mxu1 %vm4726_vm0, %v4727_v8  ;;  %v4362_v62 = vpack.c.bf16 %v3703_v61, %v3702_v59  ;;  %v4374_v32 = vpack.c.bf16 %v3723_v29, %v3722_v28  ;;  %v3732_v59 = vld [vmem:[%s6259_s4 + $0x7] ss:$0 sm:$0xff]  ;;  %v2052_v28 = vld [vmem:[%s6263_s7 + $0x10] sm:$0xff] }
 0x5eb   :  { %4355 = vmatprep.subr.bf16.mxu1 %v4725_v0  ;;  %v2068_v29 = vld [vmem:[%s6263_s7 + $0x90] sm:$0xff] }
 0x5ee   :  { %4357 = vmatpush3.bf16.msra.mxu1 %v4356_v35 }
 0x5ef   :  { %4247 = vmatprep.subr.mxu1 %v4727_v8 }
 0x5f1   :  { %4234 = vmatmul.mubr.msk.f32.vlgmr.msra.gmra.mrb[14].mxu1 %vm62_vm1, %v4843_v14 }
 0x5f2   :  { %4249 = vmatprep.mubr.msk.f32.mxu1 %vm4726_vm0, %v4727_v8 }
 0x6b8   :  { %v878_v41 = vpop.f32.mrb[10].mxu1 }
 0x6b9   :  { %v4203_v42 = vpop.f32.mrb[11].mxu1  ;;  %4207 = vmatmul.mubr.msk.f32.vlgmr.msra.gmra.mrb[8].mxu0 %vm300_vm2, %v878_v41 }
 0x6ba   :  { %4348 = vmatpush3.bf16.msra.mxu0 %v4347_v38  ;;  %4222 = vmatprep.mubr.msk.f32.mxu0 %vm4726_vm0, %v4727_v8  ;;  %v3725_v38 = vld [vmem:[%s6259_s4 + $0x3] ss:$0 sm:$0xff] }
 0x6bb   :  { %4349 = vmatprep.subr.bf16.mxu0 %v4725_v0 }
 0x6bc   :  { %v1026_v44 = vpop.f32.mrb[12].mxu1 }
 0x6bd   :  { %v4213_v45 = vpop.f32.mrb[13].mxu1 }
 0x6be   :  { %4351 = vmatpush3.bf16.msra.mxu0 %v4350_v43  ;;  %v3728_v45 = vld [vmem:[%s6256_s3 + $0xe8] sm:$0xff] }
 0x6bf   :  { %4358 = vmatprep.subr.bf16.mxu0 %v4725_v0 }
 0x6c1   :  { %4223 = vmatmul.mubr.msk.f32.vlgmr.msra.gmra.mrb[10].mxu0 %vm62_vm1, %v4843_v14 }
 0x6c2   :  { %4244 = vmatprep.mubr.msk.f32.mxu0 %vm4726_vm0, %v4727_v8  ;;  %4360 = vmatpush3.bf16.msra.mxu0 %v4359_v60 }
 0x6c3   :  { %4361 = vmatprep.subr.bf16.mxu0 %v4725_v0 }
 0x6c4   :  { %v1192_v47 = vpop.f32.mrb[14].mxu1 }
 0x6c5   :  { %v1193_v48 = vadd.f32 %v3698_v46, %v1192_v47  ;;  %v4235_v49 = vpop.f32.mrb[15].mxu1  ;;  %v3729_v46 = vld [vmem:[%s6256_s3 + $0xf0] sm:$0xff] }
 0x6c6   :  { %4363 = vmatpush3.bf16.msra.mxu0 %v4362_v62  ;;  %v3738_v62 = vld [vmem:[%s6261_s5 + $0x18] sm:$0xff] }
 0x6c7   :  { %4248 = vmatpush3.xpose.msk.msra.mxu1 %vm300_vm2, %v1193_v48  ;;  %4257 = vmatprep.subr.mxu0 %v4727_v8  ;;  %v3730_v48 = vld [vmem:[%s6256_s3 + $0xf8] sm:$0xff] }
 0x6c8   :  { %4252 = vmatprep.subr.mxu1 %v4727_v8  ;;  %v4380_v49 = vpack.c.bf16 %v3730_v48, %v3729_v46 }
 0x6c9   :  { %4245 = vmatmul.mubr.msk.f32.vlgmr.msra.gmra.mrb[12].mxu0 %vm62_vm1, %v4843_v14 }
 0x6ca   :  { %4259 = vmatprep.mubr.msk.f32.mxu0 %vm4726_vm0, %v4727_v8  ;;  %4258 = vmatpush3.msra.mxu0 %v3711_v15 }
 0x6cb   :  { %4370 = vmatprep.subr.bf16.mxu0 %v4725_v0 }
 0x78c   :  { %v953_v50 = vpop.f32.mrb[8].mxu0 }
 0x78d   :  { %v5024_v51 = vadd.f32 %v1026_v44, %v953_v50  ;;  %v4208_v52 = vpop.f32.mrb[9].mxu0  ;;  %v3727_v44 = vld [vmem:[%s6256_s3 + $0xe0] sm:$0xff] }
 0x78e   :  { %v4377_v47 = vpack.c.bf16 %v3728_v45, %v3727_v44  ;;  %v2071_v44 = vld [vmem:[%s6263_s7 + $0xa8] sm:$0xff]  ;;  %v2057_v45 = vld [vmem:[%s6263_s7 + $0x38] sm:$0xff] }
 0x794   :  { %v1109_v54 = vpop.f32.mrb[10].mxu0 }
 0x795   :  { %v1110_v55 = vadd.f32 %v3691_v53, %v1109_v54  ;;  %v4224_v56 = vpop.f32.mrb[11].mxu0 }
 0x797   :  { %4250 = vmatmul.mubr.msk.f32.vlgmr.msra.gmra.mrb[16].mxu1 %vm300_vm2, %v1110_v55 }
 0x798   :  { %4254 = vmatprep.mubr.msk.f32.mxu1 %vm4726_vm0, %v4727_v8 }
 0x79c   :  { %v1275_v10 = vpop.f32.mrb[12].mxu0 }
 0x79d   :  { %v4246_v12 = vpop.f32.mrb[13].mxu0  ;;  %v1276_v13 = vadd.f32 %v3705_v11, %v1275_v10 }
 0x79f   :  { %4253 = vmatpush3.msk.msra.mxu1 %vm394_vm4, %v1276_v13 }
 0x7a0   :  { %4364 = vmatprep.subr.bf16.mxu1 %v4725_v0 }
 0x86a   :  { %v1351_v63 = vpop.f32.mrb[16].mxu1 }
 0x86b   :  { %v1355_v1 = vmul.f32 0.35355338, %v1351_v63  ;;  %v4251_v2 = vpop.f32.mrb[17].mxu1 }
 0x86d   :  { %v1356_v3 = vsel %vm378_vm3, %v1355_v1, -inf }
 0x86e   :  { %1357 = vmax.xlane.f32.xlu0 %v1356_v3 }
 0x8fb   :  { %v1358_v4 = vpop.xlane.xlu0 %1357 }
 0x8fc   :  { %v1359_v5 = vsub.f32 %v1355_v1, %v1358_v4 }
 0x8fe   :  { %v1360_v6 = vmul.f32 1.442695, %v1359_v5 }
 0x900   :  { %4713 = vpow2.f32 %v1360_v6  ;;  %v3740_v6 = vld [vmem:[%s6262_s6] ss:$0 sm:$0xff] }
 0x90a   :  { %v4714_v7 = vpop.eup %4713 }
 0x90b   :  { %v1362_v9 = vsel %vm378_vm3, %v4714_v7, 0.0 }
 0x90c   :  { %1363 = vadd.xlane.f32.xlu1 %v1362_v9 }
 0x999   :  { %v1364_v16 = vpop.xlane.xlu1 %1363 }
 0x99a   :  { %4715 = vrcp.f32 %v1364_v16 }
 0x9a4   :  { %v4716_v17 = vpop.eup %4715 }
 0x9a5   :  { %v1366_v18 = vmul.f32 %v4716_v17, %v4714_v7 }
 0x9a7   :  { %4255 = vmatmul.mubr.msk.f32.vlgmr.msra.gmra.mrb[18].mxu1 %vm390_vm5, %v1366_v18 }
 0x9a8   :  { %4270 = vmatprep.mubr.msk.f32.mxu1 %vm4726_vm0, %v4727_v8  ;;  %4366 = vmatpush3.bf16.msra.mxu1 %v4365_v21  ;;  %v2067_v21 = vld [vmem:[%s6263_s7 + $0x88] sm:$0xff] }
 0x9a9   :  { %4367 = vmatprep.subr.bf16.mxu1 %v4725_v0  ;;  %v4382_v22 = vpack.c.bf16 %v2067_v21, %v2051_v20 }
 0x9ac   :  { %4369 = vmatpush3.bf16.msra.mxu1 %v4368_v24  ;;  %v2050_v24 = vld [vmem:[%s6263_s7] sm:$0xff] }
 0x9ad   :  { %4376 = vmatprep.subr.bf16.mxu1 %v4725_v0 }
 0x9af   :  { %4271 = vmatmul.mubr.msk.f32.vlgmr.msra.gmra.mrb[20].mxu1 %vm62_vm1, %v4843_v14 }
 0x9b0   :  { %4292 = vmatprep.mubr.msk.f32.mxu1 %vm4726_vm0, %v4727_v8  ;;  %4378 = vmatpush3.bf16.msra.mxu1 %v4377_v47  ;;  %v2073_v47 = vld [vmem:[%s6263_s7 + $0xb8] sm:$0xff] }
 0x9b1   :  { %4379 = vmatprep.subr.bf16.mxu1 %v4725_v0  ;;  %v4406_v48 = vpack.c.bf16 %v2073_v47, %v2057_v45  ;;  %v2064_v45 = vld [vmem:[%s6263_s7 + $0x70] sm:$0xff]  ;;  %v2095_v47 = vld [vmem:[%s6263_s7 + $0x168] sm:$0xff] }
 0x9b4   :  { %4381 = vmatpush3.bf16.msra.mxu1 %v4380_v49 }
 0x9b5   :  { %4305 = vmatprep.subr.mxu1 %v4727_v8 }
 0x9b7   :  { %4293 = vmatmul.mubr.msk.f32.vlgmr.msra.gmra.mrb[22].mxu1 %vm62_vm1, %v4843_v14 }
 0x9b8   :  { %4307 = vmatprep.mubr.msk.f32.mxu1 %vm4726_vm0, %v4727_v8  ;;  %4306 = vmatpush3.msra.mxu1 %v3738_v62  ;;  %v2105_v62 = vld [vmem:[%s6263_s7 + $0x1b8] sm:$0xff] }
 0xa7a   :  { %v1439_v30 = vpop.f32.mrb[18].mxu1 }
 0xa7b   :  { %v4256_v31 = vpop.f32.mrb[19].mxu1  ;;  %4260 = vmatmul.mubr.msk.f32.vlgmr.msra.gmra.mrb[14].mxu0 %vm300_vm2, %v1439_v30  ;;  %v4392_v30 = vpack.c.bf16 %v2068_v29, %v2052_v28  ;;  %v2090_v29 = vld [vmem:[%s6263_s7 + $0x140] sm:$0xff] }
 0xa7c   :  { %4372 = vmatpush3.bf16.msra.mxu0 %v4371_v27  ;;  %4281 = vmatprep.mubr.msk.f32.mxu0 %vm4726_vm0, %v4727_v8  ;;  %v4384_v27 = vpack.c.bf16 %v2066_v25, %v2050_v24  ;;  %v2083_v31 = vld [vmem:[%s6263_s7 + $0x108] sm:$0xff]  ;;  %v2093_v25 = vld [vmem:[%s6263_s7 + $0x158] sm:$0xff] }
 0xa7d   :  { %4373 = vmatprep.subr.bf16.mxu0 %v4725_v0  ;;  %v2107_v24 = vld [vmem:[%s6263_s7 + $0x1c8] sm:$0xff] }
 0xa80   :  { %4375 = vmatpush3.bf16.msra.mxu0 %v4374_v32  ;;  %v2099_v32 = vld [vmem:[%s6263_s7 + $0x188] sm:$0xff] }
 0xa81   :  { %4295 = vmatprep.subr.mxu0 %v4727_v8 }
 0xa82   :  { %v1598_v33 = vpop.f32.mrb[20].mxu1 }
 0xa83   :  { %4282 = vmatmul.mubr.msk.f32.vlgmr.msra.gmra.mrb[16].mxu0 %vm62_vm1, %v4843_v14  ;;  %v4272_v34 = vpop.f32.mrb[21].mxu1  ;;  %v1599_v43 = vadd.f32 %v3718_v39, %v1598_v33  ;;  %v2085_v33 = vld [vmem:[%s6263_s7 + $0x118] sm:$0xff] }
 0xa84   :  { %4297 = vmatprep.mubr.msk.f32.mxu0 %vm4726_vm0, %v4727_v8  ;;  %v4386_v34 = vpack.c.bf16 %v2099_v32, %v2083_v31 }
 0xa8a   :  { %v1764_v58 = vpop.f32.mrb[22].mxu1 }
 0xa8b   :  { %v4294_v60 = vpop.f32.mrb[23].mxu1  ;;  %v1765_v61 = vadd.f32 %v3732_v59, %v1764_v58  ;;  %v2072_v58 = vld [vmem:[%s6263_s7 + $0xb0] sm:$0xff]  ;;  %v2087_v59 = vld [vmem:[%s6263_s7 + $0x128] sm:$0xff] }
 0xa8c   :  { %v2103_v60 = vld [vmem:[%s6263_s7 + $0x1a8] sm:$0xff] }
 0xb4e   :  { %v1514_v35 = vpop.f32.mrb[14].mxu0 }
 0xb4f   :  { %v1518_v36 = vadd.f32 %v1514_v35, %v5024_v51  ;;  %v4261_v37 = vpop.f32.mrb[15].mxu0  ;;  %v2101_v35 = vld [vmem:[%s6263_s7 + $0x198] sm:$0xff] }
 0xb50   :  { %v2098_v37 = vld [vmem:[%s6263_s7 + $0x180] sm:$0xff] }
 0xb56   :  { %v1681_v40 = vpop.f32.mrb[16].mxu0 }
 0xb57   :  { %v1682_v41 = vadd.f32 %v3725_v38, %v1681_v40  ;;  %v4283_v42 = vpop.f32.mrb[17].mxu0  ;;  %v4394_v38 = vpack.c.bf16 %v2101_v35, %v2085_v33  ;;  %v2084_v40 = vld [vmem:[%s6263_s7 + $0x110] sm:$0xff]  ;;  %v2063_v35 = vld [vmem:[%s6263_s7 + $0x68] sm:$0xff] }
 0xb58   :  { %v2092_v33 = vld [vmem:[%s6263_s7 + $0x150] sm:$0xff] }
 0xb59   :  { %4296 = vmatpush3.xpose.msk.msra.mxu0 %vm300_vm2, %v1682_v41  ;;  %v2100_v41 = vld [vmem:[%s6263_s7 + $0x190] sm:$0xff] }
 0xb5a   :  { %4300 = vmatprep.subr.mxu0 %v4727_v8  ;;  %v4396_v42 = vpack.c.bf16 %v2100_v41, %v2084_v40  ;;  %v2062_v41 = vld [vmem:[%s6263_s7 + $0x60] sm:$0xff] }
 0xb5c   :  { %4298 = vmatmul.mubr.msk.f32.vlgmr.msra.gmra.mrb[18].mxu0 %vm300_vm2, %v1599_v43  ;;  %v2055_v43 = vld [vmem:[%s6263_s7 + $0x28] sm:$0xff] }
 0xb5d   :  { %4302 = vmatprep.mubr.msk.f32.mxu0 %vm4726_vm0, %v4727_v8  ;;  %4301 = vmatpush3.msk.msra.mxu0 %vm394_vm4, %v1765_v61  ;;  %v4398_v46 = vpack.c.bf16 %v2071_v44, %v2055_v43  ;;  %v2089_v61 = vld [vmem:[%s6263_s7 + $0x138] sm:$0xff] }
 0xb5e   :  { %4383 = vmatprep.subr.bf16.mxu0 %v4382_v22  ;;  %v2076_v22 = vld [vmem:[%s6263_s7 + $0xd0] sm:$0xff] }
 0xc2f   :  { %v1840_v50 = vpop.f32.mrb[18].mxu0 }
 0xc30   :  { %v1844_v51 = vmul.f32 0.35355338, %v1840_v50  ;;  %v4299_v52 = vpop.f32.mrb[19].mxu0 }
 0xc31   :  { %v3741_v52 = vld [vmem:[%s6264_s11] ss:$0 sm:$0xff] }
 0xc32   :  { %v1845_v53 = vsel %vm378_vm3, %v1844_v51, -inf }
 0xc33   :  { %1846 = vmax.xlane.f32.xlu0 %v1845_v53 }
 0xcc0   :  { %v1847_v54 = vpop.xlane.xlu0 %1846 }
 0xcc1   :  { %v1848_v55 = vsub.f32 %v1844_v51, %v1847_v54  ;;  %v3742_v54 = vld [vmem:[%s6265_s12] ss:$0 sm:$0xff] }
 0xcc3   :  { %v1849_v56 = vmul.f32 1.442695, %v1848_v55  ;;  %v2054_v55 = vld [vmem:[%s6263_s7 + $0x20] sm:$0xff] }
 0xcc5   :  { %4717 = vpow2.f32 %v1849_v56  ;;  %v2070_v56 = vld [vmem:[%s6263_s7 + $0xa0] sm:$0xff] }
 0xccf   :  { %v4718_v0 = vpop.eup %4717 }
 0xcd0   :  { %v1851_v57 = vsel %vm378_vm3, %v4718_v0, 0.0 }
 0xcd1   :  { %1852 = vadd.xlane.f32.xlu1 %v1851_v57  ;;  %v2056_v57 = vld [vmem:[%s6263_s7 + $0x30] sm:$0xff] }
 0xd5e   :  { %v1853_v63 = vpop.xlane.xlu1 %1852 }
 0xd5f   :  { %4719 = vrcp.f32 %v1853_v63 }
 0xd69   :  { %v4720_v1 = vpop.eup %4719 }
 0xd6a   :  { %v1855_v2 = vmul.f32 %v4720_v1, %v4718_v0  ;;  %v4400_v1 = vpack.c.bf16 %v2070_v56, %v2054_v55 }
 0xd6c   :  { %4303 = vmatmul.mubr.msk.f32.vlgmr.msra.gmra.mrb[20].mxu0 %vm390_vm5, %v1855_v2  ;;  %v4408_v2 = vpack.c.bf16 %v2072_v58, %v2056_v57  ;;  %v2112_v57 = vld [vmem:[%s6263_s7 + $0x1f0] sm:$0xff]  ;;  %v2801_v58 = vld [vmem:[%s6266_s9 + $0x80] sm:$0xff] }
 0xd6d   :  { %2265 = vmatprep.mubr.f32.mxu0 %v4727_v8  ;;  %4385 = vmatpush1.bf16.msra.mxu0 %v4384_v27 }
 0xd6e   :  { %4387 = vmatprep.subr.bf16.mxu0 %v4386_v34  ;;  %v2108_v34 = vld [vmem:[%s6263_s7 + $0x1d0] sm:$0xff] }
 0xd6f   :  { %v4428_v40 = vpack.c.bf16 %v2108_v34, %v2092_v33  ;;  %v2808_v33 = vld [vmem:[%s6266_s9 + $0xb8] sm:$0xff]  ;;  %v2839_v34 = vld [vmem:[%s6266_s9 + $0x1b0] sm:$0xff] }
 0xe3f   :  { %v1928_v3 = vpop.f32.mrb[20].mxu0 }
 0xe40   :  { %v4304_v4 = vpop.f32.mrb[21].mxu0  ;;  %4308 = vmatmul.mubr.msk.f32.vlgmr.msra.gmra.mrb[24].mxu1 %vm300_vm2, %v1928_v3  ;;  %v2086_v3 = vld [vmem:[%s6263_s7 + $0x120] sm:$0xff] }
 0xe41   :  { %2336 = vmatprep.mubr.f32.mxu1 %v4727_v8  ;;  %v2102_v4 = vld [vmem:[%s6263_s7 + $0x1a0] sm:$0xff] }
 0xf13   :  { %v2003_v5 = vpop.f32.mrb[24].mxu1 }
 0xf14   :  { %v2007_v7 = vadd.f32 %v2003_v5, %v1518_v36  ;;  %v4309_v9 = vpop.f32.mrb[25].mxu1  ;;  %v2082_v36 = vld [vmem:[%s6263_s7 + $0x100] sm:$0xff] }
 0xf15   :  { %v4388_v39 = vpack.c.bf16 %v2098_v37, %v2082_v36  ;;  %v2088_v9 = vld [vmem:[%s6263_s7 + $0x130] sm:$0xff]  ;;  %v2079_v36 = vld [vmem:[%s6263_s7 + $0xe8] sm:$0xff]  ;;  %v2065_v37 = vld [vmem:[%s6263_s7 + $0x78] sm:$0xff] }
 0xf16   :  { %v2015_v10 = vadd.f32 %v3740_v6, %v2007_v7  ;;  %v4402_v6 = vpack.c.bf16 %v2103_v60, %v2087_v59  ;;  %v4410_v7 = vpack.c.bf16 %v2105_v62, %v2089_v61  ;;  %v4430_v43 = vpack.c.bf16 %v2079_v36, %v2063_v35  ;;  %v2802_v59 = vld [vmem:[%s6266_s9 + $0x88] sm:$0xff]  ;;  %v2833_v60 = vld [vmem:[%s6266_s9 + $0x180] sm:$0xff]  ;;  %v2840_v35 = vld [vmem:[%s6266_s9 + $0x1b8] sm:$0xff] }
 0xf17   :  { %4389 = vmatpush1.bf16.msra.mxu0 %v4388_v39  ;;  %v2834_v61 = vld [vmem:[%s6266_s9 + $0x188] sm:$0xff] }
 0xf18   :  { %2017 = vst.msk [vmem:[#allocation2] sm:$0x3] %vm2016_vm6, %v2015_v10  ;;  %4399 = vmatprep.subr.bf16.mxu0 %v4398_v46  ;;  %v2104_v10 = vld [vmem:[%s6263_s7 + $0x1b0] sm:$0xff] }
 0xf19   :  { %v2080_v46 = vld [vmem:[%s6263_s7 + $0xf0] sm:$0xff] }
 0xf1f   :  { %v2018_v11 = vld [vmem:[#allocation2] sm:$0x3] }
 0xf20   :  { %v2019_v12 = vadd.f32 %v2018_v11, %v4843_v14  ;;  %v2053_v14 = vld [vmem:[%s6263_s7 + $0x18] sm:$0xff]  ;;  %v2059_v11 = vld [vmem:[%s6263_s7 + $0x48] sm:$0xff] }
 0xf21   :  { %v4390_v26 = vpack.c.bf16 %v2069_v23, %v2053_v14  ;;  %v2060_v14 = vld [vmem:[%s6263_s7 + $0x50] sm:$0xff]  ;;  %v2091_v23 = vld [vmem:[%s6263_s7 + $0x148] sm:$0xff] }
 0xf22   :  { %v2020_v13 = vsel %vm2016_vm6, %v2019_v12, 0.0  ;;  %v4424_v28 = vpack.c.bf16 %v2076_v22, %v2060_v14  ;;  %v4418_v31 = vpack.c.bf16 %v2107_v24, %v2091_v23  ;;  %v2806_v14 = vld [vmem:[%s6266_s9 + $0xa8] sm:$0xff]  ;;  %v2837_v22 = vld [vmem:[%s6266_s9 + $0x1a0] sm:$0xff] }
 0xf23   :  { %2021 = vadd.xlane.f32.xlu0 %v2020_v13  ;;  %4391 = vmatprep.subr.bf16.mxu1 %v4390_v26  ;;  %v2061_v13 = vld [vmem:[%s6263_s7 + $0x58] sm:$0xff]  ;;  %v2838_v23 = vld [vmem:[%s6266_s9 + $0x1a8] sm:$0xff] }
 0xf24   :  { %4393 = vmatpush1.bf16.msra.mxu1 %v4392_v30  ;;  %v2109_v26 = vld [vmem:[%s6263_s7 + $0x1d8] sm:$0xff]  ;;  %v2106_v30 = vld [vmem:[%s6263_s7 + $0x1c0] sm:$0xff] }
 0xf25   :  { %4395 = vmatprep.subr.bf16.mxu1 %v4394_v38  ;;  %v4426_v32 = vpack.c.bf16 %v2109_v26, %v2093_v25  ;;  %v2081_v38 = vld [vmem:[%s6263_s7 + $0xf8] sm:$0xff]  ;;  %v4420_v39 = vpack.c.bf16 %v2106_v30, %v2090_v29  ;;  %v2789_v26 = vld [vmem:[%s6266_s9 + $0x20] sm:$0xff]  ;;  %v4486_v29 = vpack.c.bf16 %v2838_v23, %v2837_v22 }
 0xf26   :  { %v4438_v44 = vpack.c.bf16 %v2081_v38, %v2065_v37  ;;  %v2821_v30 = vld [vmem:[%s6266_s9 + $0x120] sm:$0xff]  ;;  %v2791_v38 = vld [vmem:[%s6266_s9 + $0x30] sm:$0xff]  ;;  %v2848_v23 = vld [vmem:[%s6266_s9 + $0x1f8] sm:$0xff] }
 0xf28   :  { %4397 = vmatpush1.bf16.msra.mxu1 %v4396_v42  ;;  %v2078_v42 = vld [vmem:[%s6263_s7 + $0xe0] sm:$0xff] }
 0xf29   :  { %4407 = vmatprep.subr.bf16.mxu1 %v4406_v48  ;;  %v2111_v48 = vld [vmem:[%s6263_s7 + $0x1e8] sm:$0xff] }
 0xf2a   :  { %v4434_v55 = vpack.c.bf16 %v2111_v48, %v2095_v47  ;;  %v2842_v47 = vld [vmem:[%s6266_s9 + $0x1c8] sm:$0xff] }
 0xfb0   :  { %v2022_v15 = vpop.xlane.xlu0 %2021 }
 0xfb1   :  { %v2024_v16 = vmul.f32 0.03125, %v2022_v15  ;;  %v2077_v15 = vld [vmem:[%s6263_s7 + $0xd8] sm:$0xff] }
 0xfb2   :  { %v4422_v21 = vpack.c.bf16 %v2077_v15, %v2061_v13 }
 0xfb3   :  { %v2025_v17 = vsub.f32 %v2019_v12, %v2024_v16  ;;  %v2075_v12 = vld [vmem:[%s6263_s7 + $0xc8] sm:$0xff]  ;;  %v4404_v16 = vpack.c.bf16 %v2102_v4, %v2086_v3  ;;  %v4446_v3 = vpack.c.bf16 %v2802_v59, %v2801_v58  ;;  %v4478_v4 = vpack.c.bf16 %v2834_v61, %v2833_v60  ;;  %v2844_v58 = vld [vmem:[%s6266_s9 + $0x1d8] sm:$0xff]  ;;  %v2795_v61 = vld [vmem:[%s6266_s9 + $0x50] sm:$0xff] }
 0xfb4   :  { %v4414_v20 = vpack.c.bf16 %v2075_v12, %v2059_v11  ;;  %v2835_v11 = vld [vmem:[%s6266_s9 + $0x190] sm:$0xff]  ;;  %v2836_v12 = vld [vmem:[%s6266_s9 + $0x198] sm:$0xff] }
 0xfb5   :  { %v2026_v18 = vmul.f32 %v2025_v17, %v2025_v17 }
 0xfb7   :  { %v2027_v19 = vsel %vm2016_vm6, %v2026_v18, 0.0  ;;  %v2058_v18 = vld [vmem:[%s6263_s7 + $0x40] sm:$0xff] }
 0xfb8   :  { %2028 = vadd.xlane.f32.xlu1 %v2027_v19  ;;  %v2074_v19 = vld [vmem:[%s6263_s7 + $0xc0] sm:$0xff] }
 0xfb9   :  { %v4416_v27 = vpack.c.bf16 %v2074_v19, %v2058_v18  ;;  %v4482_v18 = vpack.c.bf16 %v2836_v12, %v2835_v11  ;;  %v2819_v19 = vld [vmem:[%s6266_s9 + $0x110] sm:$0xff]  ;;  %v2797_v12 = vld [vmem:[%s6266_s9 + $0x60] sm:$0xff] }
0x1045   :  { %v2029_v49 = vpop.xlane.xlu1 %2028 }
0x1046   :  { %v2030_v50 = vmul.f32 0.03125, %v2029_v49  ;;  %v2097_v49 = vld [vmem:[%s6263_s7 + $0x178] sm:$0xff] }
0x1048   :  { %v2031_v51 = vadd.f32 1e-05, %v2030_v50  ;;  %v2113_v50 = vld [vmem:[%s6263_s7 + $0x1f8] sm:$0xff] }
0x1049   :  { %v4442_v56 = vpack.c.bf16 %v2113_v50, %v2097_v49  ;;  %v2793_v50 = vld [vmem:[%s6266_s9 + $0x40] sm:$0xff] }
0x104a   :  { %4721 = vrsqrt.f32 %v2031_v51  ;;  %v4432_v51 = vpack.c.bf16 %v2078_v42, %v2062_v41  ;;  %v4490_v41 = vpack.c.bf16 %v2840_v35, %v2839_v34  ;;  %v2823_v42 = vld [vmem:[%s6266_s9 + $0x130] sm:$0xff]  ;;  %v2898_v35 = vld [vmem:[%s6266_s9 + $0x388] sm:$0xff] }
0x1054   :  { %v4722_v53 = vpop.eup %4721 }
0x1055   :  { %v2033_v0 = vmul.f32 %v4722_v53, %v2025_v17  ;;  %v4412_v17 = vpack.c.bf16 %v2104_v10, %v2088_v9  ;;  %v2094_v53 = vld [vmem:[%s6263_s7 + $0x160] sm:$0xff]  ;;  %v2803_v9 = vld [vmem:[%s6266_s9 + $0x90] sm:$0xff]  ;;  %v2804_v10 = vld [vmem:[%s6266_s9 + $0x98] sm:$0xff] }
0x1057   :  { %v2041_v63 = vmul.f32 %v3741_v52, %v2033_v0  ;;  %v4440_v52 = vpack.c.bf16 %v2080_v46, %v2064_v45  ;;  %v2096_v0 = vld [vmem:[%s6263_s7 + $0x170] sm:$0xff]  ;;  %v2810_v45 = vld [vmem:[%s6266_s9 + $0xc8] sm:$0xff]  ;;  %v2841_v46 = vld [vmem:[%s6266_s9 + $0x1c0] sm:$0xff] }
0x1059   :  { %v5249_v5 = vadd.f32 %v3742_v54, %v2041_v63  ;;  %v2110_v54 = vld [vmem:[%s6263_s7 + $0x1e0] sm:$0xff]  ;;  %v4444_v63 = vpack.c.bf16 %v2112_v57, %v2096_v0  ;;  %v2812_v0 = vld [vmem:[%s6266_s9 + $0xd8] sm:$0xff]  ;;  %v2843_v57 = vld [vmem:[%s6266_s9 + $0x1d0] sm:$0xff] }
0x105a   :  { %v4436_v62 = vpack.c.bf16 %v2110_v54, %v2094_v53  ;;  %v4494_v53 = vpack.c.bf16 %v2842_v47, %v2841_v46  ;;  %v2825_v54 = vld [vmem:[%s6266_s9 + $0x140] sm:$0xff] }
0x105b   :  { %3743 = vmatmul.mubr.msk.f32.vlgmr.msra.gmra.mrb[22].mxu0 %vm62_vm1, %v5249_v5  ;;  %3744 = vmatmul.mubr.msk.f32.vlgmr.msra.gmra.mrb[26].mxu1 %vm62_vm1, %v5249_v5 }
0x105c   :  { %4401 = vmatpush1.bf16.msra.mxu0 %v4400_v1  ;;  %4409 = vmatpush1.bf16.msra.mxu1 %v4408_v2  ;;  %v2785_v1 = vld [vmem:[%s6266_s9] sm:$0xff]  ;;  %v2786_v2 = vld [vmem:[%s6266_s9 + $0x8] sm:$0xff] }
0x105d   :  { %4403 = vmatprep.subr.bf16.mxu0 %v4402_v6  ;;  %4411 = vmatprep.subr.bf16.mxu1 %v4410_v7  ;;  %v2817_v6 = vld [vmem:[%s6266_s9 + $0x100] sm:$0xff]  ;;  %v2818_v7 = vld [vmem:[%s6266_s9 + $0x108] sm:$0xff]  ;;  %v4448_v13 = vpack.c.bf16 %v2786_v2, %v2785_v1  ;;  %v4498_v1 = vpack.c.bf16 %v2844_v58, %v2843_v57  ;;  %v2827_v2 = vld [vmem:[%s6266_s9 + $0x150] sm:$0xff] }
0x105e   :  { %2407 = vmatprep.mubr.f32.mxu0 %v4727_v8  ;;  %2478 = vmatprep.mubr.f32.mxu1 %v4727_v8  ;;  %v4480_v15 = vpack.c.bf16 %v2818_v7, %v2817_v6  ;;  %v2814_v6 = vld [vmem:[%s6266_s9 + $0xe8] sm:$0xff]  ;;  %v2845_v7 = vld [vmem:[%s6266_s9 + $0x1e0] sm:$0xff] }
0x105f   :  { %v2881_v58 = vld [vmem:[%s6266_s9 + $0x300] sm:$0xff] }
0x1060   :  { %4405 = vmatpush1.bf16.msra.mxu0 %v4404_v16  ;;  %4413 = vmatpush1.bf16.msra.mxu1 %v4412_v17  ;;  %v2788_v16 = vld [vmem:[%s6266_s9 + $0x18] sm:$0xff]  ;;  %v4450_v17 = vpack.c.bf16 %v2804_v10, %v2803_v9  ;;  %v2846_v9 = vld [vmem:[%s6266_s9 + $0x1e8] sm:$0xff] }
0x1061   :  { %4415 = vmatprep.subr.bf16.mxu0 %v4414_v20  ;;  %4423 = vmatprep.subr.bf16.mxu1 %v4422_v21  ;;  %v2820_v20 = vld [vmem:[%s6266_s9 + $0x118] sm:$0xff]  ;;  %v2805_v21 = vld [vmem:[%s6266_s9 + $0xa0] sm:$0xff] }
0x1062   :  { %v4484_v25 = vpack.c.bf16 %v2820_v20, %v2819_v19  ;;  %v2815_v20 = vld [vmem:[%s6266_s9 + $0xf0] sm:$0xff] }
0x1063   :  { %3745 = vmatmul.mubr.msk.f32.vlgmr.msra.gmra.mrb[24].mxu0 %vm62_vm1, %v5249_v5  ;;  %3746 = vmatmul.mubr.msk.f32.vlgmr.msra.gmra.mrb[28].mxu1 %vm62_vm1, %v5249_v5 }
0x1064   :  { %4417 = vmatpush1.bf16.msra.mxu0 %v4416_v27  ;;  %4425 = vmatpush1.bf16.msra.mxu1 %v4424_v28  ;;  %v2790_v27 = vld [vmem:[%s6266_s9 + $0x28] sm:$0xff]  ;;  %v4454_v28 = vpack.c.bf16 %v2806_v14, %v2805_v21  ;;  %v2816_v21 = vld [vmem:[%s6266_s9 + $0xf8] sm:$0xff]  ;;  %v2847_v14 = vld [vmem:[%s6266_s9 + $0x1f0] sm:$0xff] }
0x1065   :  { %4419 = vmatprep.subr.bf16.mxu0 %v4418_v31  ;;  %4427 = vmatprep.subr.bf16.mxu1 %v4426_v32  ;;  %v2822_v31 = vld [vmem:[%s6266_s9 + $0x128] sm:$0xff]  ;;  %v2807_v32 = vld [vmem:[%s6266_s9 + $0xb0] sm:$0xff]  ;;  %v4456_v36 = vpack.c.bf16 %v2790_v27, %v2789_v26  ;;  %v4474_v22 = vpack.c.bf16 %v2816_v21, %v2815_v20  ;;  %v4506_v26 = vpack.c.bf16 %v2848_v23, %v2847_v14 }
0x1066   :  { %2549 = vmatprep.mubr.f32.mxu0 %v4727_v8  ;;  %2620 = vmatprep.mubr.f32.mxu1 %v4727_v8  ;;  %v4488_v37 = vpack.c.bf16 %v2822_v31, %v2821_v30  ;;  %v2865_v31 = vld [vmem:[%s6266_s9 + $0x280] sm:$0xff]  ;;  %v2870_v14 = vld [vmem:[%s6266_s9 + $0x2a8] sm:$0xff] }
0x1067   :  { %v2902_v23 = vld [vmem:[%s6266_s9 + $0x3a8] sm:$0xff] }
0x1068   :  { %4421 = vmatpush1.bf16.msra.mxu0 %v4420_v39  ;;  %4429 = vmatpush1.bf16.msra.mxu1 %v4428_v40  ;;  %v2792_v39 = vld [vmem:[%s6266_s9 + $0x38] sm:$0xff]  ;;  %v4458_v40 = vpack.c.bf16 %v2808_v33, %v2807_v32  ;;  %v2866_v32 = vld [vmem:[%s6266_s9 + $0x288] sm:$0xff]  ;;  %v2897_v33 = vld [vmem:[%s6266_s9 + $0x380] sm:$0xff] }
0x1069   :  { %4431 = vmatprep.subr.bf16.mxu0 %v4430_v43  ;;  %4439 = vmatprep.subr.bf16.mxu1 %v4438_v44  ;;  %v2824_v43 = vld [vmem:[%s6266_s9 + $0x138] sm:$0xff]  ;;  %v2809_v44 = vld [vmem:[%s6266_s9 + $0xc0] sm:$0xff]  ;;  %v4460_v48 = vpack.c.bf16 %v2792_v39, %v2791_v38  ;;  %v4510_v34 = vpack.c.bf16 %v2866_v32, %v2865_v31 }
0x106a   :  { %v4492_v49 = vpack.c.bf16 %v2824_v43, %v2823_v42 }
0x106b   :  { %3747 = vmatmul.mubr.msk.f32.vlgmr.msra.gmra.mrb[26].mxu0 %vm62_vm1, %v5249_v5  ;;  %3748 = vmatmul.mubr.msk.f32.vlgmr.msra.gmra.mrb[30].mxu1 %vm62_vm1, %v5249_v5 }
0x106c   :  { %4433 = vmatpush1.bf16.msra.mxu0 %v4432_v51  ;;  %4441 = vmatpush1.bf16.msra.mxu1 %v4440_v52  ;;  %v2794_v51 = vld [vmem:[%s6266_s9 + $0x48] sm:$0xff]  ;;  %v4462_v52 = vpack.c.bf16 %v2810_v45, %v2809_v44  ;;  %v5597_v44 = vld [vmem:[%s6267_s8] sm:$0xff] }
0x106d   :  { %4435 = vmatprep.subr.bf16.mxu0 %v4434_v55  ;;  %4443 = vmatprep.subr.bf16.mxu1 %v4442_v56  ;;  %v2826_v55 = vld [vmem:[%s6266_s9 + $0x148] sm:$0xff]  ;;  %v2811_v56 = vld [vmem:[%s6266_s9 + $0xd0] sm:$0xff]  ;;  %v4464_v59 = vpack.c.bf16 %v2794_v51, %v2793_v50 }
0x106e   :  { %2691 = vmatprep.mubr.f32.mxu0 %v4727_v8  ;;  %2762 = vmatprep.mubr.f32.mxu1 %v4727_v8  ;;  %v2787_v8 = vld [vmem:[%s6266_s9 + $0x10] sm:$0xff]  ;;  %v4496_v60 = vpack.c.bf16 %v2826_v55, %v2825_v54  ;;  %v2850_v54 = vld [vmem:[%s6266_s9 + $0x208] sm:$0xff] }
0x106f   :  { %v4452_v24 = vpack.c.bf16 %v2788_v16, %v2787_v8  ;;  %v2798_v8 = vld [vmem:[%s6266_s9 + $0x68] sm:$0xff]  ;;  %v2829_v16 = vld [vmem:[%s6266_s9 + $0x160] sm:$0xff] }
0x1070   :  { %4437 = vmatpush1.bf16.msra.mxu0 %v4436_v62  ;;  %4445 = vmatpush1.bf16.msra.mxu1 %v4444_v63  ;;  %v2796_v62 = vld [vmem:[%s6266_s9 + $0x58] sm:$0xff]  ;;  %v4466_v63 = vpack.c.bf16 %v2812_v0, %v2811_v56 }
0x1071   :  { %4447 = vmatprep.subr.bf16.mxu0 %v4446_v3  ;;  %4479 = vmatprep.subr.bf16.mxu1 %v4478_v4  ;;  %v2828_v3 = vld [vmem:[%s6266_s9 + $0x158] sm:$0xff]  ;;  %v2813_v4 = vld [vmem:[%s6266_s9 + $0xe0] sm:$0xff]  ;;  %v4468_v10 = vpack.c.bf16 %v2796_v62, %v2795_v61 }
0x1072   :  { %v4500_v11 = vpack.c.bf16 %v2828_v3, %v2827_v2  ;;  %v2868_v2 = vld [vmem:[%s6266_s9 + $0x298] sm:$0xff]  ;;  %v2899_v3 = vld [vmem:[%s6266_s9 + $0x390] sm:$0xff] }
0x1073   :  { %3749 = vmatmul.mubr.msk.f32.vlgmr.msra.gmra.mrb[28].mxu0 %vm62_vm1, %v5249_v5  ;;  %3750 = vmatmul.mubr.msk.f32.vlgmr.msra.gmra.mrb[32].mxu1 %vm62_vm1, %v5249_v5 }
0x1074   :  { %4449 = vmatpush3.bf16.msra.mxu0 %v4448_v13  ;;  %4481 = vmatpush3.bf16.msra.mxu1 %v4480_v15  ;;  %v4470_v13 = vpack.c.bf16 %v2814_v6, %v2813_v4  ;;  %v4502_v15 = vpack.c.bf16 %v2846_v9, %v2845_v7  ;;  %v2900_v4 = vld [vmem:[%s6266_s9 + $0x398] sm:$0xff] }
0x1075   :  { %4451 = vmatprep.subr.bf16.mxu0 %v4450_v17  ;;  %4483 = vmatprep.subr.bf16.mxu1 %v4482_v18  ;;  %v2830_v17 = vld [vmem:[%s6266_s9 + $0x168] sm:$0xff]  ;;  %v4472_v18 = vpack.c.bf16 %v2798_v8, %v2797_v12  ;;  %v2852_v12 = vld [vmem:[%s6266_s9 + $0x218] sm:$0xff] }
0x1076   :  { %v4504_v19 = vpack.c.bf16 %v2830_v17, %v2829_v16  ;;  %v4546_v16 = vpack.c.bf16 %v2900_v4, %v2899_v3  ;;  %v2883_v17 = vld [vmem:[%s6266_s9 + $0x310] sm:$0xff] }
0x1078   :  { %4453 = vmatpush3.bf16.msra.mxu0 %v4452_v24  ;;  %4485 = vmatpush3.bf16.msra.mxu1 %v4484_v25  ;;  %v2799_v24 = vld [vmem:[%s6266_s9 + $0x70] sm:$0xff]  ;;  %v2800_v25 = vld [vmem:[%s6266_s9 + $0x78] sm:$0xff] }
0x1079   :  { %4455 = vmatprep.subr.bf16.mxu0 %v4454_v28  ;;  %4487 = vmatprep.subr.bf16.mxu1 %v4486_v29  ;;  %v4476_v27 = vpack.c.bf16 %v2800_v25, %v2799_v24  ;;  %v2831_v28 = vld [vmem:[%s6266_s9 + $0x170] sm:$0xff]  ;;  %v2832_v29 = vld [vmem:[%s6266_s9 + $0x178] sm:$0xff] }
0x107a   :  { %v4508_v30 = vpack.c.bf16 %v2832_v29, %v2831_v28  ;;  %v2853_v28 = vld [vmem:[%s6266_s9 + $0x220] sm:$0xff]  ;;  %v2854_v29 = vld [vmem:[%s6266_s9 + $0x228] sm:$0xff] }
0x107c   :  { %4457 = vmatpush3.bf16.msra.mxu0 %v4456_v36  ;;  %4489 = vmatpush3.bf16.msra.mxu1 %v4488_v37  ;;  %v4542_v36 = vpack.c.bf16 %v2898_v35, %v2897_v33  ;;  %v2118_v37 = vlaneseq  ;;  %v2886_v35 = vld [vmem:[%s6266_s9 + $0x328] sm:$0xff] }
0x107d   :  { %4459 = vmatprep.subr.bf16.mxu0 %v4458_v40  ;;  %4491 = vmatprep.subr.bf16.mxu1 %v4490_v41  ;;  %v5585_v40 = vld [vmem:[%s6267_s8 + $0x8] sm:$0xff] }
0x107e   :  { %v5579_v38 = vshrl.u32 %v2118_v37, 7 }
0x1080   :  { %4461 = vmatpush3.bf16.msra.mxu0 %v4460_v48  ;;  %4493 = vmatpush3.bf16.msra.mxu1 %v4492_v49  ;;  %v2144_v39 = vsub.s32 6, %v5579_v38  ;;  %v2120_v42 = vsub.s32 0, %v5579_v38  ;;  %v2128_v43 = vsub.s32 2, %v5579_v38  ;;  %v2124_v45 = vsub.s32 1, %v5579_v38 }
0x1081   :  { %4463 = vmatprep.subr.bf16.mxu0 %v4462_v52  ;;  %4495 = vmatprep.subr.bf16.mxu1 %v4494_v53  ;;  %v2132_v46 = vsub.s32 3, %v5579_v38  ;;  %v2849_v53 = vld [vmem:[%s6266_s9 + $0x200] sm:$0xff] }
0x1082   :  { %v5590_v41 = vrot.slane %v5585_v40, %v2144_v39  ;;  %v2121_v47 = vrot.slane %v5597_v44, %v2120_v42  ;;  %v2129_v48 = vrot.slane %v5597_v44, %v2128_v43  ;;  %v2125_v49 = vrot.slane %v5597_v44, %v2124_v45 }
0x1083   :  { %v2133_v50 = vrot.slane %v5597_v44, %v2132_v46  ;;  %v4512_v9 = vpack.c.bf16 %v2850_v54, %v2849_v53  ;;  %v2153_v54 = vrot.slane %v5585_v40, %v2120_v42 }
0x1084   :  { %4465 = vmatpush3.bf16.msra.mxu0 %v4464_v59  ;;  %4497 = vmatpush3.bf16.msra.mxu1 %v4496_v60  ;;  %v2882_v59 = vld [vmem:[%s6266_s9 + $0x308] sm:$0xff]  ;;  %v2867_v60 = vld [vmem:[%s6266_s9 + $0x290] sm:$0xff] }
0x1085   :  { %4467 = vmatprep.subr.bf16.mxu0 %v4466_v63  ;;  %4499 = vmatprep.subr.bf16.mxu1 %v4498_v1  ;;  %v2140_v63 = vsub.s32 5, %v5579_v38  ;;  %v2148_v1 = vsub.s32 7, %v5579_v38  ;;  %v4514_v8 = vpack.c.bf16 %v2868_v2, %v2867_v60  ;;  %v2888_v60 = vld [vmem:[%s6266_s9 + $0x338] sm:$0xff]  ;;  %v2906_v2 = vld [vmem:[%s6266_s9 + $0x3c8] sm:$0xff] }
0x1087   :  { %v2141_v20 = vrot.slane %v5597_v44, %v2140_v63  ;;  %v2149_v21 = vrot.slane %v5597_v44, %v2148_v1 }
0x1088   :  { %4469 = vmatpush3.bf16.msra.mxu0 %v4468_v10  ;;  %4501 = vmatpush3.bf16.msra.mxu1 %v4500_v11  ;;  %v4544_v10 = vpack.c.bf16 %v2882_v59, %v2881_v58  ;;  %v2851_v11 = vld [vmem:[%s6266_s9 + $0x210] sm:$0xff]  ;;  %v2161_v58 = vrot.slane %v5585_v40, %v2128_v43  ;;  %v2905_v43 = vld [vmem:[%s6266_s9 + $0x3c0] sm:$0xff] }
0x1089   :  { %4471 = vmatprep.subr.bf16.mxu0 %v4470_v13  ;;  %4503 = vmatprep.subr.bf16.mxu1 %v4502_v15 }
0x108c   :  { %4473 = vmatpush3.bf16.msra.mxu0 %v4472_v18  ;;  %4505 = vmatpush3.bf16.msra.mxu1 %v4504_v19  ;;  %v2884_v18 = vld [vmem:[%s6266_s9 + $0x318] sm:$0xff]  ;;  %v2869_v19 = vld [vmem:[%s6266_s9 + $0x2a0] sm:$0xff] }
0x108d   :  { %4475 = vmatprep.subr.bf16.mxu0 %v4474_v22  ;;  %4507 = vmatprep.subr.bf16.mxu1 %v4506_v26  ;;  %v2901_v22 = vld [vmem:[%s6266_s9 + $0x3a0] sm:$0xff]  ;;  %v4516_v26 = vpack.c.bf16 %v2852_v12, %v2851_v11  ;;  %v4518_v32 = vpack.c.bf16 %v2870_v14, %v2869_v19  ;;  %v2858_v11 = vld [vmem:[%s6266_s9 + $0x248] sm:$0xff]  ;;  %v2875_v19 = vld [vmem:[%s6266_s9 + $0x2d0] sm:$0xff] }
0x108e   :  { %v4550_v33 = vpack.c.bf16 %v2902_v23, %v2901_v22  ;;  %v2908_v14 = vld [vmem:[%s6266_s9 + $0x3d8] sm:$0xff]  ;;  %v2136_v22 = vsub.s32 4, %v5579_v38  ;;  %v3009_v38 = vld [vmem:[%s6266_s9 + $0x700] sm:$0xff] }
0x1090   :  { %4477 = vmatpush3.bf16.msra.mxu0 %v4476_v27  ;;  %4509 = vmatpush3.bf16.msra.mxu1 %v4508_v30  ;;  %v4548_v27 = vpack.c.bf16 %v2884_v18, %v2883_v17  ;;  %v2889_v17 = vld [vmem:[%s6266_s9 + $0x340] sm:$0xff]  ;;  %v2890_v18 = vld [vmem:[%s6266_s9 + $0x348] sm:$0xff] }
0x1091   :  { %4511 = vmatprep.subr.bf16.mxu0 %v4510_v34  ;;  %4543 = vmatprep.subr.bf16.mxu1 %v4542_v36  ;;  %v2885_v34 = vld [vmem:[%s6266_s9 + $0x320] sm:$0xff]  ;;  %v2871_v36 = vld [vmem:[%s6266_s9 + $0x2b0] sm:$0xff] }
0x112e   :  { %v2267_v51 = vpop.f32.mrb[22].mxu0  ;;  %v2338_v52 = vpop.f32.mrb[26].mxu1 }
0x112f   :  { %v2268_v55 = vadd.f32 %v2267_v51, %v2121_v47  ;;  %v2339_v56 = vadd.f32 %v2338_v52, %v2129_v48  ;;  %v2269_v0 = vpop.f32.mrb[23].mxu0  ;;  %v2340_v57 = vpop.f32.mrb[27].mxu1  ;;  %v2872_v48 = vld [vmem:[%s6266_s9 + $0x2b8] sm:$0xff]  ;;  %v4520_v51 = vpack.c.bf16 %v2854_v29, %v2853_v28  ;;  %v2891_v29 = vld [vmem:[%s6266_s9 + $0x350] sm:$0xff] }
0x1130   :  { %v2270_v61 = vadd.f32 %v2269_v0, %v2125_v49  ;;  %v2341_v62 = vadd.f32 %v2340_v57, %v2133_v50  ;;  %v2903_v49 = vld [vmem:[%s6266_s9 + $0x3b0] sm:$0xff]  ;;  %v2904_v50 = vld [vmem:[%s6266_s9 + $0x3b8] sm:$0xff]  ;;  %v4522_v42 = vpack.c.bf16 %v2872_v48, %v2871_v36  ;;  %v2909_v36 = vld [vmem:[%s6266_s9 + $0x3e0] sm:$0xff] }
0x1131   :  { %v2769_v13 = vmax.f32 %v2268_v55, 0.0  ;;  %v2771_v15 = vmax.f32 %v2339_v56, 0.0  ;;  %v4552_v55 = vpack.c.bf16 %v2886_v35, %v2885_v34  ;;  %v2855_v56 = vld [vmem:[%s6266_s9 + $0x230] sm:$0xff]  ;;  %v2856_v0 = vld [vmem:[%s6266_s9 + $0x238] sm:$0xff]  ;;  %v4554_v59 = vpack.c.bf16 %v2904_v50, %v2903_v49  ;;  %v2877_v34 = vld [vmem:[%s6266_s9 + $0x2e0] sm:$0xff] }
0x1132   :  { %v2770_v6 = vmax.f32 %v2270_v61, 0.0  ;;  %v2772_v7 = vmax.f32 %v2341_v62, 0.0  ;;  %v2887_v57 = vld [vmem:[%s6266_s9 + $0x330] sm:$0xff]  ;;  %v2873_v61 = vld [vmem:[%s6266_s9 + $0x2c0] sm:$0xff]  ;;  %v2874_v62 = vld [vmem:[%s6266_s9 + $0x2c8] sm:$0xff] }
0x1133   :  { %v2860_v28 = vld [vmem:[%s6266_s9 + $0x258] sm:$0xff]  ;;  %v2878_v35 = vld [vmem:[%s6266_s9 + $0x2e8] sm:$0xff] }
0x1134   :  { %3112 = vmatprep.mubr.f32.mxu0 %v2770_v6  ;;  %3182 = vmatprep.mubr.f32.mxu1 %v2772_v7  ;;  %v4524_v6 = vpack.c.bf16 %v2856_v0, %v2855_v56  ;;  %v4556_v7 = vpack.c.bf16 %v2888_v60, %v2887_v57  ;;  %v2911_v60 = vld [vmem:[%s6266_s9 + $0x3f0] sm:$0xff] }
0x1135   :  { %3113 = vmatmul.mubr.f32.vlgmr.msra.gmra.mrb[30].mxu0 %v2769_v13  ;;  %3183 = vmatmul.mubr.f32.vlgmr.msra.gmra.mrb[34].mxu1 %v2771_v15 }
0x1136   :  { %v5669_v24 = vpop.f32.mrb[24].mxu0  ;;  %v5671_v25 = vpop.f32.mrb[28].mxu1  ;;  %4513 = vmatpush3.bf16.msra.mxu0 %v4512_v9  ;;  %4545 = vmatpush3.bf16.msra.mxu1 %v4544_v10  ;;  %v4526_v9 = vpack.c.bf16 %v2874_v62, %v2873_v61  ;;  %v2857_v10 = vld [vmem:[%s6266_s9 + $0x240] sm:$0xff]  ;;  %v2912_v61 = vld [vmem:[%s6266_s9 + $0x3f8] sm:$0xff]  ;;  %v2137_v62 = vrot.slane %v5597_v44, %v2136_v22 }
0x1137   :  { %v2411_v30 = vpop.f32.mrb[25].mxu0  ;;  %v2482_v31 = vpop.f32.mrb[29].mxu1  ;;  %4515 = vmatprep.subr.bf16.mxu0 %v4514_v8  ;;  %4547 = vmatprep.subr.bf16.mxu1 %v4546_v16  ;;  %v4558_v16 = vpack.c.bf16 %v2906_v2, %v2905_v43  ;;  %v4528_v23 = vpack.c.bf16 %v2858_v11, %v2857_v10  ;;  %v4570_v10 = vpack.c.bf16 %v2912_v61, %v2911_v60  ;;  %v2896_v11 = vld [vmem:[%s6266_s9 + $0x378] sm:$0xff]  ;;  %v2917_v60 = vld [vmem:[%s6266_s9 + $0x420] sm:$0xff]  ;;  %v2918_v61 = vld [vmem:[%s6266_s9 + $0x428] sm:$0xff] }
0x1138   :  { %v2412_v37 = vadd.f32 %v2411_v30, %v2141_v20  ;;  %v2483_v47 = vadd.f32 %v2482_v31, %v2149_v21  ;;  %v2876_v20 = vld [vmem:[%s6266_s9 + $0x2d8] sm:$0xff]  ;;  %v2907_v21 = vld [vmem:[%s6266_s9 + $0x3d0] sm:$0xff]  ;;  %v2169_v30 = vrot.slane %v5585_v40, %v2136_v22  ;;  %v2410_v22 = vadd.f32 %v5669_v24, %v2137_v62  ;;  %v2946_v24 = vld [vmem:[%s6266_s9 + $0x508] sm:$0xff] }
0x1139   :  { %v4530_v31 = vpack.c.bf16 %v2876_v20, %v2875_v19  ;;  %v2165_v19 = vrot.slane %v5585_v40, %v2132_v46  ;;  %v2914_v46 = vld [vmem:[%s6266_s9 + $0x408] sm:$0xff]  ;;  %v2949_v62 = vld [vmem:[%s6266_s9 + $0x520] sm:$0xff] }
0x113a   :  { %v2774_v52 = vmax.f32 %v2412_v37, 0.0  ;;  %v2776_v53 = vmax.f32 %v2483_v47, 0.0  ;;  %4517 = vmatpush3.bf16.msra.mxu0 %v4516_v26  ;;  %4549 = vmatpush3.bf16.msra.mxu1 %v4548_v27  ;;  %v4560_v26 = vpack.c.bf16 %v2890_v18, %v2889_v17  ;;  %v2859_v27 = vld [vmem:[%s6266_s9 + $0x250] sm:$0xff]  ;;  %v2910_v37 = vld [vmem:[%s6266_s9 + $0x3e8] sm:$0xff] }
0x113b   :  { %4519 = vmatprep.subr.bf16.mxu0 %v4518_v32  ;;  %4551 = vmatprep.subr.bf16.mxu1 %v4550_v33  ;;  %v4562_v32 = vpack.c.bf16 %v2908_v14, %v2907_v21  ;;  %v2892_v33 = vld [vmem:[%s6266_s9 + $0x358] sm:$0xff]  ;;  %v4532_v49 = vpack.c.bf16 %v2860_v28, %v2859_v27  ;;  %v4566_v57 = vpack.c.bf16 %v2910_v37, %v2909_v36  ;;  %v2930_v17 = vld [vmem:[%s6266_s9 + $0x488] sm:$0xff]  ;;  %v2945_v28 = vld [vmem:[%s6266_s9 + $0x500] sm:$0xff] }
0x113c   :  { %3252 = vmatprep.mubr.f32.mxu0 %v2774_v52  ;;  %3322 = vmatprep.mubr.f32.mxu1 %v2776_v53  ;;  %v4564_v50 = vpack.c.bf16 %v2892_v33, %v2891_v29  ;;  %v2861_v52 = vld [vmem:[%s6266_s9 + $0x260] sm:$0xff]  ;;  %v2862_v53 = vld [vmem:[%s6266_s9 + $0x268] sm:$0xff]  ;;  %v2773_v33 = vmax.f32 %v2410_v22, 0.0  ;;  %v2916_v36 = vld [vmem:[%s6266_s9 + $0x418] sm:$0xff] }
0x113d   :  { %v4536_v43 = vpack.c.bf16 %v2862_v53, %v2861_v52  ;;  %v2962_v18 = vld [vmem:[%s6266_s9 + $0x588] sm:$0xff]  ;;  %v2947_v37 = vld [vmem:[%s6266_s9 + $0x510] sm:$0xff] }
0x113e   :  { %v2551_v3 = vpop.f32.mrb[26].mxu0  ;;  %v2622_v4 = vpop.f32.mrb[30].mxu1  ;;  %4521 = vmatpush3.bf16.msra.mxu0 %v4520_v51  ;;  %4553 = vmatpush3.bf16.msra.mxu1 %v4552_v55  ;;  %v4534_v51 = vpack.c.bf16 %v2878_v35, %v2877_v34  ;;  %v2915_v35 = vld [vmem:[%s6266_s9 + $0x410] sm:$0xff]  ;;  %v2934_v52 = vld [vmem:[%s6266_s9 + $0x4a8] sm:$0xff] }
0x113f   :  { %v5733_v12 = vadd.f32 %v2551_v3, %v2153_v54  ;;  %v5735_v13 = vadd.f32 %v2622_v4, %v2161_v58  ;;  %v5737_v15 = vpop.f32.mrb[27].mxu0  ;;  %v5739_v8 = vpop.f32.mrb[31].mxu1  ;;  %4523 = vmatprep.subr.bf16.mxu0 %v4522_v42  ;;  %4555 = vmatprep.subr.bf16.mxu1 %v4554_v59  ;;  %v2893_v58 = vld [vmem:[%s6266_s9 + $0x360] sm:$0xff]  ;;  %v2894_v42 = vld [vmem:[%s6266_s9 + $0x368] sm:$0xff]  ;;  %v2880_v59 = vld [vmem:[%s6266_s9 + $0x2f8] sm:$0xff] }
0x1140   :  { %v4568_v2 = vpack.c.bf16 %v2894_v42, %v2893_v58  ;;  %v2863_v3 = vld [vmem:[%s6266_s9 + $0x270] sm:$0xff]  ;;  %v2864_v4 = vld [vmem:[%s6266_s9 + $0x278] sm:$0xff]  ;;  %v2625_v29 = vadd.f32 %v5739_v8, %v2165_v19  ;;  %v4608_v8 = vpack.c.bf16 %v2946_v24, %v2945_v28  ;;  %v2966_v58 = vld [vmem:[%s6266_s9 + $0x5a8] sm:$0xff]  ;;  %v4580_v42 = vpack.c.bf16 %v2916_v36, %v2915_v35 }
0x1141   :  { %v4540_v20 = vpack.c.bf16 %v2864_v4, %v2863_v3  ;;  %v2935_v3 = vld [vmem:[%s6266_s9 + $0x4b0] sm:$0xff]  ;;  %v2936_v4 = vld [vmem:[%s6266_s9 + $0x4b8] sm:$0xff]  ;;  %v2937_v19 = vld [vmem:[%s6266_s9 + $0x4c0] sm:$0xff] }
0x1142   :  { %4525 = vmatpush3.bf16.msra.mxu0 %v4524_v6  ;;  %4557 = vmatpush3.bf16.msra.mxu1 %v4556_v7  ;;  %v2895_v6 = vld [vmem:[%s6266_s9 + $0x370] sm:$0xff]  ;;  %v2145_v7 = vrot.slane %v5597_v44, %v2144_v39  ;;  %v2157_v39 = vrot.slane %v5585_v40, %v2124_v45  ;;  %v2961_v44 = vld [vmem:[%s6266_s9 + $0x580] sm:$0xff]  ;;  %v2780_v53 = vmax.f32 %v2625_v29, 0.0  ;;  %v2954_v24 = vld [vmem:[%s6266_s9 + $0x548] sm:$0xff] }
0x1143   :  { %4527 = vmatprep.subr.bf16.mxu0 %v4526_v9  ;;  %4559 = vmatprep.subr.bf16.mxu1 %v4558_v16  ;;  %v2929_v16 = vld [vmem:[%s6266_s9 + $0x480] sm:$0xff]  ;;  %v4572_v21 = vpack.c.bf16 %v2896_v11, %v2895_v6  ;;  %v2967_v6 = vld [vmem:[%s6266_s9 + $0x5b0] sm:$0xff]  ;;  %v4586_v11 = vpack.c.bf16 %v2936_v4, %v2935_v3  ;;  %v2940_v29 = vld [vmem:[%s6266_s9 + $0x4d8] sm:$0xff] }
0x1144   :  { %v4574_v14 = vpack.c.bf16 %v2930_v17, %v2929_v16  ;;  %v2481_v45 = vadd.f32 %v5671_v25, %v2145_v7  ;;  %v2554_v27 = vadd.f32 %v5737_v15, %v2157_v39  ;;  %v2931_v25 = vld [vmem:[%s6266_s9 + $0x490] sm:$0xff]  ;;  %v2968_v7 = vld [vmem:[%s6266_s9 + $0x5b8] sm:$0xff] }
0x1145   :  { %v2963_v15 = vld [vmem:[%s6266_s9 + $0x590] sm:$0xff]  ;;  %v2920_v17 = vld [vmem:[%s6266_s9 + $0x438] sm:$0xff] }
0x1146   :  { %v2693_v47 = vpop.f32.mrb[28].mxu0  ;;  %v2764_v48 = vpop.f32.mrb[32].mxu1  ;;  %4529 = vmatpush3.bf16.msra.mxu0 %v4528_v23  ;;  %4561 = vmatpush3.bf16.msra.mxu1 %v4560_v26  ;;  %v4606_v23 = vpack.c.bf16 %v2962_v18, %v2961_v44  ;;  %v2913_v26 = vld [vmem:[%s6266_s9 + $0x400] sm:$0xff]  ;;  %v2775_v34 = vmax.f32 %v2481_v45, 0.0  ;;  %v2919_v16 = vld [vmem:[%s6266_s9 + $0x430] sm:$0xff]  ;;  %v4618_v44 = vpack.c.bf16 %v2968_v7, %v2967_v6  ;;  %v2952_v18 = vld [vmem:[%s6266_s9 + $0x538] sm:$0xff] }
0x1147   :  { %v5791_v54 = vadd.f32 %v2693_v47, %v2169_v30  ;;  %v5794_v55 = vadd.f32 %v2764_v48, %v5590_v41  ;;  %v5796_v56 = vpop.f32.mrb[29].mxu0  ;;  %v5798_v0 = vpop.f32.mrb[33].mxu1  ;;  %4531 = vmatprep.subr.bf16.mxu0 %v4530_v31  ;;  %4563 = vmatprep.subr.bf16.mxu1 %v4562_v32  ;;  %v2879_v41 = vld [vmem:[%s6266_s9 + $0x2f0] sm:$0xff]  ;;  %v2932_v30 = vld [vmem:[%s6266_s9 + $0x498] sm:$0xff]  ;;  %v4576_v32 = vpack.c.bf16 %v2914_v46, %v2913_v26  ;;  %v2778_v47 = vmax.f32 %v2554_v27, 0.0  ;;  %v2921_v26 = vld [vmem:[%s6266_s9 + $0x440] sm:$0xff] }
0x1148   :  { %v4538_v9 = vpack.c.bf16 %v2880_v59, %v2879_v41  ;;  %v2964_v31 = vld [vmem:[%s6266_s9 + $0x598] sm:$0xff]  ;;  %v4578_v48 = vpack.c.bf16 %v2932_v30, %v2931_v25  ;;  %v2951_v39 = vld [vmem:[%s6266_s9 + $0x530] sm:$0xff]  ;;  %v4588_v22 = vpack.c.bf16 %v2920_v17, %v2919_v16  ;;  %v2922_v46 = vld [vmem:[%s6266_s9 + $0x448] sm:$0xff] }
0x1149   :  { %v4620_v45 = vpack.c.bf16 %v2952_v18, %v2951_v39  ;;  %v2953_v27 = vld [vmem:[%s6266_s9 + $0x540] sm:$0xff]  ;;  %v2939_v25 = vld [vmem:[%s6266_s9 + $0x4d0] sm:$0xff]  ;;  %v2928_v7 = vld [vmem:[%s6266_s9 + $0x478] sm:$0xff]  ;;  %v2173_v39 = vrot.slane %v5585_v40, %v2140_v63 }
0x114a   :  { %4533 = vmatpush3.bf16.msra.mxu0 %v4532_v49  ;;  %4565 = vmatpush3.bf16.msra.mxu1 %v4564_v50  ;;  %v4610_v49 = vpack.c.bf16 %v2964_v31, %v2963_v15  ;;  %v2948_v50 = vld [vmem:[%s6266_s9 + $0x518] sm:$0xff]  ;;  %v2971_v30 = vld [vmem:[%s6266_s9 + $0x5d0] sm:$0xff]  ;;  %v4592_v31 = vpack.c.bf16 %v2922_v46, %v2921_v26  ;;  %v2993_v16 = vld [vmem:[%s6266_s9 + $0x680] sm:$0xff] }
0x114b   :  { %4535 = vmatprep.subr.bf16.mxu0 %v4534_v51  ;;  %4567 = vmatprep.subr.bf16.mxu1 %v4566_v57  ;;  %v2933_v51 = vld [vmem:[%s6266_s9 + $0x4a0] sm:$0xff]  ;;  %v4612_v41 = vpack.c.bf16 %v2948_v50, %v2947_v37  ;;  %v2972_v15 = vld [vmem:[%s6266_s9 + $0x5d8] sm:$0xff]  ;;  %v2955_v35 = vld [vmem:[%s6266_s9 + $0x550] sm:$0xff] }
0x114c   :  { %v2965_v57 = vld [vmem:[%s6266_s9 + $0x5a0] sm:$0xff]  ;;  %v4582_v59 = vpack.c.bf16 %v2934_v52, %v2933_v51  ;;  %v4626_v36 = vpack.c.bf16 %v2972_v15, %v2971_v30  ;;  %v2956_v37 = vld [vmem:[%s6266_s9 + $0x558] sm:$0xff]  ;;  %v2974_v50 = vld [vmem:[%s6266_s9 + $0x5e8] sm:$0xff]  ;;  %v2779_v15 = vmax.f32 %v5735_v13, 0.0 }
0x114d   :  { %v4628_v52 = vpack.c.bf16 %v2956_v37, %v2955_v35  ;;  %v2927_v6 = vld [vmem:[%s6266_s9 + $0x470] sm:$0xff]  ;;  %v2994_v17 = vld [vmem:[%s6266_s9 + $0x688] sm:$0xff]  ;;  %v2977_v63 = vld [vmem:[%s6266_s9 + $0x600] sm:$0xff] }
0x114e   :  { %4537 = vmatpush3.bf16.msra.mxu0 %v4536_v43  ;;  %4569 = vmatpush3.bf16.msra.mxu1 %v4568_v2  ;;  %v4614_v43 = vpack.c.bf16 %v2966_v58, %v2965_v57  ;;  %v2950_v2 = vld [vmem:[%s6266_s9 + $0x528] sm:$0xff]  ;;  %v2925_v57 = vld [vmem:[%s6266_s9 + $0x460] sm:$0xff]  ;;  %v2996_v26 = vld [vmem:[%s6266_s9 + $0x698] sm:$0xff] }
0x114f   :  { %4539 = vmatprep.subr.bf16.mxu0 %v4538_v9  ;;  %4571 = vmatprep.subr.bf16.mxu1 %v4570_v10  ;;  %v4584_v9 = vpack.c.bf16 %v2918_v61, %v2917_v60  ;;  %v4616_v10 = vpack.c.bf16 %v2950_v2, %v2949_v62  ;;  %v2926_v58 = vld [vmem:[%s6266_s9 + $0x468] sm:$0xff]  ;;  %v2943_v60 = vld [vmem:[%s6266_s9 + $0x4f0] sm:$0xff]  ;;  %v2944_v61 = vld [vmem:[%s6266_s9 + $0x4f8] sm:$0xff] }
0x1150   :  { %v2975_v62 = vld [vmem:[%s6266_s9 + $0x5f0] sm:$0xff]  ;;  %v4600_v2 = vpack.c.bf16 %v2926_v58, %v2925_v57  ;;  %v4602_v4 = vpack.c.bf16 %v2944_v61, %v2943_v60  ;;  %v3026_v18 = vld [vmem:[%s6266_s9 + $0x788] sm:$0xff]  ;;  %v3029_v13 = vld [vmem:[%s6266_s9 + $0x7a0] sm:$0xff] }
0x1151   :  { %v3011_v30 = vld [vmem:[%s6266_s9 + $0x710] sm:$0xff]  ;;  %v3030_v35 = vld [vmem:[%s6266_s9 + $0x7a8] sm:$0xff]  ;;  %v3000_v58 = vld [vmem:[%s6266_s9 + $0x6b8] sm:$0xff] }
0x1152   :  { %4541 = vmatpush3.bf16.msra.mxu0 %v4540_v20  ;;  %4573 = vmatpush3.bf16.msra.mxu1 %v4572_v21  ;;  %v2938_v20 = vld [vmem:[%s6266_s9 + $0x4c8] sm:$0xff]  ;;  %v2969_v21 = vld [vmem:[%s6266_s9 + $0x5c0] sm:$0xff]  ;;  %v2999_v57 = vld [vmem:[%s6266_s9 + $0x6b0] sm:$0xff] }
0x1153   :  { %4575 = vmatprep.subr.bf16.mxu0 %v4574_v14  ;;  %4607 = vmatprep.subr.bf16.mxu1 %v4606_v23  ;;  %v2970_v14 = vld [vmem:[%s6266_s9 + $0x5c8] sm:$0xff]  ;;  %v4590_v23 = vpack.c.bf16 %v2938_v20, %v2937_v19  ;;  %v2181_v19 = vrot.slane %v5585_v40, %v2148_v1  ;;  %v4604_v20 = vpack.c.bf16 %v2928_v7, %v2927_v6  ;;  %v3001_v6 = vld [vmem:[%s6266_s9 + $0x6c0] sm:$0xff] }
0x1154   :  { %v4622_v28 = vpack.c.bf16 %v2970_v14, %v2969_v21  ;;  %v4638_v14 = vpack.c.bf16 %v2994_v17, %v2993_v16  ;;  %v3010_v40 = vld [vmem:[%s6266_s9 + $0x708] sm:$0xff]  ;;  %v2696_v1 = vadd.f32 %v5796_v56, %v2173_v39  ;;  %v3028_v56 = vld [vmem:[%s6266_s9 + $0x798] sm:$0xff]  ;;  %v4650_v61 = vpack.c.bf16 %v3000_v58, %v2999_v57  ;;  %v2985_v39 = vld [vmem:[%s6266_s9 + $0x640] sm:$0xff] }
0x1155   :  { %3253 = vmatmul.mubr.f32.vlgmr.msra.gmra.mrb[32].mxu0 %v2773_v33  ;;  %3323 = vmatmul.mubr.f32.vlgmr.msra.gmra.mrb[36].mxu1 %v2775_v34  ;;  %v4594_v33 = vpack.c.bf16 %v2940_v29, %v2939_v25  ;;  %v2923_v34 = vld [vmem:[%s6266_s9 + $0x450] sm:$0xff]  ;;  %v2767_v46 = vadd.f32 %v5798_v0, %v2181_v19  ;;  %v4672_v25 = vpack.c.bf16 %v3010_v40, %v3009_v38  ;;  %v2980_v0 = vld [vmem:[%s6266_s9 + $0x618] sm:$0xff]  ;;  %v3002_v7 = vld [vmem:[%s6266_s9 + $0x6c8] sm:$0xff]  ;;  %v2781_v58 = vmax.f32 %v5791_v54, 0.0 }
0x1156   :  { %4577 = vmatpush3.bf16.msra.mxu0 %v4576_v32  ;;  %3392 = vmatprep.mubr.f32.mxu0 %v2778_v47  ;;  %v4624_v32 = vpack.c.bf16 %v2954_v24, %v2953_v27  ;;  %v2941_v47 = vld [vmem:[%s6266_s9 + $0x4e0] sm:$0xff]  ;;  %v2777_v24 = vmax.f32 %v5733_v12, 0.0  ;;  %v2979_v29 = vld [vmem:[%s6266_s9 + $0x610] sm:$0xff]  ;;  %v3012_v12 = vld [vmem:[%s6266_s9 + $0x718] sm:$0xff]  ;;  %v4654_v17 = vpack.c.bf16 %v3002_v7, %v3001_v6 }
0x1157   :  { %4609 = vmatpush3.bf16.msra.mxu1 %v4608_v8  ;;  %3462 = vmatprep.mubr.f32.mxu1 %v2780_v53  ;;  %v2924_v8 = vld [vmem:[%s6266_s9 + $0x458] sm:$0xff]  ;;  %v4644_v37 = vpack.c.bf16 %v2980_v0, %v2979_v29 }
0x1158   :  { %4579 = vmatprep.subr.bf16.mxu0 %v4578_v48  ;;  %4611 = vmatprep.subr.bf16.mxu1 %v4610_v49  ;;  %v2942_v48 = vld [vmem:[%s6266_s9 + $0x4e8] sm:$0xff]  ;;  %v2973_v49 = vld [vmem:[%s6266_s9 + $0x5e0] sm:$0xff]  ;;  %v4596_v51 = vpack.c.bf16 %v2924_v8, %v2923_v34  ;;  %v2782_v34 = vmax.f32 %v2696_v1, 0.0  ;;  %v2987_v1 = vld [vmem:[%s6266_s9 + $0x650] sm:$0xff] }
0x1159   :  { %v4598_v53 = vpack.c.bf16 %v2942_v48, %v2941_v47  ;;  %v4676_v47 = vpack.c.bf16 %v3012_v12, %v3011_v30  ;;  %v3021_v12 = vld [vmem:[%s6266_s9 + $0x760] sm:$0xff] }
0x115a   :  { %4581 = vmatpush3.bf16.msra.mxu0 %v4580_v42  ;;  %v2957_v42 = vld [vmem:[%s6266_s9 + $0x560] sm:$0xff] }
0x115b   :  { %4613 = vmatpush3.bf16.msra.mxu1 %v4612_v41  ;;  %4583 = vmatprep.subr.bf16.mxu0 %v4582_v59  ;;  %v4630_v41 = vpack.c.bf16 %v2974_v50, %v2973_v49  ;;  %v2958_v59 = vld [vmem:[%s6266_s9 + $0x568] sm:$0xff]  ;;  %v2981_v49 = vld [vmem:[%s6266_s9 + $0x620] sm:$0xff] }
0x115c   :  { %4615 = vmatprep.subr.bf16.mxu1 %v4614_v43  ;;  %v2976_v43 = vld [vmem:[%s6266_s9 + $0x5f8] sm:$0xff]  ;;  %v4632_v3 = vpack.c.bf16 %v2958_v59, %v2957_v42  ;;  %v2982_v50 = vld [vmem:[%s6266_s9 + $0x628] sm:$0xff]  ;;  %v3031_v42 = vld [vmem:[%s6266_s9 + $0x7b0] sm:$0xff] }
0x115d   :  { %v4648_v59 = vpack.c.bf16 %v2982_v50, %v2981_v49  ;;  %v2992_v49 = vld [vmem:[%s6266_s9 + $0x678] sm:$0xff] }
0x115e   :  { %4585 = vmatpush3.bf16.msra.mxu0 %v4584_v9  ;;  %v2959_v9 = vld [vmem:[%s6266_s9 + $0x570] sm:$0xff] }
0x115f   :  { %4617 = vmatpush3.bf16.msra.mxu1 %v4616_v10  ;;  %4587 = vmatprep.subr.bf16.mxu0 %v4586_v11  ;;  %v4634_v10 = vpack.c.bf16 %v2976_v43, %v2975_v62  ;;  %v2960_v11 = vld [vmem:[%s6266_s9 + $0x578] sm:$0xff]  ;;  %v2983_v62 = vld [vmem:[%s6266_s9 + $0x630] sm:$0xff] }
0x1160   :  { %4619 = vmatprep.subr.bf16.mxu1 %v4618_v44  ;;  %v3025_v44 = vld [vmem:[%s6266_s9 + $0x780] sm:$0xff]  ;;  %v4636_v21 = vpack.c.bf16 %v2960_v11, %v2959_v9  ;;  %v2984_v43 = vld [vmem:[%s6266_s9 + $0x638] sm:$0xff] }
0x1161   :  { %v3033_v9 = vld [vmem:[%s6266_s9 + $0x7c0] sm:$0xff]  ;;  %v4652_v11 = vpack.c.bf16 %v2984_v43, %v2983_v62 }
0x1162   :  { %4589 = vmatpush3.bf16.msra.mxu0 %v4588_v22  ;;  %v2978_v22 = vld [vmem:[%s6266_s9 + $0x608] sm:$0xff] }
0x1163   :  { %4621 = vmatpush3.bf16.msra.mxu1 %v4620_v45  ;;  %4591 = vmatprep.subr.bf16.mxu0 %v4590_v23  ;;  %v4670_v45 = vpack.c.bf16 %v3026_v18, %v3025_v44  ;;  %v2995_v23 = vld [vmem:[%s6266_s9 + $0x690] sm:$0xff]  ;;  %v4640_v27 = vpack.c.bf16 %v2978_v22, %v2977_v63  ;;  %v2986_v44 = vld [vmem:[%s6266_s9 + $0x648] sm:$0xff]  ;;  %v3017_v18 = vld [vmem:[%s6266_s9 + $0x740] sm:$0xff] }
0x1164   :  { %4623 = vmatprep.subr.bf16.mxu1 %v4622_v28  ;;  %v3027_v28 = vld [vmem:[%s6266_s9 + $0x790] sm:$0xff]  ;;  %v3036_v22 = vld [vmem:[%s6266_s9 + $0x7d8] sm:$0xff] }
0x1165   :  { %v4674_v8 = vpack.c.bf16 %v3028_v56, %v3027_v28  ;;  %v3035_v63 = vld [vmem:[%s6266_s9 + $0x7d0] sm:$0xff]  ;;  %v3005_v28 = vld [vmem:[%s6266_s9 + $0x6e0] sm:$0xff]  ;;  %v3006_v56 = vld [vmem:[%s6266_s9 + $0x6e8] sm:$0xff] }
0x1166   :  { %4593 = vmatpush3.bf16.msra.mxu0 %v4592_v31  ;;  %v4642_v31 = vpack.c.bf16 %v2996_v26, %v2995_v23  ;;  %v2988_v23 = vld [vmem:[%s6266_s9 + $0x658] sm:$0xff]  ;;  %v3019_v26 = vld [vmem:[%s6266_s9 + $0x750] sm:$0xff]  ;;  %v4662_v30 = vpack.c.bf16 %v3006_v56, %v3005_v28 }
0x1167   :  { %4625 = vmatpush3.bf16.msra.mxu1 %v4624_v32  ;;  %4595 = vmatprep.subr.bf16.mxu0 %v4594_v33  ;;  %v2997_v32 = vld [vmem:[%s6266_s9 + $0x6a0] sm:$0xff]  ;;  %v2998_v33 = vld [vmem:[%s6266_s9 + $0x6a8] sm:$0xff]  ;;  %v4660_v29 = vpack.c.bf16 %v2988_v23, %v2987_v1 }
0x1168   :  { %4627 = vmatprep.subr.bf16.mxu1 %v4626_v36  ;;  %v2784_v36 = vmax.f32 %v2767_v46, 0.0  ;;  %v4646_v48 = vpack.c.bf16 %v2998_v33, %v2997_v32  ;;  %v4690_v46 = vpack.c.bf16 %v3036_v22, %v3035_v63  ;;  %v3022_v33 = vld [vmem:[%s6266_s9 + $0x768] sm:$0xff] }
0x116a   :  { %4597 = vmatpush3.bf16.msra.mxu0 %v4596_v51  ;;  %v3013_v51 = vld [vmem:[%s6266_s9 + $0x720] sm:$0xff] }
0x116b   :  { %4629 = vmatpush3.bf16.msra.mxu1 %v4628_v52  ;;  %4599 = vmatprep.subr.bf16.mxu0 %v4598_v53  ;;  %v4678_v52 = vpack.c.bf16 %v3030_v35, %v3029_v13  ;;  %v3014_v53 = vld [vmem:[%s6266_s9 + $0x728] sm:$0xff]  ;;  %v3039_v13 = vld [vmem:[%s6266_s9 + $0x7f0] sm:$0xff]  ;;  %v3040_v35 = vld [vmem:[%s6266_s9 + $0x7f8] sm:$0xff] }
0x116c   :  { %4631 = vmatprep.subr.bf16.mxu1 %v4630_v41  ;;  %v3032_v41 = vld [vmem:[%s6266_s9 + $0x7b8] sm:$0xff]  ;;  %v4680_v60 = vpack.c.bf16 %v3014_v53, %v3013_v51  ;;  %v4698_v50 = vpack.c.bf16 %v3040_v35, %v3039_v13  ;;  %v3023_v51 = vld [vmem:[%s6266_s9 + $0x770] sm:$0xff] }
0x116e   :  { %4601 = vmatpush3.bf16.msra.mxu0 %v4600_v2  ;;  %v3015_v2 = vld [vmem:[%s6266_s9 + $0x730] sm:$0xff] }
0x116f   :  { %4633 = vmatpush3.bf16.msra.mxu1 %v4632_v3  ;;  %4603 = vmatprep.subr.bf16.mxu0 %v4602_v4  ;;  %v4682_v3 = vpack.c.bf16 %v3032_v41, %v3031_v42  ;;  %v3016_v4 = vld [vmem:[%s6266_s9 + $0x738] sm:$0xff]  ;;  %v2783_v42 = vmax.f32 %v5794_v55, 0.0 }
0x1170   :  { %4635 = vmatprep.subr.bf16.mxu1 %v4634_v10  ;;  %v3034_v10 = vld [vmem:[%s6266_s9 + $0x7c8] sm:$0xff]  ;;  %v4684_v16 = vpack.c.bf16 %v3016_v4, %v3015_v2 }
0x1171   :  { %v4686_v19 = vpack.c.bf16 %v3034_v10, %v3033_v9 }
0x1172   :  { %4605 = vmatpush3.bf16.msra.mxu0 %v4604_v20  ;;  %v3018_v20 = vld [vmem:[%s6266_s9 + $0x748] sm:$0xff] }
0x1173   :  { %4637 = vmatpush3.bf16.msra.mxu1 %v4636_v21  ;;  %4639 = vmatprep.subr.bf16.mxu0 %v4638_v14  ;;  %v3003_v21 = vld [vmem:[%s6266_s9 + $0x6d0] sm:$0xff]  ;;  %v3004_v14 = vld [vmem:[%s6266_s9 + $0x6d8] sm:$0xff]  ;;  %v4688_v38 = vpack.c.bf16 %v3018_v20, %v3017_v18 }
0x1174   :  { %4671 = vmatprep.subr.bf16.mxu1 %v4670_v45  ;;  %v4656_v45 = vpack.c.bf16 %v2986_v44, %v2985_v39  ;;  %v4658_v40 = vpack.c.bf16 %v3004_v14, %v3003_v21 }
0x1175   :  { %3393 = vmatmul.mubr.f32.vlgmr.msra.gmra.mrb[34].mxu0 %v2777_v24  ;;  %v3037_v24 = vld [vmem:[%s6266_s9 + $0x7e0] sm:$0xff] }
0x1176   :  { %3463 = vmatmul.mubr.f32.vlgmr.msra.gmra.mrb[38].mxu1 %v2779_v15  ;;  %4641 = vmatpush3.bf16.msra.mxu0 %v4640_v27  ;;  %v3020_v27 = vld [vmem:[%s6266_s9 + $0x758] sm:$0xff]  ;;  %v2989_v15 = vld [vmem:[%s6266_s9 + $0x660] sm:$0xff] }
0x1177   :  { %3532 = vmatprep.mubr.f32.mxu0 %v2782_v34  ;;  %4673 = vmatpush3.bf16.msra.mxu1 %v4672_v25  ;;  %v3038_v25 = vld [vmem:[%s6266_s9 + $0x7e8] sm:$0xff]  ;;  %v4692_v0 = vpack.c.bf16 %v3020_v27, %v3019_v26  ;;  %v3007_v34 = vld [vmem:[%s6266_s9 + $0x6f0] sm:$0xff] }
0x1178   :  { %3602 = vmatprep.mubr.f32.mxu1 %v2784_v36  ;;  %4643 = vmatprep.subr.bf16.mxu0 %v4642_v31  ;;  %v2990_v31 = vld [vmem:[%s6266_s9 + $0x668] sm:$0xff]  ;;  %v4694_v32 = vpack.c.bf16 %v3038_v25, %v3037_v24 }
0x1179   :  { %4675 = vmatprep.subr.bf16.mxu1 %v4674_v8  ;;  %v3008_v8 = vld [vmem:[%s6266_s9 + $0x6f8] sm:$0xff]  ;;  %v4664_v36 = vpack.c.bf16 %v2990_v31, %v2989_v15 }
0x117a   :  { %4645 = vmatpush3.bf16.msra.mxu0 %v4644_v37  ;;  %v4696_v37 = vpack.c.bf16 %v3022_v33, %v3021_v12  ;;  %v3752_v12 = vld [vmem:[%s6269_s13] ss:$0 sm:$0xff] }
0x117b   :  { %4677 = vmatpush3.bf16.msra.mxu1 %v4676_v47  ;;  %4647 = vmatprep.subr.bf16.mxu0 %v4646_v48  ;;  %v4666_v47 = vpack.c.bf16 %v3008_v8, %v3007_v34  ;;  %v2991_v48 = vld [vmem:[%s6266_s9 + $0x670] sm:$0xff] }
0x117c   :  { %4679 = vmatprep.subr.bf16.mxu1 %v4678_v52  ;;  %v3024_v52 = vld [vmem:[%s6266_s9 + $0x778] sm:$0xff]  ;;  %v4668_v53 = vpack.c.bf16 %v2992_v49, %v2991_v48 }
0x117d   :  { %v4700_v57 = vpack.c.bf16 %v3024_v52, %v3023_v51 }
0x117e   :  { %4649 = vmatpush3.bf16.msra.mxu0 %v4648_v59 }
0x117f   :  { %4681 = vmatpush3.bf16.msra.mxu1 %v4680_v60  ;;  %4651 = vmatprep.subr.bf16.mxu0 %v4650_v61  ;;  %v3751_v60 = vld [vmem:[%s6268_s10] ss:$0 sm:$0xff] }
0x1180   :  { %4683 = vmatprep.subr.bf16.mxu1 %v4682_v3 }
0x1182   :  { %4653 = vmatpush3.bf16.msra.mxu0 %v4652_v11 }
0x1183   :  { %4685 = vmatpush3.bf16.msra.mxu1 %v4684_v16  ;;  %4655 = vmatprep.subr.bf16.mxu0 %v4654_v17 }
0x1184   :  { %4687 = vmatprep.subr.bf16.mxu1 %v4686_v19 }
0x1186   :  { %4657 = vmatpush3.bf16.msra.mxu0 %v4656_v45 }
0x1187   :  { %4689 = vmatpush3.bf16.msra.mxu1 %v4688_v38  ;;  %4659 = vmatprep.subr.bf16.mxu0 %v4658_v40 }
0x1188   :  { %4691 = vmatprep.subr.bf16.mxu1 %v4690_v46 }
0x118a   :  { %4661 = vmatpush3.bf16.msra.mxu0 %v4660_v29 }
0x118b   :  { %4693 = vmatpush3.bf16.msra.mxu1 %v4692_v0  ;;  %4663 = vmatprep.subr.bf16.mxu0 %v4662_v30 }
0x118c   :  { %4695 = vmatprep.subr.bf16.mxu1 %v4694_v32  ;;  %v3753_v32 = vld [vmem:[%s6270_s14] ss:$0 sm:$0xff] }
0x118e   :  { %4665 = vmatpush3.bf16.msra.mxu0 %v4664_v36 }
0x118f   :  { %4697 = vmatpush3.bf16.msra.mxu1 %v4696_v37  ;;  %4667 = vmatprep.subr.bf16.mxu0 %v4666_v47 }
0x1190   :  { %4699 = vmatprep.subr.bf16.mxu1 %v4698_v50 }
0x1192   :  { %4669 = vmatpush3.bf16.msra.mxu0 %v4668_v53 }
0x1193   :  { %4701 = vmatpush3.bf16.msra.mxu1 %v4700_v57 }
0x1195   :  { %3533 = vmatmul.mubr.f32.vlgmr.msra.gmra.mrb[36].mxu0 %v2781_v58 }
0x1196   :  { %3603 = vmatmul.mubr.f32.vlgmr.msra.gmra.mrb[40].mxu1 %v2783_v42 }
0x1208   :  { %v3870_v41 = vpop.f32.mrb[30].mxu0  ;;  %v3905_v59 = vpop.f32.mrb[34].mxu1 }
0x1209   :  { %v3871_v61 = vpop.f32.mrb[31].mxu0  ;;  %v3906_v62 = vpop.f32.mrb[35].mxu1 }
0x120a   :  { %v3872_v43 = vadd.f32 %v3871_v61, %v3870_v41  ;;  %v3907_v2 = vadd.f32 %v3906_v62, %v3905_v59 }
0x120c   :  { %v3115_v3 = vadd.f32 %v3872_v43, %v3751_v60 }
0x120e   :  { %v3185_v4 = vadd.f32 %v3907_v2, %v3115_v3 }
0x1228   :  { %v3940_v6 = vpop.f32.mrb[32].mxu0  ;;  %v3975_v7 = vpop.f32.mrb[36].mxu1 }
0x1229   :  { %v3941_v54 = vpop.f32.mrb[33].mxu0  ;;  %v3976_v9 = vpop.f32.mrb[37].mxu1 }
0x122a   :  { %v3942_v10 = vadd.f32 %v3941_v54, %v3940_v6  ;;  %v3977_v55 = vadd.f32 %v3976_v9, %v3975_v7 }
0x122c   :  { %v3255_v11 = vadd.f32 %v3942_v10, %v3185_v4 }
0x122e   :  { %v3325_v16 = vadd.f32 %v3977_v55, %v3255_v11 }
0x1248   :  { %v4010_v17 = vpop.f32.mrb[34].mxu0 }
0x1249   :  { %v4045_v39 = vpop.f32.mrb[38].mxu1  ;;  %v4011_v44 = vpop.f32.mrb[35].mxu0 }
0x124a   :  { %v4012_v18 = vadd.f32 %v4011_v44, %v4010_v17  ;;  %v4046_v19 = vpop.f32.mrb[39].mxu1 }
0x124b   :  { %v4047_v20 = vadd.f32 %v4046_v19, %v4045_v39 }
0x124c   :  { %v3395_v21 = vadd.f32 %v4012_v18, %v3325_v16 }
0x124e   :  { %v3465_v14 = vadd.f32 %v4047_v20, %v3395_v21 }
0x1268   :  { %v4080_v63 = vpop.f32.mrb[36].mxu0 }
0x1269   :  { %v4115_v22 = vpop.f32.mrb[40].mxu1  ;;  %v4081_v45 = vpop.f32.mrb[37].mxu0 }
0x126a   :  { %v4082_v38 = vadd.f32 %v4081_v45, %v4080_v63  ;;  %v4116_v40 = vpop.f32.mrb[41].mxu1 }
0x126b   :  { %v4117_v1 = vadd.f32 %v4116_v40, %v4115_v22 }
0x126c   :  { %v3535_v23 = vadd.f32 %v4082_v38, %v3465_v14 }
0x126e   :  { %v3605_v26 = vadd.f32 %v4117_v1, %v3535_v23 }
0x1270   :  { %v3608_v46 = vadd.f32 %v3605_v26, %v5249_v5 }
0x1272   :  { %v3609_v27 = vsel %vm2016_vm6, %v3608_v46, 0.0 }
0x1273   :  { %3610 = vadd.xlane.f32.xlu0 %v3609_v27 }
0x1300   :  { %v3611_v28 = vpop.xlane.xlu0 %3610 }
0x1301   :  { %v3612_v56 = vmul.f32 0.03125, %v3611_v28 }
0x1303   :  { %v3613_v24 = vsub.f32 %v3608_v46, %v3612_v56 }
0x1305   :  { %v3614_v25 = vmul.f32 %v3613_v24, %v3613_v24 }
0x1307   :  { %v3615_v29 = vsel %vm2016_vm6, %v3614_v25, 0.0 }
0x1308   :  { %3616 = vadd.xlane.f32.xlu1 %v3615_v29 }
0x1395   :  { %v3617_v0 = vpop.xlane.xlu1 %3616 }
0x1396   :  { %v3618_v30 = vmul.f32 0.03125, %v3617_v0 }
0x1398   :  { %v3619_v15 = vadd.f32 1e-05, %v3618_v30 }
0x139a   :  { %4723 = vrsqrt.f32 %v3619_v15 }
0x13a4   :  { %v4724_v31 = vpop.eup %4723 }
0x13a5   :  { %v3621_v5 = vmul.f32 %v4724_v31, %v3613_v24 }
0x13a7   :  { %v3629_v33 = vmul.f32 %v3752_v12, %v3621_v5 }
0x13a9   :  { %v3637_v34 = vadd.f32 %v3753_v32, %v3629_v33 }
0x13ab   :  { %3638 = vst.msk [vmem:[%s6271_s15] sm:$0x3] %vm2016_vm6, %v3637_v34 }

// kernel: caption_generator_forward.7
= control target key start
LH: loop header
LB: loop body
LE: loop exit
PB: predicated region body
PF: predicated region fallthrough
CT: control target
= control target key end

     0   :  { %v11416_v0 = vmov 0.0|0.0   ;;  %vm11417_vm0 = vmmov 0   ;;  %v11418_v8 = vmov 0.0   ;;  %vm90_vm1 = vcmask 261120   ;;  %s14041_s4 = inlined_call_operand.vmem [shape: f32[8,32,8], index: 4, kind: input, shape index: {}]   ;;  %s14042_s2 = inlined_call_operand.vmem [shape: f32[4,32,8], index: 2, kind: input, shape index: {}]   ;;  %s14043_s0 = inlined_call_operand.vmem [shape: f32[16,32], index: 0, kind: input, shape index: {}]   ;;  %s14044_s5 = inlined_call_operand.vmem [shape: f32[8,1,8], index: 5, kind: input, shape index: {}]   ;;  %s14045_s3 = inlined_call_operand.vmem [shape: f32[4,1,8], index: 3, kind: input, shape index: {}]   ;;  %s14046_s6 = inlined_call_operand.vmem [shape: f32[4,8,32], index: 6, kind: input, shape index: {}]   ;;  %s14047_s7 = inlined_call_operand.vmem [shape: f32[1,32], index: 7, kind: input, shape index: {}]   ;;  %s14048_s8 = inlined_call_operand.vmem [shape: f32[4,32,8], index: 8, kind: input, shape index: {}]   ;;  %s14049_s18 = inlined_call_operand.vmem [shape: f32[1,32], index: 18, kind: input, shape index: {}]   ;;  %s14050_s19 = inlined_call_operand.vmem [shape: f32[1,32], index: 19, kind: input, shape index: {}]   ;;  %s14051_s10 = inlined_call_operand.vmem [shape: f32[8,32,8], index: 10, kind: input, shape index: {}]   ;;  %s14052_s1 = inlined_call_operand.vmem [shape: f32[2,1,32], index: 1, kind: input, shape index: {}]   ;;  %s14053_s11 = inlined_call_operand.vmem [shape: f32[8,1,8], index: 11, kind: input, shape index: {}]   ;;  %s14054_s9 = inlined_call_operand.vmem [shape: f32[4,1,8], index: 9, kind: input, shape index: {}]   ;;  %s14055_s12 = inlined_call_operand.vmem [shape: f32[4,8,32], index: 12, kind: input, shape index: {}]   ;;  %s14056_s13 = inlined_call_operand.vmem [shape: f32[1,32], index: 13, kind: input, shape index: {}]   ;;  %s14057_s14 = inlined_call_operand.vmem [shape: f32[32,2048], index: 14, kind: input, shape index: {}]   ;;  %s14058_s20 = inlined_call_operand.vmem [shape: f32[1,32], index: 20, kind: input, shape index: {}]   ;;  %s14059_s21 = inlined_call_operand.vmem [shape: f32[1,32], index: 21, kind: input, shape index: {}]   ;;  %s14060_s16 = inlined_call_operand.vmem [shape: f32[2048,32], index: 16, kind: input, shape index: {}]   ;;  %s14061_s15 = inlined_call_operand.vmem [shape: f32[1,2048], index: 15, kind: input, shape index: {}]   ;;  %s14062_s17 = inlined_call_operand.vmem [shape: f32[1,32], index: 17, kind: input, shape index: {}]   ;;  %s14063_s22 = inlined_call_operand.vmem [shape: f32[1,32], index: 22, kind: input, shape index: {}]   ;;  %s14064_s23 = inlined_call_operand.vmem [shape: f32[1,32], index: 23, kind: input, shape index: {}]   ;;  %s14065_s24 = inlined_call_operand.vmem [shape: f32[16,32], index: 24, kind: output, shape index: {}]  }
   0x1   :  { %14073 = sst [smem:[#allocation3_spill]] %s14041_s4  ;;  %10734 = vmatprep.subr.bf16.mxu1 %v11416_v0  ;;  %10728 = vmatprep.subr.bf16.mxu0 %v11416_v0  ;;  %vm328_vm2 = vcmask 64512   ;;  %vm4264_vm3 = vcmask 1040384   ;;  %vm4260_vm4 = vcmask 7168  }
   0x2   :  { %14074 = sst [smem:[#allocation4_spill]] %s14042_s2  ;;  %s14082_s27 = sld [smem:[#allocation3_spill]]  ;;  %10019 = vmatprep.mubr.msk.f32.mxu1 %vm11417_vm0, %v11418_v8  ;;  %10008 = vmatprep.mubr.msk.f32.mxu0 %vm11417_vm0, %v11418_v8 }
   0x3   :  { %14075 = sst [smem:[#allocation5_spill]] %s14043_s0  ;;  %s14083_s4 = sld [smem:[#allocation4_spill]] }
   0x4   :  { %14076 = sst [smem:[#allocation6_spill]] %s14044_s5  ;;  %s14084_s29 = sld [smem:[#allocation5_spill]] }
   0x5   :  { %14077 = sst [smem:[#allocation7_spill]] %s14045_s3  ;;  %s14085_s5 = sld [smem:[#allocation6_spill]] }
   0x6   :  { %14078 = sst [smem:[#allocation8_spill]] %s14046_s6  ;;  %s14086_s3 = sld [smem:[#allocation7_spill]] }
   0x7   :  { %14079 = sst [smem:[#allocation9_spill]] %s14047_s7  ;;  %s14087_s26 = sld [smem:[#allocation8_spill]] }
   0x8   :  { %14080 = sst [smem:[#allocation10_spill]] %s14048_s8  ;;  %v164_v1 = vld [vmem:[%s14082_s27] sm:$0xff]  ;;  %v165_v2 = vld [vmem:[%s14082_s27 + $0x8] sm:$0xff]  ;;  %v166_v6 = vld [vmem:[%s14082_s27 + $0x10] sm:$0xff] }
   0x9   :  { %14081 = sst [smem:[#allocation11_spill]] %s14049_s18  ;;  %v79_v3 = vld [vmem:[%s14083_s4] sm:$0xff]  ;;  %v11555_v4 = vpack.c.bf16 %v165_v2, %v164_v1  ;;  %v80_v5 = vld [vmem:[%s14083_s4 + $0x8] sm:$0xff]  ;;  %v167_v7 = vld [vmem:[%s14082_s27 + $0x18] sm:$0xff]  ;;  %s14089_s8 = sld [smem:[#allocation10_spill]] }
   0xa   :  { %v11570_v9 = vpack.c.bf16 %v80_v5, %v79_v3  ;;  %v81_v10 = vld [vmem:[%s14083_s4 + $0x10] sm:$0xff]  ;;  %v82_v11 = vld [vmem:[%s14083_s4 + $0x18] sm:$0xff]  ;;  %v11579_v12 = vpack.c.bf16 %v167_v7, %v166_v6  ;;  %v11590_v14 = vld [vmem:[%s14084_s29] sm:$0xff]  ;;  %s14090_s28 = sld [smem:[#allocation11_spill]] }
   0xb   :  { %10736 = vmatpush3.bf16.msra.mxu1 %v11555_v4  ;;  %v11583_v13 = vpack.c.bf16 %v82_v11, %v81_v10  ;;  %v11606_v15 = vld [vmem:[%s14085_s5] ss:$0 sm:$0xff]  ;;  %v9005_v24 = vld [vmem:[%s14082_s27 + $0x88] sm:$0xff]  ;;  %v9006_v25 = vld [vmem:[%s14082_s27 + $0x90] sm:$0xff] }
   0xc   :  { %10730 = vmatpush3.bf16.msra.mxu0 %v11570_v9  ;;  %10737 = vmatprep.subr.bf16.mxu1 %v11416_v0  ;;  %v11611_v16 = vld [vmem:[%s14086_s3] ss:$0 sm:$0xff]  ;;  %v9007_v27 = vld [vmem:[%s14082_s27 + $0x98] sm:$0xff]  ;;  %v11649_v39 = vld [vmem:[%s14085_s5 + $0x4] ss:$0 sm:$0xff] }
   0xd   :  { %10731 = vmatprep.subr.bf16.mxu0 %v11416_v0  ;;  %v9004_v23 = vld [vmem:[%s14082_s27 + $0x80] sm:$0xff]  ;;  %v11635_v28 = vpack.c.bf16 %v9007_v27, %v9006_v25  ;;  %v9015_v43 = vld [vmem:[%s14083_s4 + $0x28] sm:$0xff]  ;;  %v9016_v45 = vld [vmem:[%s14083_s4 + $0x30] sm:$0xff] }
   0xe   :  { %v11629_v26 = vpack.c.bf16 %v9005_v24, %v9004_v23  ;;  %v9014_v42 = vld [vmem:[%s14083_s4 + $0x20] sm:$0xff]  ;;  %v9017_v46 = vld [vmem:[%s14083_s4 + $0x38] sm:$0xff]  ;;  %v9022_v50 = vld [vmem:[%s14082_s27 + $0x28] sm:$0xff] }
   0xf   :  { %10739 = vmatpush3.bf16.msra.mxu1 %v11579_v12  ;;  %v11659_v44 = vpack.c.bf16 %v9015_v43, %v9014_v42  ;;  %v11669_v47 = vpack.c.bf16 %v9017_v46, %v9016_v45  ;;  %v9021_v49 = vld [vmem:[%s14082_s27 + $0x20] sm:$0xff]  ;;  %v9023_v54 = vld [vmem:[%s14082_s27 + $0x30] sm:$0xff]  ;;  %v9024_v55 = vld [vmem:[%s14082_s27 + $0x38] sm:$0xff] }
  0x10   :  { %10733 = vmatpush3.bf16.msra.mxu0 %v11583_v13  ;;  %10033 = vmatprep.subr.mxu1 %v11418_v8  ;;  %v11683_v52 = vpack.c.bf16 %v9022_v50, %v9021_v49  ;;  %v11693_v56 = vpack.c.bf16 %v9024_v55, %v9023_v54  ;;  %v11707_v61 = vld [vmem:[%s14085_s5 + $0x1] ss:$0 sm:$0xff]  ;;  %v9029_v6 = vld [vmem:[%s14082_s27 + $0xa8] sm:$0xff]  ;;  %v9030_v7 = vld [vmem:[%s14082_s27 + $0xb0] sm:$0xff] }
  0x11   :  { %10740 = vmatprep.subr.bf16.mxu0 %v11416_v0  ;;  %v11712_v62 = vld [vmem:[%s14086_s3 + $0x1] ss:$0 sm:$0xff]  ;;  %v9031_v11 = vld [vmem:[%s14082_s27 + $0xb8] sm:$0xff]  ;;  %v9050_v42 = vld [vmem:[%s14082_s27 + $0x50] sm:$0xff] }
  0x12   :  { %10020 = vmatmul.mubr.msk.f32.vlgmr.msra.gmra.mrb[0].mxu1 %vm90_vm1, %v11590_v14  ;;  %v9028_v5 = vld [vmem:[%s14082_s27 + $0xa0] sm:$0xff]  ;;  %v9051_v43 = vld [vmem:[%s14082_s27 + $0x58] sm:$0xff]  ;;  %v9043_v50 = vld [vmem:[%s14083_s4 + $0x50] sm:$0xff] }
  0x13   :  { %10009 = vmatmul.mubr.msk.f32.vlgmr.msra.gmra.mrb[0].mxu0 %vm90_vm1, %v11590_v14  ;;  %10035 = vmatprep.mubr.msk.f32.mxu1 %vm11417_vm0, %v11418_v8  ;;  %v11730_v10 = vpack.c.bf16 %v9029_v6, %v9028_v5  ;;  %v11790_v45 = vpack.c.bf16 %v9051_v43, %v9050_v42  ;;  %v9041_v46 = vld [vmem:[%s14083_s4 + $0x40] sm:$0xff] }
  0x14   :  { %10030 = vmatprep.mubr.msk.f32.mxu0 %vm11417_vm0, %v11418_v8  ;;  %10742 = vmatpush3.bf16.msra.mxu0 %v11629_v26  ;;  %v11838_v6 = vld [vmem:[%s14086_s3 + $0x2] ss:$0 sm:$0xff]  ;;  %v11873_v42 = vld [vmem:[%s14085_s5 + $0x6] ss:$0 sm:$0xff] }
  0x15   :  { %10743 = vmatprep.subr.bf16.mxu0 %v11416_v0 }
  0x18   :  { %10745 = vmatpush3.bf16.msra.mxu0 %v11635_v28 }
  0x19   :  { %10746 = vmatprep.subr.bf16.mxu0 %v11416_v0 }
  0x1b   :  { %10031 = vmatmul.mubr.msk.f32.vlgmr.msra.gmra.mrb[2].mxu0 %vm90_vm1, %v11590_v14 }
  0x1c   :  { %10051 = vmatprep.mubr.msk.f32.mxu0 %vm11417_vm0, %v11418_v8  ;;  %10748 = vmatpush3.bf16.msra.mxu0 %v11659_v44 }
  0x1d   :  { %10749 = vmatprep.subr.bf16.mxu0 %v11416_v0 }
  0x20   :  { %10751 = vmatpush3.bf16.msra.mxu0 %v11669_v47 }
  0x21   :  { %10758 = vmatprep.subr.bf16.mxu0 %v11416_v0 }
  0x23   :  { %10052 = vmatmul.mubr.msk.f32.vlgmr.msra.gmra.mrb[4].mxu0 %vm90_vm1, %v11590_v14 }
  0x24   :  { %10073 = vmatprep.mubr.msk.f32.mxu0 %vm11417_vm0, %v11418_v8  ;;  %10760 = vmatpush3.bf16.msra.mxu0 %v11730_v10 }
  0x25   :  { %10761 = vmatprep.subr.bf16.mxu0 %v11416_v0 }
  0xe5   :  { %v241_v17 = vpop.f32.mrb[0].mxu1 }
  0xe6   :  { %v242_v18 = vadd.f32 %v11606_v15, %v241_v17  ;;  %v10021_v19 = vpop.f32.mrb[1].mxu1  ;;  %v160_v20 = vpop.f32.mrb[0].mxu0  ;;  %v11736_v17 = vpack.c.bf16 %v9031_v11, %v9030_v7 }
  0xe7   :  { %v161_v21 = vadd.f32 %v11611_v16, %v160_v20  ;;  %v10010_v22 = vpop.f32.mrb[1].mxu0 }
  0xe8   :  { %10034 = vmatpush3.xpose.msk.msra.mxu1 %vm328_vm2, %v242_v18  ;;  %10763 = vmatpush3.bf16.msra.mxu0 %v11736_v17 }
  0xe9   :  { %10038 = vmatprep.subr.mxu1 %v11418_v8  ;;  %10086 = vmatprep.subr.mxu0 %v11418_v8 }
  0xeb   :  { %10036 = vmatmul.mubr.msk.f32.vlgmr.msra.gmra.mrb[2].mxu1 %vm328_vm2, %v161_v21  ;;  %10074 = vmatmul.mubr.msk.f32.vlgmr.msra.gmra.mrb[6].mxu0 %vm90_vm1, %v11590_v14 }
  0xec   :  { %10040 = vmatprep.mubr.msk.f32.mxu1 %vm11417_vm0, %v11418_v8  ;;  %10088 = vmatprep.mubr.msk.f32.mxu0 %vm11417_vm0, %v11418_v8 }
  0xee   :  { %v324_v38 = vpop.f32.mrb[2].mxu0 }
  0xef   :  { %v10032_v40 = vpop.f32.mrb[3].mxu0  ;;  %v325_v41 = vadd.f32 %v11649_v39, %v324_v38  ;;  %v9048_v38 = vld [vmem:[%s14082_s27 + $0x40] sm:$0xff] }
  0xf0   :  { %v9049_v40 = vld [vmem:[%s14082_s27 + $0x48] sm:$0xff] }
  0xf1   :  { %10039 = vmatpush3.msra.mxu1 %v325_v41  ;;  %v11776_v41 = vpack.c.bf16 %v9049_v40, %v9048_v38 }
  0xf2   :  { %10752 = vmatprep.subr.bf16.mxu1 %v11416_v0 }
  0xf6   :  { %v570_v57 = vpop.f32.mrb[4].mxu0 }
  0xf7   :  { %v10053_v58 = vpop.f32.mrb[5].mxu0  ;;  %v571_v3 = vadd.f32 %v11712_v62, %v570_v57 }
 0x1be   :  { %v401_v29 = vpop.f32.mrb[2].mxu1 }
 0x1bf   :  { %v405_v30 = vmul.f32 0.35355338, %v401_v29  ;;  %v10037_v31 = vpop.f32.mrb[3].mxu1  ;;  %v736_v29 = vpop.f32.mrb[6].mxu0 }
 0x1c0   :  { %v10075_v31 = vpop.f32.mrb[7].mxu0 }
 0x1c1   :  { %v406_v32 = vsel %vm328_vm2, %v405_v30, -inf }
 0x1c2   :  { %407 = vmax.xlane.f32.xlu0 %v406_v32 }
 0x24f   :  { %v408_v33 = vpop.xlane.xlu0 %407 }
 0x250   :  { %v409_v34 = vsub.f32 %v405_v30, %v408_v33  ;;  %v11750_v30 = vld [vmem:[%s14085_s5 + $0x5] ss:$0 sm:$0xff]  ;;  %v11757_v33 = vld [vmem:[%s14087_s26 + $0x8] sm:$0xff] }
 0x251   :  { %v737_v32 = vadd.f32 %v11750_v30, %v736_v29  ;;  %10087 = vmatpush3.msra.mxu0 %v11757_v33 }
 0x252   :  { %v410_v35 = vmul.f32 1.442695, %v409_v34  ;;  %10764 = vmatprep.subr.bf16.mxu0 %v11416_v0 }
 0x254   :  { %11339 = vpow2.f32 %v410_v35 }
 0x25e   :  { %v11340_v36 = vpop.eup %11339 }
 0x25f   :  { %v412_v37 = vsel %vm328_vm2, %v11340_v36, 0.0 }
 0x260   :  { %413 = vadd.xlane.f32.xlu0 %v412_v37  ;;  %v11764_v37 = vld [vmem:[%s14087_s26] sm:$0xff] }
 0x2ed   :  { %v414_v48 = vpop.xlane.xlu0 %413 }
 0x2ee   :  { %11341 = vrcp.f32 %v414_v48  ;;  %v9042_v48 = vld [vmem:[%s14083_s4 + $0x48] sm:$0xff] }
 0x2ef   :  { %v11804_v49 = vpack.c.bf16 %v9042_v48, %v9041_v46  ;;  %v11879_v48 = vld [vmem:[%s14087_s26 + $0x10] sm:$0xff] }
 0x2f8   :  { %v11342_v51 = vpop.eup %11341 }
 0x2f9   :  { %v416_v53 = vmul.f32 %v11342_v51, %v11340_v36  ;;  %v9044_v51 = vld [vmem:[%s14083_s4 + $0x58] sm:$0xff] }
 0x2fa   :  { %v11814_v55 = vpack.c.bf16 %v9044_v51, %v9043_v50 }
 0x2fb   :  { %10041 = vmatmul.mubr.msk.f32.vlgmr.msra.gmra.mrb[4].mxu1 %vm328_vm2, %v416_v53 }
 0x2fc   :  { %10754 = vmatpush3.bf16.msra.mxu1 %v11683_v52  ;;  %10062 = vmatprep.mubr.msk.f32.mxu1 %vm11417_vm0, %v11418_v8 }
 0x2fd   :  { %10755 = vmatprep.subr.bf16.mxu1 %v11416_v0 }
 0x300   :  { %10757 = vmatpush3.bf16.msra.mxu1 %v11693_v56 }
 0x301   :  { %10076 = vmatprep.subr.mxu1 %v11418_v8 }
 0x303   :  { %10063 = vmatmul.mubr.msk.f32.vlgmr.msra.gmra.mrb[6].mxu1 %vm90_vm1, %v11590_v14 }
 0x304   :  { %10078 = vmatprep.mubr.msk.f32.mxu1 %vm11417_vm0, %v11418_v8 }
 0x3ce   :  { %v486_v59 = vpop.f32.mrb[4].mxu1 }
 0x3cf   :  { %v10042_v60 = vpop.f32.mrb[5].mxu1 }
 0x3d6   :  { %v653_v63 = vpop.f32.mrb[6].mxu1 }
 0x3d7   :  { %v654_v1 = vadd.f32 %v11707_v61, %v653_v63  ;;  %v10064_v2 = vpop.f32.mrb[7].mxu1 }
 0x3d9   :  { %10077 = vmatpush3.xpose.msk.msra.mxu1 %vm328_vm2, %v654_v1 }
 0x3da   :  { %10081 = vmatprep.subr.mxu1 %v11418_v8 }
 0x3dc   :  { %10079 = vmatmul.mubr.msk.f32.vlgmr.msra.gmra.mrb[8].mxu1 %vm328_vm2, %v571_v3 }
 0x3dd   :  { %10083 = vmatprep.mubr.msk.f32.mxu1 %vm11417_vm0, %v11418_v8  ;;  %10082 = vmatpush3.msra.mxu1 %v737_v32 }
 0x3de   :  { %10091 = vmatprep.subr.mxu1 %v11418_v8 }
 0x4af   :  { %v812_v18 = vpop.f32.mrb[8].mxu1 }
 0x4b0   :  { %v816_v19 = vmul.f32 0.35355338, %v812_v18  ;;  %v10080_v20 = vpop.f32.mrb[9].mxu1 }
 0x4b1   :  { %v9056_v20 = vld [vmem:[%s14082_s27 + $0xc8] sm:$0xff] }
 0x4b2   :  { %v817_v21 = vsel %vm328_vm2, %v816_v19, -inf }
 0x4b3   :  { %818 = vmax.xlane.f32.xlu1 %v817_v21  ;;  %v9057_v21 = vld [vmem:[%s14082_s27 + $0xd0] sm:$0xff] }
 0x540   :  { %v819_v22 = vpop.xlane.xlu1 %818 }
 0x541   :  { %v820_v23 = vsub.f32 %v816_v19, %v819_v22  ;;  %v9055_v19 = vld [vmem:[%s14082_s27 + $0xc0] sm:$0xff] }
 0x542   :  { %v11853_v22 = vpack.c.bf16 %v9056_v20, %v9055_v19 }
 0x543   :  { %v821_v24 = vmul.f32 1.442695, %v820_v23  ;;  %v9058_v23 = vld [vmem:[%s14082_s27 + $0xd8] sm:$0xff] }
 0x545   :  { %11343 = vpow2.f32 %v821_v24  ;;  %v11859_v24 = vpack.c.bf16 %v9058_v23, %v9057_v21 }
 0x54f   :  { %v11344_v25 = vpop.eup %11343 }
 0x550   :  { %v823_v27 = vsel %vm328_vm2, %v11344_v25, 0.0 }
 0x551   :  { %824 = vadd.xlane.f32.xlu1 %v823_v27 }
 0x5de   :  { %v825_v34 = vpop.xlane.xlu1 %824 }
 0x5df   :  { %11345 = vrcp.f32 %v825_v34 }
 0x5e9   :  { %v11346_v35 = vpop.eup %11345 }
 0x5ea   :  { %v827_v36 = vmul.f32 %v11346_v35, %v11344_v25 }
 0x5ec   :  { %10084 = vmatmul.mubr.msk.f32.vlgmr.msra.gmra.mrb[10].mxu1 %vm328_vm2, %v827_v36 }
 0x5ed   :  { %10092 = vmatpush3.msra.mxu1 %v11764_v37  ;;  %10093 = vmatprep.mubr.msk.f32.mxu1 %vm11417_vm0, %v11418_v8 }
 0x5ee   :  { %10770 = vmatprep.subr.bf16.mxu1 %v11416_v0 }
 0x5f0   :  { %10094 = vmatmul.mubr.msk.f32.vlgmr.msra.gmra.mrb[12].mxu1 %vm328_vm2, %v486_v59  ;;  %v11828_v59 = vld [vmem:[%s14085_s5 + $0x2] ss:$0 sm:$0xff] }
 0x5f1   :  { %10772 = vmatpush3.bf16.msra.mxu1 %v11776_v41  ;;  %10115 = vmatprep.mubr.msk.f32.mxu1 %vm11417_vm0, %v11418_v8 }
 0x5f2   :  { %10773 = vmatprep.subr.bf16.mxu1 %v11416_v0 }
 0x5f5   :  { %10775 = vmatpush3.bf16.msra.mxu1 %v11790_v45 }
 0x5f6   :  { %10129 = vmatprep.subr.mxu1 %v11418_v8 }
 0x5f8   :  { %10116 = vmatmul.mubr.msk.f32.vlgmr.msra.gmra.mrb[14].mxu1 %vm90_vm1, %v11590_v14 }
 0x5f9   :  { %10131 = vmatprep.mubr.msk.f32.mxu1 %vm11417_vm0, %v11418_v8 }
 0x6bf   :  { %v897_v53 = vpop.f32.mrb[10].mxu1 }
 0x6c0   :  { %v10085_v54 = vpop.f32.mrb[11].mxu1  ;;  %10089 = vmatmul.mubr.msk.f32.vlgmr.msra.gmra.mrb[8].mxu0 %vm328_vm2, %v897_v53 }
 0x6c1   :  { %10766 = vmatpush3.bf16.msra.mxu0 %v11804_v49  ;;  %10104 = vmatprep.mubr.msk.f32.mxu0 %vm11417_vm0, %v11418_v8  ;;  %v9067_v54 = vld [vmem:[%s14083_s4 + $0x60] sm:$0xff] }
 0x6c2   :  { %10767 = vmatprep.subr.bf16.mxu0 %v11416_v0 }
 0x6c3   :  { %v1045_v57 = vpop.f32.mrb[12].mxu1 }
 0x6c4   :  { %v10095_v58 = vpop.f32.mrb[13].mxu1 }
 0x6c5   :  { %10769 = vmatpush3.bf16.msra.mxu0 %v11814_v55 }
 0x6c6   :  { %10776 = vmatprep.subr.bf16.mxu0 %v11416_v0 }
 0x6c8   :  { %10105 = vmatmul.mubr.msk.f32.vlgmr.msra.gmra.mrb[10].mxu0 %vm90_vm1, %v11590_v14 }
 0x6c9   :  { %10126 = vmatprep.mubr.msk.f32.mxu0 %vm11417_vm0, %v11418_v8  ;;  %10778 = vmatpush3.bf16.msra.mxu0 %v11853_v22 }
 0x6ca   :  { %10779 = vmatprep.subr.bf16.mxu0 %v11416_v0 }
 0x6cb   :  { %v1211_v60 = vpop.f32.mrb[14].mxu1 }
 0x6cc   :  { %v1212_v63 = vadd.f32 %v11828_v59, %v1211_v60  ;;  %v10117_v1 = vpop.f32.mrb[15].mxu1  ;;  %v9069_v60 = vld [vmem:[%s14083_s4 + $0x70] sm:$0xff] }
 0x6cd   :  { %10781 = vmatpush3.bf16.msra.mxu0 %v11859_v24 }
 0x6ce   :  { %10130 = vmatpush3.xpose.msk.msra.mxu1 %vm328_vm2, %v1212_v63  ;;  %10139 = vmatprep.subr.mxu0 %v11418_v8  ;;  %v9070_v63 = vld [vmem:[%s14083_s4 + $0x78] sm:$0xff] }
 0x6cf   :  { %10134 = vmatprep.subr.mxu1 %v11418_v8  ;;  %v11903_v1 = vpack.c.bf16 %v9070_v63, %v9069_v60 }
 0x6d0   :  { %10127 = vmatmul.mubr.msk.f32.vlgmr.msra.gmra.mrb[12].mxu0 %vm90_vm1, %v11590_v14 }
 0x6d1   :  { %10141 = vmatprep.mubr.msk.f32.mxu0 %vm11417_vm0, %v11418_v8  ;;  %10140 = vmatpush3.msra.mxu0 %v11879_v48 }
 0x6d2   :  { %10788 = vmatprep.subr.bf16.mxu0 %v11416_v0 }
 0x793   :  { %v972_v2 = vpop.f32.mrb[8].mxu0 }
 0x794   :  { %v11833_v3 = vadd.f32 %v1045_v57, %v972_v2  ;;  %v10090_v5 = vpop.f32.mrb[9].mxu0  ;;  %v9068_v57 = vld [vmem:[%s14083_s4 + $0x68] sm:$0xff]  ;;  %v9074_v2 = vld [vmem:[%s14082_s27 + $0x60] sm:$0xff] }
 0x795   :  { %v11893_v58 = vpack.c.bf16 %v9068_v57, %v9067_v54  ;;  %v9075_v5 = vld [vmem:[%s14082_s27 + $0x68] sm:$0xff] }
 0x79b   :  { %v1128_v7 = vpop.f32.mrb[10].mxu0 }
 0x79c   :  { %v1129_v11 = vadd.f32 %v11838_v6, %v1128_v7  ;;  %v10106_v18 = vpop.f32.mrb[11].mxu0  ;;  %v11917_v7 = vpack.c.bf16 %v9075_v5, %v9074_v2 }
 0x79d   :  { %v9077_v18 = vld [vmem:[%s14082_s27 + $0x78] sm:$0xff] }
 0x79e   :  { %10132 = vmatmul.mubr.msk.f32.vlgmr.msra.gmra.mrb[16].mxu1 %vm328_vm2, %v1129_v11  ;;  %v9076_v11 = vld [vmem:[%s14082_s27 + $0x70] sm:$0xff] }
 0x79f   :  { %10136 = vmatprep.mubr.msk.f32.mxu1 %vm11417_vm0, %v11418_v8  ;;  %v11927_v21 = vpack.c.bf16 %v9077_v18, %v9076_v11 }
 0x7a3   :  { %v1294_v40 = vpop.f32.mrb[12].mxu0 }
 0x7a4   :  { %v10128_v43 = vpop.f32.mrb[13].mxu0  ;;  %v1295_v46 = vadd.f32 %v11873_v42, %v1294_v40 }
 0x7a5   :  { %v9082_v43 = vld [vmem:[%s14082_s27 + $0xe8] sm:$0xff] }
 0x7a6   :  { %10135 = vmatpush3.msra.mxu1 %v1295_v46  ;;  %v9083_v46 = vld [vmem:[%s14082_s27 + $0xf0] sm:$0xff] }
 0x7a7   :  { %10782 = vmatprep.subr.bf16.mxu1 %v11416_v0 }
 0x871   :  { %v1370_v25 = vpop.f32.mrb[16].mxu1 }
 0x872   :  { %v1374_v27 = vmul.f32 0.35355338, %v1370_v25  ;;  %v10133_v29 = vpop.f32.mrb[17].mxu1 }
 0x874   :  { %v1375_v31 = vsel %vm328_vm2, %v1374_v27, -inf }
 0x875   :  { %1376 = vmax.xlane.f32.xlu0 %v1375_v31 }
 0x902   :  { %v1377_v32 = vpop.xlane.xlu0 %1376 }
 0x903   :  { %v1378_v34 = vsub.f32 %v1374_v27, %v1377_v32  ;;  %v11944_v32 = vld [vmem:[%s14085_s5 + $0x3] ss:$0 sm:$0xff] }
 0x905   :  { %v1379_v35 = vmul.f32 1.442695, %v1378_v34  ;;  %v11949_v34 = vld [vmem:[%s14086_s3 + $0x3] ss:$0 sm:$0xff]  ;;  %s14088_s3 = sld [smem:[#allocation9_spill]] }
 0x907   :  { %11347 = vpow2.f32 %v1379_v35 }
 0x911   :  { %v11348_v36 = vpop.eup %11347 }
 0x912   :  { %v1381_v38 = vsel %vm328_vm2, %v11348_v36, 0.0 }
 0x913   :  { %1382 = vadd.xlane.f32.xlu1 %v1381_v38 }
 0x9a0   :  { %v1383_v50 = vpop.xlane.xlu1 %1382 }
 0x9a1   :  { %11349 = vrcp.f32 %v1383_v50 }
 0x9ab   :  { %v11350_v51 = vpop.eup %11349 }
 0x9ac   :  { %v1385_v53 = vmul.f32 %v11350_v51, %v11348_v36  ;;  %v9084_v51 = vld [vmem:[%s14082_s27 + $0xf8] sm:$0xff] }
 0x9ae   :  { %10137 = vmatmul.mubr.msk.f32.vlgmr.msra.gmra.mrb[18].mxu1 %vm328_vm2, %v1385_v53  ;;  %v11973_v53 = vpack.c.bf16 %v9084_v51, %v9083_v46 }
 0x9af   :  { %10152 = vmatprep.mubr.msk.f32.mxu1 %vm11417_vm0, %v11418_v8  ;;  %10784 = vmatpush3.bf16.msra.mxu1 %v11893_v58 }
 0x9b0   :  { %10785 = vmatprep.subr.bf16.mxu1 %v11416_v0 }
 0x9b3   :  { %10787 = vmatpush3.bf16.msra.mxu1 %v11903_v1 }
 0x9b4   :  { %10794 = vmatprep.subr.bf16.mxu1 %v11416_v0 }
 0x9b6   :  { %10153 = vmatmul.mubr.msk.f32.vlgmr.msra.gmra.mrb[20].mxu1 %vm90_vm1, %v11590_v14 }
 0x9b7   :  { %10174 = vmatprep.mubr.msk.f32.mxu1 %vm11417_vm0, %v11418_v8 }
 0xa81   :  { %v1455_v19 = vpop.f32.mrb[18].mxu1 }
 0xa82   :  { %v10138_v20 = vpop.f32.mrb[19].mxu1  ;;  %10142 = vmatmul.mubr.msk.f32.vlgmr.msra.gmra.mrb[14].mxu0 %vm328_vm2, %v1455_v19 }
 0xa83   :  { %10790 = vmatpush3.bf16.msra.mxu0 %v11917_v7  ;;  %10163 = vmatprep.mubr.msk.f32.mxu0 %vm11417_vm0, %v11418_v8 }
 0xa84   :  { %10791 = vmatprep.subr.bf16.mxu0 %v11416_v0 }
 0xa87   :  { %10793 = vmatpush3.bf16.msra.mxu0 %v11927_v21 }
 0xa88   :  { %10177 = vmatprep.subr.mxu0 %v11418_v8 }
 0xa89   :  { %v1614_v23 = vpop.f32.mrb[20].mxu1 }
 0xa8a   :  { %10164 = vmatmul.mubr.msk.f32.vlgmr.msra.gmra.mrb[16].mxu0 %vm90_vm1, %v11590_v14  ;;  %v10154_v25 = vpop.f32.mrb[21].mxu1  ;;  %v1615_v40 = vadd.f32 %v11949_v34, %v1614_v23 }
 0xa8b   :  { %10179 = vmatprep.mubr.msk.f32.mxu0 %vm11417_vm0, %v11418_v8 }
 0xb55   :  { %v1530_v27 = vpop.f32.mrb[14].mxu0 }
 0xb56   :  { %v11939_v29 = vadd.f32 %v1530_v27, %v11833_v3  ;;  %v10143_v31 = vpop.f32.mrb[15].mxu0  ;;  %v9081_v3 = vld [vmem:[%s14082_s27 + $0xe0] sm:$0xff]  ;;  %v11993_v27 = vld [vmem:[%s14087_s26 + $0x18] sm:$0xff] }
 0xb57   :  { %v11967_v50 = vpack.c.bf16 %v9082_v43, %v9081_v3 }
 0xb59   :  { %10796 = vmatpush3.bf16.msra.mxu1 %v11967_v50 }
 0xb5a   :  { %10797 = vmatprep.subr.bf16.mxu1 %v11416_v0 }
 0xb5d   :  { %v1697_v35 = vpop.f32.mrb[16].mxu0  ;;  %10799 = vmatpush3.bf16.msra.mxu1 %v11973_v53 }
 0xb5e   :  { %v1698_v36 = vadd.f32 %v11944_v32, %v1697_v35  ;;  %v10165_v38 = vpop.f32.mrb[17].mxu0  ;;  %10187 = vmatprep.subr.mxu1 %v11418_v8 }
 0xb5f   :  { %v12008_v38 = vld [vmem:[%s14084_s29 + $0x8] sm:$0xff] }
 0xb60   :  { %10178 = vmatpush3.xpose.msk.msra.mxu0 %vm328_vm2, %v1698_v36  ;;  %10175 = vmatmul.mubr.msk.f32.vlgmr.msra.gmra.mrb[22].mxu1 %vm90_vm1, %v11590_v14  ;;  %v11987_v14 = vld [vmem:[%s14085_s5 + $0x7] ss:$0 sm:$0xff] }
 0xb61   :  { %10182 = vmatprep.subr.mxu0 %v11418_v8  ;;  %10189 = vmatprep.mubr.msk.f32.mxu1 %vm11417_vm0, %v11418_v8 }
 0xb62   :  { %10188 = vmatpush3.msra.mxu1 %v11993_v27 }
 0xb63   :  { %10180 = vmatmul.mubr.msk.f32.vlgmr.msra.gmra.mrb[18].mxu0 %vm328_vm2, %v1615_v40  ;;  %10806 = vmatprep.subr.bf16.mxu1 %v11416_v0 }
 0xb64   :  { %10184 = vmatprep.mubr.msk.f32.mxu0 %vm11417_vm0, %v11418_v8 }
 0xc33   :  { %v1780_v20 = vpop.f32.mrb[22].mxu1 }
 0xc34   :  { %v10176_v23 = vpop.f32.mrb[23].mxu1  ;;  %v1781_v25 = vadd.f32 %v11987_v14, %v1780_v20 }
 0xc36   :  { %v1856_v54 = vpop.f32.mrb[18].mxu0  ;;  %10183 = vmatpush3.msra.mxu0 %v1781_v25 }
 0xc37   :  { %v1860_v57 = vmul.f32 0.35355338, %v1856_v54  ;;  %v10181_v60 = vpop.f32.mrb[19].mxu0  ;;  %10800 = vmatprep.subr.bf16.mxu0 %v11416_v0 }
 0xc39   :  { %v1861_v63 = vsel %vm328_vm2, %v1860_v57, -inf }
 0xc3a   :  { %1862 = vmax.xlane.f32.xlu0 %v1861_v63 }
 0xcc7   :  { %v1863_v2 = vpop.xlane.xlu0 %1862 }
 0xcc8   :  { %v1864_v5 = vsub.f32 %v1860_v57, %v1863_v2 }
 0xcca   :  { %v1865_v11 = vmul.f32 1.442695, %v1864_v5 }
 0xccc   :  { %11351 = vpow2.f32 %v1865_v11 }
 0xcd6   :  { %v11352_v18 = vpop.eup %11351 }
 0xcd7   :  { %v1867_v19 = vsel %vm328_vm2, %v11352_v18, 0.0 }
 0xcd8   :  { %1868 = vadd.xlane.f32.xlu1 %v1867_v19 }
 0xd65   :  { %v1869_v31 = vpop.xlane.xlu1 %1868 }
 0xd66   :  { %11353 = vrcp.f32 %v1869_v31 }
 0xd70   :  { %v11354_v35 = vpop.eup %11353 }
 0xd71   :  { %v1871_v36 = vmul.f32 %v11354_v35, %v11352_v18 }
 0xd73   :  { %10185 = vmatmul.mubr.msk.f32.vlgmr.msra.gmra.mrb[20].mxu0 %vm328_vm2, %v1871_v36 }
 0xd74   :  { %10802 = vmatpush3.bf16.msra.mxu0 %v11570_v9  ;;  %10200 = vmatprep.mubr.msk.f32.mxu0 %vm11417_vm0, %v11418_v8 }
 0xd75   :  { %10803 = vmatprep.subr.bf16.mxu0 %v11416_v0 }
 0xd78   :  { %10805 = vmatpush3.bf16.msra.mxu0 %v11583_v13 }
 0xd79   :  { %10812 = vmatprep.subr.bf16.mxu0 %v11416_v0 }
 0xd7b   :  { %10201 = vmatmul.mubr.msk.f32.vlgmr.msra.gmra.mrb[22].mxu0 %vm90_vm1, %v12008_v38 }
 0xd7c   :  { %10814 = vmatpush3.bf16.msra.mxu0 %v11629_v26  ;;  %10222 = vmatprep.mubr.msk.f32.mxu0 %vm11417_vm0, %v11418_v8 }
 0xd7d   :  { %10815 = vmatprep.subr.bf16.mxu0 %v11416_v0 }
 0xd80   :  { %10817 = vmatpush3.bf16.msra.mxu0 %v11635_v28 }
 0xd81   :  { %10818 = vmatprep.subr.bf16.mxu0 %v11416_v0 }
 0xd83   :  { %10223 = vmatmul.mubr.msk.f32.vlgmr.msra.gmra.mrb[24].mxu0 %vm90_vm1, %v12008_v38 }
 0xd84   :  { %10820 = vmatpush3.bf16.msra.mxu0 %v11659_v44  ;;  %10243 = vmatprep.mubr.msk.f32.mxu0 %vm11417_vm0, %v11418_v8 }
 0xd85   :  { %10821 = vmatprep.subr.bf16.mxu0 %v11416_v0 }
 0xd88   :  { %10823 = vmatpush3.bf16.msra.mxu0 %v11669_v47 }
 0xd89   :  { %10830 = vmatprep.subr.bf16.mxu0 %v11416_v0 }
 0xd8b   :  { %10244 = vmatmul.mubr.msk.f32.vlgmr.msra.gmra.mrb[26].mxu0 %vm90_vm1, %v12008_v38 }
 0xd8c   :  { %10832 = vmatpush3.bf16.msra.mxu0 %v11730_v10  ;;  %10265 = vmatprep.mubr.msk.f32.mxu0 %vm11417_vm0, %v11418_v8 }
 0xd8d   :  { %10833 = vmatprep.subr.bf16.mxu0 %v11416_v0 }
 0xd90   :  { %10835 = vmatpush3.bf16.msra.mxu0 %v11736_v17 }
 0xd91   :  { %10278 = vmatprep.subr.mxu0 %v11418_v8 }
 0xd93   :  { %10266 = vmatmul.mubr.msk.f32.vlgmr.msra.gmra.mrb[28].mxu0 %vm90_vm1, %v12008_v38 }
 0xd94   :  { %10279 = vmatpush3.msra.mxu0 %v11757_v33  ;;  %10280 = vmatprep.mubr.msk.f32.mxu0 %vm11417_vm0, %v11418_v8 }
 0xd95   :  { %10836 = vmatprep.subr.bf16.mxu0 %v11416_v0 }
 0xe46   :  { %v1941_v9 = vpop.f32.mrb[20].mxu0 }
 0xe47   :  { %v10186_v13 = vpop.f32.mrb[21].mxu0  ;;  %10190 = vmatmul.mubr.msk.f32.vlgmr.msra.gmra.mrb[24].mxu1 %vm328_vm2, %v1941_v9 }
 0xe48   :  { %10808 = vmatpush3.bf16.msra.mxu1 %v11555_v4  ;;  %10211 = vmatprep.mubr.msk.f32.mxu1 %vm11417_vm0, %v11418_v8  ;;  %v12054_v4 = vld [vmem:[%s14088_s3] ss:$0 sm:$0xff] }
 0xe49   :  { %10809 = vmatprep.subr.bf16.mxu1 %v11416_v0 }
 0xe4c   :  { %10811 = vmatpush3.bf16.msra.mxu1 %v11579_v12 }
 0xe4d   :  { %10225 = vmatprep.subr.mxu1 %v11418_v8 }
 0xe4e   :  { %v2110_v26 = vpop.f32.mrb[22].mxu0 }
 0xe4f   :  { %10212 = vmatmul.mubr.msk.f32.vlgmr.msra.gmra.mrb[26].mxu1 %vm90_vm1, %v12008_v38  ;;  %v10202_v28 = vpop.f32.mrb[23].mxu0  ;;  %v2111_v3 = vadd.f32 %v11611_v16, %v2110_v26 }
 0xe50   :  { %10227 = vmatprep.mubr.msk.f32.mxu1 %vm11417_vm0, %v11418_v8 }
 0xe56   :  { %v2272_v63 = vpop.f32.mrb[24].mxu0 }
 0xe57   :  { %v10224_v2 = vpop.f32.mrb[25].mxu0  ;;  %v2273_v5 = vadd.f32 %v11649_v39, %v2272_v63 }
 0xe5e   :  { %v2515_v39 = vpop.f32.mrb[26].mxu0 }
 0xe5f   :  { %v10245_v20 = vpop.f32.mrb[27].mxu0  ;;  %v2516_v36 = vadd.f32 %v11712_v62, %v2515_v39 }
 0xf1a   :  { %v2016_v44 = vpop.f32.mrb[24].mxu1 }
 0xf1b   :  { %v2020_v47 = vadd.f32 %v2016_v44, %v11939_v29  ;;  %v10191_v10 = vpop.f32.mrb[25].mxu1 }
 0xf1c   :  { %v2677_v10 = vpop.f32.mrb[28].mxu0 }
 0xf1d   :  { %v2028_v12 = vadd.f32 %v12054_v4, %v2020_v47 }
 0xf1f   :  { %2029 = vst.msk [vmem:[#allocation2] sm:$0xff] %vm90_vm1, %v2028_v12  ;;  %v10267_v12 = vpop.f32.mrb[29].mxu0 }
 0xf22   :  { %v2191_v17 = vpop.f32.mrb[26].mxu1 }
 0xf23   :  { %v2192_v33 = vadd.f32 %v11606_v15, %v2191_v17  ;;  %v10213_v40 = vpop.f32.mrb[27].mxu1  ;;  %v2678_v17 = vadd.f32 %v11750_v30, %v2677_v10 }
 0xf25   :  { %10226 = vmatpush3.xpose.msk.msra.mxu1 %vm328_vm2, %v2192_v33 }
 0xf26   :  { %10230 = vmatprep.subr.mxu1 %v11418_v8 }
 0xf28   :  { %10228 = vmatmul.mubr.msk.f32.vlgmr.msra.gmra.mrb[28].mxu1 %vm328_vm2, %v2111_v3 }
 0xf29   :  { %10232 = vmatprep.mubr.msk.f32.mxu1 %vm11417_vm0, %v11418_v8  ;;  %10231 = vmatpush3.msra.mxu1 %v2273_v5 }
 0xf2a   :  { %10824 = vmatprep.subr.bf16.mxu1 %v11416_v0 }
 0xffb   :  { %v2348_v29 = vpop.f32.mrb[28].mxu1 }
 0xffc   :  { %v2352_v43 = vmul.f32 0.35355338, %v2348_v29  ;;  %v10229_v46 = vpop.f32.mrb[29].mxu1 }
 0xffe   :  { %v2353_v51 = vsel %vm328_vm2, %v2352_v43, -inf }
 0xfff   :  { %2354 = vmax.xlane.f32.xlu0 %v2353_v51 }
0x108c   :  { %v2355_v54 = vpop.xlane.xlu0 %2354 }
0x108d   :  { %v2356_v15 = vsub.f32 %v2352_v43, %v2355_v54 }
0x108f   :  { %v2357_v57 = vmul.f32 1.442695, %v2356_v15 }
0x1091   :  { %11355 = vpow2.f32 %v2357_v57 }
0x109b   :  { %v11356_v16 = vpop.eup %11355 }
0x109c   :  { %v2359_v60 = vsel %vm328_vm2, %v11356_v16, 0.0 }
0x109d   :  { %2360 = vadd.xlane.f32.xlu1 %v2359_v60 }
0x112a   :  { %v2361_v11 = vpop.xlane.xlu1 %2360 }
0x112b   :  { %11357 = vrcp.f32 %v2361_v11 }
0x1135   :  { %v11358_v18 = vpop.eup %11357 }
0x1136   :  { %v2363_v19 = vmul.f32 %v11358_v18, %v11356_v16 }
0x1138   :  { %10233 = vmatmul.mubr.msk.f32.vlgmr.msra.gmra.mrb[30].mxu1 %vm328_vm2, %v2363_v19 }
0x1139   :  { %10826 = vmatpush3.bf16.msra.mxu1 %v11683_v52  ;;  %10254 = vmatprep.mubr.msk.f32.mxu1 %vm11417_vm0, %v11418_v8 }
0x113a   :  { %10827 = vmatprep.subr.bf16.mxu1 %v11416_v0 }
0x113d   :  { %10829 = vmatpush3.bf16.msra.mxu1 %v11693_v56 }
0x113e   :  { %10268 = vmatprep.subr.mxu1 %v11418_v8 }
0x1140   :  { %10255 = vmatmul.mubr.msk.f32.vlgmr.msra.gmra.mrb[32].mxu1 %vm90_vm1, %v12008_v38 }
0x1141   :  { %10270 = vmatprep.mubr.msk.f32.mxu1 %vm11417_vm0, %v11418_v8 }
0x120b   :  { %v2433_v23 = vpop.f32.mrb[30].mxu1 }
0x120c   :  { %v10234_v25 = vpop.f32.mrb[31].mxu1 }
0x1213   :  { %v2596_v52 = vpop.f32.mrb[32].mxu1 }
0x1214   :  { %v2597_v31 = vadd.f32 %v11707_v61, %v2596_v52  ;;  %v10256_v35 = vpop.f32.mrb[33].mxu1 }
0x1215   :  { %v3956_v35 = vld [vmem:[#allocation2] sm:$0xff] }
0x1216   :  { %10269 = vmatpush3.xpose.msk.msra.mxu1 %vm328_vm2, %v2597_v31 }
0x1217   :  { %10273 = vmatprep.subr.mxu1 %v11418_v8 }
0x1219   :  { %10271 = vmatmul.mubr.msk.f32.vlgmr.msra.gmra.mrb[34].mxu1 %vm328_vm2, %v2516_v36 }
0x121a   :  { %10275 = vmatprep.mubr.msk.f32.mxu1 %vm11417_vm0, %v11418_v8  ;;  %10274 = vmatpush3.msra.mxu1 %v2678_v17 }
0x121b   :  { %10283 = vmatprep.subr.mxu1 %v11418_v8 }
0x12ec   :  { %v2753_v56 = vpop.f32.mrb[34].mxu1 }
0x12ed   :  { %v2757_v9 = vmul.f32 0.35355338, %v2753_v56  ;;  %v10272_v13 = vpop.f32.mrb[35].mxu1 }
0x12ef   :  { %v2758_v26 = vsel %vm328_vm2, %v2757_v9, -inf }
0x12f0   :  { %2759 = vmax.xlane.f32.xlu0 %v2758_v26 }
0x137d   :  { %v2760_v28 = vpop.xlane.xlu0 %2759 }
0x137e   :  { %v2761_v61 = vsub.f32 %v2757_v9, %v2760_v28 }
0x1380   :  { %v2762_v44 = vmul.f32 1.442695, %v2761_v61 }
0x1382   :  { %11359 = vpow2.f32 %v2762_v44 }
0x138c   :  { %v11360_v62 = vpop.eup %11359 }
0x138d   :  { %v2764_v47 = vsel %vm328_vm2, %v11360_v62, 0.0 }
0x138e   :  { %2765 = vadd.xlane.f32.xlu1 %v2764_v47 }
0x141b   :  { %v2766_v33 = vpop.xlane.xlu1 %2765 }
0x141c   :  { %11361 = vrcp.f32 %v2766_v33 }
0x1426   :  { %v11362_v40 = vpop.eup %11361 }
0x1427   :  { %v2768_v3 = vmul.f32 %v11362_v40, %v11360_v62 }
0x1429   :  { %10276 = vmatmul.mubr.msk.f32.vlgmr.msra.gmra.mrb[36].mxu1 %vm328_vm2, %v2768_v3 }
0x142a   :  { %10284 = vmatpush3.msra.mxu1 %v11764_v37  ;;  %10285 = vmatprep.mubr.msk.f32.mxu1 %vm11417_vm0, %v11418_v8 }
0x142b   :  { %10842 = vmatprep.subr.bf16.mxu1 %v11416_v0 }
0x142d   :  { %10286 = vmatmul.mubr.msk.f32.vlgmr.msra.gmra.mrb[38].mxu1 %vm328_vm2, %v2433_v23 }
0x142e   :  { %10844 = vmatpush3.bf16.msra.mxu1 %v11776_v41  ;;  %10307 = vmatprep.mubr.msk.f32.mxu1 %vm11417_vm0, %v11418_v8 }
0x142f   :  { %10845 = vmatprep.subr.bf16.mxu1 %v11416_v0 }
0x1432   :  { %10847 = vmatpush3.bf16.msra.mxu1 %v11790_v45 }
0x1433   :  { %10321 = vmatprep.subr.mxu1 %v11418_v8 }
0x1435   :  { %10308 = vmatmul.mubr.msk.f32.vlgmr.msra.gmra.mrb[40].mxu1 %vm90_vm1, %v12008_v38 }
0x1436   :  { %10323 = vmatprep.mubr.msk.f32.mxu1 %vm11417_vm0, %v11418_v8 }
0x14fc   :  { %v2838_v30 = vpop.f32.mrb[36].mxu1 }
0x14fd   :  { %v10277_v37 = vpop.f32.mrb[37].mxu1  ;;  %10281 = vmatmul.mubr.msk.f32.vlgmr.msra.gmra.mrb[30].mxu0 %vm328_vm2, %v2838_v30 }
0x14fe   :  { %10838 = vmatpush3.bf16.msra.mxu0 %v11804_v49  ;;  %10296 = vmatprep.mubr.msk.f32.mxu0 %vm11417_vm0, %v11418_v8 }
0x14ff   :  { %10839 = vmatprep.subr.bf16.mxu0 %v11416_v0 }
0x1500   :  { %v2985_v41 = vpop.f32.mrb[38].mxu1 }
0x1501   :  { %v10287_v45 = vpop.f32.mrb[39].mxu1 }
0x1502   :  { %10841 = vmatpush3.bf16.msra.mxu0 %v11814_v55 }
0x1503   :  { %10848 = vmatprep.subr.bf16.mxu0 %v11416_v0 }
0x1505   :  { %10297 = vmatmul.mubr.msk.f32.vlgmr.msra.gmra.mrb[32].mxu0 %vm90_vm1, %v12008_v38 }
0x1506   :  { %10850 = vmatpush3.bf16.msra.mxu0 %v11853_v22  ;;  %10318 = vmatprep.mubr.msk.f32.mxu0 %vm11417_vm0, %v11418_v8 }
0x1507   :  { %10851 = vmatprep.subr.bf16.mxu0 %v11416_v0 }
0x1508   :  { %v3147_v49 = vpop.f32.mrb[40].mxu1 }
0x1509   :  { %v3148_v55 = vadd.f32 %v11828_v59, %v3147_v49  ;;  %v10309_v22 = vpop.f32.mrb[41].mxu1 }
0x150a   :  { %10853 = vmatpush3.bf16.msra.mxu0 %v11859_v24  ;;  %v4007_v22 = vld [vmem:[%s14089_s8 + $0x8] sm:$0xff] }
0x150b   :  { %10331 = vmatprep.subr.mxu0 %v11418_v8  ;;  %10322 = vmatpush3.xpose.msk.msra.mxu1 %vm328_vm2, %v3148_v55  ;;  %v4006_v55 = vld [vmem:[%s14089_s8] sm:$0xff] }
0x150c   :  { %10326 = vmatprep.subr.mxu1 %v11418_v8 }
0x150d   :  { %10319 = vmatmul.mubr.msk.f32.vlgmr.msra.gmra.mrb[34].mxu0 %vm90_vm1, %v12008_v38 }
0x150e   :  { %10332 = vmatpush3.msra.mxu0 %v11879_v48  ;;  %10333 = vmatprep.mubr.msk.f32.mxu0 %vm11417_vm0, %v11418_v8 }
0x150f   :  { %10860 = vmatprep.subr.bf16.mxu0 %v11416_v0 }
0x15d0   :  { %v2912_v24 = vpop.f32.mrb[30].mxu0 }
0x15d1   :  { %v2986_v29 = vadd.f32 %v2985_v41, %v2912_v24  ;;  %v10282_v43 = vpop.f32.mrb[31].mxu0 }
0x15d2   :  { %v4008_v43 = vld [vmem:[%s14089_s8 + $0x10] sm:$0xff] }
0x15d8   :  { %v3066_v46 = vpop.f32.mrb[32].mxu0 }
0x15d9   :  { %v3067_v51 = vadd.f32 %v11838_v6, %v3066_v46  ;;  %v10298_v48 = vpop.f32.mrb[33].mxu0  ;;  %v4009_v46 = vld [vmem:[%s14089_s8 + $0x18] sm:$0xff] }
0x15db   :  { %10324 = vmatmul.mubr.msk.f32.vlgmr.msra.gmra.mrb[42].mxu1 %vm328_vm2, %v3067_v51  ;;  %v12206_v51 = vpack.c.bf16 %v4009_v46, %v4008_v43 }
0x15dc   :  { %10328 = vmatprep.mubr.msk.f32.mxu1 %vm11417_vm0, %v11418_v8 }
0x15e0   :  { %v3228_v6 = vpop.f32.mrb[34].mxu0 }
0x15e1   :  { %v10320_v11 = vpop.f32.mrb[35].mxu0  ;;  %v3229_v18 = vadd.f32 %v11873_v42, %v3228_v6  ;;  %v9196_v6 = vld [vmem:[%s14051_s10 + $0x98] sm:$0xff] }
0x15e3   :  { %10327 = vmatpush3.msra.mxu1 %v3229_v18  ;;  %v12254_v18 = vld [vmem:[%s14052_s1] sm:$0x1] }
0x15e4   :  { %10854 = vmatprep.subr.bf16.mxu1 %v11416_v0 }
0x16ae   :  { %v3304_v54 = vpop.f32.mrb[42].mxu1 }
0x16af   :  { %v3308_v15 = vmul.f32 0.35355338, %v3304_v54  ;;  %v10325_v59 = vpop.f32.mrb[43].mxu1  ;;  %v12215_v54 = vld [vmem:[%s14090_s28] ss:$0 sm:$0xff] }
0x16b0   :  { %v12221_v59 = vld [vmem:[%s14050_s19] ss:$0 sm:$0xff] }
0x16b1   :  { %v3309_v57 = vsel %vm328_vm2, %v3308_v15, -inf }
0x16b2   :  { %3310 = vmax.xlane.f32.xlu0 %v3309_v57 }
0x173f   :  { %v3311_v16 = vpop.xlane.xlu0 %3310 }
0x1740   :  { %v3312_v60 = vsub.f32 %v3308_v15, %v3311_v16 }
0x1742   :  { %v3313_v63 = vmul.f32 1.442695, %v3312_v60  ;;  %v9193_v60 = vld [vmem:[%s14051_s10 + $0x80] sm:$0xff] }
0x1744   :  { %11363 = vpow2.f32 %v3313_v63  ;;  %v9194_v63 = vld [vmem:[%s14051_s10 + $0x88] sm:$0xff] }
0x174e   :  { %v11364_v2 = vpop.eup %11363 }
0x174f   :  { %v3315_v5 = vsel %vm328_vm2, %v11364_v2, 0.0 }
0x1750   :  { %3316 = vadd.xlane.f32.xlu1 %v3315_v5  ;;  %v12240_v5 = vpack.c.bf16 %v9194_v63, %v9193_v60  ;;  %v9214_v60 = vld [vmem:[%s14051_s10 + $0xa0] sm:$0xff]  ;;  %v9215_v63 = vld [vmem:[%s14051_s10 + $0xa8] sm:$0xff] }
0x17dd   :  { %v3317_v19 = vpop.xlane.xlu1 %3316 }
0x17de   :  { %11365 = vrcp.f32 %v3317_v19  ;;  %v4090_v19 = vld [vmem:[%s14051_s10] sm:$0xff] }
0x17e8   :  { %v11366_v39 = vpop.eup %11365 }
0x17e9   :  { %v3319_v20 = vmul.f32 %v11366_v39, %v11364_v2  ;;  %v9195_v2 = vld [vmem:[%s14051_s10 + $0x90] sm:$0xff]  ;;  %v4091_v39 = vld [vmem:[%s14051_s10 + $0x8] sm:$0xff] }
0x17ea   :  { %v12246_v11 = vpack.c.bf16 %v9196_v6, %v9195_v2  ;;  %v12363_v2 = vpack.c.bf16 %v9215_v63, %v9214_v60  ;;  %v9216_v6 = vld [vmem:[%s14051_s10 + $0xb0] sm:$0xff]  ;;  %v9228_v60 = vld [vmem:[%s14089_s8 + $0x58] sm:$0xff] }
0x17eb   :  { %10329 = vmatmul.mubr.msk.f32.vlgmr.msra.gmra.mrb[44].mxu1 %vm328_vm2, %v3319_v20  ;;  %v12266_v20 = vpack.c.bf16 %v4091_v39, %v4090_v19  ;;  %v9217_v19 = vld [vmem:[%s14051_s10 + $0xb8] sm:$0xff] }
0x17ec   :  { %10856 = vmatpush3.bf16.msra.mxu1 %v11893_v58  ;;  %10344 = vmatprep.mubr.msk.f32.mxu1 %vm11417_vm0, %v11418_v8  ;;  %v12375_v39 = vpack.c.bf16 %v9217_v19, %v9216_v6 }
0x17ed   :  { %10857 = vmatprep.subr.bf16.mxu1 %v11416_v0 }
0x17f0   :  { %10859 = vmatpush3.bf16.msra.mxu1 %v11903_v1 }
0x17f1   :  { %10866 = vmatprep.subr.bf16.mxu1 %v11416_v0 }
0x17f3   :  { %10345 = vmatmul.mubr.msk.f32.vlgmr.msra.gmra.mrb[46].mxu1 %vm90_vm1, %v12008_v38 }
0x17f4   :  { %10868 = vmatpush3.bf16.msra.mxu1 %v11967_v50  ;;  %10366 = vmatprep.mubr.msk.f32.mxu1 %vm11417_vm0, %v11418_v8 }
0x17f5   :  { %10869 = vmatprep.subr.bf16.mxu1 %v11416_v0 }
0x17f8   :  { %10871 = vmatpush3.bf16.msra.mxu1 %v11973_v53 }
0x17f9   :  { %10379 = vmatprep.subr.mxu1 %v11418_v8 }
0x17fb   :  { %10367 = vmatmul.mubr.msk.f32.vlgmr.msra.gmra.mrb[48].mxu1 %vm90_vm1, %v12008_v38 }
0x17fc   :  { %10380 = vmatpush3.msra.mxu1 %v11993_v27  ;;  %10381 = vmatprep.mubr.msk.f32.mxu1 %vm11417_vm0, %v11418_v8 }
0x17fd   :  { %10878 = vmatprep.subr.bf16.mxu1 %v11416_v0 }
0x18be   :  { %v3389_v42 = vpop.f32.mrb[44].mxu1 }
0x18bf   :  { %v10330_v58 = vpop.f32.mrb[45].mxu1  ;;  %10334 = vmatmul.mubr.msk.f32.vlgmr.msra.gmra.mrb[36].mxu0 %vm328_vm2, %v3389_v42  ;;  %v4092_v42 = vld [vmem:[%s14051_s10 + $0x10] sm:$0xff] }
0x18c0   :  { %10862 = vmatpush3.bf16.msra.mxu0 %v11917_v7  ;;  %10355 = vmatprep.mubr.msk.f32.mxu0 %vm11417_vm0, %v11418_v8  ;;  %v4093_v58 = vld [vmem:[%s14051_s10 + $0x18] sm:$0xff] }
0x18c1   :  { %10863 = vmatprep.subr.bf16.mxu0 %v11416_v0 }
0x18c4   :  { %10865 = vmatpush3.bf16.msra.mxu0 %v11927_v21 }
0x18c5   :  { %10369 = vmatprep.subr.mxu0 %v11418_v8 }
0x18c6   :  { %v3545_v1 = vpop.f32.mrb[46].mxu1 }
0x18c7   :  { %10356 = vmatmul.mubr.msk.f32.vlgmr.msra.gmra.mrb[38].mxu0 %vm90_vm1, %v12008_v38  ;;  %v10346_v50 = vpop.f32.mrb[47].mxu1  ;;  %v3546_v21 = vadd.f32 %v11949_v34, %v3545_v1 }
0x18c8   :  { %10371 = vmatprep.mubr.msk.f32.mxu0 %vm11417_vm0, %v11418_v8 }
0x18ce   :  { %v3707_v40 = vpop.f32.mrb[48].mxu1 }
0x18cf   :  { %v10368_v3 = vpop.f32.mrb[49].mxu1  ;;  %v3708_v30 = vadd.f32 %v11987_v14, %v3707_v40  ;;  %v9210_v40 = vld [vmem:[%s14051_s10 + $0x30] sm:$0xff] }
0x18d0   :  { %v9211_v3 = vld [vmem:[%s14051_s10 + $0x38] sm:$0xff] }
0x1992   :  { %v3463_v53 = vpop.f32.mrb[36].mxu0 }
0x1993   :  { %v12172_v27 = vadd.f32 %v3463_v53, %v2986_v29  ;;  %v10335_v7 = vpop.f32.mrb[37].mxu0  ;;  %v12196_v29 = vpack.c.bf16 %v4007_v22, %v4006_v55  ;;  %v12276_v53 = vpack.c.bf16 %v4093_v58, %v4092_v42  ;;  %v9201_v22 = vld [vmem:[%s14089_s8 + $0x20] sm:$0xff] }
0x1994   :  { %v12389_v42 = vld [vmem:[%s14055_s12] sm:$0xff] }
0x199a   :  { %v3626_v23 = vpop.f32.mrb[38].mxu0 }
0x199b   :  { %v3627_v25 = vadd.f32 %v11944_v32, %v3626_v23  ;;  %v10357_v52 = vpop.f32.mrb[39].mxu0  ;;  %v11415_v32 = vld [vmem:[%s14084_s29] sm:$0xff] }
0x199c   :  { %v3958_v34 = vadd.f32 %v11415_v32, %v3956_v35  ;;  %v12301_v32 = vld [vmem:[%s14054_s9] ss:$0 sm:$0xff] }
0x199d   :  { %10370 = vmatpush3.xpose.msk.msra.mxu0 %vm328_vm2, %v3627_v25  ;;  %v4245_v25 = vlaneseq }
0x199e   :  { %10374 = vmatprep.subr.mxu0 %v11418_v8  ;;  %v3960_v13 = vsel %vm90_vm1, %v3958_v34, 0.0 }
0x19a0   :  { %10372 = vmatmul.mubr.msk.f32.vlgmr.msra.gmra.mrb[40].mxu0 %vm328_vm2, %v3546_v21 }
0x19a1   :  { %10376 = vmatprep.mubr.msk.f32.mxu0 %vm11417_vm0, %v11418_v8  ;;  %10375 = vmatpush3.msra.mxu0 %v3708_v30  ;;  %v12327_v30 = vpack.c.bf16 %v9211_v3, %v9210_v40 }
0x19a2   :  { %10872 = vmatprep.subr.bf16.mxu0 %v11416_v0 }
0x1a73   :  { %v3783_v31 = vpop.f32.mrb[40].mxu0 }
0x1a74   :  { %v3787_v36 = vmul.f32 0.35355338, %v3783_v31  ;;  %v10373_v56 = vpop.f32.mrb[41].mxu0 }
0x1a75   :  { %v4094_v56 = vld [vmem:[%s14053_s11] sm:$0x1] }
0x1a76   :  { %v3788_v9 = vsel %vm328_vm2, %v3787_v36, -inf }
0x1a77   :  { %3789 = vmax.xlane.f32.xlu0 %v3788_v9 }
0x1a7b   :  { %3961 = vadd.xlane.f32.xlu0 %v3960_v13 }
0x1b04   :  { %v3790_v26 = vpop.xlane.xlu0 %3789 }
0x1b05   :  { %v3791_v28 = vsub.f32 %v3787_v36, %v3790_v26  ;;  %v12289_v36 = vshrl.u32 %v4245_v25, 7 }
0x1b07   :  { %v3792_v61 = vmul.f32 1.442695, %v3791_v28  ;;  %v12296_v9 = vsub.s32 0, %v12289_v36 }
0x1b08   :  { %v3962_v44 = vpop.xlane.xlu0 %3961 }
0x1b09   :  { %11367 = vpow2.f32 %v3792_v61  ;;  %v3967_v62 = vmul.f32 0.03125, %v3962_v44  ;;  %v9197_v44 = vld [vmem:[%s14053_s11 + $0x4] sm:$0x1] }
0x1b0b   :  { %v3969_v47 = vsub.f32 %v3958_v34, %v3967_v62 }
0x1b0d   :  { %v3971_v17 = vmul.f32 %v3969_v47, %v3969_v47 }
0x1b0f   :  { %v3973_v33 = vsel %vm90_vm1, %v3971_v17, 0.0 }
0x1b13   :  { %v11368_v10 = vpop.eup %11367 }
0x1b14   :  { %v3794_v12 = vsel %vm328_vm2, %v11368_v10, 0.0 }
0x1b15   :  { %3795 = vadd.xlane.f32.xlu1 %v3794_v12 }
0x1b19   :  { %3974 = vadd.xlane.f32.xlu1 %v3973_v33 }
0x1ba2   :  { %v3796_v37 = vpop.xlane.xlu1 %3795 }
0x1ba3   :  { %11369 = vrcp.f32 %v3796_v37 }
0x1ba6   :  { %v3975_v41 = vpop.xlane.xlu1 %3974 }
0x1ba7   :  { %v3979_v45 = vmul.f32 0.03125, %v3975_v41 }
0x1ba9   :  { %v3981_v49 = vadd.f32 1e-05, %v3979_v45 }
0x1bab   :  { %11371 = vrsqrt.f32 %v3981_v49 }
0x1bad   :  { %v11370_v24 = vpop.eup %11369 }
0x1bae   :  { %v3798_v14 = vmul.f32 %v11370_v24, %v11368_v10  ;;  %v9209_v10 = vld [vmem:[%s14051_s10 + $0x28] sm:$0xff] }
0x1baf   :  { %v9202_v24 = vld [vmem:[%s14089_s8 + $0x28] sm:$0xff] }
0x1bb0   :  { %10377 = vmatmul.mubr.msk.f32.vlgmr.msra.gmra.mrb[42].mxu0 %vm328_vm2, %v3798_v14  ;;  %v12341_v43 = vpack.c.bf16 %v9202_v24, %v9201_v22  ;;  %v9235_v22 = vld [vmem:[%s14051_s10 + $0x58] sm:$0xff] }
0x1bb1   :  { %10874 = vmatpush3.bf16.msra.mxu0 %v12196_v29  ;;  %10392 = vmatprep.mubr.msk.f32.mxu0 %vm11417_vm0, %v11418_v8 }
0x1bb2   :  { %10875 = vmatprep.subr.bf16.mxu0 %v11416_v0 }
0x1bb5   :  { %v11372_v48 = vpop.eup %11371  ;;  %10877 = vmatpush3.bf16.msra.mxu0 %v12206_v51 }
0x1bb6   :  { %v3985_v15 = vmul.f32 %v11372_v48, %v3969_v47  ;;  %10884 = vmatprep.subr.bf16.mxu0 %v11416_v0  ;;  %v9208_v47 = vld [vmem:[%s14051_s10 + $0x20] sm:$0xff]  ;;  %v9203_v48 = vld [vmem:[%s14089_s8 + $0x30] sm:$0xff] }
0x1bb7   :  { %v12315_v33 = vpack.c.bf16 %v9209_v10, %v9208_v47 }
0x1bb8   :  { %v3994_v57 = vmul.f32 %v12215_v54, %v3985_v15  ;;  %v9204_v15 = vld [vmem:[%s14089_s8 + $0x38] sm:$0xff] }
0x1bba   :  { %v12225_v16 = vadd.f32 %v12221_v59, %v3994_v57  ;;  %v12351_v57 = vpack.c.bf16 %v9204_v15, %v9203_v48  ;;  %v9227_v15 = vld [vmem:[%s14089_s8 + $0x50] sm:$0xff] }
0x1bbb   :  { %v12462_v19 = vpack.c.bf16 %v9228_v60, %v9227_v15 }
0x1bbc   :  { %10393 = vmatmul.mubr.msk.f32.vlgmr.msra.gmra.mrb[44].mxu0 %vm90_vm1, %v12225_v16 }
0x1bbd   :  { %10414 = vmatprep.mubr.msk.f32.mxu0 %vm11417_vm0, %v11418_v8  ;;  %10886 = vmatpush3.bf16.msra.mxu0 %v12240_v5 }
0x1bbe   :  { %10887 = vmatprep.subr.bf16.mxu0 %v11416_v0 }
0x1bc1   :  { %10889 = vmatpush3.bf16.msra.mxu0 %v12246_v11 }
0x1bc2   :  { %10896 = vmatprep.subr.bf16.mxu0 %v11416_v0 }
0x1bc4   :  { %10415 = vmatmul.mubr.msk.f32.vlgmr.msra.gmra.mrb[46].mxu0 %vm90_vm1, %v12254_v18 }
0x1bc5   :  { %10441 = vmatprep.mubr.msk.f32.mxu0 %vm11417_vm0, %v11418_v8  ;;  %10898 = vmatpush3.bf16.msra.mxu0 %v12315_v33 }
0x1bc6   :  { %10899 = vmatprep.subr.bf16.mxu0 %v11416_v0 }
0x1bc9   :  { %10901 = vmatpush3.bf16.msra.mxu0 %v12327_v30 }
0x1bca   :  { %10455 = vmatprep.subr.mxu0 %v11418_v8 }
0x1bcc   :  { %10442 = vmatmul.mubr.msk.f32.vlgmr.msra.gmra.mrb[48].mxu0 %vm90_vm1, %v12254_v18 }
0x1bcd   :  { %10457 = vmatprep.mubr.msk.f32.mxu0 %vm11417_vm0, %v11418_v8 }
0x1c83   :  { %v3868_v1 = vpop.f32.mrb[42].mxu0 }
0x1c84   :  { %v10378_v50 = vpop.f32.mrb[43].mxu0  ;;  %10382 = vmatmul.mubr.msk.f32.vlgmr.msra.gmra.mrb[50].mxu1 %vm328_vm2, %v3868_v1 }
0x1c85   :  { %10880 = vmatpush3.bf16.msra.mxu1 %v12266_v20  ;;  %10403 = vmatprep.mubr.msk.f32.mxu1 %vm11417_vm0, %v11418_v8 }
0x1c86   :  { %10881 = vmatprep.subr.bf16.mxu1 %v11416_v0 }
0x1c89   :  { %10883 = vmatpush3.bf16.msra.mxu1 %v12276_v53 }
0x1c8a   :  { %10417 = vmatprep.subr.mxu1 %v11418_v8 }
0x1c8c   :  { %10404 = vmatmul.mubr.msk.f32.vlgmr.msra.gmra.mrb[52].mxu1 %vm90_vm1, %v12254_v18 }
0x1c8d   :  { %10419 = vmatprep.mubr.msk.f32.mxu1 %vm11417_vm0, %v11418_v8 }
0x1c8f   :  { %v4086_v7 = vpop.f32.mrb[44].mxu0 }
0x1c90   :  { %v10394_v23 = vpop.f32.mrb[45].mxu0 }
0x1c97   :  { %v4241_v62 = vpop.f32.mrb[46].mxu0 }
0x1c98   :  { %v4242_v12 = vadd.f32 %v9197_v44, %v4241_v62  ;;  %v10416_v17 = vpop.f32.mrb[47].mxu0  ;;  %v9233_v44 = vld [vmem:[%s14051_s10 + $0x48] sm:$0xff] }
0x1c9a   :  { %10418 = vmatpush3.msk.msra.mxu1 %vm4264_vm3, %v4242_v12 }
0x1c9b   :  { %10890 = vmatprep.subr.bf16.mxu1 %v11416_v0 }
0x1c9f   :  { %v4495_v58 = vpop.f32.mrb[48].mxu0 }
0x1ca0   :  { %v10443_v1 = vpop.f32.mrb[49].mxu0 }
0x1ca1   :  { %v9239_v1 = vld [vmem:[%s14051_s10 + $0xc8] sm:$0xff] }
0x1d57   :  { %v3942_v52 = vpop.f32.mrb[50].mxu1 }
0x1d58   :  { %v3946_v21 = vadd.f32 %v3942_v52, %v12172_v27  ;;  %v10383_v31 = vpop.f32.mrb[51].mxu1  ;;  %v12402_v52 = vld [vmem:[%s14054_s9 + $0x1] ss:$0 sm:$0xff] }
0x1d5a   :  { %v3954_v35 = vadd.f32 %v12054_v4, %v3946_v21  ;;  %v4087_v4 = vadd.f32 %v12301_v32, %v4086_v7  ;;  %v9212_v7 = vld [vmem:[%s14053_s11 + $0x1] sm:$0x1] }
0x1d5b   :  { %v4496_v25 = vadd.f32 %v9212_v7, %v4495_v58  ;;  %v9238_v58 = vld [vmem:[%s14051_s10 + $0xc0] sm:$0xff]  ;;  %v9240_v7 = vld [vmem:[%s14051_s10 + $0xd0] sm:$0xff] }
0x1d5c   :  { %3955 = vst.msk [vmem:[#allocation2 + $0x8] sm:$0xff] %vm90_vm1, %v3954_v35 }
0x1d5d   :  { %v4579_v21 = vrot.slane %v4496_v25, %v12296_v9 }
0x1d5f   :  { %v4164_v27 = vpop.f32.mrb[52].mxu1 }
0x1d60   :  { %v4165_v34 = vadd.f32 %v4164_v27, %v4094_v56  ;;  %v10405_v13 = vpop.f32.mrb[53].mxu1 }
0x1d61   :  { %v9218_v13 = vld [vmem:[%s14053_s11 + $0x5] sm:$0x1] }
0x1d62   :  { %v4248_v26 = vrot.slane %v4165_v34, %v12296_v9 }
0x1d64   :  { %v4249_v28 = vmul.f32 %v4248_v26, %v4087_v4 }
0x1d66   :  { %v4250_v61 = vsel %vm328_vm2, %v4249_v28, 0.0 }
0x1d67   :  { %4251 = vadd.xlane.f32.xlu0 %v4250_v61  ;;  %v9232_v61 = vld [vmem:[%s14051_s10 + $0x40] sm:$0xff] }
0x1d68   :  { %v12418_v62 = vpack.c.bf16 %v9233_v44, %v9232_v61 }
0x1df4   :  { %v4252_v37 = vpop.xlane.xlu0 %4251 }
0x1df5   :  { %v4253_v41 = vmul.f32 0.35355338, %v4252_v37 }
0x1df7   :  { %v4254_v45 = vsub.f32 %v4253_v41, %v4253_v41  ;;  %v12425_v41 = vld [vmem:[%s14055_s12 + $0x8] sm:$0xff] }
0x1df9   :  { %v4255_v49 = vmul.f32 1.442695, %v4254_v45 }
0x1dfb   :  { %11373 = vpow2.f32 %v4255_v49 }
0x1e05   :  { %v11374_v55 = vpop.eup %11373 }
0x1e06   :  { %11375 = vrcp.f32 %v11374_v55 }
0x1e10   :  { %v11376_v14 = vpop.eup %11375 }
0x1e11   :  { %v4259_v46 = vmul.f32 %v11376_v14, %v11374_v55  ;;  %v9234_v55 = vld [vmem:[%s14051_s10 + $0x50] sm:$0xff]  ;;  %v9225_v14 = vld [vmem:[%s14089_s8 + $0x40] sm:$0xff] }
0x1e12   :  { %v12438_v24 = vpack.c.bf16 %v9235_v22, %v9234_v55  ;;  %v9242_v22 = vld [vmem:[%s14053_s11 + $0x6] sm:$0x1] }
0x1e13   :  { %10420 = vmatmul.mubr.msk.f32.vlgmr.msra.gmra.mrb[54].mxu1 %vm4260_vm4, %v4259_v46  ;;  %v9226_v46 = vld [vmem:[%s14089_s8 + $0x48] sm:$0xff] }
0x1e14   :  { %10892 = vmatpush3.bf16.msra.mxu1 %v12341_v43  ;;  %10430 = vmatprep.mubr.msk.f32.mxu1 %vm11417_vm0, %v11418_v8  ;;  %v12452_v48 = vpack.c.bf16 %v9226_v46, %v9225_v14 }
0x1e15   :  { %10893 = vmatprep.subr.bf16.mxu1 %v11416_v0 }
0x1e18   :  { %10895 = vmatpush3.bf16.msra.mxu1 %v12351_v57 }
0x1e19   :  { %10902 = vmatprep.subr.bf16.mxu1 %v11416_v0 }
0x1e1b   :  { %10431 = vmatmul.mubr.msk.f32.vlgmr.msra.gmra.mrb[56].mxu1 %vm90_vm1, %v12225_v16 }
0x1e1c   :  { %10904 = vmatpush3.bf16.msra.mxu1 %v12363_v2  ;;  %10452 = vmatprep.mubr.msk.f32.mxu1 %vm11417_vm0, %v11418_v8 }
0x1e1d   :  { %10905 = vmatprep.subr.bf16.mxu1 %v11416_v0 }
0x1e20   :  { %10907 = vmatpush3.bf16.msra.mxu1 %v12375_v39 }
0x1e21   :  { %10465 = vmatprep.subr.mxu1 %v11418_v8 }
0x1e23   :  { %10453 = vmatmul.mubr.msk.f32.vlgmr.msra.gmra.mrb[58].mxu1 %vm90_vm1, %v12254_v18 }
0x1e24   :  { %10467 = vmatprep.mubr.msk.f32.mxu1 %vm11417_vm0, %v11418_v8  ;;  %10466 = vmatpush3.msra.mxu1 %v12389_v42 }
0x1e25   :  { %10914 = vmatprep.subr.bf16.mxu1 %v11416_v0 }
0x1ee6   :  { %v4334_v50 = vpop.f32.mrb[54].mxu1 }
0x1ee7   :  { %v10421_v23 = vpop.f32.mrb[55].mxu1  ;;  %10468 = vmatmul.mubr.msk.f32.vlgmr.msra.gmra.mrb[60].mxu1 %vm328_vm2, %v4334_v50  ;;  %v12474_v50 = vpack.c.bf16 %v9239_v1, %v9238_v58 }
0x1ee8   :  { %10489 = vmatprep.mubr.msk.f32.mxu1 %vm11417_vm0, %v11418_v8  ;;  %10916 = vmatpush3.bf16.msra.mxu1 %v12418_v62  ;;  %v9241_v23 = vld [vmem:[%s14051_s10 + $0xd8] sm:$0xff] }
0x1ee9   :  { %10917 = vmatprep.subr.bf16.mxu1 %v11416_v0  ;;  %v12486_v25 = vpack.c.bf16 %v9241_v23, %v9240_v7 }
0x1eec   :  { %10919 = vmatpush3.bf16.msra.mxu1 %v12438_v24 }
0x1eed   :  { %10503 = vmatprep.subr.mxu1 %v11418_v8 }
0x1eee   :  { %v4418_v31 = vpop.f32.mrb[56].mxu1 }
0x1eef   :  { %v4419_v35 = vadd.f32 %v12402_v52, %v4418_v31  ;;  %v10432_v56 = vpop.f32.mrb[57].mxu1  ;;  %10490 = vmatmul.mubr.msk.f32.vlgmr.msra.gmra.mrb[62].mxu1 %vm90_vm1, %v12254_v18  ;;  %v9249_v31 = vld [vmem:[%s14089_s8 + $0x68] sm:$0xff] }
0x1ef0   :  { %10505 = vmatprep.mubr.msk.f32.mxu1 %vm11417_vm0, %v11418_v8  ;;  %v9250_v56 = vld [vmem:[%s14089_s8 + $0x70] sm:$0xff] }
0x1ef1   :  { %v4580_v27 = vmul.f32 %v4579_v21, %v4419_v35  ;;  %v9248_v21 = vld [vmem:[%s14089_s8 + $0x60] sm:$0xff] }
0x1ef2   :  { %v12498_v35 = vpack.c.bf16 %v9249_v31, %v9248_v21 }
0x1ef3   :  { %v4581_v34 = vsel %vm328_vm2, %v4580_v27, 0.0  ;;  %v9251_v27 = vld [vmem:[%s14089_s8 + $0x78] sm:$0xff] }
0x1ef4   :  { %4582 = vadd.xlane.f32.xlu1 %v4581_v34  ;;  %v12510_v34 = vpack.c.bf16 %v9251_v27, %v9250_v56  ;;  %v12547_v56 = vld [vmem:[%s14055_s12 + $0x10] sm:$0xff]  ;;  %v9261_v27 = vld [vmem:[%s14051_s10 + $0xe0] sm:$0xff] }
0x1ef6   :  { %v4572_v4 = vpop.f32.mrb[58].mxu1 }
0x1ef7   :  { %v4573_v26 = vadd.f32 %v9218_v13, %v4572_v4  ;;  %v10454_v28 = vpop.f32.mrb[59].mxu1 }
0x1ef8   :  { %v9236_v28 = vld [vmem:[%s14053_s11 + $0x2] sm:$0x1] }
0x1ef9   :  { %10456 = vmatpush3.msk.msra.mxu0 %vm4264_vm3, %v4573_v26 }
0x1efa   :  { %10460 = vmatprep.subr.mxu0 %v11418_v8 }
0x1f81   :  { %v4583_v47 = vpop.xlane.xlu1 %4582 }
0x1f82   :  { %v4584_v10 = vmul.f32 0.35355338, %v4583_v47 }
0x1f84   :  { %v4585_v12 = vsub.f32 %v4584_v10, %v4584_v10  ;;  %v12529_v10 = vld [vmem:[%s14054_s9 + $0x2] ss:$0 sm:$0xff] }
0x1f86   :  { %v4586_v17 = vmul.f32 1.442695, %v4585_v12 }
0x1f88   :  { %11377 = vpow2.f32 %v4586_v17 }
0x1f92   :  { %v11378_v40 = vpop.eup %11377 }
0x1f93   :  { %11379 = vrcp.f32 %v11378_v40 }
0x1f9d   :  { %v11380_v3 = vpop.eup %11379 }
0x1f9e   :  { %v4590_v37 = vmul.f32 %v11380_v3, %v11378_v40 }
0x1fa0   :  { %10458 = vmatmul.mubr.msk.f32.vlgmr.msra.gmra.mrb[50].mxu0 %vm4260_vm4, %v4590_v37  ;;  %v3957_v37 = vld [vmem:[#allocation2 + $0x8] sm:$0xff] }
0x1fa1   :  { %10461 = vmatpush3.msra.mxu0 %v12425_v41  ;;  %10462 = vmatprep.mubr.msk.f32.mxu0 %vm11417_vm0, %v11418_v8 }
0x1fa2   :  { %10908 = vmatprep.subr.bf16.mxu0 %v11416_v0 }
0x1fba   :  { %v4811_v45 = vpop.f32.mrb[60].mxu1 }
0x1fbb   :  { %v10469_v49 = vpop.f32.mrb[61].mxu1 }
0x1fc2   :  { %v4971_v13 = vpop.f32.mrb[62].mxu1 }
0x1fc3   :  { %v10491_v4 = vpop.f32.mrb[63].mxu1  ;;  %v4972_v47 = vadd.f32 %v9236_v28, %v4971_v13  ;;  %v9262_v13 = vld [vmem:[%s14051_s10 + $0xe8] sm:$0xff]  ;;  %v9264_v28 = vld [vmem:[%s14051_s10 + $0xf8] sm:$0xff] }
0x1fc4   :  { %v9263_v4 = vld [vmem:[%s14051_s10 + $0xf0] sm:$0xff] }
0x1fc5   :  { %v5055_v12 = vrot.slane %v4972_v47, %v12296_v9  ;;  %v9255_v47 = vld [vmem:[%s14051_s10 + $0x60] sm:$0xff] }
0x2073   :  { %v4663_v63 = vpop.f32.mrb[50].mxu0 }
0x2074   :  { %v10459_v6 = vpop.f32.mrb[51].mxu0  ;;  %10463 = vmatmul.mubr.msk.f32.vlgmr.msra.gmra.mrb[52].mxu0 %vm328_vm2, %v4663_v63 }
0x2075   :  { %10910 = vmatpush3.bf16.msra.mxu0 %v12452_v48  ;;  %10478 = vmatprep.mubr.msk.f32.mxu0 %vm11417_vm0, %v11418_v8 }
0x2076   :  { %10911 = vmatprep.subr.bf16.mxu0 %v11416_v0 }
0x2079   :  { %10913 = vmatpush3.bf16.msra.mxu0 %v12462_v19 }
0x207a   :  { %10920 = vmatprep.subr.bf16.mxu0 %v11416_v0 }
0x207c   :  { %10479 = vmatmul.mubr.msk.f32.vlgmr.msra.gmra.mrb[54].mxu0 %vm90_vm1, %v12225_v16 }
0x207d   :  { %10922 = vmatpush3.bf16.msra.mxu0 %v12474_v50  ;;  %10500 = vmatprep.mubr.msk.f32.mxu0 %vm11417_vm0, %v11418_v8 }
0x207e   :  { %10923 = vmatprep.subr.bf16.mxu0 %v11416_v0 }
0x2081   :  { %10925 = vmatpush3.bf16.msra.mxu0 %v12486_v25 }
0x2082   :  { %10926 = vmatprep.subr.bf16.mxu0 %v11416_v0 }
0x2084   :  { %10501 = vmatmul.mubr.msk.f32.vlgmr.msra.gmra.mrb[56].mxu0 %vm90_vm1, %v12254_v18 }
0x2085   :  { %10928 = vmatpush3.bf16.msra.mxu0 %v12498_v35  ;;  %10521 = vmatprep.mubr.msk.f32.mxu0 %vm11417_vm0, %v11418_v8 }
0x2086   :  { %10929 = vmatprep.subr.bf16.mxu0 %v11416_v0 }
0x2089   :  { %10931 = vmatpush3.bf16.msra.mxu0 %v12510_v34 }
0x208a   :  { %10938 = vmatprep.subr.bf16.mxu0 %v11416_v0 }
0x208c   :  { %10522 = vmatmul.mubr.msk.f32.vlgmr.msra.gmra.mrb[58].mxu0 %vm90_vm1, %v12225_v16 }
0x208d   :  { %10543 = vmatprep.mubr.msk.f32.mxu0 %vm11417_vm0, %v11418_v8 }
0x2147   :  { %v4738_v26 = vpop.f32.mrb[52].mxu0 }
0x2148   :  { %v12524_v61 = vadd.f32 %v4811_v45, %v4738_v26  ;;  %v10464_v44 = vpop.f32.mrb[53].mxu0  ;;  %v12535_v45 = vadd.f32 %v3957_v37, %v12008_v38  ;;  %v12563_v26 = vpack.c.bf16 %v9262_v13, %v9261_v27  ;;  %v9265_v27 = vld [vmem:[%s14053_s11 + $0x7] sm:$0x1] }
0x2149   :  { %v12569_v44 = vpack.c.bf16 %v9264_v28, %v9263_v4 }
0x214a   :  { %v3963_v46 = vsel %vm90_vm1, %v12535_v45, 0.0  ;;  %10940 = vmatpush3.bf16.msra.mxu0 %v12563_v26 }
0x214b   :  { %10941 = vmatprep.subr.bf16.mxu0 %v11416_v0 }
0x214e   :  { %10943 = vmatpush3.bf16.msra.mxu0 %v12569_v44 }
0x214f   :  { %v4894_v17 = vpop.f32.mrb[54].mxu0  ;;  %10944 = vmatprep.subr.bf16.mxu0 %v11416_v0 }
0x2150   :  { %v4895_v40 = vadd.f32 %v12529_v10, %v4894_v17  ;;  %v10480_v3 = vpop.f32.mrb[55].mxu0 }
0x2151   :  { %10544 = vmatmul.mubr.msk.f32.vlgmr.msra.gmra.mrb[60].mxu0 %vm90_vm1, %v12254_v18 }
0x2152   :  { %v5056_v49 = vmul.f32 %v5055_v12, %v4895_v40  ;;  %10946 = vmatpush3.bf16.msra.mxu0 %v12196_v29  ;;  %10564 = vmatprep.mubr.msk.f32.mxu0 %vm11417_vm0, %v11418_v8  ;;  %v9256_v12 = vld [vmem:[%s14051_s10 + $0x68] sm:$0xff]  ;;  %v9257_v29 = vld [vmem:[%s14051_s10 + $0x70] sm:$0xff] }
0x2153   :  { %10947 = vmatprep.subr.bf16.mxu0 %v11416_v0  ;;  %v12588_v17 = vpack.c.bf16 %v9256_v12, %v9255_v47 }
0x2154   :  { %v5057_v55 = vsel %vm328_vm2, %v5056_v49, 0.0 }
0x2155   :  { %5058 = vadd.xlane.f32.xlu0 %v5057_v55 }
0x2156   :  { %10949 = vmatpush3.bf16.msra.mxu0 %v12206_v51  ;;  %v9258_v51 = vld [vmem:[%s14051_s10 + $0x78] sm:$0xff] }
0x2157   :  { %v5048_v14 = vpop.f32.mrb[56].mxu0  ;;  %10956 = vmatprep.subr.bf16.mxu0 %v11416_v0  ;;  %v12598_v37 = vpack.c.bf16 %v9258_v51, %v9257_v29 }
0x2158   :  { %v5049_v15 = vadd.f32 %v9242_v22, %v5048_v14  ;;  %v10502_v60 = vpop.f32.mrb[57].mxu0 }
0x2159   :  { %3964 = vadd.xlane.f32.xlu0 %v3963_v46  ;;  %v9259_v46 = vld [vmem:[%s14053_s11 + $0x3] sm:$0x1] }
0x215a   :  { %10504 = vmatpush3.msk.msra.mxu1 %vm4264_vm3, %v5049_v15  ;;  %v12618_v60 = vld [vmem:[%s14054_s9 + $0x3] ss:$0 sm:$0xff] }
0x215b   :  { %10508 = vmatprep.subr.mxu1 %v11418_v8 }
0x215f   :  { %v5298_v63 = vpop.f32.mrb[58].mxu0 }
0x2160   :  { %v10523_v6 = vpop.f32.mrb[59].mxu0 }
0x21e2   :  { %v5059_v38 = vpop.xlane.xlu0 %5058 }
0x21e3   :  { %v5060_v58 = vmul.f32 0.35355338, %v5059_v38 }
0x21e5   :  { %v5061_v1 = vsub.f32 %v5060_v58, %v5060_v58  ;;  %v5299_v58 = vadd.f32 %v12618_v60, %v5298_v63 }
0x21e6   :  { %v3965_v14 = vpop.xlane.xlu0 %3964 }
0x21e7   :  { %v5062_v7 = vmul.f32 1.442695, %v5061_v1  ;;  %v3968_v15 = vmul.f32 0.03125, %v3965_v14 }
0x21e9   :  { %11381 = vpow2.f32 %v5062_v7 }
0x21f3   :  { %v11382_v23 = vpop.eup %11381 }
0x21f4   :  { %11383 = vrcp.f32 %v11382_v23 }
0x21fe   :  { %v11384_v21 = vpop.eup %11383 }
0x21ff   :  { %v5066_v31 = vmul.f32 %v11384_v21, %v11382_v23 }
0x2201   :  { %10506 = vmatmul.mubr.msk.f32.vlgmr.msra.gmra.mrb[64].mxu1 %vm4260_vm4, %v5066_v31 }
0x2202   :  { %10509 = vmatpush3.msra.mxu1 %v12547_v56  ;;  %10510 = vmatprep.mubr.msk.f32.mxu1 %vm11417_vm0, %v11418_v8 }
0x2203   :  { %10932 = vmatprep.subr.bf16.mxu1 %v11416_v0 }
0x2224   :  { %v5452_v13 = vpop.f32.mrb[60].mxu0 }
0x2225   :  { %v5453_v4 = vadd.f32 %v9265_v27, %v5452_v13  ;;  %v10545_v28 = vpop.f32.mrb[61].mxu0 }
0x22d4   :  { %v5139_v40 = vpop.f32.mrb[64].mxu1 }
0x22d5   :  { %v10507_v3 = vpop.f32.mrb[65].mxu1  ;;  %10511 = vmatmul.mubr.msk.f32.vlgmr.msra.gmra.mrb[66].mxu1 %vm328_vm2, %v5139_v40 }
0x22d6   :  { %10934 = vmatpush3.bf16.msra.mxu1 %v12588_v17  ;;  %10532 = vmatprep.mubr.msk.f32.mxu1 %vm11417_vm0, %v11418_v8 }
0x22d7   :  { %10935 = vmatprep.subr.bf16.mxu1 %v11416_v0 }
0x22da   :  { %10937 = vmatpush3.bf16.msra.mxu1 %v12598_v37 }
0x22db   :  { %10546 = vmatprep.subr.mxu1 %v11418_v8 }
0x22dd   :  { %10533 = vmatmul.mubr.msk.f32.vlgmr.msra.gmra.mrb[68].mxu1 %vm90_vm1, %v12254_v18 }
0x22de   :  { %10548 = vmatprep.mubr.msk.f32.mxu1 %vm11417_vm0, %v11418_v8  ;;  %10547 = vmatpush3.msk.msra.mxu1 %vm4264_vm3, %v5453_v4 }
0x22df   :  { %10551 = vmatprep.subr.mxu1 %v11418_v8 }
0x23a8   :  { %v5214_v49 = vpop.f32.mrb[66].mxu1 }
0x23a9   :  { %v12610_v55 = vadd.f32 %v5214_v49, %v12524_v61  ;;  %v10512_v22 = vpop.f32.mrb[67].mxu1  ;;  %v3970_v61 = vsub.f32 %v12535_v45, %v3968_v15 }
0x23ab   :  { %v3972_v21 = vmul.f32 %v3970_v61, %v3970_v61 }
0x23ad   :  { %v3976_v31 = vsel %vm90_vm1, %v3972_v21, 0.0 }
0x23b0   :  { %v5375_v18 = vpop.f32.mrb[68].mxu1 }
0x23b1   :  { %v5376_v6 = vadd.f32 %v9259_v46, %v5375_v18  ;;  %v10534_v38 = vpop.f32.mrb[69].mxu1 }
0x23b3   :  { %v5459_v1 = vrot.slane %v5376_v6, %v12296_v9 }
0x23b5   :  { %v5460_v7 = vmul.f32 %v5459_v1, %v5299_v58 }
0x23b7   :  { %v5461_v23 = vsel %vm328_vm2, %v5460_v7, 0.0 }
0x23b8   :  { %5462 = vadd.xlane.f32.xlu1 %v5461_v23 }
0x23bc   :  { %3977 = vadd.xlane.f32.xlu1 %v3976_v31 }
0x2445   :  { %v5463_v45 = vpop.xlane.xlu1 %5462 }
0x2446   :  { %v5464_v63 = vmul.f32 0.35355338, %v5463_v45 }
0x2448   :  { %v5465_v47 = vsub.f32 %v5464_v63, %v5464_v63 }
0x2449   :  { %v3978_v12 = vpop.xlane.xlu1 %3977 }
0x244a   :  { %v5466_v29 = vmul.f32 1.442695, %v5465_v47  ;;  %v3980_v51 = vmul.f32 0.03125, %v3978_v12 }
0x244c   :  { %11385 = vpow2.f32 %v5466_v29  ;;  %v3982_v40 = vadd.f32 1e-05, %v3980_v51 }
0x244e   :  { %11387 = vrsqrt.f32 %v3982_v40 }
0x2456   :  { %v11386_v3 = vpop.eup %11385 }
0x2457   :  { %11389 = vrcp.f32 %v11386_v3 }
0x2458   :  { %v11388_v49 = vpop.eup %11387 }
0x2459   :  { %v3986_v22 = vmul.f32 %v11388_v49, %v3970_v61 }
0x245b   :  { %v3995_v14 = vmul.f32 %v12215_v54, %v3986_v22  ;;  %v12648_v54 = vld [vmem:[%s14055_s12 + $0x18] sm:$0xff] }
0x245d   :  { %v12632_v46 = vadd.f32 %v12221_v59, %v3995_v14  ;;  %v12655_v59 = vld [vmem:[%s14052_s1 + $0x1] sm:$0x1] }
0x245f   :  { %10565 = vmatmul.mubr.msk.f32.vlgmr.msra.gmra.mrb[62].mxu0 %vm90_vm1, %v12632_v46 }
0x2460   :  { %10958 = vmatpush3.bf16.msra.mxu0 %v12240_v5  ;;  %10586 = vmatprep.mubr.msk.f32.mxu0 %vm11417_vm0, %v11418_v8 }
0x2461   :  { %v11390_v15 = vpop.eup %11389  ;;  %10959 = vmatprep.subr.bf16.mxu0 %v11416_v0 }
0x2462   :  { %v5470_v18 = vmul.f32 %v11390_v15, %v11386_v3  ;;  %v9295_v3 = vld [vmem:[%s14053_s11 + $0x1] sm:$0x1] }
0x2464   :  { %10549 = vmatmul.mubr.msk.f32.vlgmr.msra.gmra.mrb[70].mxu1 %vm4260_vm4, %v5470_v18  ;;  %10961 = vmatpush3.bf16.msra.mxu0 %v12246_v11 }
0x2465   :  { %10553 = vmatprep.mubr.msk.f32.mxu1 %vm11417_vm0, %v11418_v8  ;;  %10968 = vmatprep.subr.bf16.mxu0 %v11416_v0 }
0x2466   :  { %10552 = vmatpush3.msra.mxu1 %v12648_v54 }
0x2467   :  { %10950 = vmatprep.subr.bf16.mxu1 %v11416_v0  ;;  %10587 = vmatmul.mubr.msk.f32.vlgmr.msra.gmra.mrb[64].mxu0 %vm90_vm1, %v12655_v59 }
0x2468   :  { %10970 = vmatpush3.bf16.msra.mxu0 %v12315_v33  ;;  %10613 = vmatprep.mubr.msk.f32.mxu0 %vm11417_vm0, %v11418_v8 }
0x2469   :  { %10971 = vmatprep.subr.bf16.mxu0 %v11416_v0 }
0x246c   :  { %10973 = vmatpush3.bf16.msra.mxu0 %v12327_v30 }
0x246d   :  { %10627 = vmatprep.subr.mxu0 %v11418_v8 }
0x246f   :  { %10614 = vmatmul.mubr.msk.f32.vlgmr.msra.gmra.mrb[66].mxu0 %vm90_vm1, %v12655_v59 }
0x2470   :  { %10629 = vmatprep.mubr.msk.f32.mxu0 %vm11417_vm0, %v11418_v8 }
0x2532   :  { %v5714_v5 = vpop.f32.mrb[62].mxu0 }
0x2533   :  { %v10566_v11 = vpop.f32.mrb[63].mxu0  ;;  %v5715_v21 = vadd.f32 %v12301_v32, %v5714_v5 }
0x2537   :  { %v5543_v6 = vpop.f32.mrb[70].mxu1 }
0x2538   :  { %v10550_v38 = vpop.f32.mrb[71].mxu1  ;;  %10554 = vmatmul.mubr.msk.f32.vlgmr.msra.gmra.mrb[72].mxu1 %vm328_vm2, %v5543_v6 }
0x2539   :  { %10952 = vmatpush3.bf16.msra.mxu1 %v12266_v20  ;;  %10575 = vmatprep.mubr.msk.f32.mxu1 %vm11417_vm0, %v11418_v8  ;;  %v12683_v20 = vld [vmem:[%s14056_s13] ss:$0 sm:$0xff] }
0x253a   :  { %10953 = vmatprep.subr.bf16.mxu1 %v11416_v0  ;;  %v5867_v4 = vpop.f32.mrb[64].mxu0 }
0x253b   :  { %v10588_v45 = vpop.f32.mrb[65].mxu0 }
0x253c   :  { %v9325_v45 = vld [vmem:[%s14053_s11 + $0x6] sm:$0x1] }
0x253d   :  { %10955 = vmatpush3.bf16.msra.mxu1 %v12276_v53  ;;  %v5722_v53 = vld [vmem:[%s14053_s11] sm:$0x1] }
0x253e   :  { %10589 = vmatprep.subr.mxu1 %v11418_v8 }
0x2540   :  { %10576 = vmatmul.mubr.msk.f32.vlgmr.msra.gmra.mrb[74].mxu1 %vm90_vm1, %v12655_v59 }
0x2541   :  { %10591 = vmatprep.mubr.msk.f32.mxu1 %vm11417_vm0, %v11418_v8 }
0x260b   :  { %v5618_v33 = vpop.f32.mrb[72].mxu1 }
0x260c   :  { %v5622_v30 = vadd.f32 %v5618_v33, %v12610_v55  ;;  %v10555_v58 = vpop.f32.mrb[73].mxu1  ;;  %v9280_v55 = vld [vmem:[%s14053_s11 + $0x4] sm:$0x1] }
0x260d   :  { %v5868_v28 = vadd.f32 %v9280_v55, %v5867_v4 }
0x260e   :  { %v5630_v61 = vadd.f32 %v12683_v20, %v5622_v30 }
0x260f   :  { %10590 = vmatpush3.msk.msra.mxu1 %vm4264_vm3, %v5868_v28 }
0x2610   :  { %5631 = vst.msk [vmem:[#allocation2] sm:$0xff] %vm90_vm1, %v5630_v61  ;;  %10962 = vmatprep.subr.bf16.mxu1 %v11416_v0 }
0x2613   :  { %v5792_v1 = vpop.f32.mrb[74].mxu1 }
0x2614   :  { %v5793_v7 = vadd.f32 %v5792_v1, %v5722_v53  ;;  %v10577_v23 = vpop.f32.mrb[75].mxu1 }
0x2616   :  { %v5874_v31 = vrot.slane %v5793_v7, %v12296_v9 }
0x2618   :  { %v5875_v27 = vmul.f32 %v5874_v31, %v5715_v21 }
0x261a   :  { %v5876_v13 = vsel %vm328_vm2, %v5875_v27, 0.0 }
0x261b   :  { %5877 = vadd.xlane.f32.xlu0 %v5876_v13  ;;  %v7235_v13 = vld [vmem:[#allocation2] sm:$0xff] }
0x261c   :  { %v7237_v28 = vadd.f32 %v7235_v13, %v12225_v16  ;;  %v9342_v13 = vld [vmem:[%s14053_s11 + $0x3] sm:$0x1] }
0x26a8   :  { %v5878_v63 = vpop.xlane.xlu0 %5877 }
0x26a9   :  { %v5879_v47 = vmul.f32 0.35355338, %v5878_v63 }
0x26ab   :  { %v5880_v32 = vsub.f32 %v5879_v47, %v5879_v47  ;;  %v7239_v47 = vsel %vm90_vm1, %v7237_v28, 0.0 }
0x26ad   :  { %v5881_v12 = vmul.f32 1.442695, %v5880_v32 }
0x26af   :  { %11391 = vpow2.f32 %v5881_v12 }
0x26b9   :  { %v11392_v29 = vpop.eup %11391 }
0x26ba   :  { %11393 = vrcp.f32 %v11392_v29 }
0x26c4   :  { %v11394_v51 = vpop.eup %11393 }
0x26c5   :  { %v5885_v40 = vmul.f32 %v11394_v51, %v11392_v29 }
0x26c7   :  { %10592 = vmatmul.mubr.msk.f32.vlgmr.msra.gmra.mrb[76].mxu1 %vm4260_vm4, %v5885_v40 }
0x26c8   :  { %10964 = vmatpush3.bf16.msra.mxu1 %v12341_v43  ;;  %10602 = vmatprep.mubr.msk.f32.mxu1 %vm11417_vm0, %v11418_v8  ;;  %v6115_v43 = vpop.f32.mrb[66].mxu0 }
0x26c9   :  { %10965 = vmatprep.subr.bf16.mxu1 %v11416_v0 }
0x26cc   :  { %10967 = vmatpush3.bf16.msra.mxu1 %v12351_v57  ;;  %v10615_v57 = vpop.f32.mrb[67].mxu0 }
0x26cd   :  { %10974 = vmatprep.subr.bf16.mxu1 %v11416_v0 }
0x26cf   :  { %10603 = vmatmul.mubr.msk.f32.vlgmr.msra.gmra.mrb[78].mxu1 %vm90_vm1, %v12632_v46 }
0x26d0   :  { %10976 = vmatpush3.bf16.msra.mxu1 %v12363_v2  ;;  %10624 = vmatprep.mubr.msk.f32.mxu1 %vm11417_vm0, %v11418_v8 }
0x26d1   :  { %10977 = vmatprep.subr.bf16.mxu1 %v11416_v0 }
0x26d4   :  { %10979 = vmatpush3.bf16.msra.mxu1 %v12375_v39 }
0x26d5   :  { %10637 = vmatprep.subr.mxu1 %v11418_v8 }
0x26d7   :  { %10625 = vmatmul.mubr.msk.f32.vlgmr.msra.gmra.mrb[80].mxu1 %vm90_vm1, %v12655_v59 }
0x26d8   :  { %10638 = vmatpush3.msra.mxu1 %v12389_v42  ;;  %10639 = vmatprep.mubr.msk.f32.mxu1 %vm11417_vm0, %v11418_v8  ;;  %v6116_v42 = vadd.f32 %v9295_v3, %v6115_v43 }
0x26d9   :  { %10986 = vmatprep.subr.bf16.mxu1 %v11416_v0 }
0x26da   :  { %v6197_v49 = vrot.slane %v6116_v42, %v12296_v9 }
0x279a   :  { %v5958_v2 = vpop.f32.mrb[76].mxu1 }
0x279b   :  { %v10593_v39 = vpop.f32.mrb[77].mxu1  ;;  %10640 = vmatmul.mubr.msk.f32.vlgmr.msra.gmra.mrb[82].mxu1 %vm328_vm2, %v5958_v2 }
0x279c   :  { %10988 = vmatpush3.bf16.msra.mxu1 %v12418_v62  ;;  %10661 = vmatprep.mubr.msk.f32.mxu1 %vm11417_vm0, %v11418_v8 }
0x279d   :  { %10989 = vmatprep.subr.bf16.mxu1 %v11416_v0 }
0x27a0   :  { %10991 = vmatpush3.bf16.msra.mxu1 %v12438_v24  ;;  %v9301_v24 = vld [vmem:[%s14053_s11 + $0x5] sm:$0x1] }
0x27a1   :  { %10675 = vmatprep.subr.mxu1 %v11418_v8 }
0x27a2   :  { %v6040_v22 = vpop.f32.mrb[78].mxu1 }
0x27a3   :  { %v6041_v14 = vadd.f32 %v12402_v52, %v6040_v22  ;;  %v10604_v15 = vpop.f32.mrb[79].mxu1  ;;  %10662 = vmatmul.mubr.msk.f32.vlgmr.msra.gmra.mrb[84].mxu1 %vm90_vm1, %v12655_v59 }
0x27a4   :  { %10677 = vmatprep.mubr.msk.f32.mxu1 %vm11417_vm0, %v11418_v8  ;;  %v7284_v15 = vld [vmem:[%s14057_s14 + $0x8] sm:$0xff] }
0x27a5   :  { %v6198_v62 = vmul.f32 %v6197_v49, %v6041_v14 }
0x27a7   :  { %v6199_v18 = vsel %vm328_vm2, %v6198_v62, 0.0  ;;  %v7300_v62 = vld [vmem:[%s14057_s14 + $0x88] sm:$0xff] }
0x27a8   :  { %6200 = vadd.xlane.f32.xlu1 %v6199_v18  ;;  %v11016_v18 = vpack.c.bf16 %v7300_v62, %v7284_v15 }
0x27aa   :  { %v6190_v5 = vpop.f32.mrb[80].mxu1 }
0x27ab   :  { %v6191_v11 = vadd.f32 %v9301_v24, %v6190_v5  ;;  %v10626_v6 = vpop.f32.mrb[81].mxu1  ;;  %v7283_v24 = vld [vmem:[%s14057_s14] sm:$0xff] }
0x27ac   :  { %v7332_v6 = vld [vmem:[%s14057_s14 + $0x188] sm:$0xff] }
0x27ad   :  { %10628 = vmatpush3.msk.msra.mxu0 %vm4264_vm3, %v6191_v11  ;;  %v7316_v11 = vld [vmem:[%s14057_s14 + $0x108] sm:$0xff] }
0x27ae   :  { %10632 = vmatprep.subr.mxu0 %v11418_v8 }
0x2835   :  { %v6201_v52 = vpop.xlane.xlu1 %6200 }
0x2836   :  { %v6202_v38 = vmul.f32 0.35355338, %v6201_v52  ;;  %v11020_v52 = vpack.c.bf16 %v7332_v6, %v7316_v11 }
0x2838   :  { %v6203_v33 = vsub.f32 %v6202_v38, %v6202_v38  ;;  %v7315_v38 = vld [vmem:[%s14057_s14 + $0x100] sm:$0xff] }
0x283a   :  { %v6204_v30 = vmul.f32 1.442695, %v6203_v33  ;;  %v7331_v33 = vld [vmem:[%s14057_s14 + $0x180] sm:$0xff] }
0x283c   :  { %11395 = vpow2.f32 %v6204_v30  ;;  %v11022_v30 = vpack.c.bf16 %v7331_v33, %v7315_v38 }
0x2846   :  { %v11396_v58 = vpop.eup %11395 }
0x2847   :  { %11397 = vrcp.f32 %v11396_v58 }
0x2851   :  { %v11398_v61 = vpop.eup %11397 }
0x2852   :  { %v6208_v53 = vmul.f32 %v11398_v61, %v11396_v58 }
0x2854   :  { %10630 = vmatmul.mubr.msk.f32.vlgmr.msra.gmra.mrb[68].mxu0 %vm4260_vm4, %v6208_v53 }
0x2855   :  { %10633 = vmatpush3.msra.mxu0 %v12425_v41  ;;  %10634 = vmatprep.mubr.msk.f32.mxu0 %vm11417_vm0, %v11418_v8 }
0x2856   :  { %10980 = vmatprep.subr.bf16.mxu0 %v11416_v0 }
0x286e   :  { %v6428_v1 = vpop.f32.mrb[82].mxu1 }
0x286f   :  { %v10641_v7 = vpop.f32.mrb[83].mxu1 }
0x2876   :  { %v6584_v41 = vpop.f32.mrb[84].mxu1 }
0x2927   :  { %v6281_v23 = vpop.f32.mrb[68].mxu0 }
0x2928   :  { %v10631_v21 = vpop.f32.mrb[69].mxu0  ;;  %10635 = vmatmul.mubr.msk.f32.vlgmr.msra.gmra.mrb[70].mxu0 %vm328_vm2, %v6281_v23 }
0x2929   :  { %10982 = vmatpush3.bf16.msra.mxu0 %v12452_v48  ;;  %10650 = vmatprep.mubr.msk.f32.mxu0 %vm11417_vm0, %v11418_v8  ;;  %v10663_v48 = vpop.f32.mrb[85].mxu1  ;;  %v12830_v21 = vld [vmem:[%s14058_s20] ss:$0 sm:$0xff] }
0x292a   :  { %10983 = vmatprep.subr.bf16.mxu0 %v11416_v0  ;;  %v12835_v48 = vld [vmem:[%s14059_s21] ss:$0 sm:$0xff] }
0x292d   :  { %10985 = vmatpush3.bf16.msra.mxu0 %v12462_v19 }
0x292e   :  { %10992 = vmatprep.subr.bf16.mxu0 %v11416_v0 }
0x2930   :  { %10651 = vmatmul.mubr.msk.f32.vlgmr.msra.gmra.mrb[72].mxu0 %vm90_vm1, %v12632_v46 }
0x2931   :  { %10994 = vmatpush3.bf16.msra.mxu0 %v12474_v50  ;;  %10672 = vmatprep.mubr.msk.f32.mxu0 %vm11417_vm0, %v11418_v8  ;;  %v9319_v50 = vld [vmem:[%s14053_s11 + $0x2] sm:$0x1] }
0x2932   :  { %10995 = vmatprep.subr.bf16.mxu0 %v11416_v0 }
0x2935   :  { %10997 = vmatpush3.bf16.msra.mxu0 %v12486_v25 }
0x2936   :  { %10998 = vmatprep.subr.bf16.mxu0 %v11416_v0 }
0x2938   :  { %10673 = vmatmul.mubr.msk.f32.vlgmr.msra.gmra.mrb[74].mxu0 %vm90_vm1, %v12655_v59 }
0x2939   :  { %11000 = vmatpush3.bf16.msra.mxu0 %v12498_v35  ;;  %10693 = vmatprep.mubr.msk.f32.mxu0 %vm11417_vm0, %v11418_v8 }
0x293a   :  { %11001 = vmatprep.subr.bf16.mxu0 %v11416_v0 }
0x293d   :  { %11003 = vmatpush3.bf16.msra.mxu0 %v12510_v34  ;;  %v6585_v34 = vadd.f32 %v9319_v50, %v6584_v41 }
0x293e   :  { %11010 = vmatprep.subr.bf16.mxu0 %v11416_v0 }
0x2940   :  { %10694 = vmatmul.mubr.msk.f32.vlgmr.msra.gmra.mrb[76].mxu0 %vm90_vm1, %v12632_v46 }
0x2941   :  { %11012 = vmatpush3.bf16.msra.mxu0 %v12563_v26  ;;  %10715 = vmatprep.mubr.msk.f32.mxu0 %vm11417_vm0, %v11418_v8  ;;  %v6666_v26 = vrot.slane %v6585_v34, %v12296_v9 }
0x2942   :  { %11013 = vmatprep.subr.bf16.mxu0 %v11416_v0 }
0x2945   :  { %11015 = vmatpush3.bf16.msra.mxu0 %v12569_v44 }
0x2946   :  { %11017 = vmatprep.subr.bf16.mxu0 %v11016_v18 }
0x2948   :  { %10716 = vmatmul.mubr.msk.f32.vlgmr.msra.gmra.mrb[78].mxu0 %vm90_vm1, %v12655_v59 }
0x2949   :  { %7501 = vmatprep.mubr.f32.mxu0 %v11418_v8 }
0x29fb   :  { %v6355_v19 = vpop.f32.mrb[70].mxu0 }
0x29fc   :  { %v12783_v25 = vadd.f32 %v6428_v1, %v6355_v19  ;;  %v10636_v35 = vpop.f32.mrb[71].mxu0 }
0x2a03   :  { %v6509_v31 = vpop.f32.mrb[72].mxu0 }
0x2a04   :  { %v6510_v44 = vadd.f32 %v12529_v10, %v6509_v31  ;;  %v10652_v27 = vpop.f32.mrb[73].mxu0 }
0x2a06   :  { %v6667_v55 = vmul.f32 %v6666_v26, %v6510_v44  ;;  %v9348_v26 = vld [vmem:[%s14053_s11 + $0x7] sm:$0x1] }
0x2a08   :  { %v6668_v4 = vsel %vm328_vm2, %v6667_v55, 0.0 }
0x2a09   :  { %6669 = vadd.xlane.f32.xlu0 %v6668_v4 }
0x2a0b   :  { %v6659_v63 = vpop.f32.mrb[74].mxu0 }
0x2a0c   :  { %v6660_v32 = vadd.f32 %v9325_v45, %v6659_v63  ;;  %v10674_v12 = vpop.f32.mrb[75].mxu0 }
0x2a0d   :  { %7240 = vadd.xlane.f32.xlu0 %v7239_v47 }
0x2a0e   :  { %10676 = vmatpush3.msk.msra.mxu1 %vm4264_vm3, %v6660_v32 }
0x2a0f   :  { %10680 = vmatprep.subr.mxu1 %v11418_v8 }
0x2a13   :  { %v12795_v10 = vpop.f32.mrb[76].mxu0 }
0x2a14   :  { %v10695_v29 = vpop.f32.mrb[77].mxu0 }
0x2a1b   :  { %v7056_v58 = vpop.f32.mrb[78].mxu0 }
0x2a1c   :  { %v10717_v61 = vpop.f32.mrb[79].mxu0  ;;  %v7057_v31 = vadd.f32 %v9348_v26, %v7056_v58 }
0x2a96   :  { %v6670_v51 = vpop.xlane.xlu0 %6669 }
0x2a97   :  { %v6671_v16 = vmul.f32 0.35355338, %v6670_v51 }
0x2a99   :  { %v6672_v40 = vsub.f32 %v6671_v16, %v6671_v16 }
0x2a9a   :  { %v7241_v43 = vpop.xlane.xlu0 %7240 }
0x2a9b   :  { %v6673_v57 = vmul.f32 1.442695, %v6672_v40  ;;  %v7245_v2 = vmul.f32 0.03125, %v7241_v43 }
0x2a9d   :  { %11399 = vpow2.f32 %v6673_v57  ;;  %v7247_v3 = vsub.f32 %v7237_v28, %v7245_v2  ;;  %v6907_v28 = vadd.f32 %v12618_v60, %v12795_v10  ;;  %v7286_v60 = vld [vmem:[%s14057_s14 + $0x18] sm:$0xff]  ;;  %v7285_v57 = vld [vmem:[%s14057_s14 + $0x10] sm:$0xff] }
0x2a9e   :  { %v7302_v10 = vld [vmem:[%s14057_s14 + $0x98] sm:$0xff] }
0x2a9f   :  { %v7249_v39 = vmul.f32 %v7247_v3, %v7247_v3  ;;  %v11024_v43 = vpack.c.bf16 %v7302_v10, %v7286_v60  ;;  %v7318_v2 = vld [vmem:[%s14057_s14 + $0x118] sm:$0xff] }
0x2aa0   :  { %v7310_v60 = vld [vmem:[%s14057_s14 + $0xd8] sm:$0xff] }
0x2aa1   :  { %v7251_v42 = vsel %vm90_vm1, %v7249_v39, 0.0 }
0x2aa2   :  { %7252 = vadd.xlane.f32.xlu0 %v7251_v42 }
0x2aa7   :  { %v11400_v49 = vpop.eup %11399 }
0x2aa8   :  { %11401 = vrcp.f32 %v11400_v49 }
0x2ab2   :  { %v11402_v22 = vpop.eup %11401 }
0x2ab3   :  { %v6677_v14 = vmul.f32 %v11402_v22, %v11400_v49  ;;  %v7317_v49 = vld [vmem:[%s14057_s14 + $0x110] sm:$0xff] }
0x2ab4   :  { %v7333_v22 = vld [vmem:[%s14057_s14 + $0x190] sm:$0xff] }
0x2ab5   :  { %10678 = vmatmul.mubr.msk.f32.vlgmr.msra.gmra.mrb[86].mxu1 %vm4260_vm4, %v6677_v14  ;;  %v11030_v62 = vpack.c.bf16 %v7333_v22, %v7317_v49  ;;  %v7307_v22 = vld [vmem:[%s14057_s14 + $0xc0] sm:$0xff] }
0x2ab6   :  { %10681 = vmatpush3.msra.mxu1 %v12547_v56  ;;  %10682 = vmatprep.mubr.msk.f32.mxu1 %vm11417_vm0, %v11418_v8  ;;  %v7299_v56 = vld [vmem:[%s14057_s14 + $0x80] sm:$0xff] }
0x2ab7   :  { %11004 = vmatprep.subr.bf16.mxu1 %v11416_v0  ;;  %v11018_v5 = vpack.c.bf16 %v7299_v56, %v7283_v24 }
0x2ab9   :  { %11019 = vmatpush1.bf16.msra.mxu0 %v11018_v5 }
0x2aba   :  { %11021 = vmatprep.subr.bf16.mxu0 %v11020_v52 }
0x2abd   :  { %11023 = vmatpush1.bf16.msra.mxu0 %v11022_v30 }
0x2b2f   :  { %v7253_v53 = vpop.xlane.xlu0 %7252 }
0x2b30   :  { %v7257_v1 = vmul.f32 0.03125, %v7253_v53 }
0x2b32   :  { %v7259_v7 = vadd.f32 1e-05, %v7257_v1 }
0x2b34   :  { %11403 = vrsqrt.f32 %v7259_v7  ;;  %v7304_v7 = vld [vmem:[%s14057_s14 + $0xa8] sm:$0xff] }
0x2b3e   :  { %v11404_v23 = vpop.eup %11403 }
0x2b3f   :  { %v7263_v41 = vmul.f32 %v11404_v23, %v7247_v3  ;;  %v7334_v3 = vld [vmem:[%s14057_s14 + $0x198] sm:$0xff] }
0x2b40   :  { %v11028_v42 = vpack.c.bf16 %v7334_v3, %v7318_v2 }
0x2b41   :  { %v7272_v19 = vmul.f32 %v12830_v21, %v7263_v41  ;;  %v7306_v41 = vld [vmem:[%s14057_s14 + $0xb8] sm:$0xff] }
0x2b43   :  { %v12839_v50 = vadd.f32 %v12835_v48, %v7272_v19  ;;  %v7287_v19 = vld [vmem:[%s14057_s14 + $0x20] sm:$0xff] }
0x2b45   :  { %9357 = vmatmul.mubr.msk.f32.vlgmr.msra.gmra.mrb[80].mxu0 %vm90_vm1, %v12839_v50 }
0x2b46   :  { %7507 = vmatprep.mubr.f32.mxu0 %v11418_v8 }
0x2b88   :  { %v6750_v35 = vpop.f32.mrb[86].mxu1 }
0x2b89   :  { %v10679_v34 = vpop.f32.mrb[87].mxu1  ;;  %10683 = vmatmul.mubr.msk.f32.vlgmr.msra.gmra.mrb[88].mxu1 %vm328_vm2, %v6750_v35  ;;  %v7303_v35 = vld [vmem:[%s14057_s14 + $0xa0] sm:$0xff] }
0x2b8a   :  { %11006 = vmatpush3.bf16.msra.mxu1 %v12588_v17  ;;  %10704 = vmatprep.mubr.msk.f32.mxu1 %vm11417_vm0, %v11418_v8  ;;  %v11034_v26 = vpack.c.bf16 %v7303_v35, %v7287_v19  ;;  %v7297_v19 = vld [vmem:[%s14057_s14 + $0x70] sm:$0xff] }
0x2b8b   :  { %11007 = vmatprep.subr.bf16.mxu1 %v11416_v0  ;;  %v7313_v35 = vld [vmem:[%s14057_s14 + $0xf0] sm:$0xff] }
0x2b8e   :  { %11009 = vmatpush3.bf16.msra.mxu1 %v12598_v37 }
0x2b8f   :  { %10718 = vmatprep.subr.mxu1 %v11418_v8 }
0x2b91   :  { %10705 = vmatmul.mubr.msk.f32.vlgmr.msra.gmra.mrb[90].mxu1 %vm90_vm1, %v12655_v59 }
0x2b92   :  { %10719 = vmatpush3.msk.msra.mxu1 %vm4264_vm3, %v7057_v31  ;;  %10720 = vmatprep.mubr.msk.f32.mxu1 %vm11417_vm0, %v11418_v8  ;;  %v7289_v31 = vld [vmem:[%s14057_s14 + $0x30] sm:$0xff] }
0x2b93   :  { %10723 = vmatprep.subr.mxu1 %v11418_v8 }
0x2c18   :  { %v12860_v0 = vpop.f32.mrb[80].mxu0 }
0x2c19   :  { %v12862_v17 = vpop.f32.mrb[81].mxu0 }
0x2c5c   :  { %v6824_v44 = vpop.f32.mrb[88].mxu1 }
0x2c5d   :  { %v6828_v37 = vadd.f32 %v6824_v44, %v12783_v25  ;;  %v10684_v27 = vpop.f32.mrb[89].mxu1  ;;  %v7305_v44 = vld [vmem:[%s14057_s14 + $0xb0] sm:$0xff] }
0x2c5e   :  { %v7320_v27 = vld [vmem:[%s14057_s14 + $0x128] sm:$0xff] }
0x2c64   :  { %v6981_v59 = vpop.f32.mrb[90].mxu1 }
0x2c65   :  { %v6982_v55 = vadd.f32 %v9342_v13, %v6981_v59  ;;  %v10706_v4 = vpop.f32.mrb[91].mxu1  ;;  %v7336_v13 = vld [vmem:[%s14057_s14 + $0x1a8] sm:$0xff]  ;;  %v7322_v59 = vld [vmem:[%s14057_s14 + $0x138] sm:$0xff] }
0x2c66   :  { %v7338_v4 = vld [vmem:[%s14057_s14 + $0x1b8] sm:$0xff] }
0x2c67   :  { %v7063_v45 = vrot.slane %v6982_v55, %v12296_v9  ;;  %v11036_v55 = vpack.c.bf16 %v7336_v13, %v7320_v27  ;;  %v7346_v27 = vld [vmem:[%s14057_s14 + $0x1f8] sm:$0xff] }
0x2c69   :  { %v7064_v63 = vmul.f32 %v7063_v45, %v6907_v28  ;;  %v7319_v28 = vld [vmem:[%s14057_s14 + $0x120] sm:$0xff] }
0x2c6a   :  { %v7335_v45 = vld [vmem:[%s14057_s14 + $0x1a0] sm:$0xff] }
0x2c6b   :  { %v7065_v47 = vsel %vm328_vm2, %v7064_v63, 0.0  ;;  %v11044_v63 = vpack.c.bf16 %v7338_v4, %v7322_v59  ;;  %v11074_v59 = vpack.c.bf16 %v7313_v35, %v7297_v19  ;;  %v7343_v4 = vld [vmem:[%s14057_s14 + $0x1e0] sm:$0xff]  ;;  %v8107_v19 = vld [vmem:[%s14060_s16 + $0xb0] sm:$0xff] }
0x2c6c   :  { %7066 = vadd.xlane.f32.xlu1 %v7065_v47  ;;  %v11038_v47 = vpack.c.bf16 %v7335_v45, %v7319_v28  ;;  %v7329_v28 = vld [vmem:[%s14057_s14 + $0x170] sm:$0xff] }
0x2c6d   :  { %v7345_v45 = vld [vmem:[%s14057_s14 + $0x1f0] sm:$0xff] }
0x2cf9   :  { %v7067_v32 = vpop.xlane.xlu1 %7066 }
0x2cfa   :  { %v7068_v12 = vmul.f32 0.35355338, %v7067_v32  ;;  %v7321_v32 = vld [vmem:[%s14057_s14 + $0x130] sm:$0xff] }
0x2cfc   :  { %v7069_v25 = vsub.f32 %v7068_v12, %v7068_v12  ;;  %v7337_v12 = vld [vmem:[%s14057_s14 + $0x1b0] sm:$0xff] }
0x2cfe   :  { %v7070_v29 = vmul.f32 1.442695, %v7069_v25  ;;  %v11046_v25 = vpack.c.bf16 %v7337_v12, %v7321_v32  ;;  %v8101_v32 = vld [vmem:[%s14060_s16 + $0x80] sm:$0xff]  ;;  %v7357_v12 = vsub.s32 1, %v12289_v36 }
0x2d00   :  { %11405 = vpow2.f32 %v7070_v29  ;;  %v7292_v29 = vld [vmem:[%s14057_s14 + $0x48] sm:$0xff] }
0x2d0a   :  { %v11406_v51 = vpop.eup %11405 }
0x2d0b   :  { %11407 = vrcp.f32 %v11406_v51 }
0x2d15   :  { %v11408_v16 = vpop.eup %11407 }
0x2d16   :  { %v7074_v40 = vmul.f32 %v11408_v16, %v11406_v51  ;;  %v7308_v51 = vld [vmem:[%s14057_s14 + $0xc8] sm:$0xff]  ;;  %v7294_v16 = vld [vmem:[%s14057_s14 + $0x58] sm:$0xff] }
0x2d17   :  { %v11056_v10 = vpack.c.bf16 %v7310_v60, %v7294_v16  ;;  %v8134_v16 = vld [vmem:[%s14060_s16 + $0x188] sm:$0xff] }
0x2d18   :  { %10721 = vmatmul.mubr.msk.f32.vlgmr.msra.gmra.mrb[92].mxu1 %vm4260_vm4, %v7074_v40  ;;  %v11048_v40 = vpack.c.bf16 %v7308_v51, %v7292_v29  ;;  %v8102_v29 = vld [vmem:[%s14060_s16 + $0x88] sm:$0xff]  ;;  %v8133_v51 = vld [vmem:[%s14060_s16 + $0x180] sm:$0xff] }
0x2d19   :  { %10724 = vmatpush3.msra.mxu1 %v12648_v54  ;;  %10725 = vmatprep.mubr.msk.f32.mxu1 %vm11417_vm0, %v11418_v8  ;;  %v7301_v54 = vld [vmem:[%s14057_s14 + $0x90] sm:$0xff] }
0x2d1a   :  { %11025 = vmatprep.subr.bf16.mxu1 %v11024_v43  ;;  %v11026_v39 = vpack.c.bf16 %v7301_v54, %v7285_v57 }
0x2deb   :  { %v7147_v14 = vpop.f32.mrb[92].mxu1 }
0x2dec   :  { %v10722_v15 = vpop.f32.mrb[93].mxu1  ;;  %10726 = vmatmul.mubr.msk.f32.vlgmr.msra.gmra.mrb[94].mxu1 %vm328_vm2, %v7147_v14  ;;  %v7293_v14 = vld [vmem:[%s14057_s14 + $0x50] sm:$0xff] }
0x2ded   :  { %11027 = vmatpush1.bf16.msra.mxu1 %v11026_v39  ;;  %7578 = vmatprep.mubr.f32.mxu1 %v11418_v8  ;;  %v7309_v15 = vld [vmem:[%s14057_s14 + $0xd0] sm:$0xff] }
0x2dee   :  { %11029 = vmatprep.subr.bf16.mxu1 %v11028_v42  ;;  %v7291_v42 = vld [vmem:[%s14057_s14 + $0x40] sm:$0xff] }
0x2df1   :  { %11031 = vmatpush1.bf16.msra.mxu1 %v11030_v62  ;;  %v7326_v62 = vld [vmem:[%s14057_s14 + $0x158] sm:$0xff] }
0x2df4   :  { %9359 = vmatmul.mubr.msk.f32.vlgmr.msra.gmra.mrb[96].mxu1 %vm90_vm1, %v12839_v50 }
0x2df5   :  { %7584 = vmatprep.mubr.f32.mxu1 %v11418_v8 }
0x2ebf   :  { %v7221_v18 = vpop.f32.mrb[94].mxu1 }
0x2ec0   :  { %v7225_v24 = vadd.f32 %v7221_v18, %v6828_v37  ;;  %v10727_v56 = vpop.f32.mrb[95].mxu1  ;;  %v11042_v37 = vpack.c.bf16 %v7305_v44, %v7289_v31  ;;  %v7342_v18 = vld [vmem:[%s14057_s14 + $0x1d8] sm:$0xff]  ;;  %v7328_v31 = vld [vmem:[%s14057_s14 + $0x168] sm:$0xff] }
0x2ec1   :  { %v11058_v56 = vpack.c.bf16 %v7309_v15, %v7293_v14  ;;  %v7344_v44 = vld [vmem:[%s14057_s14 + $0x1e8] sm:$0xff]  ;;  %v8104_v15 = vld [vmem:[%s14060_s16 + $0x98] sm:$0xff] }
0x2ec2   :  { %v7233_v5 = vadd.f32 %v12683_v20, %v7225_v24  ;;  %v7288_v20 = vld [vmem:[%s14057_s14 + $0x28] sm:$0xff]  ;;  %v11050_v24 = vpack.c.bf16 %v7307_v22, %v7291_v42  ;;  %v8103_v42 = vld [vmem:[%s14060_s16 + $0x90] sm:$0xff] }
0x2ec3   :  { %v11032_v23 = vpack.c.bf16 %v7304_v7, %v7288_v20  ;;  %v7314_v20 = vld [vmem:[%s14057_s14 + $0xf8] sm:$0xff] }
0x2ec4   :  { %7234 = vst.msk [vmem:[#allocation2 + $0x8] sm:$0xff] %vm90_vm1, %v7233_v5  ;;  %v7323_v5 = vld [vmem:[%s14057_s14 + $0x140] sm:$0xff] }
0x2ec5   :  { %11033 = vmatprep.subr.bf16.mxu0 %v11032_v23  ;;  %v7295_v23 = vld [vmem:[%s14057_s14 + $0x60] sm:$0xff] }
0x2ec6   :  { %11035 = vmatpush1.bf16.msra.mxu0 %v11034_v26 }
0x2ec7   :  { %v12907_v11 = vpop.f32.mrb[96].mxu1  ;;  %11037 = vmatprep.subr.bf16.mxu0 %v11036_v55  ;;  %v7327_v55 = vld [vmem:[%s14057_s14 + $0x160] sm:$0xff] }
0x2ec8   :  { %v12909_v6 = vpop.f32.mrb[97].mxu1  ;;  %v11070_v60 = vpack.c.bf16 %v7343_v4, %v7327_v55  ;;  %v8092_v55 = vld [vmem:[%s14060_s16 + $0x38] sm:$0xff] }
0x2eca   :  { %11039 = vmatpush1.bf16.msra.mxu0 %v11038_v47 }
0x2ecb   :  { %v7236_v52 = vld [vmem:[#allocation2 + $0x8] sm:$0xff]  ;;  %11049 = vmatprep.subr.bf16.mxu0 %v11048_v40  ;;  %v13101_v40 = vld [vmem:[%s14061_s15] sm:$0xff] }
0x2ecc   :  { %v7238_v38 = vadd.f32 %v7236_v52, %v12632_v46  ;;  %v7290_v46 = vld [vmem:[%s14057_s14 + $0x38] sm:$0xff]  ;;  %v7339_v52 = vld [vmem:[%s14057_s14 + $0x1c0] sm:$0xff]  ;;  %v13123_v22 = vrot.slane %v13101_v40, %v7357_v12 }
0x2ecd   :  { %v11040_v34 = vpack.c.bf16 %v7306_v41, %v7290_v46  ;;  %v11054_v7 = vpack.c.bf16 %v7339_v52, %v7323_v5  ;;  %v7311_v41 = vld [vmem:[%s14057_s14 + $0xe0] sm:$0xff]  ;;  %v8119_v5 = vld [vmem:[%s14060_s16 + $0x110] sm:$0xff]  ;;  %v8120_v52 = vld [vmem:[%s14060_s16 + $0x118] sm:$0xff] }
0x2ece   :  { %v7242_v33 = vsel %vm90_vm1, %v7238_v38, 0.0  ;;  %v11066_v13 = vpack.c.bf16 %v7311_v41, %v7295_v23  ;;  %v8121_v23 = vld [vmem:[%s14060_s16 + $0x120] sm:$0xff]  ;;  %v8122_v41 = vld [vmem:[%s14060_s16 + $0x128] sm:$0xff] }
0x2ecf   :  { %7243 = vadd.xlane.f32.xlu1 %v7242_v33  ;;  %11041 = vmatprep.subr.bf16.mxu1 %v11040_v34  ;;  %v7341_v33 = vld [vmem:[%s14057_s14 + $0x1d0] sm:$0xff] }
0x2ed0   :  { %11043 = vmatpush1.bf16.msra.mxu1 %v11042_v37  ;;  %v7330_v37 = vld [vmem:[%s14057_s14 + $0x178] sm:$0xff] }
0x2ed1   :  { %11045 = vmatprep.subr.bf16.mxu1 %v11044_v63  ;;  %v11068_v63 = vpack.c.bf16 %v7344_v44, %v7328_v31  ;;  %v11076_v47 = vpack.c.bf16 %v7346_v27, %v7330_v37  ;;  %v8140_v31 = vld [vmem:[%s14060_s16 + $0x1b8] sm:$0xff] }
0x2ed4   :  { %11047 = vmatpush1.bf16.msra.mxu1 %v11046_v25  ;;  %v7365_v25 = vsub.s32 3, %v12289_v36 }
0x2ed5   :  { %11057 = vmatprep.subr.bf16.mxu1 %v11056_v10  ;;  %v11078_v10 = vpack.c.bf16 %v7345_v45, %v7329_v28  ;;  %v8123_v45 = vld [vmem:[%s14060_s16 + $0x130] sm:$0xff] }
0x2ed6   :  { %v13128_v14 = vrot.slane %v13101_v40, %v7365_v25 }
0x2f5c   :  { %v7244_v30 = vpop.xlane.xlu1 %7243 }
0x2f5d   :  { %v7246_v58 = vmul.f32 0.03125, %v7244_v30 }
0x2f5f   :  { %v7248_v61 = vsub.f32 %v7238_v38, %v7246_v58  ;;  %v7325_v38 = vld [vmem:[%s14057_s14 + $0x150] sm:$0xff]  ;;  %v11060_v58 = vpack.c.bf16 %v7342_v18, %v7326_v62 }
0x2f60   :  { %v11062_v46 = vpack.c.bf16 %v7341_v33, %v7325_v38  ;;  %v11084_v38 = vpack.c.bf16 %v8104_v15, %v8103_v42  ;;  %v8112_v42 = vld [vmem:[%s14060_s16 + $0xd8] sm:$0xff]  ;;  %v8143_v15 = vld [vmem:[%s14060_s16 + $0x1d0] sm:$0xff] }
0x2f61   :  { %v7250_v53 = vmul.f32 %v7248_v61, %v7248_v61 }
0x2f63   :  { %v7254_v1 = vsel %vm90_vm1, %v7250_v53, 0.0  ;;  %v7312_v53 = vld [vmem:[%s14057_s14 + $0xe8] sm:$0xff] }
0x2f64   :  { %7255 = vadd.xlane.f32.xlu1 %v7254_v1  ;;  %v7298_v1 = vld [vmem:[%s14057_s14 + $0x78] sm:$0xff] }
0x2f65   :  { %v11072_v26 = vpack.c.bf16 %v7314_v20, %v7298_v1  ;;  %v8137_v1 = vld [vmem:[%s14060_s16 + $0x1a0] sm:$0xff]  ;;  %v11118_v20 = vpack.c.bf16 %v8120_v52, %v8119_v5  ;;  %v8127_v52 = vld [vmem:[%s14060_s16 + $0x150] sm:$0xff] }
0x2ff1   :  { %v7256_v43 = vpop.xlane.xlu1 %7255 }
0x2ff2   :  { %v7258_v57 = vmul.f32 0.03125, %v7256_v43  ;;  %v8085_v43 = vld [vmem:[%s14060_s16] sm:$0xff] }
0x2ff4   :  { %v7260_v54 = vadd.f32 1e-05, %v7258_v57  ;;  %v8086_v57 = vld [vmem:[%s14060_s16 + $0x8] sm:$0xff] }
0x2ff5   :  { %v11082_v62 = vpack.c.bf16 %v8086_v57, %v8085_v43  ;;  %v8094_v43 = vld [vmem:[%s14060_s16 + $0x48] sm:$0xff] }
0x2ff6   :  { %11409 = vrsqrt.f32 %v7260_v54  ;;  %v8117_v54 = vld [vmem:[%s14060_s16 + $0x100] sm:$0xff] }
0x3000   :  { %v11410_v2 = vpop.eup %11409 }
0x3001   :  { %v7264_v3 = vmul.f32 %v11410_v2, %v7248_v61  ;;  %v7296_v61 = vld [vmem:[%s14057_s14 + $0x68] sm:$0xff] }
0x3002   :  { %v11064_v34 = vpack.c.bf16 %v7312_v53, %v7296_v61  ;;  %v8118_v2 = vld [vmem:[%s14060_s16 + $0x108] sm:$0xff]  ;;  %v7583_v61 = vadd.f32 %v12909_v6, %v13128_v14 }
0x3003   :  { %v7273_v39 = vmul.f32 %v12830_v21, %v7264_v3  ;;  %v7324_v21 = vld [vmem:[%s14057_s14 + $0x148] sm:$0xff]  ;;  %v11080_v3 = vpack.c.bf16 %v8102_v29, %v8101_v32  ;;  %v11114_v18 = vpack.c.bf16 %v8118_v2, %v8117_v54  ;;  %v8141_v29 = vld [vmem:[%s14060_s16 + $0x1c0] sm:$0xff] }
0x3004   :  { %v8106_v53 = vld [vmem:[%s14060_s16 + $0xa8] sm:$0xff]  ;;  %v8056_v37 = vmax.f32 %v7583_v61, 0.0  ;;  %v8125_v2 = vld [vmem:[%s14060_s16 + $0x140] sm:$0xff] }
0x3005   :  { %v12979_v49 = vadd.f32 %v12835_v48, %v7273_v39  ;;  %v7340_v48 = vld [vmem:[%s14057_s14 + $0x1c8] sm:$0xff]  ;;  %v11112_v39 = vpack.c.bf16 %v8134_v16, %v8133_v51 }
0x3006   :  { %v11052_v30 = vpack.c.bf16 %v7340_v48, %v7324_v21  ;;  %v8135_v21 = vld [vmem:[%s14060_s16 + $0x190] sm:$0xff]  ;;  %v8136_v48 = vld [vmem:[%s14060_s16 + $0x198] sm:$0xff]  ;;  %v8110_v32 = vld [vmem:[%s14060_s16 + $0xc8] sm:$0xff] }
0x3007   :  { %9358 = vmatmul.mubr.msk.f32.gmra.mrb[82].mxu0 %vm90_vm1, %v12979_v49  ;;  %9360 = vmatmul.mubr.msk.f32.gmra.mrb[98].mxu1 %vm90_vm1, %v12979_v49  ;;  %v11116_v33 = vpack.c.bf16 %v8136_v48, %v8135_v21  ;;  %v8142_v51 = vld [vmem:[%s14060_s16 + $0x1c8] sm:$0xff]  ;;  %v8144_v21 = vld [vmem:[%s14060_s16 + $0x1d8] sm:$0xff] }
0x3008   :  { %7655 = vmatprep.mubr.f32.mxu0 %v11418_v8  ;;  %7732 = vmatprep.mubr.f32.mxu1 %v11418_v8  ;;  %v11128_v54 = vpack.c.bf16 %v8142_v51, %v8141_v29  ;;  %v11132_v5 = vpack.c.bf16 %v8144_v21, %v8143_v15  ;;  %v8146_v61 = vld [vmem:[%s14060_s16 + $0x1e8] sm:$0xff] }
0x300b   :  { %9361 = vmatmul.mubr.msk.f32.vlgmr.msra.gmra.mrb[84].mxu0 %vm90_vm1, %v12839_v50  ;;  %9363 = vmatmul.mubr.msk.f32.vlgmr.msra.gmra.mrb[100].mxu1 %vm90_vm1, %v12839_v50 }
0x300c   :  { %11051 = vmatpush1.bf16.msra.mxu0 %v11050_v24  ;;  %11059 = vmatpush1.bf16.msra.mxu1 %v11058_v56  ;;  %v8087_v24 = vld [vmem:[%s14060_s16 + $0x10] sm:$0xff]  ;;  %v8088_v56 = vld [vmem:[%s14060_s16 + $0x18] sm:$0xff] }
0x300d   :  { %7661 = vmatprep.mubr.f32.mxu0 %v11418_v8  ;;  %7738 = vmatprep.mubr.f32.mxu1 %v11418_v8  ;;  %v11086_v6 = vpack.c.bf16 %v8088_v56, %v8087_v24  ;;  %v8096_v24 = vld [vmem:[%s14060_s16 + $0x58] sm:$0xff] }
0x300e   :  { %11053 = vmatprep.subr.bf16.mxu0 %v11052_v30  ;;  %11061 = vmatprep.subr.bf16.mxu1 %v11060_v58  ;;  %v8105_v30 = vld [vmem:[%s14060_s16 + $0xa0] sm:$0xff]  ;;  %v7506_v58 = vadd.f32 %v12862_v17, %v13123_v22  ;;  %v8138_v17 = vld [vmem:[%s14060_s16 + $0x1a8] sm:$0xff] }
0x300f   :  { %9362 = vmatmul.mubr.msk.f32.gmra.mrb[86].mxu0 %vm90_vm1, %v12979_v49  ;;  %9364 = vmatmul.mubr.msk.f32.gmra.mrb[102].mxu1 %vm90_vm1, %v12979_v49  ;;  %v11088_v35 = vpack.c.bf16 %v8106_v53, %v8105_v30  ;;  %v8114_v30 = vld [vmem:[%s14060_s16 + $0xe8] sm:$0xff] }
0x3010   :  { %11055 = vmatpush1.bf16.msra.mxu0 %v11054_v7  ;;  %11063 = vmatpush1.bf16.msra.mxu1 %v11062_v46  ;;  %v8089_v7 = vld [vmem:[%s14060_s16 + $0x20] sm:$0xff]  ;;  %v8090_v46 = vld [vmem:[%s14060_s16 + $0x28] sm:$0xff]  ;;  %v8054_v44 = vmax.f32 %v7506_v58, 0.0 }
0x3011   :  { %7809 = vmatprep.mubr.f32.mxu0 %v11418_v8  ;;  %7886 = vmatprep.mubr.f32.mxu1 %v11418_v8  ;;  %v11090_v27 = vpack.c.bf16 %v8090_v46, %v8089_v7  ;;  %v8145_v58 = vld [vmem:[%s14060_s16 + $0x1e0] sm:$0xff] }
0x3012   :  { %11065 = vmatprep.subr.bf16.mxu0 %v11064_v34  ;;  %11073 = vmatprep.subr.bf16.mxu1 %v11072_v26  ;;  %v11120_v34 = vpack.c.bf16 %v8138_v17, %v8137_v1  ;;  %v8139_v26 = vld [vmem:[%s14060_s16 + $0x1b0] sm:$0xff]  ;;  %v8097_v17 = vld [vmem:[%s14060_s16 + $0x60] sm:$0xff]  ;;  %v11136_v46 = vpack.c.bf16 %v8146_v61, %v8145_v58  ;;  %v8202_v61 = vld [vmem:[%s14060_s16 + $0x3a8] sm:$0xff] }
0x3013   :  { %9365 = vmatmul.mubr.msk.f32.vlgmr.msra.gmra.mrb[88].mxu0 %vm90_vm1, %v12839_v50  ;;  %9367 = vmatmul.mubr.msk.f32.vlgmr.msra.gmra.mrb[104].mxu1 %vm90_vm1, %v12839_v50  ;;  %v11124_v28 = vpack.c.bf16 %v8140_v31, %v8139_v26  ;;  %v13306_v26 = vrot.slane %v13101_v40, %v12296_v9  ;;  %v8201_v58 = vld [vmem:[%s14060_s16 + $0x3a0] sm:$0xff] }
0x3014   :  { %11067 = vmatpush1.bf16.msra.mxu0 %v11066_v13  ;;  %11075 = vmatpush1.bf16.msra.mxu1 %v11074_v59  ;;  %v11122_v13 = vpack.c.bf16 %v8122_v41, %v8121_v23  ;;  %v8091_v59 = vld [vmem:[%s14060_s16 + $0x30] sm:$0xff]  ;;  %v8129_v23 = vld [vmem:[%s14060_s16 + $0x160] sm:$0xff]  ;;  %v8130_v41 = vld [vmem:[%s14060_s16 + $0x168] sm:$0xff] }
0x3015   :  { %7815 = vmatprep.mubr.f32.mxu0 %v11418_v8  ;;  %7892 = vmatprep.mubr.f32.mxu1 %v11418_v8  ;;  %v11094_v16 = vpack.c.bf16 %v8092_v55, %v8091_v59  ;;  %v7504_v29 = vadd.f32 %v12860_v0, %v13306_v26  ;;  %v8181_v0 = vld [vmem:[%s14060_s16 + $0x300] sm:$0xff] }
0x3016   :  { %11069 = vmatprep.subr.bf16.mxu0 %v11068_v63  ;;  %11077 = vmatprep.subr.bf16.mxu1 %v11076_v47  ;;  %v8124_v63 = vld [vmem:[%s14060_s16 + $0x138] sm:$0xff]  ;;  %v8109_v47 = vld [vmem:[%s14060_s16 + $0xc0] sm:$0xff] }
0x3017   :  { %9366 = vmatmul.mubr.msk.f32.gmra.mrb[90].mxu0 %vm90_vm1, %v12979_v49  ;;  %9368 = vmatmul.mubr.msk.f32.gmra.mrb[106].mxu1 %vm90_vm1, %v12979_v49  ;;  %v11096_v57 = vpack.c.bf16 %v8110_v32, %v8109_v47  ;;  %v8197_v47 = vld [vmem:[%s14060_s16 + $0x380] sm:$0xff]  ;;  %v8198_v32 = vld [vmem:[%s14060_s16 + $0x388] sm:$0xff] }
0x3018   :  { %11071 = vmatpush1.bf16.msra.mxu0 %v11070_v60  ;;  %11079 = vmatpush1.bf16.msra.mxu1 %v11078_v10  ;;  %v11126_v60 = vpack.c.bf16 %v8124_v63, %v8123_v45  ;;  %v8093_v10 = vld [vmem:[%s14060_s16 + $0x40] sm:$0xff]  ;;  %v8166_v63 = vld [vmem:[%s14060_s16 + $0x288] sm:$0xff] }
0x3019   :  { %7963 = vmatprep.mubr.f32.mxu0 %v11418_v8  ;;  %8040 = vmatprep.mubr.f32.mxu1 %v11418_v8  ;;  %v11098_v48 = vpack.c.bf16 %v8094_v43, %v8093_v10  ;;  %v8165_v45 = vld [vmem:[%s14060_s16 + $0x280] sm:$0xff]  ;;  %v8150_v10 = vld [vmem:[%s14060_s16 + $0x208] sm:$0xff] }
0x301a   :  { %11081 = vmatprep.subr.bf16.mxu0 %v11080_v3  ;;  %11113 = vmatprep.subr.bf16.mxu1 %v11112_v39  ;;  %v8126_v3 = vld [vmem:[%s14060_s16 + $0x148] sm:$0xff]  ;;  %v8111_v39 = vld [vmem:[%s14060_s16 + $0xd0] sm:$0xff] }
0x301b   :  { %9369 = vmatmul.mubr.msk.f32.vlgmr.msra.gmra.mrb[92].mxu0 %vm90_vm1, %v12839_v50  ;;  %9371 = vmatmul.mubr.msk.f32.vlgmr.msra.gmra.mrb[108].mxu1 %vm90_vm1, %v12839_v50  ;;  %v11100_v56 = vpack.c.bf16 %v8112_v42, %v8111_v39  ;;  %v8199_v39 = vld [vmem:[%s14060_s16 + $0x390] sm:$0xff]  ;;  %v8200_v42 = vld [vmem:[%s14060_s16 + $0x398] sm:$0xff] }
0x301c   :  { %11083 = vmatpush3.bf16.msra.mxu0 %v11082_v62  ;;  %11115 = vmatpush3.bf16.msra.mxu1 %v11114_v18  ;;  %v11130_v62 = vpack.c.bf16 %v8126_v3, %v8125_v2  ;;  %v8095_v18 = vld [vmem:[%s14060_s16 + $0x50] sm:$0xff]  ;;  %v8182_v2 = vld [vmem:[%s14060_s16 + $0x308] sm:$0xff] }
0x301d   :  { %7969 = vmatprep.mubr.f32.mxu0 %v11418_v8  ;;  %8046 = vmatprep.mubr.f32.mxu1 %v11418_v8  ;;  %v8108_v8 = vld [vmem:[%s14060_s16 + $0xb8] sm:$0xff]  ;;  %v11102_v53 = vpack.c.bf16 %v8096_v24, %v8095_v18  ;;  %v8167_v3 = vld [vmem:[%s14060_s16 + $0x290] sm:$0xff]  ;;  %v11178_v21 = vpack.c.bf16 %v8182_v2, %v8181_v0  ;;  %v8053_v18 = vmax.f32 %v7504_v29, 0.0 }
0x301e   :  { %11085 = vmatprep.subr.bf16.mxu0 %v11084_v38  ;;  %11117 = vmatprep.subr.bf16.mxu1 %v11116_v33  ;;  %v11092_v4 = vpack.c.bf16 %v8108_v8, %v8107_v19  ;;  %v8128_v38 = vld [vmem:[%s14060_s16 + $0x158] sm:$0xff]  ;;  %v8113_v33 = vld [vmem:[%s14060_s16 + $0xe0] sm:$0xff]  ;;  %v8115_v19 = vld [vmem:[%s14060_s16 + $0xf0] sm:$0xff] }
0x301f   :  { %9370 = vmatmul.mubr.msk.f32.gmra.mrb[94].mxu0 %vm90_vm1, %v12979_v49  ;;  %9372 = vmatmul.mubr.msk.f32.gmra.mrb[110].mxu1 %vm90_vm1, %v12979_v49  ;;  %v11134_v1 = vpack.c.bf16 %v8128_v38, %v8127_v52  ;;  %v11104_v7 = vpack.c.bf16 %v8114_v30, %v8113_v33  ;;  %v8148_v8 = vld [vmem:[%s14060_s16 + $0x1f8] sm:$0xff]  ;;  %v8183_v52 = vld [vmem:[%s14060_s16 + $0x310] sm:$0xff]  ;;  %v8169_v33 = vld [vmem:[%s14060_s16 + $0x2a0] sm:$0xff] }
0x3020   :  { %11087 = vmatpush3.bf16.msra.mxu0 %v11086_v6  ;;  %11119 = vmatpush3.bf16.msra.mxu1 %v11118_v20  ;;  %v8098_v6 = vld [vmem:[%s14060_s16 + $0x68] sm:$0xff]  ;;  %v7361_v20 = vsub.s32 2, %v12289_v36  ;;  %v8184_v38 = vld [vmem:[%s14060_s16 + $0x318] sm:$0xff]  ;;  %v8175_v0 = vld [vmem:[%s14060_s16 + $0x2d0] sm:$0xff] }
0x3021   :  { %8412 = vmatprep.mubr.f32.mxu0 %v8054_v44  ;;  %8487 = vmatprep.mubr.f32.mxu1 %v8056_v37  ;;  %v11106_v31 = vpack.c.bf16 %v8098_v6, %v8097_v17  ;;  %v11138_v44 = vpack.c.bf16 %v8130_v41, %v8129_v23  ;;  %v8099_v37 = vld [vmem:[%s14060_s16 + $0x70] sm:$0xff]  ;;  %v8170_v30 = vld [vmem:[%s14060_s16 + $0x2a8] sm:$0xff]  ;;  %v8153_v17 = vld [vmem:[%s14060_s16 + $0x220] sm:$0xff] }
0x3022   :  { %11089 = vmatprep.subr.bf16.mxu0 %v11088_v35  ;;  %11121 = vmatprep.subr.bf16.mxu1 %v11120_v34  ;;  %v8116_v35 = vld [vmem:[%s14060_s16 + $0xf8] sm:$0xff]  ;;  %v8147_v34 = vld [vmem:[%s14060_s16 + $0x1f0] sm:$0xff]  ;;  %v8154_v6 = vld [vmem:[%s14060_s16 + $0x228] sm:$0xff] }
0x3023   :  { %v11108_v59 = vpack.c.bf16 %v8116_v35, %v8115_v19  ;;  %v11140_v55 = vpack.c.bf16 %v8148_v8, %v8147_v34  ;;  %v8185_v23 = vld [vmem:[%s14060_s16 + $0x320] sm:$0xff]  ;;  %v8186_v41 = vld [vmem:[%s14060_s16 + $0x328] sm:$0xff]  ;;  %v8171_v19 = vld [vmem:[%s14060_s16 + $0x2b0] sm:$0xff] }
0x3024   :  { %11091 = vmatpush3.bf16.msra.mxu0 %v11090_v27  ;;  %11123 = vmatpush3.bf16.msra.mxu1 %v11122_v13  ;;  %v8100_v27 = vld [vmem:[%s14060_s16 + $0x78] sm:$0xff]  ;;  %v13317_v13 = vrot.slane %v13101_v40, %v7361_v20  ;;  %v8203_v34 = vld [vmem:[%s14060_s16 + $0x3b0] sm:$0xff] }
0x3025   :  { %11093 = vmatprep.subr.bf16.mxu0 %v11092_v4  ;;  %11125 = vmatprep.subr.bf16.mxu1 %v11124_v28  ;;  %v8131_v4 = vld [vmem:[%s14060_s16 + $0x170] sm:$0xff]  ;;  %v8132_v28 = vld [vmem:[%s14060_s16 + $0x178] sm:$0xff]  ;;  %v11110_v51 = vpack.c.bf16 %v8100_v27, %v8099_v37 }
0x3026   :  { %v7581_v43 = vadd.f32 %v12907_v11, %v13317_v13  ;;  %v8168_v11 = vld [vmem:[%s14060_s16 + $0x298] sm:$0xff]  ;;  %v8155_v37 = vld [vmem:[%s14060_s16 + $0x230] sm:$0xff] }
0x3027   :  { %v8172_v35 = vld [vmem:[%s14060_s16 + $0x2b8] sm:$0xff] }
0x3028   :  { %11095 = vmatpush3.bf16.msra.mxu0 %v11094_v16  ;;  %11127 = vmatpush3.bf16.msra.mxu1 %v11126_v60  ;;  %v11142_v16 = vpack.c.bf16 %v8132_v28, %v8131_v4  ;;  %v8149_v60 = vld [vmem:[%s14060_s16 + $0x200] sm:$0xff]  ;;  %v8055_v24 = vmax.f32 %v7581_v43, 0.0  ;;  %v8204_v8 = vld [vmem:[%s14060_s16 + $0x3b8] sm:$0xff]  ;;  %v8187_v4 = vld [vmem:[%s14060_s16 + $0x330] sm:$0xff] }
0x3029   :  { %11097 = vmatprep.subr.bf16.mxu0 %v11096_v57  ;;  %11129 = vmatprep.subr.bf16.mxu1 %v11128_v54  ;;  %v11144_v57 = vpack.c.bf16 %v8166_v63, %v8165_v45  ;;  %v11176_v54 = vpack.c.bf16 %v8198_v32, %v8197_v47  ;;  %v11146_v15 = vpack.c.bf16 %v8150_v10, %v8149_v60  ;;  %v8156_v27 = vld [vmem:[%s14060_s16 + $0x238] sm:$0xff]  ;;  %v8173_v45 = vld [vmem:[%s14060_s16 + $0x2c0] sm:$0xff]  ;;  %v8174_v63 = vld [vmem:[%s14060_s16 + $0x2c8] sm:$0xff] }
0x302a   :  { %v8188_v28 = vld [vmem:[%s14060_s16 + $0x338] sm:$0xff]  ;;  %v8205_v47 = vld [vmem:[%s14060_s16 + $0x3c0] sm:$0xff]  ;;  %v8206_v32 = vld [vmem:[%s14060_s16 + $0x3c8] sm:$0xff]  ;;  %v11158_v29 = vpack.c.bf16 %v8156_v27, %v8155_v37  ;;  %v11160_v10 = vpack.c.bf16 %v8174_v63, %v8173_v45 }
0x302b   :  { %v8158_v60 = vld [vmem:[%s14060_s16 + $0x248] sm:$0xff]  ;;  %v11192_v43 = vpack.c.bf16 %v8206_v32, %v8205_v47  ;;  %v8176_v2 = vld [vmem:[%s14060_s16 + $0x2d8] sm:$0xff]  ;;  %v8195_v27 = vld [vmem:[%s14060_s16 + $0x370] sm:$0xff] }
0x302c   :  { %11099 = vmatpush3.bf16.msra.mxu0 %v11098_v48  ;;  %11131 = vmatpush3.bf16.msra.mxu1 %v11130_v62  ;;  %v8151_v48 = vld [vmem:[%s14060_s16 + $0x210] sm:$0xff]  ;;  %v8152_v62 = vld [vmem:[%s14060_s16 + $0x218] sm:$0xff]  ;;  %v8261_v45 = vld [vmem:[%s14060_s16 + $0x580] sm:$0xff] }
0x302d   :  { %11101 = vmatprep.subr.bf16.mxu0 %v11100_v56  ;;  %11133 = vmatprep.subr.bf16.mxu1 %v11132_v5  ;;  %v11148_v56 = vpack.c.bf16 %v8168_v11, %v8167_v3  ;;  %v11180_v5 = vpack.c.bf16 %v8200_v42, %v8199_v39  ;;  %v8207_v3 = vld [vmem:[%s14060_s16 + $0x3d0] sm:$0xff]  ;;  %v8208_v11 = vld [vmem:[%s14060_s16 + $0x3d8] sm:$0xff]  ;;  %v8262_v47 = vld [vmem:[%s14060_s16 + $0x588] sm:$0xff] }
0x302e   :  { %v11240_v32 = vpack.c.bf16 %v8262_v47, %v8261_v45  ;;  %v8233_v47 = vld [vmem:[%s14060_s16 + $0x4a0] sm:$0xff] }
0x3030   :  { %11103 = vmatpush3.bf16.msra.mxu0 %v11102_v53  ;;  %11135 = vmatpush3.bf16.msra.mxu1 %v11134_v1  ;;  %v11150_v53 = vpack.c.bf16 %v8152_v62, %v8151_v48  ;;  %v11182_v1 = vpack.c.bf16 %v8184_v38, %v8183_v52  ;;  %v11196_v48 = vpack.c.bf16 %v8208_v11, %v8207_v3  ;;  %v8160_v62 = vld [vmem:[%s14060_s16 + $0x258] sm:$0xff]  ;;  %v8177_v52 = vld [vmem:[%s14060_s16 + $0x2e0] sm:$0xff]  ;;  %v8178_v38 = vld [vmem:[%s14060_s16 + $0x2e8] sm:$0xff] }
0x3031   :  { %11105 = vmatprep.subr.bf16.mxu0 %v11104_v7  ;;  %11137 = vmatprep.subr.bf16.mxu1 %v11136_v46  ;;  %v11152_v7 = vpack.c.bf16 %v8170_v30, %v8169_v33  ;;  %v11184_v46 = vpack.c.bf16 %v8202_v61, %v8201_v58  ;;  %v8209_v33 = vld [vmem:[%s14060_s16 + $0x3e0] sm:$0xff]  ;;  %v11168_v30 = vpack.c.bf16 %v8178_v38, %v8177_v52  ;;  %v8210_v58 = vld [vmem:[%s14060_s16 + $0x3e8] sm:$0xff] }
0x3032   :  { %v8161_v61 = vld [vmem:[%s14060_s16 + $0x260] sm:$0xff] }
0x3034   :  { %11107 = vmatpush3.bf16.msra.mxu0 %v11106_v31  ;;  %11139 = vmatpush3.bf16.msra.mxu1 %v11138_v44  ;;  %v11154_v31 = vpack.c.bf16 %v8154_v6, %v8153_v17  ;;  %v11186_v44 = vpack.c.bf16 %v8186_v41, %v8185_v23  ;;  %v8193_v6 = vld [vmem:[%s14060_s16 + $0x360] sm:$0xff]  ;;  %v8179_v23 = vld [vmem:[%s14060_s16 + $0x2f0] sm:$0xff]  ;;  %v8180_v41 = vld [vmem:[%s14060_s16 + $0x2f8] sm:$0xff] }
0x3035   :  { %11109 = vmatprep.subr.bf16.mxu0 %v11108_v59  ;;  %11141 = vmatprep.subr.bf16.mxu1 %v11140_v55  ;;  %v11156_v59 = vpack.c.bf16 %v8172_v35, %v8171_v19  ;;  %v11188_v55 = vpack.c.bf16 %v8204_v8, %v8203_v34  ;;  %v8211_v19 = vld [vmem:[%s14060_s16 + $0x3f0] sm:$0xff]  ;;  %v11172_v35 = vpack.c.bf16 %v8180_v41, %v8179_v23  ;;  %v8212_v34 = vld [vmem:[%s14060_s16 + $0x3f8] sm:$0xff] }
0x3036   :  { %v8163_v8 = vld [vmem:[%s14060_s16 + $0x270] sm:$0xff] }
0x3037   :  { %v8215_v41 = vld [vmem:[%s14060_s16 + $0x410] sm:$0xff] }
0x3038   :  { %11111 = vmatpush3.bf16.msra.mxu0 %v11110_v51  ;;  %11143 = vmatpush3.bf16.msra.mxu1 %v11142_v16  ;;  %v11190_v51 = vpack.c.bf16 %v8188_v28, %v8187_v4  ;;  %v8157_v16 = vld [vmem:[%s14060_s16 + $0x240] sm:$0xff]  ;;  %v8230_v28 = vld [vmem:[%s14060_s16 + $0x488] sm:$0xff] }
0x3039   :  { %11145 = vmatprep.subr.bf16.mxu0 %v11144_v57  ;;  %11177 = vmatprep.subr.bf16.mxu1 %v11176_v54  ;;  %v8189_v57 = vld [vmem:[%s14060_s16 + $0x340] sm:$0xff]  ;;  %v8190_v54 = vld [vmem:[%s14060_s16 + $0x348] sm:$0xff]  ;;  %v11162_v39 = vpack.c.bf16 %v8158_v60, %v8157_v16  ;;  %v7373_v16 = vsub.s32 5, %v12289_v36  ;;  %v7381_v60 = vsub.s32 7, %v12289_v36 }
0x303a   :  { %v11194_v42 = vpack.c.bf16 %v8190_v54, %v8189_v57  ;;  %v8229_v4 = vld [vmem:[%s14060_s16 + $0x480] sm:$0xff] }
0x303b   :  { %8413 = vmatmul.mubr.f32.vlgmr.msra.gmra.mrb[96].mxu0 %v8053_v18  ;;  %8488 = vmatmul.mubr.f32.vlgmr.msra.gmra.mrb[112].mxu1 %v8055_v24  ;;  %v8191_v18 = vld [vmem:[%s14060_s16 + $0x350] sm:$0xff]  ;;  %v8192_v24 = vld [vmem:[%s14060_s16 + $0x358] sm:$0xff]  ;;  %v11208_v63 = vpack.c.bf16 %v8230_v28, %v8229_v4 }
0x303c   :  { %11147 = vmatpush3.bf16.msra.mxu0 %v11146_v15  ;;  %11179 = vmatpush3.bf16.msra.mxu1 %v11178_v21  ;;  %v8159_v15 = vld [vmem:[%s14060_s16 + $0x250] sm:$0xff]  ;;  %v11164_v21 = vpack.c.bf16 %v8176_v2, %v8175_v0 }
0x303d   :  { %11149 = vmatprep.subr.bf16.mxu0 %v11148_v56  ;;  %11181 = vmatprep.subr.bf16.mxu1 %v11180_v5  ;;  %v11166_v56 = vpack.c.bf16 %v8160_v62, %v8159_v15  ;;  %v11198_v5 = vpack.c.bf16 %v8192_v24, %v8191_v18  ;;  %v8213_v15 = vld [vmem:[%s14060_s16 + $0x400] sm:$0xff] }
0x3040   :  { %11151 = vmatpush3.bf16.msra.mxu0 %v11150_v53  ;;  %11183 = vmatpush3.bf16.msra.mxu1 %v11182_v1  ;;  %v8162_v53 = vld [vmem:[%s14060_s16 + $0x268] sm:$0xff]  ;;  %v11200_v1 = vpack.c.bf16 %v8210_v58, %v8209_v33 }
0x3041   :  { %11153 = vmatprep.subr.bf16.mxu0 %v11152_v7  ;;  %11185 = vmatprep.subr.bf16.mxu1 %v11184_v46  ;;  %v11170_v17 = vpack.c.bf16 %v8162_v53, %v8161_v61  ;;  %v8194_v7 = vld [vmem:[%s14060_s16 + $0x368] sm:$0xff]  ;;  %v8263_v53 = vld [vmem:[%s14060_s16 + $0x590] sm:$0xff] }
0x3042   :  { %v11202_v46 = vpack.c.bf16 %v8194_v7, %v8193_v6 }
0x3044   :  { %11155 = vmatpush3.bf16.msra.mxu0 %v11154_v31  ;;  %11187 = vmatpush3.bf16.msra.mxu1 %v11186_v44  ;;  %v8164_v31 = vld [vmem:[%s14060_s16 + $0x278] sm:$0xff]  ;;  %v11204_v44 = vpack.c.bf16 %v8212_v34, %v8211_v19 }
0x3045   :  { %11157 = vmatprep.subr.bf16.mxu0 %v11156_v59  ;;  %11189 = vmatprep.subr.bf16.mxu1 %v11188_v55  ;;  %v11174_v37 = vpack.c.bf16 %v8164_v31, %v8163_v8  ;;  %v8196_v59 = vld [vmem:[%s14060_s16 + $0x378] sm:$0xff] }
0x3046   :  { %v11206_v55 = vpack.c.bf16 %v8196_v59, %v8195_v27  ;;  %v8247_v27 = vld [vmem:[%s14060_s16 + $0x510] sm:$0xff] }
0x3048   :  { %11159 = vmatpush3.bf16.msra.mxu0 %v11158_v29  ;;  %11191 = vmatpush3.bf16.msra.mxu1 %v11190_v51  ;;  %v7369_v29 = vsub.s32 4, %v12289_v36  ;;  %v7377_v51 = vsub.s32 6, %v12289_v36  ;;  %v8279_v36 = vld [vmem:[%s14060_s16 + $0x610] sm:$0xff] }
0x3049   :  { %11161 = vmatprep.subr.bf16.mxu0 %v11160_v10  ;;  %11193 = vmatprep.subr.bf16.mxu1 %v11192_v43 }
0x304a   :  { %v7370_v3 = vrot.slane %v13101_v40, %v7369_v29  ;;  %v7378_v11 = vrot.slane %v13101_v40, %v7377_v51 }
0x304c   :  { %11163 = vmatpush3.bf16.msra.mxu0 %v11162_v39  ;;  %11195 = vmatpush3.bf16.msra.mxu1 %v11194_v42 }
0x304d   :  { %11165 = vmatprep.subr.bf16.mxu0 %v11164_v21  ;;  %11197 = vmatprep.subr.bf16.mxu1 %v11196_v48  ;;  %v8214_v21 = vld [vmem:[%s14060_s16 + $0x408] sm:$0xff] }
0x304e   :  { %v11210_v7 = vpack.c.bf16 %v8214_v21, %v8213_v15  ;;  %v8249_v15 = vld [vmem:[%s14060_s16 + $0x520] sm:$0xff] }
0x3050   :  { %11167 = vmatpush3.bf16.msra.mxu0 %v11166_v56  ;;  %11199 = vmatpush3.bf16.msra.mxu1 %v11198_v5  ;;  %v8231_v56 = vld [vmem:[%s14060_s16 + $0x490] sm:$0xff]  ;;  %v8232_v5 = vld [vmem:[%s14060_s16 + $0x498] sm:$0xff] }
0x3051   :  { %11169 = vmatprep.subr.bf16.mxu0 %v11168_v30  ;;  %11201 = vmatprep.subr.bf16.mxu1 %v11200_v1  ;;  %v8264_v1 = vld [vmem:[%s14060_s16 + $0x598] sm:$0xff]  ;;  %v11212_v31 = vpack.c.bf16 %v8232_v5, %v8231_v56  ;;  %v8235_v56 = vld [vmem:[%s14060_s16 + $0x4b0] sm:$0xff] }
0x3054   :  { %11171 = vmatpush3.bf16.msra.mxu0 %v11170_v17  ;;  %11203 = vmatpush3.bf16.msra.mxu1 %v11202_v46 }
0x3055   :  { %11173 = vmatprep.subr.bf16.mxu0 %v11172_v35  ;;  %11205 = vmatprep.subr.bf16.mxu1 %v11204_v44  ;;  %v11244_v44 = vpack.c.bf16 %v8264_v1, %v8263_v53 }
0x3058   :  { %11175 = vmatpush3.bf16.msra.mxu0 %v11174_v37  ;;  %11207 = vmatpush3.bf16.msra.mxu1 %v11206_v55  ;;  %v8216_v37 = vld [vmem:[%s14060_s16 + $0x418] sm:$0xff] }
0x3059   :  { %11209 = vmatprep.subr.bf16.mxu0 %v11208_v63  ;;  %11241 = vmatprep.subr.bf16.mxu1 %v11240_v32  ;;  %v8248_v63 = vld [vmem:[%s14060_s16 + $0x518] sm:$0xff] }
0x30da   :  { %v7509_v10 = vpop.f32.mrb[82].mxu0  ;;  %v7586_v43 = vpop.f32.mrb[98].mxu1 }
0x30db   :  { %v7510_v57 = vadd.f32 %v7509_v10, %v13306_v26  ;;  %v7587_v54 = vadd.f32 %v7586_v43, %v13317_v13  ;;  %v7511_v0 = vpop.f32.mrb[83].mxu0  ;;  %v7588_v2 = vpop.f32.mrb[99].mxu1  ;;  %v7374_v26 = vrot.slane %v13101_v40, %v7373_v16  ;;  %v7382_v13 = vrot.slane %v13101_v40, %v7381_v60  ;;  %v13568_v40 = vld [vmem:[%s14061_s15 + $0x8] sm:$0xff] }
0x30dc   :  { %v7512_v39 = vadd.f32 %v7511_v0, %v13123_v22  ;;  %v7589_v42 = vadd.f32 %v7588_v2, %v13128_v14  ;;  %v8245_v22 = vld [vmem:[%s14060_s16 + $0x500] sm:$0xff]  ;;  %v8246_v14 = vld [vmem:[%s14060_s16 + $0x508] sm:$0xff]  ;;  %v13585_v23 = vrot.slane %v13568_v40, %v7357_v12  ;;  %v13605_v43 = vrot.slane %v13568_v40, %v7365_v25 }
0x30dd   :  { %v8069_v52 = vmax.f32 %v7510_v57, 0.0  ;;  %v8071_v38 = vmax.f32 %v7587_v54, 0.0  ;;  %v11242_v46 = vpack.c.bf16 %v8246_v14, %v8245_v22  ;;  %v8234_v57 = vld [vmem:[%s14060_s16 + $0x4a8] sm:$0xff]  ;;  %v8265_v54 = vld [vmem:[%s14060_s16 + $0x5a0] sm:$0xff] }
0x30de   :  { %v8070_v48 = vmax.f32 %v7512_v39, 0.0  ;;  %v8072_v62 = vmax.f32 %v7589_v42, 0.0  ;;  %v7657_v18 = vpop.f32.mrb[84].mxu0  ;;  %v7734_v24 = vpop.f32.mrb[100].mxu1  ;;  %v8266_v0 = vld [vmem:[%s14060_s16 + $0x5a8] sm:$0xff]  ;;  %v8217_v2 = vld [vmem:[%s14060_s16 + $0x420] sm:$0xff]  ;;  %v11214_v42 = vpack.c.bf16 %v8216_v37, %v8215_v41 }
0x30df   :  { %v7658_v33 = vadd.f32 %v7657_v18, %v7370_v3  ;;  %v7735_v30 = vadd.f32 %v7734_v24, %v7378_v11  ;;  %v7659_v58 = vpop.f32.mrb[85].mxu0  ;;  %v7736_v61 = vpop.f32.mrb[101].mxu1  ;;  %v11248_v18 = vpack.c.bf16 %v8266_v0, %v8265_v54  ;;  %v8250_v24 = vld [vmem:[%s14060_s16 + $0x528] sm:$0xff]  ;;  %v8220_v41 = vld [vmem:[%s14060_s16 + $0x438] sm:$0xff]  ;;  %v8237_v37 = vld [vmem:[%s14060_s16 + $0x4c0] sm:$0xff] }
0x30e0   :  { %v7660_v17 = vadd.f32 %v7659_v58, %v7374_v26  ;;  %v7737_v6 = vadd.f32 %v7736_v61, %v7382_v13  ;;  %8417 = vmatprep.mubr.f32.mxu0 %v8070_v48  ;;  %8492 = vmatprep.mubr.f32.mxu1 %v8072_v62  ;;  %v11216_v62 = vpack.c.bf16 %v8234_v57, %v8233_v47  ;;  %v8219_v61 = vld [vmem:[%s14060_s16 + $0x430] sm:$0xff]  ;;  %v8222_v47 = vld [vmem:[%s14060_s16 + $0x448] sm:$0xff] }
0x30e1   :  { %8418 = vmatmul.mubr.f32.gmra.mrb[98].mxu0 %v8069_v52  ;;  %8493 = vmatmul.mubr.f32.gmra.mrb[114].mxu1 %v8071_v38  ;;  %v8057_v12 = vmax.f32 %v7658_v33, 0.0  ;;  %v8059_v59 = vmax.f32 %v7735_v30, 0.0  ;;  %v8236_v38 = vld [vmem:[%s14060_s16 + $0x4b8] sm:$0xff]  ;;  %v8267_v33 = vld [vmem:[%s14060_s16 + $0x5b0] sm:$0xff] }
0x30e2   :  { %v8058_v19 = vmax.f32 %v7660_v17, 0.0  ;;  %v8060_v35 = vmax.f32 %v7737_v6, 0.0  ;;  %v7663_v34 = vpop.f32.mrb[86].mxu0  ;;  %v7740_v8 = vpop.f32.mrb[102].mxu1  ;;  %v8268_v30 = vld [vmem:[%s14060_s16 + $0x5b8] sm:$0xff] }
0x30e3   :  { %v7664_v55 = vadd.f32 %v7663_v34, %v7370_v3  ;;  %v7741_v4 = vadd.f32 %v7740_v8, %v7378_v11  ;;  %v7665_v28 = vpop.f32.mrb[87].mxu0  ;;  %v7742_v45 = vpop.f32.mrb[103].mxu1  ;;  %v7410_v8 = vrot.slane %v13568_v40, %v7377_v51  ;;  %v8269_v51 = vld [vmem:[%s14060_s16 + $0x5c0] sm:$0xff] }
0x30e4   :  { %v7666_v32 = vadd.f32 %v7665_v28, %v7374_v26  ;;  %v7743_v10 = vadd.f32 %v7742_v45, %v7382_v13  ;;  %8562 = vmatprep.mubr.f32.mxu0 %v8058_v19  ;;  %8637 = vmatprep.mubr.f32.mxu1 %v8060_v35  ;;  %v11246_v26 = vpack.c.bf16 %v8248_v63, %v8247_v27  ;;  %v8218_v13 = vld [vmem:[%s14060_s16 + $0x428] sm:$0xff]  ;;  %v8251_v19 = vld [vmem:[%s14060_s16 + $0x530] sm:$0xff]  ;;  %v8221_v63 = vld [vmem:[%s14060_s16 + $0x440] sm:$0xff] }
0x30e5   :  { %8563 = vmatmul.mubr.f32.vlgmr.msra.gmra.mrb[100].mxu0 %v8057_v12  ;;  %8638 = vmatmul.mubr.f32.vlgmr.msra.gmra.mrb[116].mxu1 %v8059_v59  ;;  %v8073_v21 = vmax.f32 %v7664_v55, 0.0  ;;  %v8075_v22 = vmax.f32 %v7741_v4, 0.0  ;;  %v11218_v58 = vpack.c.bf16 %v8218_v13, %v8217_v2  ;;  %v8238_v27 = vld [vmem:[%s14060_s16 + $0x4c8] sm:$0xff]  ;;  %v11222_v4 = vpack.c.bf16 %v8220_v41, %v8219_v61  ;;  %v8272_v13 = vld [vmem:[%s14060_s16 + $0x5d8] sm:$0xff]  ;;  %v8225_v41 = vld [vmem:[%s14060_s16 + $0x460] sm:$0xff] }
0x30e6   :  { %v8074_v25 = vmax.f32 %v7666_v32, 0.0  ;;  %v8076_v3 = vmax.f32 %v7743_v10, 0.0  ;;  %11211 = vmatpush3.bf16.msra.mxu0 %v11210_v7  ;;  %11243 = vmatpush3.bf16.msra.mxu1 %v11242_v46  ;;  %v13619_v11 = vpop.f32.mrb[88].mxu0  ;;  %v13621_v39 = vpop.f32.mrb[104].mxu1  ;;  %v11250_v7 = vpack.c.bf16 %v8250_v24, %v8249_v15  ;;  %v7402_v46 = vrot.slane %v13568_v40, %v7369_v29  ;;  %v8270_v12 = vld [vmem:[%s14060_s16 + $0x5c8] sm:$0xff]  ;;  %v8253_v32 = vld [vmem:[%s14060_s16 + $0x540] sm:$0xff] }
0x30e7   :  { %v7813_v14 = vpop.f32.mrb[89].mxu0  ;;  %v7890_v48 = vpop.f32.mrb[105].mxu1  ;;  %11213 = vmatprep.subr.bf16.mxu0 %v11212_v31  ;;  %11245 = vmatprep.subr.bf16.mxu1 %v11244_v44  ;;  %v11220_v31 = vpack.c.bf16 %v8236_v38, %v8235_v56  ;;  %v11252_v29 = vpack.c.bf16 %v8268_v30, %v8267_v33  ;;  %v8252_v44 = vld [vmem:[%s14060_s16 + $0x538] sm:$0xff]  ;;  %v11224_v45 = vpack.c.bf16 %v8238_v27, %v8237_v37  ;;  %v8255_v33 = vld [vmem:[%s14060_s16 + $0x550] sm:$0xff]  ;;  %v8242_v61 = vld [vmem:[%s14060_s16 + $0x4e8] sm:$0xff] }
0x30e8   :  { %v7814_v5 = vadd.f32 %v7813_v14, %v13585_v23  ;;  %v7891_v52 = vadd.f32 %v7890_v48, %v13605_v43  ;;  %8567 = vmatprep.mubr.f32.mxu0 %v8074_v25  ;;  %8642 = vmatprep.mubr.f32.mxu1 %v8076_v3  ;;  %v11254_v28 = vpack.c.bf16 %v8252_v44, %v8251_v19  ;;  %v8254_v25 = vld [vmem:[%s14060_s16 + $0x548] sm:$0xff]  ;;  %v8239_v3 = vld [vmem:[%s14060_s16 + $0x4d0] sm:$0xff]  ;;  %v8256_v30 = vld [vmem:[%s14060_s16 + $0x558] sm:$0xff] }
0x30e9   :  { %8568 = vmatmul.mubr.f32.gmra.mrb[102].mxu0 %v8073_v21  ;;  %8643 = vmatmul.mubr.f32.gmra.mrb[118].mxu1 %v8075_v22  ;;  %v11256_v2 = vpack.c.bf16 %v8270_v12, %v8269_v51  ;;  %v11226_v22 = vpack.c.bf16 %v8222_v47, %v8221_v63  ;;  %v11258_v14 = vpack.c.bf16 %v8254_v25, %v8253_v32  ;;  %v8226_v19 = vld [vmem:[%s14060_s16 + $0x468] sm:$0xff]  ;;  %v8243_v37 = vld [vmem:[%s14060_s16 + $0x4f0] sm:$0xff]  ;;  %v8244_v27 = vld [vmem:[%s14060_s16 + $0x4f8] sm:$0xff] }
0x30ea   :  { %v8062_v53 = vmax.f32 %v7814_v5, 0.0  ;;  %v8064_v1 = vmax.f32 %v7891_v52, 0.0  ;;  %11215 = vmatpush3.bf16.msra.mxu0 %v11214_v42  ;;  %11247 = vmatpush3.bf16.msra.mxu1 %v11246_v26  ;;  %v13649_v17 = vpop.f32.mrb[90].mxu0  ;;  %v13651_v6 = vpop.f32.mrb[106].mxu1  ;;  %v8240_v42 = vld [vmem:[%s14060_s16 + $0x4d8] sm:$0xff]  ;;  %v8271_v26 = vld [vmem:[%s14060_s16 + $0x5d0] sm:$0xff]  ;;  %v11236_v47 = vpack.c.bf16 %v8244_v27, %v8243_v37 }
0x30eb   :  { %v13662_v35 = vpop.f32.mrb[91].mxu0  ;;  %v13664_v34 = vpop.f32.mrb[107].mxu1  ;;  %11217 = vmatprep.subr.bf16.mxu0 %v11216_v62  ;;  %11249 = vmatprep.subr.bf16.mxu1 %v11248_v18  ;;  %v11228_v48 = vpack.c.bf16 %v8240_v42, %v8239_v3  ;;  %v8223_v62 = vld [vmem:[%s14060_s16 + $0x450] sm:$0xff]  ;;  %v8224_v18 = vld [vmem:[%s14060_s16 + $0x458] sm:$0xff]  ;;  %v11260_v38 = vpack.c.bf16 %v8272_v13, %v8271_v26  ;;  %v8258_v44 = vld [vmem:[%s14060_s16 + $0x568] sm:$0xff] }
0x30ec   :  { %8712 = vmatprep.mubr.f32.mxu0 %v8062_v53  ;;  %8787 = vmatprep.mubr.f32.mxu1 %v8064_v1  ;;  %v8273_v53 = vld [vmem:[%s14060_s16 + $0x5e0] sm:$0xff]  ;;  %v8274_v1 = vld [vmem:[%s14060_s16 + $0x5e8] sm:$0xff]  ;;  %v8275_v51 = vld [vmem:[%s14060_s16 + $0x5f0] sm:$0xff] }
0x30ed   :  { %v8276_v12 = vld [vmem:[%s14060_s16 + $0x5f8] sm:$0xff]  ;;  %v8259_v63 = vld [vmem:[%s14060_s16 + $0x570] sm:$0xff]  ;;  %v8293_v25 = vld [vmem:[%s14060_s16 + $0x680] sm:$0xff] }
0x30ee   :  { %11219 = vmatpush3.bf16.msra.mxu0 %v11218_v58  ;;  %11251 = vmatpush3.bf16.msra.mxu1 %v11250_v7  ;;  %v7965_v59 = vpop.f32.mrb[92].mxu0  ;;  %v8042_v55 = vpop.f32.mrb[108].mxu1  ;;  %v8241_v58 = vld [vmem:[%s14060_s16 + $0x4e0] sm:$0xff]  ;;  %v11230_v7 = vpack.c.bf16 %v8224_v18, %v8223_v62  ;;  %v11268_v32 = vpack.c.bf16 %v8276_v12, %v8275_v51  ;;  %v8294_v3 = vld [vmem:[%s14060_s16 + $0x688] sm:$0xff]  ;;  %v8295_v62 = vld [vmem:[%s14060_s16 + $0x690] sm:$0xff] }
0x30ef   :  { %v13693_v10 = vadd.f32 %v7965_v59, %v7402_v46  ;;  %v13695_v57 = vadd.f32 %v8042_v55, %v7410_v8  ;;  %v13697_v54 = vpop.f32.mrb[93].mxu0  ;;  %v13699_v0 = vpop.f32.mrb[109].mxu1  ;;  %11221 = vmatprep.subr.bf16.mxu0 %v11220_v31  ;;  %11253 = vmatprep.subr.bf16.mxu1 %v11252_v29  ;;  %v11264_v31 = vpack.c.bf16 %v8274_v1, %v8273_v53  ;;  %v8257_v29 = vld [vmem:[%s14060_s16 + $0x560] sm:$0xff]  ;;  %v8326_v42 = vld [vmem:[%s14060_s16 + $0x788] sm:$0xff] }
0x30f0   :  { %v7386_v59 = vrot.slane %v13568_v40, %v12296_v9  ;;  %v11234_v55 = vpack.c.bf16 %v8226_v19, %v8225_v41  ;;  %v7394_v9 = vrot.slane %v13568_v40, %v7361_v20  ;;  %v8325_v20 = vld [vmem:[%s14060_s16 + $0x780] sm:$0xff]  ;;  %v8278_v13 = vld [vmem:[%s14060_s16 + $0x608] sm:$0xff]  ;;  %v13834_v53 = vrot.slane %v13568_v40, %v7373_v16  ;;  %v8280_v16 = vld [vmem:[%s14060_s16 + $0x618] sm:$0xff] }
0x30f1   :  { %v8277_v26 = vld [vmem:[%s14060_s16 + $0x600] sm:$0xff]  ;;  %v13839_v1 = vrot.slane %v13568_v40, %v7381_v60  ;;  %v11278_v51 = vpack.c.bf16 %v8280_v16, %v8279_v36  ;;  %v8318_v36 = vld [vmem:[%s14060_s16 + $0x748] sm:$0xff]  ;;  %v8303_v16 = vld [vmem:[%s14060_s16 + $0x6d0] sm:$0xff] }
0x30f2   :  { %11223 = vmatpush3.bf16.msra.mxu0 %v11222_v4  ;;  %11255 = vmatpush3.bf16.msra.mxu1 %v11254_v28  ;;  %v7971_v15 = vpop.f32.mrb[94].mxu0  ;;  %v8048_v21 = vpop.f32.mrb[110].mxu1  ;;  %v11266_v4 = vpack.c.bf16 %v8258_v44, %v8257_v29  ;;  %v8227_v28 = vld [vmem:[%s14060_s16 + $0x470] sm:$0xff]  ;;  %v7812_v18 = vadd.f32 %v13619_v11, %v7386_v59  ;;  %v7820_v11 = vadd.f32 %v13662_v35, %v13585_v23  ;;  %v8297_v29 = vld [vmem:[%s14060_s16 + $0x6a0] sm:$0xff]  ;;  %v8330_v44 = vld [vmem:[%s14060_s16 + $0x7a8] sm:$0xff] }
0x30f3   :  { %v13722_v24 = vadd.f32 %v7971_v15, %v7402_v46  ;;  %v13724_v56 = vadd.f32 %v8048_v21, %v7410_v8  ;;  %v13726_v5 = vpop.f32.mrb[95].mxu0  ;;  %v13728_v52 = vpop.f32.mrb[111].mxu1  ;;  %11225 = vmatprep.subr.bf16.mxu0 %v11224_v45  ;;  %11257 = vmatprep.subr.bf16.mxu1 %v11256_v2  ;;  %v11262_v46 = vpack.c.bf16 %v8256_v30, %v8255_v33  ;;  %v8228_v45 = vld [vmem:[%s14060_s16 + $0x478] sm:$0xff] }
0x30f4   :  { %v11232_v8 = vpack.c.bf16 %v8242_v61, %v8241_v58  ;;  %v8260_v2 = vld [vmem:[%s14060_s16 + $0x578] sm:$0xff]  ;;  %v11238_v15 = vpack.c.bf16 %v8228_v45, %v8227_v28  ;;  %v11304_v33 = vpack.c.bf16 %v8326_v42, %v8325_v20  ;;  %v8327_v58 = vld [vmem:[%s14060_s16 + $0x790] sm:$0xff]  ;;  %v8061_v23 = vmax.f32 %v7812_v18, 0.0  ;;  %v8333_v18 = vld [vmem:[%s14060_s16 + $0x7c0] sm:$0xff] }
0x30f5   :  { %v11270_v21 = vpack.c.bf16 %v8260_v2, %v8259_v63  ;;  %v8296_v30 = vld [vmem:[%s14060_s16 + $0x698] sm:$0xff]  ;;  %v8078_v60 = vmax.f32 %v7820_v11, 0.0 }
0x30f6   :  { %11227 = vmatpush3.bf16.msra.mxu0 %v11226_v22  ;;  %11259 = vmatpush3.bf16.msra.mxu1 %v11258_v14  ;;  %v11272_v22 = vpack.c.bf16 %v8294_v3, %v8293_v25  ;;  %v8309_v14 = vld [vmem:[%s14060_s16 + $0x700] sm:$0xff]  ;;  %v8328_v61 = vld [vmem:[%s14060_s16 + $0x798] sm:$0xff]  ;;  %v11276_v41 = vpack.c.bf16 %v8296_v30, %v8295_v62  ;;  %v8331_v25 = vld [vmem:[%s14060_s16 + $0x7b0] sm:$0xff] }
0x30f7   :  { %11229 = vmatprep.subr.bf16.mxu0 %v11228_v48  ;;  %11261 = vmatprep.subr.bf16.mxu1 %v11260_v38  ;;  %v8310_v48 = vld [vmem:[%s14060_s16 + $0x708] sm:$0xff]  ;;  %v7889_v38 = vadd.f32 %v13621_v39, %v7394_v9  ;;  %v7897_v39 = vadd.f32 %v13664_v34, %v13605_v43  ;;  %v11308_v19 = vpack.c.bf16 %v8328_v61, %v8327_v58  ;;  %v8300_v2 = vld [vmem:[%s14060_s16 + $0x6b8] sm:$0xff]  ;;  %v13922_v58 = vld [vmem:[%s14062_s17] ss:$0 sm:$0xff] }
0x30f8   :  { %v7818_v43 = vadd.f32 %v13649_v17, %v7386_v59  ;;  %v7895_v34 = vadd.f32 %v13651_v6, %v7394_v9  ;;  %v8045_v17 = vadd.f32 %v13699_v0, %v13839_v1  ;;  %v8311_v6 = vld [vmem:[%s14060_s16 + $0x710] sm:$0xff]  ;;  %v8329_v0 = vld [vmem:[%s14060_s16 + $0x7a0] sm:$0xff]  ;;  %v8332_v3 = vld [vmem:[%s14060_s16 + $0x7b8] sm:$0xff] }
0x30f9   :  { %v8063_v35 = vmax.f32 %v7889_v38, 0.0  ;;  %v8080_v40 = vmax.f32 %v7897_v39, 0.0  ;;  %v8281_v59 = vld [vmem:[%s14060_s16 + $0x620] sm:$0xff]  ;;  %v11312_v63 = vpack.c.bf16 %v8330_v44, %v8329_v0  ;;  %v8302_v62 = vld [vmem:[%s14060_s16 + $0x6c8] sm:$0xff] }
0x30fa   :  { %11231 = vmatpush3.bf16.msra.mxu0 %v11230_v7  ;;  %11263 = vmatpush3.bf16.msra.mxu1 %v11262_v46  ;;  %v11274_v7 = vpack.c.bf16 %v8278_v13, %v8277_v26  ;;  %v11306_v46 = vpack.c.bf16 %v8310_v48, %v8309_v14  ;;  %v8077_v37 = vmax.f32 %v7818_v43, 0.0  ;;  %v8079_v27 = vmax.f32 %v7895_v34, 0.0  ;;  %v8313_v9 = vld [vmem:[%s14060_s16 + $0x720] sm:$0xff]  ;;  %v8283_v26 = vld [vmem:[%s14060_s16 + $0x630] sm:$0xff]  ;;  %v8284_v13 = vld [vmem:[%s14060_s16 + $0x638] sm:$0xff] }
0x30fb   :  { %11233 = vmatprep.subr.bf16.mxu0 %v11232_v8  ;;  %11265 = vmatprep.subr.bf16.mxu1 %v11264_v31  ;;  %v7968_v8 = vadd.f32 %v13697_v54, %v13834_v53  ;;  %v8312_v31 = vld [vmem:[%s14060_s16 + $0x718] sm:$0xff]  ;;  %v8298_v54 = vld [vmem:[%s14060_s16 + $0x6a8] sm:$0xff]  ;;  %v8068_v28 = vmax.f32 %v8045_v17, 0.0  ;;  %v8301_v48 = vld [vmem:[%s14060_s16 + $0x6c0] sm:$0xff]  ;;  %v11286_v39 = vpack.c.bf16 %v8284_v13, %v8283_v26 }
0x30fc   :  { %v11310_v12 = vpack.c.bf16 %v8312_v31, %v8311_v6  ;;  %v11280_v45 = vpack.c.bf16 %v8298_v54, %v8297_v29  ;;  %v8316_v14 = vld [vmem:[%s14060_s16 + $0x738] sm:$0xff]  ;;  %v8334_v38 = vld [vmem:[%s14060_s16 + $0x7c8] sm:$0xff]  ;;  %v8317_v34 = vld [vmem:[%s14060_s16 + $0x740] sm:$0xff] }
0x30fd   :  { %v11320_v43 = vpack.c.bf16 %v8334_v38, %v8333_v18  ;;  %v11322_v31 = vpack.c.bf16 %v8318_v36, %v8317_v34  ;;  %v8287_v29 = vld [vmem:[%s14060_s16 + $0x650] sm:$0xff]  ;;  %v8288_v54 = vld [vmem:[%s14060_s16 + $0x658] sm:$0xff] }
0x30fe   :  { %11235 = vmatpush3.bf16.msra.mxu0 %v11234_v55  ;;  %11267 = vmatpush3.bf16.msra.mxu1 %v11266_v4  ;;  %v8282_v55 = vld [vmem:[%s14060_s16 + $0x628] sm:$0xff]  ;;  %v8066_v4 = vmax.f32 %v7968_v8, 0.0  ;;  %v8336_v8 = vld [vmem:[%s14060_s16 + $0x7d8] sm:$0xff] }
0x30ff   :  { %11237 = vmatprep.subr.bf16.mxu0 %v11236_v47  ;;  %11269 = vmatprep.subr.bf16.mxu1 %v11268_v32  ;;  %v8314_v47 = vld [vmem:[%s14060_s16 + $0x728] sm:$0xff]  ;;  %v8299_v32 = vld [vmem:[%s14060_s16 + $0x6b0] sm:$0xff]  ;;  %v11282_v20 = vpack.c.bf16 %v8282_v55, %v8281_v59  ;;  %v8337_v55 = vld [vmem:[%s14060_s16 + $0x7e0] sm:$0xff] }
0x3100   :  { %v11314_v42 = vpack.c.bf16 %v8314_v47, %v8313_v9  ;;  %v8306_v59 = vld [vmem:[%s14060_s16 + $0x6e8] sm:$0xff]  ;;  %v8340_v26 = vld [vmem:[%s14060_s16 + $0x7f8] sm:$0xff] }
0x3101   :  { %v8290_v9 = vld [vmem:[%s14060_s16 + $0x668] sm:$0xff]  ;;  %v8324_v18 = vld [vmem:[%s14060_s16 + $0x778] sm:$0xff] }
0x3102   :  { %11239 = vmatpush3.bf16.msra.mxu0 %v11238_v15  ;;  %11271 = vmatpush3.bf16.msra.mxu1 %v11270_v21  ;;  %v8315_v15 = vld [vmem:[%s14060_s16 + $0x730] sm:$0xff]  ;;  %v11284_v21 = vpack.c.bf16 %v8300_v2, %v8299_v32  ;;  %v8321_v2 = vld [vmem:[%s14060_s16 + $0x760] sm:$0xff] }
0x3103   :  { %11273 = vmatprep.subr.bf16.mxu0 %v11272_v22  ;;  %11305 = vmatprep.subr.bf16.mxu1 %v11304_v33  ;;  %v11316_v22 = vpack.c.bf16 %v8332_v3, %v8331_v25  ;;  %v8322_v25 = vld [vmem:[%s14060_s16 + $0x768] sm:$0xff]  ;;  %v8307_v3 = vld [vmem:[%s14060_s16 + $0x6f0] sm:$0xff] }
0x3105   :  { %8713 = vmatmul.mubr.f32.vlgmr.msra.gmra.mrb[104].mxu0 %v8061_v23  ;;  %8788 = vmatmul.mubr.f32.vlgmr.msra.gmra.mrb[120].mxu1 %v8063_v35 }
0x3106   :  { %8717 = vmatprep.mubr.f32.mxu0 %v8078_v60  ;;  %8792 = vmatprep.mubr.f32.mxu1 %v8080_v40  ;;  %v8304_v60 = vld [vmem:[%s14060_s16 + $0x6d8] sm:$0xff]  ;;  %v8335_v40 = vld [vmem:[%s14060_s16 + $0x7d0] sm:$0xff] }
0x3107   :  { %11275 = vmatpush3.bf16.msra.mxu0 %v11274_v7  ;;  %11307 = vmatpush3.bf16.msra.mxu1 %v11306_v46  ;;  %v11318_v7 = vpack.c.bf16 %v8316_v14, %v8315_v15  ;;  %v11288_v46 = vpack.c.bf16 %v8302_v62, %v8301_v48  ;;  %v11292_v44 = vpack.c.bf16 %v8304_v60, %v8303_v16  ;;  %v8292_v48 = vld [vmem:[%s14060_s16 + $0x678] sm:$0xff]  ;;  %v8323_v62 = vld [vmem:[%s14060_s16 + $0x770] sm:$0xff] }
0x3108   :  { %11277 = vmatprep.subr.bf16.mxu0 %v11276_v41  ;;  %11309 = vmatprep.subr.bf16.mxu1 %v11308_v19  ;;  %v8285_v41 = vld [vmem:[%s14060_s16 + $0x640] sm:$0xff]  ;;  %v8286_v19 = vld [vmem:[%s14060_s16 + $0x648] sm:$0xff]  ;;  %v11330_v15 = vpack.c.bf16 %v8322_v25, %v8321_v2 }
0x3109   :  { %8718 = vmatmul.mubr.f32.gmra.mrb[106].mxu0 %v8077_v37  ;;  %8793 = vmatmul.mubr.f32.gmra.mrb[122].mxu1 %v8079_v27  ;;  %v11290_v6 = vpack.c.bf16 %v8286_v19, %v8285_v41  ;;  %v11324_v37 = vpack.c.bf16 %v8336_v8, %v8335_v40  ;;  %v8319_v27 = vld [vmem:[%s14060_s16 + $0x750] sm:$0xff]  ;;  %v8081_v41 = vmax.f32 %v13722_v24, 0.0  ;;  %v8083_v19 = vmax.f32 %v13724_v56, 0.0 }
0x310a   :  { %8862 = vmatprep.mubr.f32.mxu0 %v8066_v4  ;;  %8937 = vmatprep.mubr.f32.mxu1 %v8068_v28  ;;  %v8338_v4 = vld [vmem:[%s14060_s16 + $0x7e8] sm:$0xff]  ;;  %v11294_v28 = vpack.c.bf16 %v8288_v54, %v8287_v29 }
0x310b   :  { %11279 = vmatpush3.bf16.msra.mxu0 %v11278_v51  ;;  %11311 = vmatpush3.bf16.msra.mxu1 %v11310_v12  ;;  %v8320_v51 = vld [vmem:[%s14060_s16 + $0x758] sm:$0xff]  ;;  %v8305_v12 = vld [vmem:[%s14060_s16 + $0x6e0] sm:$0xff]  ;;  %v11328_v32 = vpack.c.bf16 %v8338_v4, %v8337_v55 }
0x310c   :  { %11281 = vmatprep.subr.bf16.mxu0 %v11280_v45  ;;  %11313 = vmatprep.subr.bf16.mxu1 %v11312_v63  ;;  %v11326_v45 = vpack.c.bf16 %v8320_v51, %v8319_v27  ;;  %v8289_v63 = vld [vmem:[%s14060_s16 + $0x660] sm:$0xff]  ;;  %v11296_v47 = vpack.c.bf16 %v8306_v59, %v8305_v12 }
0x310d   :  { %v11298_v13 = vpack.c.bf16 %v8290_v9, %v8289_v63 }
0x310e   :  { %v9728_v33 = vpop.f32.mrb[96].mxu0  ;;  %v9766_v30 = vpop.f32.mrb[112].mxu1 }
0x310f   :  { %11283 = vmatpush3.bf16.msra.mxu0 %v11282_v20  ;;  %11315 = vmatpush3.bf16.msra.mxu1 %v11314_v42  ;;  %v9729_v61 = vpop.f32.mrb[97].mxu0  ;;  %v9767_v11 = vpop.f32.mrb[113].mxu1  ;;  %v8308_v20 = vld [vmem:[%s14060_s16 + $0x6f8] sm:$0xff]  ;;  %v8339_v42 = vld [vmem:[%s14060_s16 + $0x7f0] sm:$0xff] }
0x3110   :  { %v9730_v23 = vadd.f32 %v9729_v61, %v9728_v33  ;;  %v9768_v35 = vadd.f32 %v9767_v11, %v9766_v30  ;;  %11285 = vmatprep.subr.bf16.mxu0 %v11284_v21  ;;  %11317 = vmatprep.subr.bf16.mxu1 %v11316_v22  ;;  %v8291_v21 = vld [vmem:[%s14060_s16 + $0x670] sm:$0xff]  ;;  %v11300_v22 = vpack.c.bf16 %v8308_v20, %v8307_v3  ;;  %v8065_v11 = vmax.f32 %v13693_v10, 0.0 }
0x3111   :  { %v11332_v14 = vpack.c.bf16 %v8340_v26, %v8339_v42  ;;  %v11302_v38 = vpack.c.bf16 %v8292_v48, %v8291_v21  ;;  %v11334_v33 = vpack.c.bf16 %v8324_v18, %v8323_v62  ;;  %v7974_v30 = vadd.f32 %v13726_v5, %v13834_v53 }
0x3112   :  { %v8415_v17 = vadd.f32 %v9730_v23, %v13922_v58  ;;  %v8051_v61 = vadd.f32 %v13728_v52, %v13839_v1 }
0x3113   :  { %11287 = vmatpush3.bf16.msra.mxu0 %v11286_v39  ;;  %11319 = vmatpush3.bf16.msra.mxu1 %v11318_v7  ;;  %v8067_v39 = vmax.f32 %v13695_v57, 0.0  ;;  %v8082_v7 = vmax.f32 %v7974_v30, 0.0 }
0x3114   :  { %v13955_v0 = vadd.f32 %v9768_v35, %v8415_v17  ;;  %11289 = vmatprep.subr.bf16.mxu0 %v11288_v46  ;;  %11321 = vmatprep.subr.bf16.mxu1 %v11320_v43  ;;  %v8084_v46 = vmax.f32 %v8051_v61, 0.0 }
0x3117   :  { %11291 = vmatpush3.bf16.msra.mxu0 %v11290_v6  ;;  %11323 = vmatpush3.bf16.msra.mxu1 %v11322_v31 }
0x3118   :  { %11293 = vmatprep.subr.bf16.mxu0 %v11292_v44  ;;  %11325 = vmatprep.subr.bf16.mxu1 %v11324_v37 }
0x311b   :  { %11295 = vmatpush3.bf16.msra.mxu0 %v11294_v28  ;;  %11327 = vmatpush3.bf16.msra.mxu1 %v11326_v45 }
0x311c   :  { %11297 = vmatprep.subr.bf16.mxu0 %v11296_v47  ;;  %11329 = vmatprep.subr.bf16.mxu1 %v11328_v32 }
0x311f   :  { %11299 = vmatpush3.bf16.msra.mxu0 %v11298_v13  ;;  %11331 = vmatpush3.bf16.msra.mxu1 %v11330_v15 }
0x3120   :  { %11301 = vmatprep.subr.bf16.mxu0 %v11300_v22  ;;  %11333 = vmatprep.subr.bf16.mxu1 %v11332_v14 }
0x3123   :  { %11303 = vmatpush3.bf16.msra.mxu0 %v11302_v38  ;;  %11335 = vmatpush3.bf16.msra.mxu1 %v11334_v33 }
0x3126   :  { %8863 = vmatmul.mubr.f32.vlgmr.msra.gmra.mrb[108].mxu0 %v8065_v11  ;;  %8938 = vmatmul.mubr.f32.vlgmr.msra.gmra.mrb[124].mxu1 %v8067_v39 }
0x3127   :  { %8867 = vmatprep.mubr.f32.mxu0 %v8082_v7  ;;  %8942 = vmatprep.mubr.f32.mxu1 %v8084_v46 }
0x312a   :  { %8868 = vmatmul.mubr.f32.gmra.mrb[110].mxu0 %v8081_v41  ;;  %8943 = vmatmul.mubr.f32.gmra.mrb[126].mxu1 %v8083_v19 }
0x31b4   :  { %v9731_v5 = vpop.f32.mrb[98].mxu0  ;;  %v9769_v52 = vpop.f32.mrb[114].mxu1 }
0x31b5   :  { %v9732_v53 = vpop.f32.mrb[99].mxu0  ;;  %v9770_v1 = vpop.f32.mrb[115].mxu1 }
0x31b6   :  { %v9733_v23 = vadd.f32 %v9732_v53, %v9731_v5  ;;  %v9771_v10 = vadd.f32 %v9770_v1, %v9769_v52 }
0x31b8   :  { %v8420_v57 = vadd.f32 %v9733_v23, %v13922_v58  ;;  %v9804_v35 = vpop.f32.mrb[100].mxu0  ;;  %v9842_v43 = vpop.f32.mrb[116].mxu1 }
0x31b9   :  { %v9805_v34 = vpop.f32.mrb[101].mxu0  ;;  %v9843_v36 = vpop.f32.mrb[117].mxu1 }
0x31ba   :  { %v8495_v16 = vadd.f32 %v9771_v10, %v8420_v57  ;;  %v9806_v60 = vadd.f32 %v9805_v34, %v9804_v35  ;;  %v9844_v40 = vadd.f32 %v9843_v36, %v9842_v43 }
0x31bc   :  { %v8565_v24 = vadd.f32 %v9806_v60, %v13955_v0  ;;  %v9807_v56 = vpop.f32.mrb[102].mxu0  ;;  %v9845_v8 = vpop.f32.mrb[118].mxu1 }
0x31bd   :  { %v9808_v17 = vpop.f32.mrb[103].mxu0  ;;  %v9846_v6 = vpop.f32.mrb[119].mxu1 }
0x31be   :  { %v8640_v31 = vadd.f32 %v9844_v40, %v8565_v24  ;;  %v9809_v29 = vadd.f32 %v9808_v17, %v9807_v56  ;;  %v9847_v54 = vadd.f32 %v9846_v6, %v9845_v8  ;;  %v9374_v40 = vld [vmem:[%s14063_s22] ss:$0 sm:$0xff] }
0x31bf   :  { %v9375_v56 = vld [vmem:[%s14064_s23] ss:$0 sm:$0xff] }
0x31c0   :  { %v8570_v44 = vadd.f32 %v9809_v29, %v8495_v16 }
0x31c2   :  { %v8645_v37 = vadd.f32 %v9847_v54, %v8570_v44 }
0x31d8   :  { %v9880_v27 = vpop.f32.mrb[104].mxu0  ;;  %v9918_v58 = vpop.f32.mrb[120].mxu1 }
0x31d9   :  { %v9881_v51 = vpop.f32.mrb[105].mxu0  ;;  %v9919_v12 = vpop.f32.mrb[121].mxu1 }
0x31da   :  { %v9882_v59 = vadd.f32 %v9881_v51, %v9880_v27  ;;  %v9920_v55 = vadd.f32 %v9919_v12, %v9918_v58 }
0x31dc   :  { %v8715_v4 = vadd.f32 %v9882_v59, %v8640_v31  ;;  %v9883_v28 = vpop.f32.mrb[106].mxu0  ;;  %v9921_v45 = vpop.f32.mrb[122].mxu1 }
0x31dd   :  { %v9884_v63 = vpop.f32.mrb[107].mxu0  ;;  %v9922_v0 = vpop.f32.mrb[123].mxu1 }
0x31de   :  { %v8790_v9 = vadd.f32 %v9920_v55, %v8715_v4  ;;  %v9885_v47 = vadd.f32 %v9884_v63, %v9883_v28  ;;  %v9923_v32 = vadd.f32 %v9922_v0, %v9921_v45 }
0x31e0   :  { %v8720_v2 = vadd.f32 %v9885_v47, %v8645_v37 }
0x31e2   :  { %v8795_v25 = vadd.f32 %v9923_v32, %v8720_v2 }
0x31f9   :  { %v9956_v3 = vpop.f32.mrb[108].mxu0  ;;  %v9994_v20 = vpop.f32.mrb[124].mxu1 }
0x31fa   :  { %v9957_v42 = vpop.f32.mrb[109].mxu0  ;;  %v9995_v26 = vpop.f32.mrb[125].mxu1 }
0x31fb   :  { %v9958_v13 = vadd.f32 %v9957_v42, %v9956_v3  ;;  %v9996_v15 = vadd.f32 %v9995_v26, %v9994_v20 }
0x31fd   :  { %v8865_v21 = vadd.f32 %v9958_v13, %v8790_v9  ;;  %v9959_v22 = vpop.f32.mrb[110].mxu0  ;;  %v9997_v14 = vpop.f32.mrb[126].mxu1 }
0x31fe   :  { %v9960_v48 = vpop.f32.mrb[111].mxu0  ;;  %v9998_v62 = vpop.f32.mrb[127].mxu1 }
0x31ff   :  { %v8940_v18 = vadd.f32 %v9996_v15, %v8865_v21  ;;  %v9961_v38 = vadd.f32 %v9960_v48, %v9959_v22  ;;  %v9999_v33 = vadd.f32 %v9998_v62, %v9997_v14 }
0x3201   :  { %v8870_v30 = vadd.f32 %v9961_v38, %v8795_v25  ;;  %v8948_v61 = vadd.f32 %v8940_v18, %v12839_v50 }
0x3203   :  { %v8945_v11 = vadd.f32 %v9999_v33, %v8870_v30  ;;  %v8950_v39 = vsel %vm90_vm1, %v8948_v61, 0.0 }
0x3204   :  { %8951 = vadd.xlane.f32.xlu0 %v8950_v39 }
0x3205   :  { %v8949_v7 = vadd.f32 %v8945_v11, %v12979_v49 }
0x3207   :  { %v8953_v46 = vsel %vm90_vm1, %v8949_v7, 0.0 }
0x3208   :  { %8954 = vadd.xlane.f32.xlu1 %v8953_v46 }
0x3291   :  { %v8952_v41 = vpop.xlane.xlu0 %8951 }
0x3292   :  { %v8956_v19 = vmul.f32 0.03125, %v8952_v41 }
0x3294   :  { %v8958_v5 = vsub.f32 %v8948_v61, %v8956_v19 }
0x3295   :  { %v8955_v52 = vpop.xlane.xlu1 %8954 }
0x3296   :  { %v8957_v53 = vmul.f32 0.03125, %v8955_v52  ;;  %v8960_v1 = vmul.f32 %v8958_v5, %v8958_v5 }
0x3298   :  { %v8959_v23 = vsub.f32 %v8949_v7, %v8957_v53  ;;  %v8962_v10 = vsel %vm90_vm1, %v8960_v1, 0.0 }
0x3299   :  { %8963 = vadd.xlane.f32.xlu0 %v8962_v10 }
0x329a   :  { %v8961_v50 = vmul.f32 %v8959_v23, %v8959_v23 }
0x329c   :  { %v8965_v57 = vsel %vm90_vm1, %v8961_v50, 0.0 }
0x329d   :  { %8966 = vadd.xlane.f32.xlu1 %v8965_v57 }
0x3326   :  { %v8964_v35 = vpop.xlane.xlu0 %8963 }
0x3327   :  { %v8968_v43 = vmul.f32 0.03125, %v8964_v35 }
0x3329   :  { %v8970_v49 = vadd.f32 1e-05, %v8968_v43 }
0x332a   :  { %v8967_v34 = vpop.xlane.xlu1 %8966 }
0x332b   :  { %11411 = vrsqrt.f32 %v8970_v49  ;;  %v8969_v36 = vmul.f32 0.03125, %v8967_v34 }
0x332d   :  { %v8971_v16 = vadd.f32 1e-05, %v8969_v36 }
0x332f   :  { %11413 = vrsqrt.f32 %v8971_v16 }
0x3335   :  { %v11412_v60 = vpop.eup %11411 }
0x3336   :  { %v8974_v24 = vmul.f32 %v11412_v60, %v8958_v5 }
0x3338   :  { %v8983_v8 = vmul.f32 %v9374_v40, %v8974_v24 }
0x3339   :  { %v11414_v17 = vpop.eup %11413 }
0x333a   :  { %v8992_v6 = vadd.f32 %v9375_v56, %v8983_v8  ;;  %v8975_v31 = vmul.f32 %v11414_v17, %v8959_v23 }
0x333c   :  { %8994 = vst.msk [vmem:[%s14065_s24] sm:$0xff] %vm90_vm1, %v8992_v6  ;;  %v8984_v29 = vmul.f32 %v9374_v40, %v8975_v31 }
0x333e   :  { %v8993_v54 = vadd.f32 %v9375_v56, %v8984_v29 }
0x3340   :  { %8995 = vst.msk [vmem:[%s14065_s24 + $0x8] sm:$0xff] %vm90_vm1, %v8993_v54 }

</bundles_post_ra>
